<compile_context>
chip_gen: v7x
topology: tpu7x:2x2x1
jax: 0.10.0
libtpu: 0.0.40
codegen_flags: <defaults>
</compile_context>

<pallas_src>
import numpy as np
import jax
import jax.numpy as jnp
from jax.experimental import pallas as pl
from jax.experimental.pallas import tpu as pltpu


NUM_CLASSES = 100
NUM_CLASSES_PADDED = 128
_VMEM_SPEC = pl.BlockSpec(memory_space=pltpu.MemorySpace.VMEM)


# ----------------------------------------------------------------------------
# Fused forward kernel: conv (as dense matmul) + ReLU + maxpool + classifier
# ----------------------------------------------------------------------------
def _fused_forward_kernel(x_ref, wc_ref, bc_ref, w1_ref, b1_ref,
                          w2_ref, b2_ref, w3_ref, b3_ref, o_ref):
    """Whole CNNModelWide1 forward, fully VMEM-resident (single grid step).

    Weights are bf16; every dot accumulates in f32.  Dropout = identity (eval).
    """
    qw = bc_ref.shape[1] // 4            # pooled width = Ho*Wo*Cout = 512

    # Conv2d(3x3, pad=1) + ReLU as one lane-dense matmul.  Columns of wc are
    # ordered (pool-quadrant, c, ho, wo).
    xb = x_ref[...].astype(jnp.bfloat16)
    z = jnp.dot(xb, wc_ref[...], preferred_element_type=jnp.float32)
    z = jnp.maximum(z + bc_ref[...], 0.0)                       # (B, 4*qw)

    # MaxPool2d(2): max over the four pooling quadrants (128-aligned slices).
    # Result columns are already in torch's x.view(B, -1) (c, h, w) order.
    p = jnp.maximum(jnp.maximum(z[:, 0 * qw:1 * qw], z[:, 1 * qw:2 * qw]),
                    jnp.maximum(z[:, 2 * qw:3 * qw], z[:, 3 * qw:4 * qw]))

    # Classifier: Linear(512,2048)+ReLU -> Linear(2048,1024)+ReLU
    #             -> Linear(1024,100 padded to 128).
    h = jnp.dot(p.astype(jnp.bfloat16), w1_ref[...],
                preferred_element_type=jnp.float32)
    h = jnp.maximum(h + b1_ref[...], 0.0)
    h = jnp.dot(h.astype(jnp.bfloat16), w2_ref[...],
                preferred_element_type=jnp.float32)
    h = jnp.maximum(h + b2_ref[...], 0.0)
    out = jnp.dot(h.astype(jnp.bfloat16), w3_ref[...],
                  preferred_element_type=jnp.float32)
    o_ref[...] = (out + b3_ref[...]).astype(o_ref.dtype)


def fused_forward(x_flat, prepared):
    wc, bc, w1, b1, w2, b2, w3, b3 = prepared
    B = x_flat.shape[0]
    npad = w3.shape[1]                   # 128 (lane-dense, padded from 100)
    # TODO(synk): on v7x a 2-way 'parallel' grid splitting w1's columns /
    # w2's rows across both TensorCores would halve the per-core weight DMA;
    # omitted to keep the single-step kernel simple and race-free.
    return pl.pallas_call(
        _fused_forward_kernel,
        out_shape=jax.ShapeDtypeStruct((B, npad), jnp.float32),
        in_specs=[_VMEM_SPEC] * 9,
        out_specs=_VMEM_SPEC,
        compiler_params=pltpu.CompilerParams(
            vmem_limit_bytes=24 * 1024 * 1024),
    )(x_flat, wc, bc, w1, b1, w2, b2, w3, b3)


# ----------------------------------------------------------------------------
# Parameter preparation (one-time / offline)
# ----------------------------------------------------------------------------
def _dense_pooled_conv_matrix(conv_w, conv_b, H, W):
    """Fold Conv2d(Cin->Cout, 3x3, stride=1, pad=1) into a dense matrix.

    Rows:  torch NCHW flatten of the input, index ci*H*W + hi*W + wi.
    Cols:  q*(Cout*Ho*Wo) + co*(Ho*Wo) + ho*Wo + wo, where q = ph*2 + pw is the
           2x2 pooling quadrant and (2*ho+ph, 2*wo+pw) is the conv output pos.
    Quadrant-grouped columns make MaxPool2d(2) a max over four contiguous
    lane slices in-kernel, and the within-quadrant (c, h, w) order matches
    torch's x.view(B, -1), so w1 is used unpermuted.
    """
    conv_w = np.asarray(conv_w, np.float32)
    conv_b = np.asarray(conv_b, np.float32)
    Cout, Cin, KH, KW = conv_w.shape
    assert (KH, KW) == (3, 3) and H % 2 == 0 and W % 2 == 0
    Ho, Wo = H // 2, W // 2
    qw = Cout * Ho * Wo
    wc = np.zeros((Cin * H * W, 4 * qw), np.float32)
    ci_rows = np.arange(Cin) * (H * W)
    co_cols = np.arange(Cout) * (Ho * Wo)
    for ph in range(2):
        for pw in range(2):
            q = ph * 2 + pw
            for ho in range(Ho):
                for wo in range(Wo):
                    oh, ow = 2 * ho + ph, 2 * wo + pw
                    col0 = q * qw + ho * Wo + wo
                    for kh in range(KH):
                        hi = oh + kh - 1
                        if not 0 <= hi < H:
                            continue
                        for kw in range(KW):
                            wi = ow + kw - 1
                            if not 0 <= wi < W:
                                continue
                            rows = ci_rows + hi * W + wi
                            cols = col0 + co_cols
                            wc[np.ix_(rows, cols)] = conv_w[:, :, kh, kw].T
    bc = np.tile(np.repeat(conv_b, Ho * Wo), 4)
    return wc, bc


def prepare_params(params, input_hw):
    """Fold conv (+ pool-friendly column layout) into a dense bf16 matrix, cast
    classifier weights to bf16, pad the 100-wide head to 128 lanes, and reshape
    biases to (1, N) rows."""
    conv_w, conv_b, w1, b1, w2, b2, w3, b3 = params
    H, W = input_hw
    wc, bc = _dense_pooled_conv_matrix(conv_w, conv_b, H, W)

    w3p = jnp.pad(w3, ((0, 0), (0, NUM_CLASSES_PADDED - w3.shape[1])))
    b3p = jnp.pad(b3, (0, NUM_CLASSES_PADDED - b3.shape[0]))

    as_bf16 = lambda a: jnp.asarray(a, jnp.bfloat16)
    row = lambda b: jnp.asarray(b, jnp.float32).reshape(1, -1)
    return (as_bf16(wc), row(bc),
            as_bf16(w1), row(b1),
            as_bf16(w2), row(b2),
            as_bf16(w3p), row(b3p))


# ----------------------------------------------------------------------------
# Forward pass
# ----------------------------------------------------------------------------
@jax.jit
def cnn_model_wide1_forward(x, prepared):
    B = x.shape[0]
    x_flat = x.reshape(B, -1)            # torch NCHW x.view(B, -1) order (free view)
    out = fused_forward(x_flat, prepared)            # (B, 128) padded logits
    # Consumers that tolerate padded logits should keep all 128 columns;
    # slice here only to match the reference module's (B, 100) output.
    return out[:, :NUM_CLASSES]


# ----------------------------------------------------------------------------
# Deterministic parameter construction + smoke test
# ----------------------------------------------------------------------------
def _linear_init(kw_, kb_, fan_in, fan_out):
    # PyTorch nn.Linear default init: U(-1/sqrt(fan_in), 1/sqrt(fan_in))
    bound = 1.0 / float(fan_in) ** 0.5
    w = jax.random.uniform(kw_, (fan_in, fan_out), jnp.float32, -bound, bound)
    b = jax.random.uniform(kb_, (fan_out,), jnp.float32, -bound, bound)
    return w, b


if __name__ == "__main__":
    key = jax.random.PRNGKey(0)
    k_x, k_cw, k_w1, k_b1, k_w2, k_b2, k_w3, k_b3 = jax.random.split(key, 8)

    # `features` is a constructor argument (not fixed by the spec); assume
    # Conv2d(3, 32, 3, padding=1) + ReLU + MaxPool2d(2) on an 8x8 input so the
    # flattened feature width is (8/2)*(8/2)*32 == 512 == classifier input.
    B, Cin, H, W = 2, 3, 8, 8
    Cout = 32
    x = jax.random.normal(k_x, (B, Cin, H, W), jnp.float32)

    n = 3 * 3 * Cout                     # conv init: normal(0, sqrt(2/n)), bias 0
    conv_w = jax.random.normal(k_cw, (Cout, Cin, 3, 3), jnp.float32) * (2.0 / n) ** 0.5
    conv_b = jnp.zeros((Cout,), jnp.float32)

    w1, b1 = _linear_init(k_w1, k_b1, 512, 2048)
    w2, b2 = _linear_init(k_w2, k_b2, 2048, 1024)
    w3, b3 = _linear_init(k_w3, k_b3, 1024, NUM_CLASSES)

    params = (conv_w, conv_b, w1, b1, w2, b2, w3, b3)
    prepared = prepare_params(params, input_hw=(H, W))

    out = cnn_model_wide1_forward(x, prepared)
    out = jax.block_until_ready(out)
    assert out.shape == (B, NUM_CLASSES) and out.dtype == jnp.float32
    print("KERNEL_OK")
</pallas_src>

<mosaic_0001>
module attributes {stable_mosaic.version = 11 : i64} {
  func.func @_fused_forward_kernel(%arg0: memref<2x192xf32, #tpu.memory_space<vmem>>, %arg1: memref<192x2048xbf16, #tpu.memory_space<vmem>>, %arg2: memref<1x2048xf32, #tpu.memory_space<vmem>>, %arg3: memref<512x2048xbf16, #tpu.memory_space<vmem>>, %arg4: memref<1x2048xf32, #tpu.memory_space<vmem>>, %arg5: memref<2048x1024xbf16, #tpu.memory_space<vmem>>, %arg6: memref<1x1024xf32, #tpu.memory_space<vmem>>, %arg7: memref<1024x128xbf16, #tpu.memory_space<vmem>>, %arg8: memref<1x128xf32, #tpu.memory_space<vmem>>, %arg9: memref<2x128xf32, #tpu.memory_space<vmem>>) attributes {dimension_semantics = [], scalar_prefetch = 0 : i64, scratch_operands = 0 : i64, tpu.core_type = #tpu.core_type<tc>} {
    %c0 = arith.constant 0 : index
    %c0_0 = arith.constant 0 : index
    %0 = vector.load %arg0[%c0, %c0_0] : memref<2x192xf32, #tpu.memory_space<vmem>>, vector<2x192xf32>
    %1 = arith.truncf %0 : vector<2x192xf32> to vector<2x192xbf16>
    %c0_1 = arith.constant 0 : index
    %c0_2 = arith.constant 0 : index
    %2 = vector.load %arg1[%c0_1, %c0_2] : memref<192x2048xbf16, #tpu.memory_space<vmem>>, vector<192x2048xbf16>
    %cst = arith.constant dense<0.000000e+00> : vector<2x2048xf32>
    %3 = tpu.matmul %1, %2, %cst {dimension_numbers = #tpu.dot_dimension_numbers<[1], [0], [0], [1], [0, 0, 1, 1], [], []>} : vector<2x192xbf16>, vector<192x2048xbf16>, vector<2x2048xf32> -> vector<2x2048xf32>
    %c0_3 = arith.constant 0 : index
    %c0_4 = arith.constant 0 : index
    %4 = vector.load %arg2[%c0_3, %c0_4] : memref<1x2048xf32, #tpu.memory_space<vmem>>, vector<1x2048xf32>
    %5 = vector.broadcast %4 : vector<1x2048xf32> to vector<2x2048xf32>
    %6 = arith.addf %3, %5 : vector<2x2048xf32>
    %cst_5 = arith.constant 0.000000e+00 : f32
    %7 = vector.broadcast %cst_5 : f32 to vector<2x2048xf32>
    %8 = arith.maximumf %6, %7 : vector<2x2048xf32>
    %9 = vector.extract_strided_slice %8 {offsets = [0, 0], sizes = [2, 512], strides = [1, 1]} : vector<2x2048xf32> to vector<2x512xf32>
    %10 = vector.extract_strided_slice %8 {offsets = [0, 512], sizes = [2, 512], strides = [1, 1]} : vector<2x2048xf32> to vector<2x512xf32>
    %11 = arith.maximumf %9, %10 : vector<2x512xf32>
    %12 = vector.extract_strided_slice %8 {offsets = [0, 1024], sizes = [2, 512], strides = [1, 1]} : vector<2x2048xf32> to vector<2x512xf32>
    %13 = vector.extract_strided_slice %8 {offsets = [0, 1536], sizes = [2, 512], strides = [1, 1]} : vector<2x2048xf32> to vector<2x512xf32>
    %14 = arith.maximumf %12, %13 : vector<2x512xf32>
    %15 = arith.maximumf %11, %14 : vector<2x512xf32>
    %16 = arith.truncf %15 : vector<2x512xf32> to vector<2x512xbf16>
    %c0_6 = arith.constant 0 : index
    %c0_7 = arith.constant 0 : index
    %17 = vector.load %arg3[%c0_6, %c0_7] : memref<512x2048xbf16, #tpu.memory_space<vmem>>, vector<512x2048xbf16>
    %cst_8 = arith.constant dense<0.000000e+00> : vector<2x2048xf32>
    %18 = tpu.matmul %16, %17, %cst_8 {dimension_numbers = #tpu.dot_dimension_numbers<[1], [0], [0], [1], [0, 0, 1, 1], [], []>} : vector<2x512xbf16>, vector<512x2048xbf16>, vector<2x2048xf32> -> vector<2x2048xf32>
    %c0_9 = arith.constant 0 : index
    %c0_10 = arith.constant 0 : index
    %19 = vector.load %arg4[%c0_9, %c0_10] : memref<1x2048xf32, #tpu.memory_space<vmem>>, vector<1x2048xf32>
    %20 = vector.broadcast %19 : vector<1x2048xf32> to vector<2x2048xf32>
    %21 = arith.addf %18, %20 : vector<2x2048xf32>
    %cst_11 = arith.constant 0.000000e+00 : f32
    %22 = vector.broadcast %cst_11 : f32 to vector<2x2048xf32>
    %23 = arith.maximumf %21, %22 : vector<2x2048xf32>
    %24 = arith.truncf %23 : vector<2x2048xf32> to vector<2x2048xbf16>
    %c0_12 = arith.constant 0 : index
    %c0_13 = arith.constant 0 : index
    %25 = vector.load %arg5[%c0_12, %c0_13] : memref<2048x1024xbf16, #tpu.memory_space<vmem>>, vector<2048x1024xbf16>
    %cst_14 = arith.constant dense<0.000000e+00> : vector<2x1024xf32>
    %26 = tpu.matmul %24, %25, %cst_14 {dimension_numbers = #tpu.dot_dimension_numbers<[1], [0], [0], [1], [0, 0, 1, 1], [], []>} : vector<2x2048xbf16>, vector<2048x1024xbf16>, vector<2x1024xf32> -> vector<2x1024xf32>
    %c0_15 = arith.constant 0 : index
    %c0_16 = arith.constant 0 : index
    %27 = vector.load %arg6[%c0_15, %c0_16] : memref<1x1024xf32, #tpu.memory_space<vmem>>, vector<1x1024xf32>
    %28 = vector.broadcast %27 : vector<1x1024xf32> to vector<2x1024xf32>
    %29 = arith.addf %26, %28 : vector<2x1024xf32>
    %cst_17 = arith.constant 0.000000e+00 : f32
    %30 = vector.broadcast %cst_17 : f32 to vector<2x1024xf32>
    %31 = arith.maximumf %29, %30 : vector<2x1024xf32>
    %32 = arith.truncf %31 : vector<2x1024xf32> to vector<2x1024xbf16>
    %c0_18 = arith.constant 0 : index
    %c0_19 = arith.constant 0 : index
    %33 = vector.load %arg7[%c0_18, %c0_19] : memref<1024x128xbf16, #tpu.memory_space<vmem>>, vector<1024x128xbf16>
    %cst_20 = arith.constant dense<0.000000e+00> : vector<2x128xf32>
    %34 = tpu.matmul %32, %33, %cst_20 {dimension_numbers = #tpu.dot_dimension_numbers<[1], [0], [0], [1], [0, 0, 1, 1], [], []>} : vector<2x1024xbf16>, vector<1024x128xbf16>, vector<2x128xf32> -> vector<2x128xf32>
    %c0_21 = arith.constant 0 : index
    %c0_22 = arith.constant 0 : index
    %35 = vector.load %arg8[%c0_21, %c0_22] : memref<1x128xf32, #tpu.memory_space<vmem>>, vector<1x128xf32>
    %36 = vector.broadcast %35 : vector<1x128xf32> to vector<2x128xf32>
    %37 = arith.addf %34, %36 : vector<2x128xf32>
    %c0_23 = arith.constant 0 : index
    %c0_24 = arith.constant 0 : index
    %38 = vector.load %arg9[%c0_23, %c0_24] : memref<2x128xf32, #tpu.memory_space<vmem>>, vector<2x128xf32>
    tpu.vector_store %arg9[%c0_23, %c0_24], %37 {strides = array<i32>} : memref<2x128xf32, #tpu.memory_space<vmem>>, vector<2x128xf32>,
    return
  }
}

</mosaic_0001>

<bundles_post_ra>
// kernel: cnn_model_wide1_forward.1
= control target key start
LH: loop header
LB: loop body
LE: loop exit
PB: predicated region body
PF: predicated region fallthrough
CT: control target
= control target key end

     0   :  { %14 = vsyncpa [#allocation3], 0  ;;  %s16705_s0 = inlined_call_operand.vmem [shape: f32[2,192], index: 0, kind: input, shape index: {}]   ;;  %s16706_s1 = inlined_call_operand.hbm [shape: bf16[192,2048], index: 1, kind: input, shape index: {}]   ;;  %s16707_s2 = inlined_call_operand.hbm [shape: f32[1,2048], index: 2, kind: input, shape index: {}]   ;;  %s16708_s3 = inlined_call_operand.hbm [shape: bf16[512,2048], index: 3, kind: input, shape index: {}]   ;;  %s16709_s4 = inlined_call_operand.hbm [shape: f32[1,2048], index: 4, kind: input, shape index: {}]   ;;  %s16710_s5 = inlined_call_operand.hbm [shape: bf16[2048,1024], index: 5, kind: input, shape index: {}]   ;;  %s16711_s6 = inlined_call_operand.hbm [shape: f32[1,1024], index: 6, kind: input, shape index: {}]   ;;  %s16712_s7 = inlined_call_operand.hbm [shape: bf16[1024,128], index: 7, kind: input, shape index: {}]   ;;  %s16713_s8 = inlined_call_operand.hbm [shape: f32[1,128], index: 8, kind: input, shape index: {}]   ;;  %s16714_s9 = inlined_call_operand.hbm [shape: f32[2,128], index: 9, kind: output, shape index: {}]  }
   0x1   :  { %15 = vsyncpa [#allocation6], 0 }
   0x2   :  { %16 = vsyncpa [#allocation9], 0 }
   0x3   :  { %17 = vsyncpa [#allocation12], 0 }
   0x4   :  { %18 = vsyncpa [#allocation15], 0 }
   0x5   :  { %19 = vsyncpa [#allocation4], 0  ;;  %s16154_s30 = smov [#allocation5]   ;;  %s16155_s11 = smov [#allocation8]  }
   0x6   :  { %s40_s10 = sshll.u32 %s16154_s30, 4  ;;  %s62_s12 = sshll.u32 %s16155_s11, 4  ;;  %s41_s10 = int_to_ptr.vmem [resolvable:$true] %s40_s10  ;;  %s63_s12 = int_to_ptr.vmem [resolvable:$true] %s62_s12 }
   0x7   :  { %s15944_s15 = scalar_lea.hbm %s16707_s2, 256 }
   0x8   :  { %p15945_p0 = scmp.ne.s32.totalorder %s16707_s2, %s15944_s15  ;;  %p15948_p1 = scmp.lt.u32.totalorder %s15944_s15, %s16707_s2 }
   0xa   :  { %p15950_p2 = pnand %p15948_p1, %p15945_p0 }
   0xc   :  { %15953 = shalt.err (!%p15950_p2)
}
   0xd   :  { %s15954_s20 = scalar_lea.vmem %s41_s10, 256  ;;  %p15959_p4 = scmp.lt.s32.totalorder %s41_s10, %s41_s10 }
   0xe   :  { %p15955_p3 = scmp.ne.s32.totalorder %s41_s10, %s15954_s20  ;;  %p15960_p5 = scmp.lt.s32.totalorder %s15954_s20, %s15954_s20 }
  0x10   :  { %p15961_p6 = por %p15960_p5, %p15959_p4 }
  0x12   :  { %p15962_p7 = pnand %p15961_p6, %p15955_p3 }
  0x14   :  { %15965 = shalt.err (!%p15962_p7)
}
  0x15   :  { %43 = dma.hbm_to_vmem [thread:$0]  %s16707_s2, 256, %s41_s10, [#allocation6]  }
  0x16   :  { %s15966_s25 = scalar_lea.hbm %s16709_s4, 256 }
  0x17   :  { %p15967_p8 = scmp.ne.s32.totalorder %s16709_s4, %s15966_s25  ;;  %p15970_p9 = scmp.lt.u32.totalorder %s15966_s25, %s16709_s4 }
  0x19   :  { %p15972_p10 = pnand %p15970_p9, %p15967_p8 }
  0x1b   :  { %15975 = shalt.err (!%p15972_p10)
}
  0x1c   :  { %s15976_s30 = scalar_lea.vmem %s63_s12, 256  ;;  %p15981_p12 = scmp.lt.s32.totalorder %s63_s12, %s63_s12 }
  0x1d   :  { %p15977_p11 = scmp.ne.s32.totalorder %s63_s12, %s15976_s30  ;;  %p15982_p13 = scmp.lt.s32.totalorder %s15976_s30, %s15976_s30 }
  0x1f   :  { %p15983_p0 = por %p15982_p13, %p15981_p12 }
  0x21   :  { %p15984_p1 = pnand %p15983_p0, %p15977_p11 }
  0x23   :  { %15987 = shalt.err (!%p15984_p1)
}
  0x24   :  { %65 = dma.hbm_to_vmem [thread:$0]  %s16709_s4, 256, %s63_s12, [#allocation9]  }
  0x25   :  { %s16156_s11 = smov [#allocation11]   ;;  %s16157_s14 = smov [#allocation2]  }
  0x26   :  { %s84_s13 = sshll.u32 %s16156_s11, 4  ;;  %s27_s15 = sshll.u32 %s16157_s14, 4  ;;  %s85_s13 = int_to_ptr.vmem [resolvable:$true] %s84_s13  ;;  %s16242_s15 = int_to_ptr.vmem [resolvable:$true] %s27_s15 }
  0x27   :  { %s15988_s18 = scalar_lea.hbm %s16711_s6, 128 }
  0x28   :  { %p15989_p2 = scmp.ne.s32.totalorder %s16711_s6, %s15988_s18  ;;  %p15992_p3 = scmp.lt.u32.totalorder %s15988_s18, %s16711_s6 }
  0x2a   :  { %p15994_p4 = pnand %p15992_p3, %p15989_p2 }
  0x2c   :  { %15997 = shalt.err (!%p15994_p4)
}
  0x2d   :  { %s15998_s4 = scalar_lea.vmem %s85_s13, 128  ;;  %p16003_p6 = scmp.lt.s32.totalorder %s85_s13, %s85_s13 }
  0x2e   :  { %p15999_p5 = scmp.ne.s32.totalorder %s85_s13, %s15998_s4  ;;  %p16004_p7 = scmp.lt.s32.totalorder %s15998_s4, %s15998_s4 }
  0x30   :  { %p16005_p8 = por %p16004_p7, %p16003_p6 }
  0x32   :  { %p16006_p9 = pnand %p16005_p8, %p15999_p5 }
  0x34   :  { %16009 = shalt.err (!%p16006_p9)
}
  0x35   :  { %87 = dma.hbm_to_vmem [thread:$0]  %s16711_s6, 128, %s85_s13, [#allocation12]  }
  0x36   :  { %s16010_s26 = scalar_lea.hbm %s16706_s1, 24576 }
  0x37   :  { %p16011_p10 = scmp.ne.s32.totalorder %s16706_s1, %s16010_s26  ;;  %p16014_p11 = scmp.lt.u32.totalorder %s16010_s26, %s16706_s1 }
  0x39   :  { %p16016_p12 = pnand %p16014_p11, %p16011_p10 }
  0x3b   :  { %16019 = shalt.err (!%p16016_p12)
}
  0x3c   :  { %s16020_s2 = scalar_lea.vmem %s16242_s15, 24576  ;;  %p16025_p0 = scmp.lt.s32.totalorder %s16242_s15, %s16242_s15 }
  0x3d   :  { %p16021_p13 = scmp.ne.s32.totalorder %s16242_s15, %s16020_s2  ;;  %p16026_p1 = scmp.lt.s32.totalorder %s16020_s2, %s16020_s2 }
  0x3f   :  { %p16027_p2 = por %p16026_p1, %p16025_p0 }
  0x41   :  { %p16028_p3 = pnand %p16027_p2, %p16021_p13 }
  0x43   :  { %16031 = shalt.err (!%p16028_p3)
}
  0x44   :  { %s16158_s6 = smov 1024   ;;  %s16159_s10 = smov 64  }
  0x45   :  { %33 = dma.hbm_to_vmem [thread:$0]  %s16706_s1, 24576, %s16242_s15, [#allocation3], %s16158_s6, %s16158_s6, %s16159_s10  }
  0x46   :  { %s16160_s14 = smov [#allocation7]   ;;  %s16161_s17 = smov [#allocation10]  }
  0x47   :  { %s49_s16 = sshll.u32 %s16160_s14, 4  ;;  %s71_s18 = sshll.u32 %s16161_s17, 4  ;;  %s50_s16 = int_to_ptr.vmem [resolvable:$true] %s49_s16  ;;  %s16274_s18 = int_to_ptr.vmem [resolvable:$true] %s71_s18 }
  0x48   :  { %s16032_s21 = scalar_lea.hbm %s16708_s3, 65536 }
  0x49   :  { %p16033_p4 = scmp.ne.s32.totalorder %s16708_s3, %s16032_s21  ;;  %p16036_p5 = scmp.lt.u32.totalorder %s16032_s21, %s16708_s3 }
  0x4b   :  { %p16038_p6 = pnand %p16036_p5, %p16033_p4 }
  0x4d   :  { %16041 = shalt.err (!%p16038_p6)
}
  0x4e   :  { %s16042_s1 = scalar_lea.vmem %s50_s16, 65536  ;;  %p16047_p8 = scmp.lt.s32.totalorder %s50_s16, %s50_s16 }
  0x4f   :  { %p16043_p7 = scmp.ne.s32.totalorder %s50_s16, %s16042_s1  ;;  %p16048_p9 = scmp.lt.s32.totalorder %s16042_s1, %s16042_s1 }
  0x51   :  { %p16049_p10 = por %p16048_p9, %p16047_p8 }
  0x53   :  { %p16050_p11 = pnand %p16049_p10, %p16043_p7 }
  0x55   :  { %16053 = shalt.err (!%p16050_p11)
}
  0x56   :  { %55 = dma.hbm_to_vmem [thread:$0]  %s16708_s3, 65536, %s50_s16, [#allocation6], %s16158_s6, %s16158_s6, %s16159_s10  }
  0x57   :  { %s16054_s27 = scalar_lea.hbm %s16710_s5, 131072 }
  0x58   :  { %p16055_p12 = scmp.ne.s32.totalorder %s16710_s5, %s16054_s27  ;;  %p16058_p13 = scmp.lt.u32.totalorder %s16054_s27, %s16710_s5 }
  0x5a   :  { %p16060_p0 = pnand %p16058_p13, %p16055_p12 }
  0x5c   :  { %16063 = shalt.err (!%p16060_p0)
}
  0x5d   :  { %s16064_s11 = scalar_lea.vmem %s16274_s18, 131072  ;;  %p16069_p2 = scmp.lt.s32.totalorder %s16274_s18, %s16274_s18 }
  0x5e   :  { %p16065_p1 = scmp.ne.s32.totalorder %s16274_s18, %s16064_s11  ;;  %p16070_p3 = scmp.lt.s32.totalorder %s16064_s11, %s16064_s11 }
  0x60   :  { %p16071_p4 = por %p16070_p3, %p16069_p2 }
  0x62   :  { %p16072_p5 = pnand %p16071_p4, %p16065_p1 }
  0x64   :  { %16075 = shalt.err (!%p16072_p5)
}
  0x65   :  { %s16162_s3 = smov 512   ;;  %s16163_s6 = smov 32  }
  0x66   :  { %77 = dma.hbm_to_vmem [thread:$0]  %s16710_s5, 131072, %s16274_s18, [#allocation9], %s16162_s3, %s16162_s3, %s16163_s6  }
  0x67   :  { %s16164_s16 = smov [#allocation13]   ;;  %s16165_s19 = smov [#allocation14]  }
  0x68   :  { %s93_s17 = sshll.u32 %s16164_s16, 4  ;;  %s106_s20 = sshll.u32 %s16165_s19, 4  ;;  %s94_s17 = int_to_ptr.vmem [resolvable:$true] %s93_s17  ;;  %s107_s20 = int_to_ptr.vmem [resolvable:$true] %s106_s20 }
  0x69   :  { %s16076_s4 = scalar_lea.hbm %s16712_s7, 8192 }
  0x6a   :  { %p16077_p6 = scmp.ne.s32.totalorder %s16712_s7, %s16076_s4  ;;  %p16080_p7 = scmp.lt.u32.totalorder %s16076_s4, %s16712_s7 }
  0x6c   :  { %p16082_p8 = pnand %p16080_p7, %p16077_p6 }
  0x6e   :  { %16085 = shalt.err (!%p16082_p8)
}
  0x6f   :  { %s16086_s5 = scalar_lea.vmem %s94_s17, 8192  ;;  %p16091_p10 = scmp.lt.s32.totalorder %s94_s17, %s94_s17 }
  0x70   :  { %p16087_p9 = scmp.ne.s32.totalorder %s94_s17, %s16086_s5  ;;  %p16092_p11 = scmp.lt.s32.totalorder %s16086_s5, %s16086_s5 }
  0x72   :  { %p16093_p12 = por %p16092_p11, %p16091_p10 }
  0x74   :  { %p16094_p13 = pnand %p16093_p12, %p16087_p9 }
  0x76   :  { %16097 = shalt.err (!%p16094_p13)
}
  0x77   :  { %s16166_s18 = smov 4   ;;  %s16098_s28 = scalar_lea.hbm %s16713_s8, 16 }
  0x78   :  { %99 = dma.hbm_to_vmem [thread:$0]  %s16712_s7, 8192, %s94_s17, [#allocation12], %s16159_s10, %s16159_s10, %s16166_s18  }
  0x79   :  { %p16099_p0 = scmp.ne.s32.totalorder %s16713_s8, %s16098_s28  ;;  %p16102_p1 = scmp.lt.u32.totalorder %s16098_s28, %s16713_s8 }
  0x7b   :  { %p16104_p2 = pnand %p16102_p1, %p16099_p0 }
  0x7d   :  { %16107 = shalt.err (!%p16104_p2)
}
  0x7e   :  { %s16108_s3 = scalar_lea.vmem %s107_s20, 16  ;;  %s16112_s6 = scalar_lea.vmem %s107_s20, 32 }
  0x7f   :  { %p16109_p3 = scmp.ne.s32.totalorder %s107_s20, %s16108_s3  ;;  %p16113_p4 = scmp.lt.s32.totalorder %s107_s20, %s107_s20 }
  0x80   :  { %p16114_p5 = scmp.lt.s32.totalorder %s16112_s6, %s16108_s3 }
  0x82   :  { %p16115_p6 = por %p16114_p5, %p16113_p4 }
  0x84   :  { %p16116_p7 = pnand %p16115_p6, %p16109_p3 }
  0x86   :  { %16119 = shalt.err (!%p16116_p7)
}
  0x87   :  { %109 = dma.hbm_to_vmem [thread:$0]  %s16713_s8, 16, %s107_s20, [#allocation15]  }
  0x88   :  { %16142 = dma.done.wait [#allocation3], 24576  }
  0x89   :  { %16143 = vsyncadd [#allocation3], 4294942720 }
  0x8a   :  { %16144 = dma.done.wait [#allocation6], 65792  }
  0x8b   :  { %16145 = vsyncadd [#allocation6], 4294901504 }
  0x8c   :  { %16146 = dma.done.wait [#allocation9], 131328  }
  0x8d   :  { %16147 = vsyncadd [#allocation9], 4294835968 }
  0x8e   :  { %16148 = dma.done.wait [#allocation12], 8320  }
  0x8f   :  { %16149 = vsyncadd [#allocation12], 4294958976 }
  0x90   :  { %16150 = dma.done.wait [#allocation15], 16  }
  0x91   :  { %16151 = vsyncadd [#allocation15], 4294967280  ;;  %v149_v0 = vld [vmem:[#allocation2] sm:$0xff]  ;;  %v150_v2 = vld [vmem:[#allocation2 + $0x8] sm:$0xff]  ;;  %vm1385_vm0 = vcmask 523264  }
  0x92   :  { %v157_v1 = vld [vmem:[#allocation2 + $0x40] sm:$0xff]  ;;  %v158_v4 = vld [vmem:[#allocation2 + $0x48] sm:$0xff] }
  0x93   :  { %v13808_v3 = vcombine.high %v149_v0, %v157_v1  ;;  %v13807_v5 = vcombine.low %v149_v0, %v157_v1  ;;  %v165_v6 = vld [vmem:[#allocation2 + $0x80] sm:$0xff]  ;;  %v13810_v8 = vcombine.high %v150_v2, %v158_v4  ;;  %v13809_v9 = vcombine.low %v150_v2, %v158_v4  ;;  %v166_v11 = vld [vmem:[#allocation2 + $0x88] sm:$0xff] }
  0x94   :  { %v173_v7 = vld [vmem:[#allocation2 + $0xc0] sm:$0xff]  ;;  %v174_v12 = vld [vmem:[#allocation2 + $0xc8] sm:$0xff] }
  0x95   :  { %v13824_v10 = vcombine.high %v165_v6, %v173_v7  ;;  %v181_v13 = vld [vmem:[#allocation2 + $0x100] sm:$0xff]  ;;  %1389 = vmatprep.subr.bf16.mxu0 %v13808_v3  ;;  %v13826_v14 = vcombine.high %v166_v11, %v174_v12  ;;  %v182_v16 = vld [vmem:[#allocation2 + $0x108] sm:$0xff]  ;;  %1430 = vmatprep.subr.bf16.mxu1 %v13810_v8  ;;  %v13823_v18 = vcombine.low %v165_v6, %v173_v7 }
  0x96   :  { %v189_v15 = vld [vmem:[#allocation2 + $0x140] sm:$0xff]  ;;  %v190_v17 = vld [vmem:[#allocation2 + $0x148] sm:$0xff]  ;;  %1390 = vmatpush1.bf16.msra.mxu0 %v13807_v5  ;;  %1431 = vmatpush1.bf16.msra.mxu1 %v13809_v9  ;;  %v13825_v19 = vcombine.low %v166_v11, %v174_v12 }
  0x97   :  { %1391 = vmatprep.subr.bf16.mxu0 %v13824_v10  ;;  %v13840_v20 = vcombine.high %v181_v13, %v189_v15  ;;  %1432 = vmatprep.subr.bf16.mxu1 %v13826_v14  ;;  %v13842_v21 = vcombine.high %v182_v16, %v190_v17  ;;  %v197_v22 = vld [vmem:[#allocation2 + $0x180] sm:$0xff]  ;;  %v198_v24 = vld [vmem:[#allocation2 + $0x188] sm:$0xff]  ;;  %v13839_v26 = vcombine.low %v181_v13, %v189_v15 }
  0x98   :  { %v205_v23 = vld [vmem:[#allocation2 + $0x1c0] sm:$0xff]  ;;  %v206_v25 = vld [vmem:[#allocation2 + $0x1c8] sm:$0xff]  ;;  %v13841_v27 = vcombine.low %v182_v16, %v190_v17 }
  0x99   :  { %v13856_v28 = vcombine.high %v197_v22, %v205_v23  ;;  %v13858_v29 = vcombine.high %v198_v24, %v206_v25  ;;  %v213_v30 = vld [vmem:[#allocation2 + $0x200] sm:$0xff]  ;;  %v214_v32 = vld [vmem:[#allocation2 + $0x208] sm:$0xff]  ;;  %v13855_v34 = vcombine.low %v197_v22, %v205_v23  ;;  %v13857_v35 = vcombine.low %v198_v24, %v206_v25 }
  0x9a   :  { %1392 = vmatpush1.bf16.msra.mxu0 %v13823_v18  ;;  %1433 = vmatpush1.bf16.msra.mxu1 %v13825_v19  ;;  %v221_v31 = vld [vmem:[#allocation2 + $0x240] sm:$0xff]  ;;  %v222_v33 = vld [vmem:[#allocation2 + $0x248] sm:$0xff] }
  0x9b   :  { %1393 = vmatprep.subr.bf16.mxu0 %v13840_v20  ;;  %1434 = vmatprep.subr.bf16.mxu1 %v13842_v21  ;;  %v13872_v36 = vcombine.high %v213_v30, %v221_v31  ;;  %v13874_v37 = vcombine.high %v214_v32, %v222_v33  ;;  %v229_v38 = vld [vmem:[#allocation2 + $0x280] sm:$0xff]  ;;  %v230_v40 = vld [vmem:[#allocation2 + $0x288] sm:$0xff]  ;;  %v13871_v42 = vcombine.low %v213_v30, %v221_v31 }
  0x9c   :  { %v237_v39 = vld [vmem:[#allocation2 + $0x2c0] sm:$0xff]  ;;  %v238_v41 = vld [vmem:[#allocation2 + $0x2c8] sm:$0xff]  ;;  %v13873_v44 = vcombine.low %v214_v32, %v222_v33  ;;  %v151_v33 = vld [vmem:[#allocation2 + $0x10] sm:$0xff] }
  0x9d   :  { %v16335_v43 = vld.sshfl [vmem:[%s16705_s0] sm:$0x33 pattern:$0x76325410]  ;;  %v13888_v45 = vcombine.high %v229_v38, %v237_v39  ;;  %v13890_v47 = vcombine.high %v230_v40, %v238_v41  ;;  %v246_v50 = vld [vmem:[#allocation2 + $0x308] sm:$0xff]  ;;  %v13887_v53 = vcombine.low %v229_v38, %v237_v39  ;;  %v13889_v54 = vcombine.low %v230_v40, %v238_v41  ;;  %v167_v41 = vld [vmem:[#allocation2 + $0x90] sm:$0xff] }
  0x9e   :  { %1394 = vmatpush1.bf16.msra.mxu0 %v13839_v26  ;;  %1435 = vmatpush1.bf16.msra.mxu1 %v13841_v27  ;;  %v144_v46 = vcombine.high %v16335_v43, %v16335_v43  ;;  %v245_v48 = vld [vmem:[#allocation2 + $0x300] sm:$0xff]  ;;  %v254_v51 = vld [vmem:[#allocation2 + $0x348] sm:$0xff]  ;;  %s16167_s0 = smov [#allocation16]  }
  0x9f   :  { %1395 = vmatprep.subr.bf16.mxu0 %v13856_v28  ;;  %1436 = vmatprep.subr.bf16.mxu1 %v13858_v29  ;;  %v253_v49 = vld [vmem:[#allocation2 + $0x340] sm:$0xff]  ;;  %v13906_v56 = vcombine.high %v246_v50, %v254_v51  ;;  %v262_v59 = vld [vmem:[#allocation2 + $0x388] sm:$0xff]  ;;  %v13905_v62 = vcombine.low %v246_v50, %v254_v51  ;;  %v183_v51 = vld [vmem:[#allocation2 + $0x110] sm:$0xff]  ;;  %s13793_s14 = sshll.u32 %s16167_s0, 4  ;;  %s13794_s14 = int_to_ptr.vmem [resolvable:$true] %s13793_s14 }
  0xa0   :  { %v16339_v52 = vpack.c.bf16 %v144_v46, %v144_v46  ;;  %v13904_v55 = vcombine.high %v245_v48, %v253_v49  ;;  %v261_v57 = vld [vmem:[#allocation2 + $0x380] sm:$0xff]  ;;  %v270_v60 = vld [vmem:[#allocation2 + $0x3c8] sm:$0xff]  ;;  %v13903_v61 = vcombine.low %v245_v48, %v253_v49  ;;  %v176_v46 = vld [vmem:[#allocation2 + $0xd8] sm:$0xff]  ;;  %s16120_s16 = scalar_lea.vmem %s13794_s14, 32  ;;  %p16125_p9 = scmp.lt.s32.totalorder %s13794_s14, %s13794_s14 }
  0xa1   :  { %v269_v58 = vld [vmem:[#allocation2 + $0x3c0] sm:$0xff]  ;;  %v13922_v0 = vcombine.high %v262_v59, %v270_v60  ;;  %v278_v3 = vld [vmem:[#allocation2 + $0x408] sm:$0xff]  ;;  %v13921_v6 = vcombine.low %v262_v59, %v270_v60  ;;  %v199_v59 = vld [vmem:[#allocation2 + $0x190] sm:$0xff]  ;;  %p16121_p8 = scmp.ne.s32.totalorder %s13794_s14, %s16120_s16  ;;  %p16126_p10 = scmp.lt.s32.totalorder %s16120_s16, %s16120_s16 }
  0xa2   :  { %1396 = vmatpush1.bf16.msra.mxu0 %v13855_v34  ;;  %1437 = vmatpush1.bf16.msra.mxu1 %v13857_v35  ;;  %v13920_v63 = vcombine.high %v261_v57, %v269_v58  ;;  %v277_v1 = vld [vmem:[#allocation2 + $0x400] sm:$0xff]  ;;  %v286_v4 = vld [vmem:[#allocation2 + $0x448] sm:$0xff]  ;;  %v13919_v5 = vcombine.low %v261_v57, %v269_v58  ;;  %v159_v34 = vld [vmem:[#allocation2 + $0x50] sm:$0xff] }
  0xa3   :  { %1397 = vmatprep.subr.bf16.mxu0 %v13872_v36  ;;  %1438 = vmatprep.subr.bf16.mxu1 %v13874_v37  ;;  %v285_v2 = vld [vmem:[#allocation2 + $0x440] sm:$0xff]  ;;  %v13938_v8 = vcombine.high %v278_v3, %v286_v4  ;;  %v294_v11 = vld [vmem:[#allocation2 + $0x488] sm:$0xff]  ;;  %v13937_v14 = vcombine.low %v278_v3, %v286_v4  ;;  %v152_v35 = vld [vmem:[#allocation2 + $0x18] sm:$0xff]  ;;  %v13812_v39 = vcombine.high %v151_v33, %v159_v34  ;;  %p16127_p11 = por %p16126_p10, %p16125_p9 }
  0xa4   :  { %13999 = vmatprep.mubr.msk.bf16.mxu0 %vm1385_vm0, %v16339_v52  ;;  %14000 = vmatprep.mubr.msk.bf16.mxu1 %vm1385_vm0, %v16339_v52  ;;  %v13936_v7 = vcombine.high %v277_v1, %v285_v2  ;;  %v293_v9 = vld [vmem:[#allocation2 + $0x480] sm:$0xff]  ;;  %v302_v12 = vld [vmem:[#allocation2 + $0x4c8] sm:$0xff]  ;;  %v13935_v13 = vcombine.low %v277_v1, %v285_v2  ;;  %v160_v36 = vld [vmem:[#allocation2 + $0x58] sm:$0xff] }
  0xa5   :  { %v301_v10 = vld [vmem:[#allocation2 + $0x4c0] sm:$0xff]  ;;  %v13954_v16 = vcombine.high %v294_v11, %v302_v12  ;;  %v310_v19 = vld [vmem:[#allocation2 + $0x508] sm:$0xff]  ;;  %v13953_v22 = vcombine.low %v294_v11, %v302_v12  ;;  %v13814_v40 = vcombine.high %v152_v35, %v160_v36  ;;  %v13813_v48 = vcombine.low %v152_v35, %v160_v36  ;;  %v207_v60 = vld [vmem:[#allocation2 + $0x1d0] sm:$0xff]  ;;  %p16128_p12 = pnand %p16127_p11, %p16121_p8 }
  0xa6   :  { %1398 = vmatpush1.bf16.msra.mxu0 %v13871_v42  ;;  %1439 = vmatpush1.bf16.msra.mxu1 %v13873_v44  ;;  %v13952_v15 = vcombine.high %v293_v9, %v301_v10  ;;  %v309_v17 = vld [vmem:[#allocation2 + $0x500] sm:$0xff]  ;;  %v318_v20 = vld [vmem:[#allocation2 + $0x548] sm:$0xff]  ;;  %v13951_v21 = vcombine.low %v293_v9, %v301_v10  ;;  %v175_v42 = vld [vmem:[#allocation2 + $0xd0] sm:$0xff]  ;;  %v16347_v44 = vpack.c.bf16 %v16335_v43, %v16335_v43 }
  0xa7   :  { %1399 = vmatprep.subr.bf16.mxu0 %v13888_v45  ;;  %1440 = vmatprep.subr.bf16.mxu1 %v13890_v47  ;;  %v317_v18 = vld [vmem:[#allocation2 + $0x540] sm:$0xff]  ;;  %v13970_v24 = vcombine.high %v310_v19, %v318_v20  ;;  %v326_v27 = vld [vmem:[#allocation2 + $0x588] sm:$0xff]  ;;  %v13969_v30 = vcombine.low %v310_v19, %v318_v20  ;;  %v168_v45 = vld [vmem:[#allocation2 + $0x98] sm:$0xff]  ;;  %v13811_v47 = vcombine.low %v151_v33, %v159_v34 }
  0xa8   :  { %v13968_v23 = vcombine.high %v309_v17, %v317_v18  ;;  %v325_v25 = vld [vmem:[#allocation2 + $0x580] sm:$0xff]  ;;  %v334_v28 = vld [vmem:[#allocation2 + $0x5c8] sm:$0xff]  ;;  %v13967_v29 = vcombine.low %v309_v17, %v317_v18  ;;  %v13828_v49 = vcombine.high %v167_v41, %v175_v42  ;;  %v13830_v50 = vcombine.high %v168_v45, %v176_v46  ;;  %v215_v3 = vld [vmem:[#allocation2 + $0x210] sm:$0xff] }
  0xa9   :  { %v333_v26 = vld [vmem:[#allocation2 + $0x5c0] sm:$0xff]  ;;  %v13986_v32 = vcombine.high %v326_v27, %v334_v28  ;;  %v13985_v38 = vcombine.low %v326_v27, %v334_v28  ;;  %v13827_v43 = vcombine.low %v167_v41, %v175_v42  ;;  %v13860_v1 = vcombine.high %v199_v59, %v207_v60  ;;  %v223_v4 = vld [vmem:[#allocation2 + $0x250] sm:$0xff]  ;;  %v248_v20 = vld [vmem:[#allocation2 + $0x318] sm:$0xff] }
  0xaa   :  { %1400 = vmatpush1.bf16.msra.mxu0 %v13887_v53  ;;  %1441 = vmatpush1.bf16.msra.mxu1 %v13889_v54  ;;  %v13984_v31 = vcombine.high %v325_v25, %v333_v26  ;;  %v13983_v37 = vcombine.low %v325_v25, %v333_v26  ;;  %v191_v53 = vld [vmem:[#allocation2 + $0x150] sm:$0xff]  ;;  %v184_v54 = vld [vmem:[#allocation2 + $0x118] sm:$0xff]  ;;  %v13876_v9 = vcombine.high %v215_v3, %v223_v4 }
  0xab   :  { %1401 = vmatprep.subr.bf16.mxu0 %v13904_v55  ;;  %1442 = vmatprep.subr.bf16.mxu1 %v13906_v56  ;;  %v192_v55 = vld [vmem:[#allocation2 + $0x158] sm:$0xff]  ;;  %v13829_v56 = vcombine.low %v168_v45, %v176_v46  ;;  %v13844_v57 = vcombine.high %v183_v51, %v191_v53  ;;  %v231_v11 = vld [vmem:[#allocation2 + $0x290] sm:$0xff] }
  0xac   :  { %v13846_v58 = vcombine.high %v184_v54, %v192_v55  ;;  %v239_v12 = vld [vmem:[#allocation2 + $0x2d0] sm:$0xff]  ;;  %v264_v28 = vld [vmem:[#allocation2 + $0x398] sm:$0xff] }
  0xad   :  { %v255_v17 = vld [vmem:[#allocation2 + $0x350] sm:$0xff]  ;;  %v13892_v19 = vcombine.high %v231_v11, %v239_v12  ;;  %v280_v36 = vld [vmem:[#allocation2 + $0x418] sm:$0xff] }
  0xae   :  { %1402 = vmatpush1.bf16.msra.mxu0 %v13903_v61  ;;  %1443 = vmatpush1.bf16.msra.mxu1 %v13905_v62  ;;  %v200_v61 = vld [vmem:[#allocation2 + $0x198] sm:$0xff]  ;;  %v271_v25 = vld [vmem:[#allocation2 + $0x3d0] sm:$0xff] }
  0xaf   :  { %1403 = vmatprep.subr.bf16.mxu0 %v13920_v63  ;;  %1444 = vmatprep.subr.bf16.mxu1 %v13922_v0  ;;  %v208_v62 = vld [vmem:[#allocation2 + $0x1d8] sm:$0xff]  ;;  %v13843_v63 = vcombine.low %v183_v51, %v191_v53  ;;  %v13845_v0 = vcombine.low %v184_v54, %v192_v55  ;;  %v287_v33 = vld [vmem:[#allocation2 + $0x450] sm:$0xff] }
  0xb0   :  { %v13862_v2 = vcombine.high %v200_v61, %v208_v62  ;;  %v303_v41 = vld [vmem:[#allocation2 + $0x4d0] sm:$0xff]  ;;  %v296_v46 = vld [vmem:[#allocation2 + $0x498] sm:$0xff] }
  0xb1   :  { %v319_v51 = vld [vmem:[#allocation2 + $0x550] sm:$0xff]  ;;  %v312_v55 = vld [vmem:[#allocation2 + $0x518] sm:$0xff] }
  0xb2   :  { %1404 = vmatpush1.bf16.msra.mxu0 %v13919_v5  ;;  %1445 = vmatpush1.bf16.msra.mxu1 %v13921_v6  ;;  %v216_v5 = vld [vmem:[#allocation2 + $0x218] sm:$0xff] }
  0xb3   :  { %1405 = vmatprep.subr.bf16.mxu0 %v13936_v7  ;;  %1446 = vmatprep.subr.bf16.mxu1 %v13938_v8  ;;  %v224_v6 = vld [vmem:[#allocation2 + $0x258] sm:$0xff]  ;;  %v13859_v7 = vcombine.low %v199_v59, %v207_v60  ;;  %v13861_v8 = vcombine.low %v200_v61, %v208_v62  ;;  %v335_v59 = vld [vmem:[#allocation2 + $0x5d0] sm:$0xff] }
  0xb4   :  { %v13878_v10 = vcombine.high %v216_v5, %v224_v6  ;;  %v13877_v18 = vcombine.low %v216_v5, %v224_v6  ;;  %v328_v62 = vld [vmem:[#allocation2 + $0x598] sm:$0xff]  ;;  %v154_v6 = vld [vmem:[#allocation2 + $0x28] sm:$0xff] }
  0xb6   :  { %1406 = vmatpush1.bf16.msra.mxu0 %v13935_v13  ;;  %1447 = vmatpush1.bf16.msra.mxu1 %v13937_v14  ;;  %v232_v13 = vld [vmem:[#allocation2 + $0x298] sm:$0xff] }
  0xb7   :  { %1407 = vmatprep.subr.bf16.mxu0 %v13952_v15  ;;  %1448 = vmatprep.subr.bf16.mxu1 %v13954_v16  ;;  %v240_v14 = vld [vmem:[#allocation2 + $0x2d8] sm:$0xff]  ;;  %v13875_v15 = vcombine.low %v215_v3, %v223_v4  ;;  %v247_v16 = vld [vmem:[#allocation2 + $0x310] sm:$0xff]  ;;  %v161_v3 = vld [vmem:[#allocation2 + $0x60] sm:$0xff] }
  0xb8   :  { %v13893_v26 = vcombine.low %v232_v13, %v240_v14  ;;  %v13908_v27 = vcombine.high %v247_v16, %v255_v17 }
  0xba   :  { %1408 = vmatpush1.bf16.msra.mxu0 %v13951_v21  ;;  %1449 = vmatpush1.bf16.msra.mxu1 %v13953_v22  ;;  %v256_v21 = vld [vmem:[#allocation2 + $0x358] sm:$0xff]  ;;  %v13894_v22 = vcombine.high %v232_v13, %v240_v14  ;;  %v170_v14 = vld [vmem:[#allocation2 + $0xa8] sm:$0xff] }
  0xbb   :  { %1409 = vmatprep.subr.bf16.mxu0 %v13968_v23  ;;  %1450 = vmatprep.subr.bf16.mxu1 %v13970_v24  ;;  %v13891_v23 = vcombine.low %v231_v11, %v239_v12  ;;  %v263_v24 = vld [vmem:[#allocation2 + $0x390] sm:$0xff]  ;;  %v13909_v34 = vcombine.low %v248_v20, %v256_v21  ;;  %v177_v11 = vld [vmem:[#allocation2 + $0xe0] sm:$0xff] }
  0xbc   :  { %v13924_v35 = vcombine.high %v263_v24, %v271_v25 }
  0xbe   :  { %1410 = vmatpush1.bf16.msra.mxu0 %v13967_v29  ;;  %1451 = vmatpush1.bf16.msra.mxu1 %v13969_v30  ;;  %v13910_v29 = vcombine.high %v248_v20, %v256_v21  ;;  %v272_v30 = vld [vmem:[#allocation2 + $0x3d8] sm:$0xff] }
  0xbf   :  { %1411 = vmatprep.subr.bf16.mxu0 %v13984_v31  ;;  %1452 = vmatprep.subr.bf16.mxu1 %v13986_v32  ;;  %v13907_v31 = vcombine.low %v247_v16, %v255_v17  ;;  %v279_v32 = vld [vmem:[#allocation2 + $0x410] sm:$0xff]  ;;  %v13925_v42 = vcombine.low %v264_v28, %v272_v30 }
  0xc0   :  { %v13940_v45 = vcombine.high %v279_v32, %v287_v33 }
  0xc2   :  { %1412 = vmatpush1.bf16.msra.mxu0 %v13983_v37  ;;  %1453 = vmatpush1.bf16.msra.mxu1 %v13985_v38  ;;  %v288_v37 = vld [vmem:[#allocation2 + $0x458] sm:$0xff]  ;;  %v13926_v38 = vcombine.high %v264_v28, %v272_v30  ;;  %v202_v30 = vld [vmem:[#allocation2 + $0x1a8] sm:$0xff] }
  0xc3   :  { %1471 = vmatprep.subr.bf16.mxu0 %v13812_v39  ;;  %1512 = vmatprep.subr.bf16.mxu1 %v13814_v40  ;;  %v13923_v39 = vcombine.low %v263_v24, %v271_v25  ;;  %v295_v40 = vld [vmem:[#allocation2 + $0x490] sm:$0xff]  ;;  %v13941_v53 = vcombine.low %v280_v36, %v288_v37 }
  0xc4   :  { %v13956_v54 = vcombine.high %v295_v40, %v303_v41 }
  0xc5   :  { %1422 = vmatmul.mubr.bf16.vlgmr.msra.gmra.mrb[0].mxu0 %v16347_v44  ;;  %1463 = vmatmul.mubr.bf16.vlgmr.msra.gmra.mrb[0].mxu1 %v16347_v44 }
  0xc6   :  { %1472 = vmatpush1.bf16.msra.mxu0 %v13811_v47  ;;  %1513 = vmatpush1.bf16.msra.mxu1 %v13813_v48  ;;  %v304_v47 = vld [vmem:[#allocation2 + $0x4d8] sm:$0xff]  ;;  %v13942_v48 = vcombine.high %v280_v36, %v288_v37 }
  0xc7   :  { %1473 = vmatprep.subr.bf16.mxu0 %v13828_v49  ;;  %1514 = vmatprep.subr.bf16.mxu1 %v13830_v50  ;;  %v13939_v49 = vcombine.low %v279_v32, %v287_v33  ;;  %v311_v50 = vld [vmem:[#allocation2 + $0x510] sm:$0xff]  ;;  %v13957_v60 = vcombine.low %v296_v46, %v304_v47 }
  0xc8   :  { %14001 = vmatprep.mubr.msk.bf16.mxu0 %vm1385_vm0, %v16339_v52  ;;  %14002 = vmatprep.mubr.msk.bf16.mxu1 %vm1385_vm0, %v16339_v52  ;;  %v13972_v61 = vcombine.high %v311_v50, %v319_v51 }
  0xca   :  { %1474 = vmatpush1.bf16.msra.mxu0 %v13827_v43  ;;  %1515 = vmatpush1.bf16.msra.mxu1 %v13829_v56  ;;  %v320_v43 = vld [vmem:[#allocation2 + $0x558] sm:$0xff]  ;;  %v13958_v56 = vcombine.high %v296_v46, %v304_v47  ;;  %v233_v47 = vld [vmem:[#allocation2 + $0x2a0] sm:$0xff] }
  0xcb   :  { %1475 = vmatprep.subr.bf16.mxu0 %v13844_v57  ;;  %1516 = vmatprep.subr.bf16.mxu1 %v13846_v58  ;;  %v13955_v57 = vcombine.low %v295_v40, %v303_v41  ;;  %v327_v58 = vld [vmem:[#allocation2 + $0x590] sm:$0xff]  ;;  %v13973_v4 = vcombine.low %v312_v55, %v320_v43 }
  0xcc   :  { %v13988_v5 = vcombine.high %v327_v58, %v335_v59 }
  0xce   :  { %1476 = vmatpush1.bf16.msra.mxu0 %v13843_v63  ;;  %1517 = vmatpush1.bf16.msra.mxu1 %v13845_v0  ;;  %v336_v63 = vld [vmem:[#allocation2 + $0x5d8] sm:$0xff]  ;;  %v13974_v0 = vcombine.high %v312_v55, %v320_v43  ;;  %v249_v43 = vld [vmem:[#allocation2 + $0x320] sm:$0xff] }
  0xcf   :  { %1477 = vmatprep.subr.bf16.mxu0 %v13860_v1  ;;  %1518 = vmatprep.subr.bf16.mxu1 %v13862_v2  ;;  %v13971_v1 = vcombine.low %v311_v50, %v319_v51  ;;  %v153_v2 = vld [vmem:[#allocation2 + $0x20] sm:$0xff]  ;;  %v13989_v12 = vcombine.low %v328_v62, %v336_v63  ;;  %v242_v50 = vld [vmem:[#allocation2 + $0x2e8] sm:$0xff] }
  0xd0   :  { %v13816_v13 = vcombine.high %v153_v2, %v161_v3  ;;  %v13815_v17 = vcombine.low %v153_v2, %v161_v3  ;;  %v274_v2 = vld [vmem:[#allocation2 + $0x3e8] sm:$0xff] }
  0xd2   :  { %1478 = vmatpush1.bf16.msra.mxu0 %v13859_v7  ;;  %1519 = vmatpush1.bf16.msra.mxu1 %v13861_v8  ;;  %v162_v7 = vld [vmem:[#allocation2 + $0x68] sm:$0xff]  ;;  %v13990_v8 = vcombine.high %v328_v62, %v336_v63  ;;  %v265_v63 = vld [vmem:[#allocation2 + $0x3a0] sm:$0xff] }
  0xd3   :  { %1479 = vmatprep.subr.bf16.mxu0 %v13876_v9  ;;  %1520 = vmatprep.subr.bf16.mxu1 %v13878_v10  ;;  %v13987_v9 = vcombine.low %v327_v58, %v335_v59  ;;  %v169_v10 = vld [vmem:[#allocation2 + $0xa0] sm:$0xff]  ;;  %v13818_v16 = vcombine.high %v154_v6, %v162_v7  ;;  %v13817_v20 = vcombine.low %v154_v6, %v162_v7  ;;  %v258_v58 = vld [vmem:[#allocation2 + $0x368] sm:$0xff] }
  0xd4   :  { %v13832_v21 = vcombine.high %v169_v10, %v177_v11  ;;  %v13831_v25 = vcombine.low %v169_v10, %v177_v11  ;;  %v281_v7 = vld [vmem:[#allocation2 + $0x420] sm:$0xff]  ;;  %v290_v10 = vld [vmem:[#allocation2 + $0x468] sm:$0xff] }
  0xd6   :  { %1480 = vmatpush1.bf16.msra.mxu0 %v13875_v15  ;;  %1521 = vmatpush1.bf16.msra.mxu1 %v13877_v18  ;;  %v178_v15 = vld [vmem:[#allocation2 + $0xe8] sm:$0xff]  ;;  %v185_v18 = vld [vmem:[#allocation2 + $0x120] sm:$0xff] }
  0xd7   :  { %1481 = vmatprep.subr.bf16.mxu0 %v13892_v19  ;;  %1522 = vmatprep.subr.bf16.mxu1 %v13894_v22  ;;  %v193_v19 = vld [vmem:[#allocation2 + $0x160] sm:$0xff]  ;;  %v186_v22 = vld [vmem:[#allocation2 + $0x128] sm:$0xff]  ;;  %v13834_v24 = vcombine.high %v170_v14, %v178_v15  ;;  %v13833_v28 = vcombine.low %v170_v14, %v178_v15 }
  0xd8   :  { %v13847_v33 = vcombine.low %v185_v18, %v193_v19  ;;  %v297_v15 = vld [vmem:[#allocation2 + $0x4a0] sm:$0xff] }
  0xda   :  { %1482 = vmatpush1.bf16.msra.mxu0 %v13891_v23  ;;  %1523 = vmatpush1.bf16.msra.mxu1 %v13893_v26  ;;  %v194_v23 = vld [vmem:[#allocation2 + $0x168] sm:$0xff]  ;;  %v201_v26 = vld [vmem:[#allocation2 + $0x1a0] sm:$0xff] }
  0xdb   :  { %1483 = vmatprep.subr.bf16.mxu0 %v13908_v27  ;;  %1524 = vmatprep.subr.bf16.mxu1 %v13910_v29  ;;  %v209_v27 = vld [vmem:[#allocation2 + $0x1e0] sm:$0xff]  ;;  %v13848_v29 = vcombine.high %v185_v18, %v193_v19  ;;  %v13850_v32 = vcombine.high %v186_v22, %v194_v23  ;;  %v13849_v36 = vcombine.low %v186_v22, %v194_v23  ;;  %v306_v18 = vld [vmem:[#allocation2 + $0x4e8] sm:$0xff] }
  0xdc   :  { %v13864_v37 = vcombine.high %v201_v26, %v209_v27  ;;  %v13863_v41 = vcombine.low %v201_v26, %v209_v27  ;;  %v313_v23 = vld [vmem:[#allocation2 + $0x520] sm:$0xff]  ;;  %v322_v26 = vld [vmem:[#allocation2 + $0x568] sm:$0xff] }
  0xde   :  { %1484 = vmatpush1.bf16.msra.mxu0 %v13907_v31  ;;  %1525 = vmatpush1.bf16.msra.mxu1 %v13909_v34  ;;  %v210_v31 = vld [vmem:[#allocation2 + $0x1e8] sm:$0xff]  ;;  %v217_v34 = vld [vmem:[#allocation2 + $0x220] sm:$0xff] }
  0xdf   :  { %1485 = vmatprep.subr.bf16.mxu0 %v13924_v35  ;;  %1526 = vmatprep.subr.bf16.mxu1 %v13926_v38  ;;  %v225_v35 = vld [vmem:[#allocation2 + $0x260] sm:$0xff]  ;;  %v218_v38 = vld [vmem:[#allocation2 + $0x228] sm:$0xff]  ;;  %v13866_v40 = vcombine.high %v202_v30, %v210_v31 }
  0xe0   :  { %v13879_v51 = vcombine.low %v217_v34, %v225_v35 }
  0xe2   :  { %1486 = vmatpush1.bf16.msra.mxu0 %v13923_v39  ;;  %1527 = vmatpush1.bf16.msra.mxu1 %v13925_v42  ;;  %v226_v39 = vld [vmem:[#allocation2 + $0x268] sm:$0xff]  ;;  %v13865_v42 = vcombine.low %v202_v30, %v210_v31  ;;  %v329_v31 = vld [vmem:[#allocation2 + $0x5a0] sm:$0xff] }
  0xe3   :  { %1487 = vmatprep.subr.bf16.mxu0 %v13940_v45  ;;  %1528 = vmatprep.subr.bf16.mxu1 %v13942_v48  ;;  %v13880_v45 = vcombine.high %v217_v34, %v225_v35  ;;  %v13882_v46 = vcombine.high %v218_v38, %v226_v39  ;;  %v241_v48 = vld [vmem:[#allocation2 + $0x2e0] sm:$0xff]  ;;  %v338_v34 = vld [vmem:[#allocation2 + $0x5e8] sm:$0xff] }
  0xe4   :  { %v13895_v59 = vcombine.low %v233_v47, %v241_v48 }
  0xe6   :  { %1488 = vmatpush1.bf16.msra.mxu0 %v13939_v49  ;;  %1529 = vmatpush1.bf16.msra.mxu1 %v13941_v53  ;;  %v234_v49 = vld [vmem:[#allocation2 + $0x2a8] sm:$0xff]  ;;  %v13881_v53 = vcombine.low %v218_v38, %v226_v39  ;;  %v155_v39 = vld [vmem:[#allocation2 + $0x30] sm:$0xff] }
  0xe7   :  { %1489 = vmatprep.subr.bf16.mxu0 %v13956_v54  ;;  %1530 = vmatprep.subr.bf16.mxu1 %v13958_v56  ;;  %v13896_v54 = vcombine.high %v233_v47, %v241_v48  ;;  %v13898_v55 = vcombine.high %v234_v49, %v242_v50  ;;  %v257_v56 = vld [vmem:[#allocation2 + $0x360] sm:$0xff] }
  0xe8   :  { %v13911_v3 = vcombine.low %v249_v43, %v257_v56 }
  0xea   :  { %1490 = vmatpush1.bf16.msra.mxu0 %v13955_v57  ;;  %1531 = vmatpush1.bf16.msra.mxu1 %v13957_v60  ;;  %v250_v57 = vld [vmem:[#allocation2 + $0x328] sm:$0xff]  ;;  %v13897_v60 = vcombine.low %v234_v49, %v242_v50  ;;  %v171_v49 = vld [vmem:[#allocation2 + $0xb0] sm:$0xff] }
  0xeb   :  { %1491 = vmatprep.subr.bf16.mxu0 %v13972_v61  ;;  %1532 = vmatprep.subr.bf16.mxu1 %v13974_v0  ;;  %v13912_v61 = vcombine.high %v249_v43, %v257_v56  ;;  %v13914_v62 = vcombine.high %v250_v57, %v258_v58  ;;  %v273_v0 = vld [vmem:[#allocation2 + $0x3e0] sm:$0xff]  ;;  %v179_v50 = vld [vmem:[#allocation2 + $0xf0] sm:$0xff] }
  0xec   :  { %v13927_v11 = vcombine.low %v265_v63, %v273_v0  ;;  %v13836_v43 = vcombine.high %v171_v49, %v179_v50 }
  0xee   :  { %1492 = vmatpush1.bf16.msra.mxu0 %v13971_v1  ;;  %1533 = vmatpush1.bf16.msra.mxu1 %v13973_v4  ;;  %v266_v1 = vld [vmem:[#allocation2 + $0x3a8] sm:$0xff]  ;;  %v13913_v4 = vcombine.low %v250_v57, %v258_v58  ;;  %v187_v57 = vld [vmem:[#allocation2 + $0x130] sm:$0xff] }
  0xef   :  { %1493 = vmatprep.subr.bf16.mxu0 %v13988_v5  ;;  %1534 = vmatprep.subr.bf16.mxu1 %v13990_v8  ;;  %v13928_v5 = vcombine.high %v265_v63, %v273_v0  ;;  %v13930_v6 = vcombine.high %v266_v1, %v274_v2  ;;  %v289_v8 = vld [vmem:[#allocation2 + $0x460] sm:$0xff]  ;;  %v195_v58 = vld [vmem:[#allocation2 + $0x170] sm:$0xff] }
  0xf0   :  { %v13943_v19 = vcombine.low %v281_v7, %v289_v8  ;;  %v13852_v63 = vcombine.high %v187_v57, %v195_v58 }
  0xf2   :  { %1494 = vmatpush1.bf16.msra.mxu0 %v13987_v9  ;;  %1535 = vmatpush1.bf16.msra.mxu1 %v13989_v12  ;;  %v282_v9 = vld [vmem:[#allocation2 + $0x428] sm:$0xff]  ;;  %v13929_v12 = vcombine.low %v266_v1, %v274_v2  ;;  %v203_v1 = vld [vmem:[#allocation2 + $0x1b0] sm:$0xff] }
  0xf3   :  { %1553 = vmatprep.subr.bf16.mxu0 %v13816_v13  ;;  %1594 = vmatprep.subr.bf16.mxu1 %v13818_v16  ;;  %v13944_v13 = vcombine.high %v281_v7, %v289_v8  ;;  %v13946_v14 = vcombine.high %v282_v9, %v290_v10  ;;  %v305_v16 = vld [vmem:[#allocation2 + $0x4e0] sm:$0xff]  ;;  %v211_v2 = vld [vmem:[#allocation2 + $0x1f0] sm:$0xff] }
  0xf4   :  { %v13959_v27 = vcombine.low %v297_v15, %v305_v16  ;;  %v13868_v7 = vcombine.high %v203_v1, %v211_v2 }
  0xf5   :  { %1504 = vmatmul.mubr.bf16.vlgmr.msra.gmra.mrb[4].mxu0 %v16347_v44  ;;  %1545 = vmatmul.mubr.bf16.vlgmr.msra.gmra.mrb[4].mxu1 %v16347_v44 }
  0xf6   :  { %1554 = vmatpush1.bf16.msra.mxu0 %v13815_v17  ;;  %1595 = vmatpush1.bf16.msra.mxu1 %v13817_v20  ;;  %v298_v17 = vld [vmem:[#allocation2 + $0x4a8] sm:$0xff]  ;;  %v13945_v20 = vcombine.low %v282_v9, %v290_v10  ;;  %v219_v9 = vld [vmem:[#allocation2 + $0x230] sm:$0xff] }
  0xf7   :  { %1555 = vmatprep.subr.bf16.mxu0 %v13832_v21  ;;  %1596 = vmatprep.subr.bf16.mxu1 %v13834_v24  ;;  %v13960_v21 = vcombine.high %v297_v15, %v305_v16  ;;  %v13962_v22 = vcombine.high %v298_v17, %v306_v18  ;;  %v321_v24 = vld [vmem:[#allocation2 + $0x560] sm:$0xff]  ;;  %v227_v10 = vld [vmem:[#allocation2 + $0x270] sm:$0xff] }
  0xf8   :  { %14003 = vmatprep.mubr.msk.bf16.mxu0 %vm1385_vm0, %v16339_v52  ;;  %14004 = vmatprep.mubr.msk.bf16.mxu1 %vm1385_vm0, %v16339_v52  ;;  %v13975_v35 = vcombine.low %v313_v23, %v321_v24  ;;  %v13884_v15 = vcombine.high %v219_v9, %v227_v10  ;;  %v235_v16 = vld [vmem:[#allocation2 + $0x2b0] sm:$0xff] }
  0xfa   :  { %1556 = vmatpush1.bf16.msra.mxu0 %v13831_v25  ;;  %1597 = vmatpush1.bf16.msra.mxu1 %v13833_v28  ;;  %v314_v25 = vld [vmem:[#allocation2 + $0x528] sm:$0xff]  ;;  %v13961_v28 = vcombine.low %v298_v17, %v306_v18  ;;  %v243_v17 = vld [vmem:[#allocation2 + $0x2f0] sm:$0xff]  ;;  %v236_v18 = vld [vmem:[#allocation2 + $0x2b8] sm:$0xff] }
  0xfb   :  { %1557 = vmatprep.subr.bf16.mxu0 %v13848_v29  ;;  %1598 = vmatprep.subr.bf16.mxu1 %v13850_v32  ;;  %v13976_v29 = vcombine.high %v313_v23, %v321_v24  ;;  %v13978_v30 = vcombine.high %v314_v25, %v322_v26  ;;  %v337_v32 = vld [vmem:[#allocation2 + $0x5e0] sm:$0xff]  ;;  %v251_v24 = vld [vmem:[#allocation2 + $0x330] sm:$0xff] }
  0xfe   :  { %1558 = vmatpush1.bf16.msra.mxu0 %v13847_v33  ;;  %1599 = vmatpush1.bf16.msra.mxu1 %v13849_v36  ;;  %v330_v33 = vld [vmem:[#allocation2 + $0x5a8] sm:$0xff]  ;;  %v13977_v36 = vcombine.low %v314_v25, %v322_v26  ;;  %v259_v25 = vld [vmem:[#allocation2 + $0x370] sm:$0xff]  ;;  %v252_v26 = vld [vmem:[#allocation2 + $0x338] sm:$0xff] }
  0xff   :  { %1559 = vmatprep.subr.bf16.mxu0 %v13864_v37  ;;  %1600 = vmatprep.subr.bf16.mxu1 %v13866_v40  ;;  %v13992_v37 = vcombine.high %v329_v31, %v337_v32  ;;  %v13994_v38 = vcombine.high %v330_v33, %v338_v34  ;;  %v163_v40 = vld [vmem:[#allocation2 + $0x70] sm:$0xff] }
 0x100   :  { %v13820_v47 = vcombine.high %v155_v39, %v163_v40 }
 0x102   :  { %1560 = vmatpush1.bf16.msra.mxu0 %v13863_v41  ;;  %1601 = vmatpush1.bf16.msra.mxu1 %v13865_v42  ;;  %v156_v41 = vld [vmem:[#allocation2 + $0x38] sm:$0xff] }
 0x103   :  { %1561 = vmatprep.subr.bf16.mxu0 %v13880_v45  ;;  %1602 = vmatprep.subr.bf16.mxu1 %v13882_v46  ;;  %v164_v42 = vld [vmem:[#allocation2 + $0x78] sm:$0xff]  ;;  %v13991_v45 = vcombine.low %v329_v31, %v337_v32  ;;  %v13993_v46 = vcombine.low %v330_v33, %v338_v34  ;;  %v267_v32 = vld [vmem:[#allocation2 + $0x3b0] sm:$0xff] }
 0x104   :  { %v13822_v48 = vcombine.high %v156_v41, %v164_v42  ;;  %v275_v33 = vld [vmem:[#allocation2 + $0x3f0] sm:$0xff]  ;;  %v268_v34 = vld [vmem:[#allocation2 + $0x3b8] sm:$0xff] }
 0x106   :  { %1562 = vmatpush1.bf16.msra.mxu0 %v13879_v51  ;;  %1603 = vmatpush1.bf16.msra.mxu1 %v13881_v53  ;;  %v172_v51 = vld [vmem:[#allocation2 + $0xb8] sm:$0xff] }
 0x107   :  { %1563 = vmatprep.subr.bf16.mxu0 %v13896_v54  ;;  %1604 = vmatprep.subr.bf16.mxu1 %v13898_v55  ;;  %v180_v53 = vld [vmem:[#allocation2 + $0xf8] sm:$0xff]  ;;  %v13819_v54 = vcombine.low %v155_v39, %v163_v40  ;;  %v13821_v55 = vcombine.low %v156_v41, %v164_v42  ;;  %v283_v40 = vld [vmem:[#allocation2 + $0x430] sm:$0xff] }
 0x108   :  { %v13838_v56 = vcombine.high %v172_v51, %v180_v53  ;;  %v291_v41 = vld [vmem:[#allocation2 + $0x470] sm:$0xff]  ;;  %v284_v42 = vld [vmem:[#allocation2 + $0x438] sm:$0xff] }
 0x10a   :  { %1564 = vmatpush1.bf16.msra.mxu0 %v13895_v59  ;;  %1605 = vmatpush1.bf16.msra.mxu1 %v13897_v60  ;;  %v188_v59 = vld [vmem:[#allocation2 + $0x138] sm:$0xff] }
 0x10b   :  { %1565 = vmatprep.subr.bf16.mxu0 %v13912_v61  ;;  %1606 = vmatprep.subr.bf16.mxu1 %v13914_v62  ;;  %v196_v60 = vld [vmem:[#allocation2 + $0x178] sm:$0xff]  ;;  %v13835_v61 = vcombine.low %v171_v49, %v179_v50  ;;  %v13837_v62 = vcombine.low %v172_v51, %v180_v53  ;;  %v299_v50 = vld [vmem:[#allocation2 + $0x4b0] sm:$0xff] }
 0x10c   :  { %v13854_v0 = vcombine.high %v188_v59, %v196_v60  ;;  %v307_v51 = vld [vmem:[#allocation2 + $0x4f0] sm:$0xff]  ;;  %v300_v53 = vld [vmem:[#allocation2 + $0x4b8] sm:$0xff] }
 0x10e   :  { %1566 = vmatpush1.bf16.msra.mxu0 %v13911_v3  ;;  %1607 = vmatpush1.bf16.msra.mxu1 %v13913_v4  ;;  %v204_v3 = vld [vmem:[#allocation2 + $0x1b8] sm:$0xff] }
 0x10f   :  { %1567 = vmatprep.subr.bf16.mxu0 %v13928_v5  ;;  %1608 = vmatprep.subr.bf16.mxu1 %v13930_v6  ;;  %v212_v4 = vld [vmem:[#allocation2 + $0x1f8] sm:$0xff]  ;;  %v13851_v5 = vcombine.low %v187_v57, %v195_v58  ;;  %v13853_v6 = vcombine.low %v188_v59, %v196_v60  ;;  %v315_v58 = vld [vmem:[#allocation2 + $0x530] sm:$0xff] }
 0x110   :  { %v13870_v8 = vcombine.high %v204_v3, %v212_v4  ;;  %v323_v59 = vld [vmem:[#allocation2 + $0x570] sm:$0xff]  ;;  %v316_v60 = vld [vmem:[#allocation2 + $0x538] sm:$0xff] }
 0x112   :  { %1568 = vmatpush1.bf16.msra.mxu0 %v13927_v11  ;;  %1609 = vmatpush1.bf16.msra.mxu1 %v13929_v12  ;;  %v220_v11 = vld [vmem:[#allocation2 + $0x238] sm:$0xff] }
 0x113   :  { %1569 = vmatprep.subr.bf16.mxu0 %v13944_v13  ;;  %1610 = vmatprep.subr.bf16.mxu1 %v13946_v14  ;;  %v228_v12 = vld [vmem:[#allocation2 + $0x278] sm:$0xff]  ;;  %v13867_v13 = vcombine.low %v203_v1, %v211_v2  ;;  %v13869_v14 = vcombine.low %v204_v3, %v212_v4  ;;  %v331_v2 = vld [vmem:[#allocation2 + $0x5b0] sm:$0xff] }
 0x114   :  { %v339_v3 = vld [vmem:[#allocation2 + $0x5f0] sm:$0xff]  ;;  %v332_v4 = vld [vmem:[#allocation2 + $0x5b8] sm:$0xff] }
 0x116   :  { %1570 = vmatpush1.bf16.msra.mxu0 %v13943_v19  ;;  %1611 = vmatpush1.bf16.msra.mxu1 %v13945_v20  ;;  %v244_v19 = vld [vmem:[#allocation2 + $0x2f8] sm:$0xff]  ;;  %v13883_v20 = vcombine.low %v219_v9, %v227_v10  ;;  %v13995_v10 = vcombine.low %v331_v2, %v339_v3 }
 0x117   :  { %1571 = vmatprep.subr.bf16.mxu0 %v13960_v21  ;;  %1612 = vmatprep.subr.bf16.mxu1 %v13962_v22  ;;  %v13885_v21 = vcombine.low %v220_v11, %v228_v12  ;;  %v13900_v22 = vcombine.high %v235_v16, %v243_v17  ;;  %v13902_v23 = vcombine.high %v236_v18, %v244_v19 }
 0x11a   :  { %1572 = vmatpush1.bf16.msra.mxu0 %v13959_v27  ;;  %1613 = vmatpush1.bf16.msra.mxu1 %v13961_v28  ;;  %v260_v27 = vld [vmem:[#allocation2 + $0x378] sm:$0xff]  ;;  %v13899_v28 = vcombine.low %v235_v16, %v243_v17 }
 0x11b   :  { %1573 = vmatprep.subr.bf16.mxu0 %v13976_v29  ;;  %1614 = vmatprep.subr.bf16.mxu1 %v13978_v30  ;;  %v13901_v29 = vcombine.low %v236_v18, %v244_v19  ;;  %v13916_v30 = vcombine.high %v251_v24, %v259_v25  ;;  %v13918_v31 = vcombine.high %v252_v26, %v260_v27  ;;  %v1765_v19 = vld [vmem:[#allocation7 + $0x80] sm:$0xff] }
 0x11e   :  { %1574 = vmatpush1.bf16.msra.mxu0 %v13975_v35  ;;  %1615 = vmatpush1.bf16.msra.mxu1 %v13977_v36  ;;  %v276_v35 = vld [vmem:[#allocation2 + $0x3f8] sm:$0xff]  ;;  %v13915_v36 = vcombine.low %v251_v24, %v259_v25 }
 0x11f   :  { %1575 = vmatprep.subr.bf16.mxu0 %v13992_v37  ;;  %1616 = vmatprep.subr.bf16.mxu1 %v13994_v38  ;;  %v13917_v37 = vcombine.low %v252_v26, %v260_v27  ;;  %v13932_v38 = vcombine.high %v267_v32, %v275_v33  ;;  %v13934_v39 = vcombine.high %v268_v34, %v276_v35  ;;  %v1781_v27 = vld [vmem:[#allocation7 + $0x100] sm:$0xff] }
 0x122   :  { %1576 = vmatpush1.bf16.msra.mxu0 %v13991_v45  ;;  %1617 = vmatpush1.bf16.msra.mxu1 %v13993_v46  ;;  %v292_v45 = vld [vmem:[#allocation2 + $0x478] sm:$0xff]  ;;  %v13931_v46 = vcombine.low %v267_v32, %v275_v33 }
 0x123   :  { %1635 = vmatprep.subr.bf16.mxu0 %v13820_v47  ;;  %1676 = vmatprep.subr.bf16.mxu1 %v13822_v48  ;;  %v13933_v47 = vcombine.low %v268_v34, %v276_v35  ;;  %v13948_v48 = vcombine.high %v283_v40, %v291_v41  ;;  %v13950_v49 = vcombine.high %v284_v42, %v292_v45  ;;  %v1797_v34 = vld [vmem:[#allocation7 + $0x180] sm:$0xff] }
 0x124   :  { %v1805_v35 = vld [vmem:[#allocation7 + $0x1c0] sm:$0xff] }
 0x125   :  { %1586 = vmatmul.mubr.bf16.vlgmr.msra.gmra.mrb[8].mxu0 %v16347_v44  ;;  %1627 = vmatmul.mubr.bf16.vlgmr.msra.gmra.mrb[8].mxu1 %v16347_v44 }
 0x126   :  { %1636 = vmatpush1.bf16.msra.mxu0 %v13819_v54  ;;  %1677 = vmatpush1.bf16.msra.mxu1 %v13821_v55  ;;  %v308_v54 = vld [vmem:[#allocation2 + $0x4f8] sm:$0xff]  ;;  %v13947_v55 = vcombine.low %v283_v40, %v291_v41  ;;  %v1821_v40 = vld [vmem:[#allocation7 + $0x240] sm:$0xff]  ;;  %v14055_v41 = vcombine.low %v1797_v34, %v1805_v35 }
 0x127   :  { %1637 = vmatprep.subr.bf16.mxu0 %v13836_v43  ;;  %1678 = vmatprep.subr.bf16.mxu1 %v13838_v56  ;;  %v13949_v43 = vcombine.low %v284_v42, %v292_v45  ;;  %v13964_v56 = vcombine.high %v299_v50, %v307_v51  ;;  %v13966_v57 = vcombine.high %v300_v53, %v308_v54  ;;  %v1814_v45 = vld [vmem:[#allocation7 + $0x208] sm:$0xff] }
 0x128   :  { %14005 = vmatprep.mubr.msk.bf16.mxu0 %vm1385_vm0, %v16339_v52  ;;  %14006 = vmatprep.mubr.msk.bf16.mxu1 %vm1385_vm0, %v16339_v52  ;;  %v13886_v52 = vcombine.high %v220_v11, %v228_v12  ;;  %v1749_v12 = vld [vmem:[#allocation7] sm:$0xff] }
 0x12a   :  { %1638 = vmatpush1.bf16.msra.mxu0 %v13835_v61  ;;  %1679 = vmatpush1.bf16.msra.mxu1 %v13837_v62  ;;  %v324_v61 = vld [vmem:[#allocation2 + $0x578] sm:$0xff]  ;;  %v13963_v62 = vcombine.low %v299_v50, %v307_v51  ;;  %v1829_v50 = vld [vmem:[#allocation7 + $0x280] sm:$0xff] }
 0x12b   :  { %1639 = vmatprep.subr.bf16.mxu0 %v13852_v63  ;;  %1680 = vmatprep.subr.bf16.mxu1 %v13854_v0  ;;  %v13965_v63 = vcombine.low %v300_v53, %v308_v54  ;;  %v13980_v0 = vcombine.high %v315_v58, %v323_v59  ;;  %v13982_v1 = vcombine.high %v316_v60, %v324_v61  ;;  %v1837_v51 = vld [vmem:[#allocation7 + $0x2c0] sm:$0xff]  ;;  %v1830_v53 = vld [vmem:[#allocation7 + $0x288] sm:$0xff] }
 0x12c   :  { %v1838_v54 = vld [vmem:[#allocation7 + $0x2c8] sm:$0xff] }
 0x12e   :  { %1640 = vmatpush1.bf16.msra.mxu0 %v13851_v5  ;;  %1681 = vmatpush1.bf16.msra.mxu1 %v13853_v6  ;;  %v340_v5 = vld [vmem:[#allocation2 + $0x5f8] sm:$0xff]  ;;  %v13979_v6 = vcombine.low %v315_v58, %v323_v59  ;;  %v1845_v58 = vld [vmem:[#allocation7 + $0x300] sm:$0xff] }
 0x12f   :  { %1641 = vmatprep.subr.bf16.mxu0 %v13868_v7  ;;  %1682 = vmatprep.subr.bf16.mxu1 %v13870_v8  ;;  %v13981_v7 = vcombine.low %v316_v60, %v324_v61  ;;  %v13996_v8 = vcombine.high %v331_v2, %v339_v3  ;;  %v13998_v9 = vcombine.high %v332_v4, %v340_v5  ;;  %v1853_v59 = vld [vmem:[#allocation7 + $0x340] sm:$0xff]  ;;  %v1846_v60 = vld [vmem:[#allocation7 + $0x308] sm:$0xff] }
 0x130   :  { %v13997_v11 = vcombine.low %v332_v4, %v340_v5  ;;  %v1854_v61 = vld [vmem:[#allocation7 + $0x348] sm:$0xff]  ;;  %v1861_v2 = vld [vmem:[#allocation7 + $0x380] sm:$0xff] }
 0x131   :  { %v1869_v3 = vld [vmem:[#allocation7 + $0x3c0] sm:$0xff]  ;;  %v1862_v4 = vld [vmem:[#allocation7 + $0x388] sm:$0xff] }
 0x132   :  { %1642 = vmatpush1.bf16.msra.mxu0 %v13867_v13  ;;  %1683 = vmatpush1.bf16.msra.mxu1 %v13869_v14  ;;  %v1757_v13 = vld [vmem:[#allocation7 + $0x40] sm:$0xff]  ;;  %v1750_v14 = vld [vmem:[#allocation7 + $0x8] sm:$0xff] }
 0x133   :  { %1643 = vmatprep.subr.bf16.mxu0 %v13884_v15  ;;  %1684 = vmatprep.subr.bf16.mxu1 %v13886_v52  ;;  %v1758_v15 = vld [vmem:[#allocation7 + $0x48] sm:$0xff]  ;;  %v14008_v52 = vcombine.high %v1749_v12, %v1757_v13  ;;  %v14007_v17 = vcombine.low %v1749_v12, %v1757_v13 }
 0x134   :  { %v14010_v16 = vcombine.high %v1750_v14, %v1758_v15  ;;  %v14009_v18 = vcombine.low %v1750_v14, %v1758_v15  ;;  %v1870_v5 = vld [vmem:[#allocation7 + $0x3c8] sm:$0xff]  ;;  %v14119_v14 = vcombine.low %v1861_v2, %v1869_v3 }
 0x135   :  { %v1878_v12 = vld [vmem:[#allocation7 + $0x408] sm:$0xff]  ;;  %v14121_v15 = vcombine.low %v1862_v4, %v1870_v5 }
 0x136   :  { %1644 = vmatpush1.bf16.msra.mxu0 %v13883_v20  ;;  %1685 = vmatpush1.bf16.msra.mxu1 %v13885_v21  ;;  %v1773_v20 = vld [vmem:[#allocation7 + $0xc0] sm:$0xff]  ;;  %v1766_v21 = vld [vmem:[#allocation7 + $0x88] sm:$0xff] }
 0x137   :  { %1645 = vmatprep.subr.bf16.mxu0 %v13900_v22  ;;  %1686 = vmatprep.subr.bf16.mxu1 %v13902_v23  ;;  %v14024_v22 = vcombine.high %v1765_v19, %v1773_v20  ;;  %v1774_v23 = vld [vmem:[#allocation7 + $0xc8] sm:$0xff]  ;;  %v14023_v24 = vcombine.low %v1765_v19, %v1773_v20 }
 0x138   :  { %v14025_v25 = vcombine.low %v1766_v21, %v1774_v23  ;;  %v14026_v26 = vcombine.high %v1766_v21, %v1774_v23  ;;  %v1886_v13 = vld [vmem:[#allocation7 + $0x448] sm:$0xff] }
 0x139   :  { %v1894_v19 = vld [vmem:[#allocation7 + $0x488] sm:$0xff] }
 0x13a   :  { %1646 = vmatpush1.bf16.msra.mxu0 %v13899_v28  ;;  %1687 = vmatpush1.bf16.msra.mxu1 %v13901_v29  ;;  %v1789_v28 = vld [vmem:[#allocation7 + $0x140] sm:$0xff]  ;;  %v1782_v29 = vld [vmem:[#allocation7 + $0x108] sm:$0xff] }
 0x13b   :  { %1647 = vmatprep.subr.bf16.mxu0 %v13916_v30  ;;  %1688 = vmatprep.subr.bf16.mxu1 %v13918_v31  ;;  %v14040_v30 = vcombine.high %v1781_v27, %v1789_v28  ;;  %v1790_v31 = vld [vmem:[#allocation7 + $0x148] sm:$0xff] }
 0x13c   :  { %v14041_v32 = vcombine.low %v1782_v29, %v1790_v31  ;;  %v14042_v33 = vcombine.high %v1782_v29, %v1790_v31  ;;  %v1902_v20 = vld [vmem:[#allocation7 + $0x4c8] sm:$0xff] }
 0x13e   :  { %1648 = vmatpush1.bf16.msra.mxu0 %v13915_v36  ;;  %1689 = vmatpush1.bf16.msra.mxu1 %v13917_v37  ;;  %v1798_v36 = vld [vmem:[#allocation7 + $0x188] sm:$0xff]  ;;  %v14056_v37 = vcombine.high %v1797_v34, %v1805_v35  ;;  %v1933_v34 = vld [vmem:[#allocation7 + $0x5c0] sm:$0xff] }
 0x13f   :  { %1649 = vmatprep.subr.bf16.mxu0 %v13932_v38  ;;  %1690 = vmatprep.subr.bf16.mxu1 %v13934_v39  ;;  %v1806_v38 = vld [vmem:[#allocation7 + $0x1c8] sm:$0xff]  ;;  %v1813_v39 = vld [vmem:[#allocation7 + $0x200] sm:$0xff] }
 0x140   :  { %v14058_v42 = vcombine.high %v1798_v36, %v1806_v38 }
 0x142   :  { %1650 = vmatpush1.bf16.msra.mxu0 %v13931_v46  ;;  %1691 = vmatpush1.bf16.msra.mxu1 %v13933_v47  ;;  %v1822_v46 = vld [vmem:[#allocation7 + $0x248] sm:$0xff]  ;;  %v14057_v47 = vcombine.low %v1798_v36, %v1806_v38 }
 0x143   :  { %1651 = vmatprep.subr.bf16.mxu0 %v13948_v48  ;;  %1692 = vmatprep.subr.bf16.mxu1 %v13950_v49  ;;  %v14072_v48 = vcombine.high %v1813_v39, %v1821_v40  ;;  %v14074_v49 = vcombine.high %v1814_v45, %v1822_v46  ;;  %v1934_v38 = vld [vmem:[#allocation7 + $0x5c8] sm:$0xff] }
 0x146   :  { %1652 = vmatpush1.bf16.msra.mxu0 %v13947_v55  ;;  %1693 = vmatpush1.bf16.msra.mxu1 %v13949_v43  ;;  %v14071_v55 = vcombine.low %v1813_v39, %v1821_v40  ;;  %v14073_v43 = vcombine.low %v1814_v45, %v1822_v46 }
 0x147   :  { %1653 = vmatprep.subr.bf16.mxu0 %v13964_v56  ;;  %1694 = vmatprep.subr.bf16.mxu1 %v13966_v57  ;;  %v14088_v56 = vcombine.high %v1829_v50, %v1837_v51  ;;  %v14090_v57 = vcombine.high %v1830_v53, %v1838_v54 }
 0x14a   :  { %1654 = vmatpush1.bf16.msra.mxu0 %v13963_v62  ;;  %1695 = vmatpush1.bf16.msra.mxu1 %v13965_v63  ;;  %v14087_v62 = vcombine.low %v1829_v50, %v1837_v51  ;;  %v14089_v63 = vcombine.low %v1830_v53, %v1838_v54  ;;  %v1941_v50 = vld [vmem:[#allocation7 + $0x600] sm:$0xff]  ;;  %v1942_v53 = vld [vmem:[#allocation7 + $0x608] sm:$0xff] }
 0x14b   :  { %1655 = vmatprep.subr.bf16.mxu0 %v13980_v0  ;;  %1696 = vmatprep.subr.bf16.mxu1 %v13982_v1  ;;  %v14104_v0 = vcombine.high %v1845_v58, %v1853_v59  ;;  %v14106_v1 = vcombine.high %v1846_v60, %v1854_v61  ;;  %v1949_v51 = vld [vmem:[#allocation7 + $0x640] sm:$0xff]  ;;  %v1950_v54 = vld [vmem:[#allocation7 + $0x648] sm:$0xff] }
 0x14e   :  { %1656 = vmatpush1.bf16.msra.mxu0 %v13979_v6  ;;  %1697 = vmatpush1.bf16.msra.mxu1 %v13981_v7  ;;  %v14103_v6 = vcombine.low %v1845_v58, %v1853_v59  ;;  %v14105_v7 = vcombine.low %v1846_v60, %v1854_v61  ;;  %v14199_v58 = vcombine.low %v1941_v50, %v1949_v51  ;;  %v1957_v60 = vld [vmem:[#allocation7 + $0x680] sm:$0xff] }
 0x14f   :  { %1657 = vmatprep.subr.bf16.mxu0 %v13996_v8  ;;  %1698 = vmatprep.subr.bf16.mxu1 %v13998_v9  ;;  %v14120_v8 = vcombine.high %v1861_v2, %v1869_v3  ;;  %v14122_v9 = vcombine.high %v1862_v4, %v1870_v5  ;;  %v14201_v59 = vcombine.low %v1942_v53, %v1950_v54  ;;  %v1965_v61 = vld [vmem:[#allocation7 + $0x6c0] sm:$0xff] }
 0x150   :  { %v1973_v4 = vld [vmem:[#allocation7 + $0x700] sm:$0xff] }
 0x151   :  { %v1981_v5 = vld [vmem:[#allocation7 + $0x740] sm:$0xff] }
 0x152   :  { %1658 = vmatpush1.bf16.msra.mxu0 %v13995_v10  ;;  %1699 = vmatpush1.bf16.msra.mxu1 %v13997_v11  ;;  %v1877_v10 = vld [vmem:[#allocation7 + $0x400] sm:$0xff] }
 0x153   :  { %4905 = vmatprep.subr.bf16.mxu0 %v14008_v52  ;;  %4987 = vmatprep.subr.bf16.mxu1 %v14010_v16  ;;  %v1885_v11 = vld [vmem:[#allocation7 + $0x440] sm:$0xff]  ;;  %v14138_v16 = vcombine.high %v1878_v12, %v1886_v13 }
 0x154   :  { %v14136_v52 = vcombine.high %v1877_v10, %v1885_v11  ;;  %v14135_v21 = vcombine.low %v1877_v10, %v1885_v11 }
 0x155   :  { %1668 = vmatmul.mubr.bf16.vlgmr.msra.gmra.mrb[12].mxu0 %v16347_v44  ;;  %1709 = vmatmul.mubr.bf16.vlgmr.msra.gmra.mrb[12].mxu1 %v16347_v44  ;;  %v14039_v44 = vcombine.low %v1781_v27, %v1789_v28  ;;  %v1910_v27 = vld [vmem:[#allocation7 + $0x508] sm:$0xff] }
 0x156   :  { %4906 = vmatpush1.bf16.msra.mxu0 %v14007_v17  ;;  %4988 = vmatpush1.bf16.msra.mxu1 %v14009_v18  ;;  %v1893_v17 = vld [vmem:[#allocation7 + $0x480] sm:$0xff]  ;;  %v1918_v28 = vld [vmem:[#allocation7 + $0x548] sm:$0xff] }
 0x157   :  { %4907 = vmatprep.subr.bf16.mxu0 %v14024_v22  ;;  %4989 = vmatprep.subr.bf16.mxu1 %v14026_v26  ;;  %v1901_v18 = vld [vmem:[#allocation7 + $0x4c0] sm:$0xff]  ;;  %v14137_v22 = vcombine.low %v1878_v12, %v1886_v13  ;;  %v14169_v46 = vcombine.low %v1910_v27, %v1918_v28 }
 0x158   :  { %v14152_v23 = vcombine.high %v1893_v17, %v1901_v18  ;;  %v1917_v26 = vld [vmem:[#allocation7 + $0x540] sm:$0xff]  ;;  %v14151_v29 = vcombine.low %v1893_v17, %v1901_v18 }
 0x159   :  { %v1989_v12 = vld [vmem:[#allocation7 + $0x780] sm:$0xff] }
 0x15a   :  { %4908 = vmatpush1.bf16.msra.mxu0 %v14023_v24  ;;  %4990 = vmatpush1.bf16.msra.mxu1 %v14025_v25  ;;  %v14154_v24 = vcombine.high %v1894_v19, %v1902_v20  ;;  %v1909_v25 = vld [vmem:[#allocation7 + $0x500] sm:$0xff] }
 0x15b   :  { %4909 = vmatprep.subr.bf16.mxu0 %v14040_v30  ;;  %4991 = vmatprep.subr.bf16.mxu1 %v14042_v33  ;;  %v14153_v30 = vcombine.low %v1894_v19, %v1902_v20  ;;  %v14168_v31 = vcombine.high %v1909_v25, %v1917_v26  ;;  %v1925_v33 = vld [vmem:[#allocation7 + $0x580] sm:$0xff] }
 0x15c   :  { %v1997_v13 = vld [vmem:[#allocation7 + $0x7c0] sm:$0xff] }
 0x15d   :  { %v16377_v19 = vld [vmem:[#allocation7 + $0x800] sm:$0xff] }
 0x15e   :  { %4910 = vmatpush1.bf16.msra.mxu0 %v14039_v44  ;;  %4992 = vmatpush1.bf16.msra.mxu1 %v14041_v32  ;;  %v14170_v32 = vcombine.high %v1910_v27, %v1918_v28  ;;  %v16379_v20 = vld [vmem:[#allocation7 + $0x840] sm:$0xff]  ;;  %v345_v27 = vlaneseq }
 0x15f   :  { %4911 = vmatprep.subr.bf16.mxu0 %v14056_v37  ;;  %4993 = vmatprep.subr.bf16.mxu1 %v14058_v42  ;;  %v1926_v37 = vld [vmem:[#allocation7 + $0x588] sm:$0xff] }
 0x160   :  { %v346_v28 = vshrl.u32 %v345_v27, 7 }
 0x162   :  { %4912 = vmatpush1.bf16.msra.mxu0 %v14055_v41  ;;  %4994 = vmatpush1.bf16.msra.mxu1 %v14057_v47  ;;  %v14167_v41 = vcombine.low %v1909_v25, %v1917_v26  ;;  %v14184_v47 = vcombine.high %v1925_v33, %v1933_v34 }
 0x163   :  { %4913 = vmatprep.subr.bf16.mxu0 %v14072_v48  ;;  %4995 = vmatprep.subr.bf16.mxu1 %v14074_v49  ;;  %v14186_v49 = vcombine.high %v1926_v37, %v1934_v38 }
 0x166   :  { %4914 = vmatpush1.bf16.msra.mxu0 %v14071_v55  ;;  %4996 = vmatpush1.bf16.msra.mxu1 %v14073_v43  ;;  %v14183_v55 = vcombine.low %v1925_v33, %v1933_v34  ;;  %v14185_v43 = vcombine.low %v1926_v37, %v1934_v38  ;;  %v16399_v33 = vsub.s32 1, %v346_v28  ;;  %v16401_v34 = vsub.s32 4, %v346_v28 }
 0x167   :  { %4915 = vmatprep.subr.bf16.mxu0 %v14088_v56  ;;  %4997 = vmatprep.subr.bf16.mxu1 %v14090_v57  ;;  %v14200_v56 = vcombine.high %v1941_v50, %v1949_v51  ;;  %v14202_v57 = vcombine.high %v1942_v53, %v1950_v54  ;;  %v16403_v37 = vsub.s32 5, %v346_v28 }
 0x16a   :  { %4916 = vmatpush1.bf16.msra.mxu0 %v14087_v62  ;;  %4998 = vmatpush1.bf16.msra.mxu1 %v14089_v63  ;;  %v1958_v62 = vld [vmem:[#allocation7 + $0x688] sm:$0xff]  ;;  %v14216_v63 = vcombine.high %v1957_v60, %v1965_v61 }
 0x16b   :  { %4917 = vmatprep.subr.bf16.mxu0 %v14104_v0  ;;  %4999 = vmatprep.subr.bf16.mxu1 %v14106_v1  ;;  %v1966_v0 = vld [vmem:[#allocation7 + $0x6c8] sm:$0xff]  ;;  %v14215_v1 = vcombine.low %v1957_v60, %v1965_v61 }
 0x16c   :  { %v14217_v2 = vcombine.low %v1958_v62, %v1966_v0  ;;  %v14218_v3 = vcombine.high %v1958_v62, %v1966_v0 }
 0x16e   :  { %4918 = vmatpush1.bf16.msra.mxu0 %v14103_v6  ;;  %5000 = vmatpush1.bf16.msra.mxu1 %v14105_v7  ;;  %v1974_v6 = vld [vmem:[#allocation7 + $0x708] sm:$0xff]  ;;  %v14232_v7 = vcombine.high %v1973_v4, %v1981_v5 }
 0x16f   :  { %4919 = vmatprep.subr.bf16.mxu0 %v14120_v8  ;;  %5001 = vmatprep.subr.bf16.mxu1 %v14122_v9  ;;  %v1982_v8 = vld [vmem:[#allocation7 + $0x748] sm:$0xff]  ;;  %v14231_v9 = vcombine.low %v1973_v4, %v1981_v5 }
 0x170   :  { %v14233_v10 = vcombine.low %v1974_v6, %v1982_v8  ;;  %v14234_v11 = vcombine.high %v1974_v6, %v1982_v8 }
 0x172   :  { %4920 = vmatpush1.bf16.msra.mxu0 %v14119_v14  ;;  %5002 = vmatpush1.bf16.msra.mxu1 %v14121_v15  ;;  %v1990_v14 = vld [vmem:[#allocation7 + $0x788] sm:$0xff]  ;;  %v14248_v15 = vcombine.high %v1989_v12, %v1997_v13 }
 0x173   :  { %4921 = vmatprep.subr.bf16.mxu0 %v14136_v52  ;;  %5003 = vmatprep.subr.bf16.mxu1 %v14138_v16  ;;  %v1998_v52 = vld [vmem:[#allocation7 + $0x7c8] sm:$0xff]  ;;  %v14247_v16 = vcombine.low %v1989_v12, %v1997_v13 }
 0x174   :  { %v14249_v17 = vcombine.low %v1990_v14, %v1998_v52  ;;  %v14250_v18 = vcombine.high %v1990_v14, %v1998_v52 }
 0x176   :  { %4922 = vmatpush1.bf16.msra.mxu0 %v14135_v21  ;;  %5004 = vmatpush1.bf16.msra.mxu1 %v14137_v22  ;;  %v16381_v21 = vld [vmem:[#allocation7 + $0x808] sm:$0xff]  ;;  %v14264_v22 = vcombine.high %v16377_v19, %v16379_v20 }
 0x177   :  { %4923 = vmatprep.subr.bf16.mxu0 %v14152_v23  ;;  %5005 = vmatprep.subr.bf16.mxu1 %v14154_v24  ;;  %v16385_v23 = vld [vmem:[#allocation7 + $0x848] sm:$0xff]  ;;  %v14263_v24 = vcombine.low %v16377_v19, %v16379_v20 }
 0x178   :  { %v14265_v25 = vcombine.low %v16381_v21, %v16385_v23  ;;  %v14266_v26 = vcombine.high %v16381_v21, %v16385_v23 }
 0x17a   :  { %4924 = vmatpush1.bf16.msra.mxu0 %v14151_v29  ;;  %5006 = vmatpush1.bf16.msra.mxu1 %v14153_v30  ;;  %v16393_v29 = vsub.s32 2, %v346_v28  ;;  %v16395_v30 = vsub.s32 0, %v346_v28 }
 0x17b   :  { %4925 = vmatprep.subr.bf16.mxu0 %v14168_v31  ;;  %5007 = vmatprep.subr.bf16.mxu1 %v14170_v32  ;;  %v16397_v31 = vsub.s32 3, %v346_v28  ;;  %v341_v32 = vld [vmem:[#allocation5] sm:$0xff] }
 0x17c   :  { %v356_v38 = vrot.slane %v341_v32, %v16393_v29 }
 0x17e   :  { %4926 = vmatpush1.bf16.msra.mxu0 %v14167_v41  ;;  %5008 = vmatpush1.bf16.msra.mxu1 %v14169_v46  ;;  %v348_v41 = vrot.slane %v341_v32, %v16395_v30  ;;  %v352_v46 = vrot.slane %v341_v32, %v16399_v33 }
 0x17f   :  { %4927 = vmatprep.subr.bf16.mxu0 %v14184_v47  ;;  %5009 = vmatprep.subr.bf16.mxu1 %v14186_v49  ;;  %v364_v47 = vrot.slane %v341_v32, %v16401_v34 }
 0x182   :  { %4928 = vmatpush1.bf16.msra.mxu0 %v14183_v55  ;;  %5010 = vmatpush1.bf16.msra.mxu1 %v14185_v43 }
 0x183   :  { %4929 = vmatprep.subr.bf16.mxu0 %v14200_v56  ;;  %5011 = vmatprep.subr.bf16.mxu1 %v14202_v57 }
 0x186   :  { %4930 = vmatpush1.bf16.msra.mxu0 %v14199_v58  ;;  %5012 = vmatpush1.bf16.msra.mxu1 %v14201_v59 }
 0x187   :  { %4931 = vmatprep.subr.bf16.mxu0 %v14216_v63  ;;  %5013 = vmatprep.subr.bf16.mxu1 %v14218_v3 }
 0x18a   :  { %4932 = vmatpush1.bf16.msra.mxu0 %v14215_v1  ;;  %5014 = vmatpush1.bf16.msra.mxu1 %v14217_v2 }
 0x18b   :  { %4933 = vmatprep.subr.bf16.mxu0 %v14232_v7  ;;  %5015 = vmatprep.subr.bf16.mxu1 %v14234_v11 }
 0x18e   :  { %4934 = vmatpush1.bf16.msra.mxu0 %v14231_v9  ;;  %5016 = vmatpush1.bf16.msra.mxu1 %v14233_v10 }
 0x18f   :  { %4935 = vmatprep.subr.bf16.mxu0 %v14248_v15  ;;  %5017 = vmatprep.subr.bf16.mxu1 %v14250_v18  ;;  %v342_v18 = vld [vmem:[#allocation5 + $0x8] sm:$0xff] }
 0x190   :  { %v392_v27 = vrot.slane %v342_v18, %v16397_v31 }
 0x192   :  { %4936 = vmatpush1.bf16.msra.mxu0 %v14247_v16  ;;  %5018 = vmatpush1.bf16.msra.mxu1 %v14249_v17 }
 0x193   :  { %4946 = vmatprep.subr.bf16.mxu0 %v14264_v22  ;;  %5028 = vmatprep.subr.bf16.mxu1 %v14266_v26  ;;  %v388_v22 = vrot.slane %v342_v18, %v16393_v29  ;;  %v380_v26 = vrot.slane %v342_v18, %v16395_v30 }
 0x198   :  { %v16369_v44 = vpop.f32.mrb[0].mxu0  ;;  %v16373_v36 = vpop.f32.mrb[0].mxu1 }
 0x199   :  { %v16371_v35 = vpop.f32.mrb[1].mxu0  ;;  %v16375_v40 = vpop.f32.mrb[1].mxu1  ;;  %v1465_v49 = vadd.f32 %v16373_v36, %v356_v38  ;;  %v1424_v51 = vadd.f32 %v16369_v44, %v348_v41 }
 0x19a   :  { %v1427_v39 = vpop.f32.mrb[2].mxu0  ;;  %v1468_v45 = vpop.f32.mrb[2].mxu1  ;;  %v1426_v55 = vadd.f32 %v16371_v35, %v352_v46 }
 0x19b   :  { %v1428_v42 = vpop.f32.mrb[3].mxu0  ;;  %v1469_v48 = vpop.f32.mrb[3].mxu1  ;;  %v16406_v39 = vsub.s32 6, %v346_v28  ;;  %v16410_v45 = vsub.s32 7, %v346_v28  ;;  %v1719_v61 = vmax.f32 %v1465_v49, 0.0  ;;  %v1717_v36 = vmax.f32 %v1424_v51, 0.0 }
 0x19c   :  { %v360_v42 = vrot.slane %v341_v32, %v16397_v31  ;;  %v368_v48 = vrot.slane %v341_v32, %v16403_v37  ;;  %v384_v28 = vrot.slane %v342_v18, %v16399_v33 }
 0x19d   :  { %v372_v50 = vrot.slane %v341_v32, %v16406_v39  ;;  %v376_v54 = vrot.slane %v341_v32, %v16410_v45  ;;  %v396_v32 = vrot.slane %v342_v18, %v16401_v34  ;;  %v404_v41 = vrot.slane %v342_v18, %v16406_v39 }
 0x19e   :  { %v1467_v53 = vadd.f32 %v16375_v40, %v360_v42  ;;  %v1718_v40 = vmax.f32 %v1426_v55, 0.0  ;;  %v400_v42 = vrot.slane %v342_v18, %v16403_v37 }
 0x1a0   :  { %v1720_v2 = vmax.f32 %v1467_v53, 0.0 }
 0x1c8   :  { %v1505_v43 = vpop.f32.mrb[4].mxu0  ;;  %v1546_v58 = vpop.f32.mrb[4].mxu1 }
 0x1c9   :  { %v1506_v56 = vadd.f32 %v1505_v43, %v364_v47  ;;  %v1507_v57 = vpop.f32.mrb[5].mxu0  ;;  %v1547_v62 = vadd.f32 %v1546_v58, %v372_v50  ;;  %v1548_v63 = vpop.f32.mrb[5].mxu1 }
 0x1ca   :  { %v1508_v59 = vadd.f32 %v1507_v57, %v368_v48  ;;  %v1509_v60 = vpop.f32.mrb[6].mxu0  ;;  %v1549_v44 = vadd.f32 %v1548_v63, %v376_v54  ;;  %v1550_v3 = vpop.f32.mrb[6].mxu1  ;;  %v408_v48 = vrot.slane %v342_v18, %v16410_v45 }
 0x1cb   :  { %v1721_v0 = vmax.f32 %v1506_v56, 0.0  ;;  %v1510_v1 = vpop.f32.mrb[7].mxu0  ;;  %v1723_v5 = vmax.f32 %v1547_v62, 0.0  ;;  %v1551_v6 = vpop.f32.mrb[7].mxu1 }
 0x1cc   :  { %v1722_v4 = vmax.f32 %v1508_v59, 0.0  ;;  %v1724_v7 = vmax.f32 %v1549_v44, 0.0 }
 0x1cd   :  { %v1733_v35 = vmax.f32 %v1717_v36, %v1721_v0  ;;  %v1735_v9 = vmax.f32 %v1719_v61, %v1723_v5 }
 0x1ce   :  { %v1734_v8 = vmax.f32 %v1718_v40, %v1722_v4  ;;  %v1736_v10 = vmax.f32 %v1720_v2, %v1724_v7 }
 0x1f8   :  { %v1587_v11 = vpop.f32.mrb[8].mxu0  ;;  %v1628_v13 = vpop.f32.mrb[8].mxu1 }
 0x1f9   :  { %v1589_v12 = vpop.f32.mrb[9].mxu0  ;;  %v1630_v15 = vpop.f32.mrb[9].mxu1  ;;  %v1629_v38 = vadd.f32 %v1628_v13, %v388_v22  ;;  %v1588_v46 = vadd.f32 %v1587_v11, %v380_v26  ;;  %v2021_v13 = vld [vmem:[#allocation7 + $0x880] sm:$0xff] }
 0x1fa   :  { %v1591_v14 = vpop.f32.mrb[10].mxu0  ;;  %v1632_v16 = vpop.f32.mrb[10].mxu1  ;;  %v1631_v47 = vadd.f32 %v1630_v15, %v392_v27  ;;  %v1590_v49 = vadd.f32 %v1589_v12, %v384_v28  ;;  %v2029_v15 = vld [vmem:[#allocation7 + $0x8c0] sm:$0xff]  ;;  %v2046_v28 = vld [vmem:[#allocation7 + $0x948] sm:$0xff] }
 0x1fb   :  { %v1592_v52 = vpop.f32.mrb[11].mxu0  ;;  %v1633_v17 = vpop.f32.mrb[11].mxu1  ;;  %v1727_v55 = vmax.f32 %v1629_v38, 0.0  ;;  %v1725_v59 = vmax.f32 %v1588_v46, 0.0  ;;  %v2030_v16 = vld [vmem:[#allocation7 + $0x8c8] sm:$0xff]  ;;  %v2037_v22 = vld [vmem:[#allocation7 + $0x900] sm:$0xff]  ;;  %v14280_v26 = vcombine.high %v2021_v13, %v2029_v15 }
 0x1fc   :  { %v1728_v60 = vmax.f32 %v1631_v47, 0.0  ;;  %v1726_v0 = vmax.f32 %v1590_v49, 0.0  ;;  %v2022_v52 = vld [vmem:[#allocation7 + $0x888] sm:$0xff]  ;;  %v2045_v27 = vld [vmem:[#allocation7 + $0x940] sm:$0xff] }
 0x1fd   :  { %v14296_v38 = vcombine.high %v2037_v22, %v2045_v27  ;;  %v2061_v46 = vld [vmem:[#allocation7 + $0x9c0] sm:$0xff]  ;;  %v2054_v47 = vld [vmem:[#allocation7 + $0x988] sm:$0xff]  ;;  %v14295_v19 = vcombine.low %v2037_v22, %v2045_v27 }
 0x1fe   :  { %v2070_v49 = vld [vmem:[#allocation7 + $0xa08] sm:$0xff] }
 0x1ff   :  { %v2134_v22 = vld [vmem:[#allocation7 + $0xc08] sm:$0xff] }
 0x228   :  { %v1669_v50 = vpop.f32.mrb[12].mxu0  ;;  %v1710_v53 = vpop.f32.mrb[12].mxu1 }
 0x229   :  { %v1670_v51 = vadd.f32 %v1669_v50, %v396_v32  ;;  %v1671_v54 = vpop.f32.mrb[13].mxu0  ;;  %v1711_v43 = vadd.f32 %v1710_v53, %v404_v41  ;;  %v1712_v57 = vpop.f32.mrb[13].mxu1  ;;  %v14281_v32 = vcombine.low %v2022_v52, %v2030_v16  ;;  %v2078_v50 = vld [vmem:[#allocation7 + $0xa48] sm:$0xff] }
 0x22a   :  { %v1672_v56 = vadd.f32 %v1671_v54, %v400_v42  ;;  %v1673_v58 = vpop.f32.mrb[14].mxu0  ;;  %v1713_v62 = vadd.f32 %v1712_v57, %v408_v48  ;;  %v1714_v36 = vpop.f32.mrb[14].mxu1  ;;  %v2053_v42 = vld [vmem:[#allocation7 + $0x980] sm:$0xff]  ;;  %v2062_v48 = vld [vmem:[#allocation7 + $0x9c8] sm:$0xff] }
 0x22b   :  { %v1729_v61 = vmax.f32 %v1670_v51, 0.0  ;;  %v1674_v63 = vpop.f32.mrb[15].mxu0  ;;  %v1731_v1 = vmax.f32 %v1711_v43, 0.0  ;;  %v1715_v44 = vpop.f32.mrb[15].mxu1  ;;  %v14312_v21 = vcombine.high %v2053_v42, %v2061_v46  ;;  %v14314_v23 = vcombine.high %v2054_v47, %v2062_v48  ;;  %v2085_v43 = vld [vmem:[#allocation7 + $0xa80] sm:$0xff]  ;;  %v2086_v57 = vld [vmem:[#allocation7 + $0xa88] sm:$0xff] }
 0x22c   :  { %v1730_v2 = vmax.f32 %v1672_v56, 0.0  ;;  %v1732_v40 = vmax.f32 %v1713_v62, 0.0  ;;  %v14311_v51 = vcombine.low %v2053_v42, %v2061_v46  ;;  %v14313_v53 = vcombine.low %v2054_v47, %v2062_v48  ;;  %v2093_v56 = vld [vmem:[#allocation7 + $0xac0] sm:$0xff]  ;;  %v2094_v58 = vld [vmem:[#allocation7 + $0xac8] sm:$0xff] }
 0x22d   :  { %v1737_v3 = vmax.f32 %v1725_v59, %v1729_v61  ;;  %v1739_v4 = vmax.f32 %v1727_v55, %v1731_v1  ;;  %v14330_v55 = vcombine.high %v2070_v49, %v2078_v50  ;;  %v14344_v61 = vcombine.high %v2085_v43, %v2093_v56  ;;  %v2101_v63 = vld [vmem:[#allocation7 + $0xb00] sm:$0xff]  ;;  %v2110_v1 = vld [vmem:[#allocation7 + $0xb48] sm:$0xff] }
 0x22e   :  { %v1738_v5 = vmax.f32 %v1726_v0, %v1730_v2  ;;  %v1740_v7 = vmax.f32 %v1728_v60, %v1732_v40  ;;  %v14329_v60 = vcombine.low %v2070_v49, %v2078_v50  ;;  %v14346_v62 = vcombine.high %v2086_v57, %v2094_v58  ;;  %v2109_v36 = vld [vmem:[#allocation7 + $0xb40] sm:$0xff]  ;;  %v2102_v0 = vld [vmem:[#allocation7 + $0xb08] sm:$0xff] }
 0x22f   :  { %v1741_v6 = vmax.f32 %v1733_v35, %v1737_v3  ;;  %v16429_v11 = vmax.f32 %v1735_v9, %v1739_v4  ;;  %v14282_v35 = vcombine.high %v2022_v52, %v2030_v16  ;;  %v2038_v9 = vld [vmem:[#allocation7 + $0x908] sm:$0xff]  ;;  %v14343_v2 = vcombine.low %v2085_v43, %v2093_v56  ;;  %v2117_v4 = vld [vmem:[#allocation7 + $0xb80] sm:$0xff] }
 0x230   :  { %v1742_v12 = vmax.f32 %v1734_v8, %v1738_v5  ;;  %v1744_v14 = vmax.f32 %v1736_v10, %v1740_v7  ;;  %v14279_v10 = vcombine.low %v2021_v13, %v2029_v15  ;;  %v14298_v41 = vcombine.high %v2038_v9, %v2046_v28  ;;  %v2125_v5 = vld [vmem:[#allocation7 + $0xbc0] sm:$0xff]  ;;  %v2126_v7 = vld [vmem:[#allocation7 + $0xbc8] sm:$0xff] }
 0x231   :  { %v16433_v18 = vpack.c.bf16 %v1741_v6, %v1741_v6  ;;  %v14297_v20 = vcombine.low %v2038_v9, %v2046_v28  ;;  %v14345_v44 = vcombine.low %v2086_v57, %v2094_v58  ;;  %v14360_v3 = vcombine.high %v2101_v63, %v2109_v36  ;;  %v2118_v6 = vld [vmem:[#allocation7 + $0xb88] sm:$0xff]  ;;  %v2133_v52 = vld [vmem:[#allocation7 + $0xc00] sm:$0xff] }
 0x232   :  { %v16431_v17 = vpack.c.bf16 %v1742_v12, %v1742_v12  ;;  %v16437_v8 = vpack.c.bf16 %v1744_v14, %v1744_v14  ;;  %v14362_v40 = vcombine.high %v2102_v0, %v2110_v1  ;;  %v14359_v12 = vcombine.low %v2101_v63, %v2109_v36  ;;  %v2141_v16 = vld [vmem:[#allocation7 + $0xc40] sm:$0xff] }
 0x233   :  { %v14361_v13 = vcombine.low %v2102_v0, %v2110_v1  ;;  %v14376_v14 = vcombine.high %v2117_v4, %v2125_v5  ;;  %v14378_v15 = vcombine.high %v2118_v6, %v2126_v7  ;;  %v14377_v27 = vcombine.low %v2118_v6, %v2126_v7 }
 0x234   :  { %4937 = vmatprep.mubr.bf16.mxu0 %v16431_v17  ;;  %5019 = vmatprep.mubr.bf16.mxu1 %v16431_v17  ;;  %v14392_v9 = vcombine.high %v2133_v52, %v2141_v16  ;;  %v14391_v42 = vcombine.low %v2133_v52, %v2141_v16 }
 0x235   :  { %4938 = vmatmul.mubr.bf16.vlgmr.msra.gmra.mrb[16].mxu0 %v16433_v18  ;;  %5020 = vmatmul.mubr.bf16.vlgmr.msra.gmra.mrb[16].mxu1 %v16433_v18 }
 0x236   :  { %4947 = vmatpush1.bf16.msra.mxu0 %v14263_v24  ;;  %5029 = vmatpush1.bf16.msra.mxu1 %v14265_v25  ;;  %v2069_v24 = vld [vmem:[#allocation7 + $0xa00] sm:$0xff] }
 0x237   :  { %4978 = vmatprep.mubr.bf16.mxu0 %v16437_v8  ;;  %5060 = vmatprep.mubr.bf16.mxu1 %v16437_v8  ;;  %v2077_v25 = vld [vmem:[#allocation7 + $0xa40] sm:$0xff] }
 0x238   :  { %4948 = vmatprep.subr.bf16.mxu0 %v14280_v26  ;;  %5030 = vmatprep.subr.bf16.mxu1 %v14282_v35  ;;  %v14328_v54 = vcombine.high %v2069_v24, %v2077_v25  ;;  %v14327_v59 = vcombine.low %v2069_v24, %v2077_v25  ;;  %v2142_v26 = vld [vmem:[#allocation7 + $0xc48] sm:$0xff]  ;;  %v14375_v35 = vcombine.low %v2117_v4, %v2125_v5 }
 0x239   :  { %v14394_v28 = vcombine.high %v2134_v22, %v2142_v26  ;;  %v14393_v46 = vcombine.low %v2134_v22, %v2142_v26 }
 0x23a   :  { %4949 = vmatpush1.bf16.msra.mxu0 %v14279_v10  ;;  %5031 = vmatpush1.bf16.msra.mxu1 %v14281_v32  ;;  %v2149_v10 = vld [vmem:[#allocation7 + $0xc80] sm:$0xff] }
 0x23b   :  { %4950 = vmatprep.subr.bf16.mxu0 %v14296_v38  ;;  %5032 = vmatprep.subr.bf16.mxu1 %v14298_v41  ;;  %v2157_v32 = vld [vmem:[#allocation7 + $0xcc0] sm:$0xff]  ;;  %v2150_v38 = vld [vmem:[#allocation7 + $0xc88] sm:$0xff] }
 0x23c   :  { %v2158_v41 = vld [vmem:[#allocation7 + $0xcc8] sm:$0xff]  ;;  %v14408_v47 = vcombine.high %v2149_v10, %v2157_v32  ;;  %v14407_v24 = vcombine.low %v2149_v10, %v2157_v32 }
 0x23d   :  { %v14410_v48 = vcombine.high %v2150_v38, %v2158_v41  ;;  %v14409_v25 = vcombine.low %v2150_v38, %v2158_v41 }
 0x23e   :  { %4951 = vmatpush1.bf16.msra.mxu0 %v14295_v19  ;;  %5033 = vmatpush1.bf16.msra.mxu1 %v14297_v20  ;;  %v2165_v19 = vld [vmem:[#allocation7 + $0xd00] sm:$0xff] }
 0x23f   :  { %4952 = vmatprep.subr.bf16.mxu0 %v14312_v21  ;;  %5034 = vmatprep.subr.bf16.mxu1 %v14314_v23  ;;  %v2173_v20 = vld [vmem:[#allocation7 + $0xd40] sm:$0xff]  ;;  %v2166_v21 = vld [vmem:[#allocation7 + $0xd08] sm:$0xff] }
 0x240   :  { %v2174_v23 = vld [vmem:[#allocation7 + $0xd48] sm:$0xff]  ;;  %v14424_v49 = vcombine.high %v2165_v19, %v2173_v20  ;;  %v14423_v43 = vcombine.low %v2165_v19, %v2173_v20 }
 0x241   :  { %v14426_v50 = vcombine.high %v2166_v21, %v2174_v23  ;;  %v14425_v56 = vcombine.low %v2166_v21, %v2174_v23 }
 0x242   :  { %4953 = vmatpush1.bf16.msra.mxu0 %v14311_v51  ;;  %5035 = vmatpush1.bf16.msra.mxu1 %v14313_v53  ;;  %v2181_v51 = vld [vmem:[#allocation7 + $0xd80] sm:$0xff] }
 0x243   :  { %4954 = vmatprep.subr.bf16.mxu0 %v14328_v54  ;;  %5036 = vmatprep.subr.bf16.mxu1 %v14330_v55  ;;  %v2189_v53 = vld [vmem:[#allocation7 + $0xdc0] sm:$0xff]  ;;  %v2182_v54 = vld [vmem:[#allocation7 + $0xd88] sm:$0xff] }
 0x244   :  { %v2190_v55 = vld [vmem:[#allocation7 + $0xdc8] sm:$0xff]  ;;  %v14440_v57 = vcombine.high %v2181_v51, %v2189_v53  ;;  %v14439_v63 = vcombine.low %v2181_v51, %v2189_v53  ;;  %v16451_v53 = vpack.c.bf16 %v16429_v11, %v16429_v11 }
 0x245   :  { %v14442_v58 = vcombine.high %v2182_v54, %v2190_v55  ;;  %v14441_v36 = vcombine.low %v2182_v54, %v2190_v55 }
 0x246   :  { %4955 = vmatpush1.bf16.msra.mxu0 %v14327_v59  ;;  %5037 = vmatpush1.bf16.msra.mxu1 %v14329_v60  ;;  %v2197_v59 = vld [vmem:[#allocation7 + $0xe00] sm:$0xff] }
 0x247   :  { %4956 = vmatprep.subr.bf16.mxu0 %v14344_v61  ;;  %5038 = vmatprep.subr.bf16.mxu1 %v14346_v62  ;;  %v2205_v60 = vld [vmem:[#allocation7 + $0xe40] sm:$0xff]  ;;  %v2198_v61 = vld [vmem:[#allocation7 + $0xe08] sm:$0xff] }
 0x248   :  { %v2206_v62 = vld [vmem:[#allocation7 + $0xe48] sm:$0xff]  ;;  %v14456_v0 = vcombine.high %v2197_v59, %v2205_v60  ;;  %v14455_v4 = vcombine.low %v2197_v59, %v2205_v60  ;;  %v1792_v59 = vld [vmem:[#allocation7 + $0x158] sm:$0xff] }
 0x249   :  { %v14458_v1 = vcombine.high %v2198_v61, %v2206_v62  ;;  %v14457_v5 = vcombine.low %v2198_v61, %v2206_v62 }
 0x24a   :  { %4957 = vmatpush1.bf16.msra.mxu0 %v14343_v2  ;;  %5039 = vmatpush1.bf16.msra.mxu1 %v14345_v44  ;;  %v2213_v2 = vld [vmem:[#allocation7 + $0xe80] sm:$0xff] }
 0x24b   :  { %4958 = vmatprep.subr.bf16.mxu0 %v14360_v3  ;;  %5040 = vmatprep.subr.bf16.mxu1 %v14362_v40  ;;  %v2221_v44 = vld [vmem:[#allocation7 + $0xec0] sm:$0xff]  ;;  %v2214_v3 = vld [vmem:[#allocation7 + $0xe88] sm:$0xff] }
 0x24c   :  { %v2222_v40 = vld [vmem:[#allocation7 + $0xec8] sm:$0xff]  ;;  %v14472_v6 = vcombine.high %v2213_v2, %v2221_v44  ;;  %v14471_v52 = vcombine.low %v2213_v2, %v2221_v44 }
 0x24d   :  { %v14474_v7 = vcombine.high %v2214_v3, %v2222_v40  ;;  %v14473_v16 = vcombine.low %v2214_v3, %v2222_v40 }
 0x24e   :  { %4959 = vmatpush1.bf16.msra.mxu0 %v14359_v12  ;;  %5041 = vmatpush1.bf16.msra.mxu1 %v14361_v13  ;;  %v2229_v12 = vld [vmem:[#allocation7 + $0xf00] sm:$0xff] }
 0x24f   :  { %4960 = vmatprep.subr.bf16.mxu0 %v14376_v14  ;;  %5042 = vmatprep.subr.bf16.mxu1 %v14378_v15  ;;  %v2237_v13 = vld [vmem:[#allocation7 + $0xf40] sm:$0xff]  ;;  %v2230_v14 = vld [vmem:[#allocation7 + $0xf08] sm:$0xff] }
 0x250   :  { %v2238_v15 = vld [vmem:[#allocation7 + $0xf48] sm:$0xff]  ;;  %v14488_v22 = vcombine.high %v2229_v12, %v2237_v13  ;;  %v14487_v10 = vcombine.low %v2229_v12, %v2237_v13 }
 0x251   :  { %v14490_v26 = vcombine.high %v2230_v14, %v2238_v15  ;;  %v14489_v32 = vcombine.low %v2230_v14, %v2238_v15 }
 0x252   :  { %4961 = vmatpush1.bf16.msra.mxu0 %v14375_v35  ;;  %5043 = vmatpush1.bf16.msra.mxu1 %v14377_v27  ;;  %v2245_v35 = vld [vmem:[#allocation7 + $0xf80] sm:$0xff] }
 0x253   :  { %4962 = vmatprep.subr.bf16.mxu0 %v14392_v9  ;;  %5044 = vmatprep.subr.bf16.mxu1 %v14394_v28  ;;  %v2253_v27 = vld [vmem:[#allocation7 + $0xfc0] sm:$0xff]  ;;  %v2246_v9 = vld [vmem:[#allocation7 + $0xf88] sm:$0xff] }
 0x254   :  { %v2254_v28 = vld [vmem:[#allocation7 + $0xfc8] sm:$0xff]  ;;  %v14504_v38 = vcombine.high %v2245_v35, %v2253_v27  ;;  %v14503_v19 = vcombine.low %v2245_v35, %v2253_v27 }
 0x255   :  { %v14506_v41 = vcombine.high %v2246_v9, %v2254_v28  ;;  %v14505_v20 = vcombine.low %v2246_v9, %v2254_v28 }
 0x256   :  { %4963 = vmatpush1.bf16.msra.mxu0 %v14391_v42  ;;  %5045 = vmatpush1.bf16.msra.mxu1 %v14393_v46  ;;  %v1751_v42 = vld [vmem:[#allocation7 + $0x10] sm:$0xff] }
 0x257   :  { %4964 = vmatprep.subr.bf16.mxu0 %v14408_v47  ;;  %5046 = vmatprep.subr.bf16.mxu1 %v14410_v48  ;;  %v1759_v46 = vld [vmem:[#allocation7 + $0x50] sm:$0xff]  ;;  %v1752_v47 = vld [vmem:[#allocation7 + $0x18] sm:$0xff] }
 0x258   :  { %v1760_v48 = vld [vmem:[#allocation7 + $0x58] sm:$0xff]  ;;  %v14012_v21 = vcombine.high %v1751_v42, %v1759_v46  ;;  %v14011_v51 = vcombine.low %v1751_v42, %v1759_v46 }
 0x259   :  { %v14014_v23 = vcombine.high %v1752_v47, %v1760_v48  ;;  %v14013_v54 = vcombine.low %v1752_v47, %v1760_v48 }
 0x25a   :  { %4965 = vmatpush1.bf16.msra.mxu0 %v14407_v24  ;;  %5047 = vmatpush1.bf16.msra.mxu1 %v14409_v25  ;;  %v1767_v24 = vld [vmem:[#allocation7 + $0x90] sm:$0xff] }
 0x25b   :  { %4966 = vmatprep.subr.bf16.mxu0 %v14424_v49  ;;  %5048 = vmatprep.subr.bf16.mxu1 %v14426_v50  ;;  %v1775_v25 = vld [vmem:[#allocation7 + $0xd0] sm:$0xff]  ;;  %v1768_v49 = vld [vmem:[#allocation7 + $0x98] sm:$0xff] }
 0x25c   :  { %v1776_v50 = vld [vmem:[#allocation7 + $0xd8] sm:$0xff]  ;;  %v14028_v55 = vcombine.high %v1767_v24, %v1775_v25  ;;  %v14027_v60 = vcombine.low %v1767_v24, %v1775_v25 }
 0x25d   :  { %v14029_v11 = vcombine.low %v1768_v49, %v1776_v50 }
 0x25e   :  { %4967 = vmatpush1.bf16.msra.mxu0 %v14423_v43  ;;  %5049 = vmatpush1.bf16.msra.mxu1 %v14425_v56  ;;  %v14030_v43 = vcombine.high %v1768_v49, %v1776_v50  ;;  %v1783_v56 = vld [vmem:[#allocation7 + $0x110] sm:$0xff] }
 0x25f   :  { %4968 = vmatprep.subr.bf16.mxu0 %v14440_v57  ;;  %5050 = vmatprep.subr.bf16.mxu1 %v14442_v58  ;;  %v1791_v57 = vld [vmem:[#allocation7 + $0x150] sm:$0xff]  ;;  %v1784_v58 = vld [vmem:[#allocation7 + $0x118] sm:$0xff] }
 0x260   :  { %v14044_v61 = vcombine.high %v1783_v56, %v1791_v57  ;;  %v14046_v62 = vcombine.high %v1784_v58, %v1792_v59  ;;  %v14043_v2 = vcombine.low %v1783_v56, %v1791_v57  ;;  %v14045_v44 = vcombine.low %v1784_v58, %v1792_v59 }
 0x262   :  { %4969 = vmatpush1.bf16.msra.mxu0 %v14439_v63  ;;  %5051 = vmatpush1.bf16.msra.mxu1 %v14441_v36  ;;  %v1799_v63 = vld [vmem:[#allocation7 + $0x190] sm:$0xff] }
 0x263   :  { %4970 = vmatprep.subr.bf16.mxu0 %v14456_v0  ;;  %5052 = vmatprep.subr.bf16.mxu1 %v14458_v1  ;;  %v1807_v36 = vld [vmem:[#allocation7 + $0x1d0] sm:$0xff]  ;;  %v1800_v0 = vld [vmem:[#allocation7 + $0x198] sm:$0xff] }
 0x264   :  { %v1808_v1 = vld [vmem:[#allocation7 + $0x1d8] sm:$0xff]  ;;  %v14060_v3 = vcombine.high %v1799_v63, %v1807_v36  ;;  %v14059_v12 = vcombine.low %v1799_v63, %v1807_v36 }
 0x265   :  { %v14062_v40 = vcombine.high %v1800_v0, %v1808_v1  ;;  %v14061_v13 = vcombine.low %v1800_v0, %v1808_v1 }
 0x266   :  { %4971 = vmatpush1.bf16.msra.mxu0 %v14455_v4  ;;  %5053 = vmatpush1.bf16.msra.mxu1 %v14457_v5  ;;  %v1815_v4 = vld [vmem:[#allocation7 + $0x210] sm:$0xff] }
 0x267   :  { %4972 = vmatprep.subr.bf16.mxu0 %v14472_v6  ;;  %5054 = vmatprep.subr.bf16.mxu1 %v14474_v7  ;;  %v1823_v5 = vld [vmem:[#allocation7 + $0x250] sm:$0xff]  ;;  %v1816_v6 = vld [vmem:[#allocation7 + $0x218] sm:$0xff] }
 0x268   :  { %v1824_v7 = vld [vmem:[#allocation7 + $0x258] sm:$0xff]  ;;  %v14076_v14 = vcombine.high %v1815_v4, %v1823_v5  ;;  %v14075_v35 = vcombine.low %v1815_v4, %v1823_v5 }
 0x269   :  { %v14078_v15 = vcombine.high %v1816_v6, %v1824_v7  ;;  %v14077_v27 = vcombine.low %v1816_v6, %v1824_v7 }
 0x26a   :  { %4973 = vmatpush1.bf16.msra.mxu0 %v14471_v52  ;;  %5055 = vmatpush1.bf16.msra.mxu1 %v14473_v16  ;;  %v1831_v52 = vld [vmem:[#allocation7 + $0x290] sm:$0xff] }
 0x26b   :  { %4974 = vmatprep.subr.bf16.mxu0 %v14488_v22  ;;  %5056 = vmatprep.subr.bf16.mxu1 %v14490_v26  ;;  %v1839_v16 = vld [vmem:[#allocation7 + $0x2d0] sm:$0xff]  ;;  %v1832_v22 = vld [vmem:[#allocation7 + $0x298] sm:$0xff] }
 0x26c   :  { %v1840_v26 = vld [vmem:[#allocation7 + $0x2d8] sm:$0xff]  ;;  %v14092_v9 = vcombine.high %v1831_v52, %v1839_v16  ;;  %v14091_v42 = vcombine.low %v1831_v52, %v1839_v16 }
 0x26d   :  { %v14094_v28 = vcombine.high %v1832_v22, %v1840_v26  ;;  %v14093_v46 = vcombine.low %v1832_v22, %v1840_v26 }
 0x26e   :  { %4975 = vmatpush1.bf16.msra.mxu0 %v14487_v10  ;;  %5057 = vmatpush1.bf16.msra.mxu1 %v14489_v32  ;;  %v1847_v10 = vld [vmem:[#allocation7 + $0x310] sm:$0xff] }
 0x26f   :  { %4976 = vmatprep.subr.bf16.mxu0 %v14504_v38  ;;  %5058 = vmatprep.subr.bf16.mxu1 %v14506_v41  ;;  %v1855_v32 = vld [vmem:[#allocation7 + $0x350] sm:$0xff]  ;;  %v1848_v38 = vld [vmem:[#allocation7 + $0x318] sm:$0xff] }
 0x270   :  { %v1856_v41 = vld [vmem:[#allocation7 + $0x358] sm:$0xff]  ;;  %v14108_v47 = vcombine.high %v1847_v10, %v1855_v32  ;;  %v14107_v24 = vcombine.low %v1847_v10, %v1855_v32 }
 0x271   :  { %v14110_v48 = vcombine.high %v1848_v38, %v1856_v41  ;;  %v14109_v25 = vcombine.low %v1848_v38, %v1856_v41 }
 0x272   :  { %4977 = vmatpush1.bf16.msra.mxu0 %v14503_v19  ;;  %5059 = vmatpush1.bf16.msra.mxu1 %v14505_v20  ;;  %v1863_v19 = vld [vmem:[#allocation7 + $0x390] sm:$0xff] }
 0x273   :  { %5069 = vmatprep.subr.bf16.mxu0 %v14012_v21  ;;  %5151 = vmatprep.subr.bf16.mxu1 %v14014_v23  ;;  %v1871_v20 = vld [vmem:[#allocation7 + $0x3d0] sm:$0xff]  ;;  %v1864_v21 = vld [vmem:[#allocation7 + $0x398] sm:$0xff] }
 0x274   :  { %v1872_v23 = vld [vmem:[#allocation7 + $0x3d8] sm:$0xff]  ;;  %v14124_v49 = vcombine.high %v1863_v19, %v1871_v20  ;;  %v14123_v56 = vcombine.low %v1863_v19, %v1871_v20 }
 0x275   :  { %4979 = vmatmul.mubr.bf16.vlgmr.msra.gmra.mrb[16].mxu0 %v16451_v53  ;;  %5061 = vmatmul.mubr.bf16.vlgmr.msra.gmra.mrb[16].mxu1 %v16451_v53  ;;  %v14126_v50 = vcombine.high %v1864_v21, %v1872_v23  ;;  %v14125_v57 = vcombine.low %v1864_v21, %v1872_v23 }
 0x276   :  { %5070 = vmatpush1.bf16.msra.mxu0 %v14011_v51  ;;  %5101 = vmatprep.mubr.bf16.mxu0 %v16431_v17  ;;  %v1879_v51 = vld [vmem:[#allocation7 + $0x410] sm:$0xff] }
 0x277   :  { %5152 = vmatpush1.bf16.msra.mxu1 %v14013_v54  ;;  %5183 = vmatprep.mubr.bf16.mxu1 %v16431_v17  ;;  %v1887_v54 = vld [vmem:[#allocation7 + $0x450] sm:$0xff] }
 0x278   :  { %5071 = vmatprep.subr.bf16.mxu0 %v14028_v55  ;;  %5153 = vmatprep.subr.bf16.mxu1 %v14030_v43  ;;  %v1880_v55 = vld [vmem:[#allocation7 + $0x418] sm:$0xff]  ;;  %v14140_v58 = vcombine.high %v1879_v51, %v1887_v54  ;;  %v14139_v63 = vcombine.low %v1879_v51, %v1887_v54 }
 0x279   :  { %v1888_v43 = vld [vmem:[#allocation7 + $0x458] sm:$0xff] }
 0x27a   :  { %5072 = vmatpush1.bf16.msra.mxu0 %v14027_v60  ;;  %v14142_v59 = vcombine.high %v1880_v55, %v1888_v43  ;;  %v1895_v60 = vld [vmem:[#allocation7 + $0x490] sm:$0xff]  ;;  %v14141_v36 = vcombine.low %v1880_v55, %v1888_v43 }
 0x27b   :  { %5154 = vmatpush1.bf16.msra.mxu1 %v14029_v11  ;;  %5073 = vmatprep.subr.bf16.mxu0 %v14044_v61  ;;  %v1903_v11 = vld [vmem:[#allocation7 + $0x4d0] sm:$0xff]  ;;  %v1896_v61 = vld [vmem:[#allocation7 + $0x498] sm:$0xff] }
 0x27c   :  { %5155 = vmatprep.subr.bf16.mxu1 %v14046_v62  ;;  %v1904_v62 = vld [vmem:[#allocation7 + $0x4d8] sm:$0xff]  ;;  %v14156_v0 = vcombine.high %v1895_v60, %v1903_v11  ;;  %v14155_v4 = vcombine.low %v1895_v60, %v1903_v11 }
 0x27d   :  { %v14158_v1 = vcombine.high %v1896_v61, %v1904_v62  ;;  %v14157_v5 = vcombine.low %v1896_v61, %v1904_v62 }
 0x27e   :  { %5074 = vmatpush1.bf16.msra.mxu0 %v14043_v2  ;;  %v1911_v2 = vld [vmem:[#allocation7 + $0x510] sm:$0xff] }
 0x27f   :  { %5156 = vmatpush1.bf16.msra.mxu1 %v14045_v44  ;;  %5075 = vmatprep.subr.bf16.mxu0 %v14060_v3  ;;  %v1919_v44 = vld [vmem:[#allocation7 + $0x550] sm:$0xff]  ;;  %v1912_v3 = vld [vmem:[#allocation7 + $0x518] sm:$0xff] }
 0x280   :  { %5157 = vmatprep.subr.bf16.mxu1 %v14062_v40  ;;  %v1920_v40 = vld [vmem:[#allocation7 + $0x558] sm:$0xff]  ;;  %v14172_v6 = vcombine.high %v1911_v2, %v1919_v44  ;;  %v14171_v52 = vcombine.low %v1911_v2, %v1919_v44 }
 0x281   :  { %v14174_v7 = vcombine.high %v1912_v3, %v1920_v40  ;;  %v14173_v16 = vcombine.low %v1912_v3, %v1920_v40 }
 0x282   :  { %5076 = vmatpush1.bf16.msra.mxu0 %v14059_v12  ;;  %v1927_v12 = vld [vmem:[#allocation7 + $0x590] sm:$0xff] }
 0x283   :  { %5158 = vmatpush1.bf16.msra.mxu1 %v14061_v13  ;;  %5077 = vmatprep.subr.bf16.mxu0 %v14076_v14  ;;  %v1935_v13 = vld [vmem:[#allocation7 + $0x5d0] sm:$0xff]  ;;  %v1928_v14 = vld [vmem:[#allocation7 + $0x598] sm:$0xff] }
 0x284   :  { %5159 = vmatprep.subr.bf16.mxu1 %v14078_v15  ;;  %v1936_v15 = vld [vmem:[#allocation7 + $0x5d8] sm:$0xff]  ;;  %v14188_v22 = vcombine.high %v1927_v12, %v1935_v13  ;;  %v14187_v10 = vcombine.low %v1927_v12, %v1935_v13 }
 0x285   :  { %v14190_v26 = vcombine.high %v1928_v14, %v1936_v15  ;;  %v14189_v32 = vcombine.low %v1928_v14, %v1936_v15  ;;  %v2032_v12 = vld [vmem:[#allocation7 + $0x8d8] sm:$0xff]  ;;  %v2039_v15 = vld [vmem:[#allocation7 + $0x910] sm:$0xff] }
 0x286   :  { %5078 = vmatpush1.bf16.msra.mxu0 %v14075_v35  ;;  %v1943_v35 = vld [vmem:[#allocation7 + $0x610] sm:$0xff] }
 0x287   :  { %5160 = vmatpush1.bf16.msra.mxu1 %v14077_v27  ;;  %5079 = vmatprep.subr.bf16.mxu0 %v14092_v9  ;;  %v1951_v27 = vld [vmem:[#allocation7 + $0x650] sm:$0xff]  ;;  %v1944_v9 = vld [vmem:[#allocation7 + $0x618] sm:$0xff] }
 0x288   :  { %5161 = vmatprep.subr.bf16.mxu1 %v14094_v28  ;;  %v1952_v28 = vld [vmem:[#allocation7 + $0x658] sm:$0xff]  ;;  %v14204_v38 = vcombine.high %v1943_v35, %v1951_v27  ;;  %v14203_v19 = vcombine.low %v1943_v35, %v1951_v27 }
 0x289   :  { %v14206_v41 = vcombine.high %v1944_v9, %v1952_v28  ;;  %v14205_v20 = vcombine.low %v1944_v9, %v1952_v28 }
 0x28a   :  { %5080 = vmatpush1.bf16.msra.mxu0 %v14091_v42  ;;  %v1959_v42 = vld [vmem:[#allocation7 + $0x690] sm:$0xff] }
 0x28b   :  { %5162 = vmatpush1.bf16.msra.mxu1 %v14093_v46  ;;  %5081 = vmatprep.subr.bf16.mxu0 %v14108_v47  ;;  %v1967_v46 = vld [vmem:[#allocation7 + $0x6d0] sm:$0xff]  ;;  %v1960_v47 = vld [vmem:[#allocation7 + $0x698] sm:$0xff] }
 0x28c   :  { %5163 = vmatprep.subr.bf16.mxu1 %v14110_v48  ;;  %v1968_v48 = vld [vmem:[#allocation7 + $0x6d8] sm:$0xff]  ;;  %v14220_v21 = vcombine.high %v1959_v42, %v1967_v46  ;;  %v14219_v51 = vcombine.low %v1959_v42, %v1967_v46 }
 0x28d   :  { %v14222_v23 = vcombine.high %v1960_v47, %v1968_v48  ;;  %v14221_v54 = vcombine.low %v1960_v47, %v1968_v48 }
 0x28e   :  { %5082 = vmatpush1.bf16.msra.mxu0 %v14107_v24  ;;  %v1975_v24 = vld [vmem:[#allocation7 + $0x710] sm:$0xff] }
 0x28f   :  { %5164 = vmatpush1.bf16.msra.mxu1 %v14109_v25  ;;  %5083 = vmatprep.subr.bf16.mxu0 %v14124_v49  ;;  %v1983_v25 = vld [vmem:[#allocation7 + $0x750] sm:$0xff]  ;;  %v1976_v49 = vld [vmem:[#allocation7 + $0x718] sm:$0xff] }
 0x290   :  { %5165 = vmatprep.subr.bf16.mxu1 %v14126_v50  ;;  %v1984_v50 = vld [vmem:[#allocation7 + $0x758] sm:$0xff]  ;;  %v14236_v55 = vcombine.high %v1975_v24, %v1983_v25  ;;  %v14235_v60 = vcombine.low %v1975_v24, %v1983_v25 }
 0x291   :  { %v14238_v43 = vcombine.high %v1976_v49, %v1984_v50  ;;  %v14237_v11 = vcombine.low %v1976_v49, %v1984_v50 }
 0x292   :  { %5084 = vmatpush1.bf16.msra.mxu0 %v14123_v56  ;;  %v1991_v56 = vld [vmem:[#allocation7 + $0x790] sm:$0xff] }
 0x293   :  { %5166 = vmatpush1.bf16.msra.mxu1 %v14125_v57  ;;  %5085 = vmatprep.subr.bf16.mxu0 %v14140_v58  ;;  %v1999_v57 = vld [vmem:[#allocation7 + $0x7d0] sm:$0xff]  ;;  %v1992_v58 = vld [vmem:[#allocation7 + $0x798] sm:$0xff] }
 0x294   :  { %5167 = vmatprep.subr.bf16.mxu1 %v14142_v59  ;;  %v2000_v59 = vld [vmem:[#allocation7 + $0x7d8] sm:$0xff]  ;;  %v14252_v61 = vcombine.high %v1991_v56, %v1999_v57  ;;  %v14251_v2 = vcombine.low %v1991_v56, %v1999_v57 }
 0x295   :  { %v14254_v62 = vcombine.high %v1992_v58, %v2000_v59  ;;  %v14253_v44 = vcombine.low %v1992_v58, %v2000_v59 }
 0x296   :  { %5086 = vmatpush1.bf16.msra.mxu0 %v14139_v63  ;;  %v2007_v63 = vld [vmem:[#allocation7 + $0x810] sm:$0xff] }
 0x297   :  { %5168 = vmatpush1.bf16.msra.mxu1 %v14141_v36  ;;  %5087 = vmatprep.subr.bf16.mxu0 %v14156_v0  ;;  %v2015_v36 = vld [vmem:[#allocation7 + $0x850] sm:$0xff]  ;;  %v2008_v0 = vld [vmem:[#allocation7 + $0x818] sm:$0xff] }
 0x298   :  { %5169 = vmatprep.subr.bf16.mxu1 %v14158_v1  ;;  %v2016_v1 = vld [vmem:[#allocation7 + $0x858] sm:$0xff]  ;;  %v14268_v3 = vcombine.high %v2007_v63, %v2015_v36 }
 0x299   :  { %v14270_v40 = vcombine.high %v2008_v0, %v2016_v1  ;;  %v14269_v13 = vcombine.low %v2008_v0, %v2016_v1 }
 0x29a   :  { %5088 = vmatpush1.bf16.msra.mxu0 %v14155_v4  ;;  %v2023_v4 = vld [vmem:[#allocation7 + $0x890] sm:$0xff] }
 0x29b   :  { %5170 = vmatpush1.bf16.msra.mxu1 %v14157_v5  ;;  %5089 = vmatprep.subr.bf16.mxu0 %v14172_v6  ;;  %v2031_v5 = vld [vmem:[#allocation7 + $0x8d0] sm:$0xff]  ;;  %v14267_v6 = vcombine.low %v2007_v63, %v2015_v36 }
 0x29c   :  { %5171 = vmatprep.subr.bf16.mxu1 %v14174_v7  ;;  %v2024_v7 = vld [vmem:[#allocation7 + $0x898] sm:$0xff]  ;;  %v14284_v14 = vcombine.high %v2023_v4, %v2031_v5  ;;  %v14283_v35 = vcombine.low %v2023_v4, %v2031_v5 }
 0x29d   :  { %v14285_v27 = vcombine.low %v2024_v7, %v2032_v12 }
 0x29e   :  { %5090 = vmatpush1.bf16.msra.mxu0 %v14171_v52  ;;  %v2047_v52 = vld [vmem:[#allocation7 + $0x950] sm:$0xff] }
 0x29f   :  { %5172 = vmatpush1.bf16.msra.mxu1 %v14173_v16  ;;  %5091 = vmatprep.subr.bf16.mxu0 %v14188_v22  ;;  %v14286_v16 = vcombine.high %v2024_v7, %v2032_v12  ;;  %v2040_v22 = vld [vmem:[#allocation7 + $0x918] sm:$0xff]  ;;  %v14300_v9 = vcombine.high %v2039_v15, %v2047_v52  ;;  %v14299_v42 = vcombine.low %v2039_v15, %v2047_v52  ;;  %v2135_v12 = vld [vmem:[#allocation7 + $0xc10] sm:$0xff] }
 0x2a0   :  { %5173 = vmatprep.subr.bf16.mxu1 %v14190_v26  ;;  %v2048_v26 = vld [vmem:[#allocation7 + $0x958] sm:$0xff] }
 0x2a1   :  { %v14302_v28 = vcombine.high %v2040_v22, %v2048_v26  ;;  %v14301_v46 = vcombine.low %v2040_v22, %v2048_v26  ;;  %v2144_v15 = vld [vmem:[#allocation7 + $0xc58] sm:$0xff] }
 0x2a2   :  { %5092 = vmatpush1.bf16.msra.mxu0 %v14187_v10  ;;  %v2055_v10 = vld [vmem:[#allocation7 + $0x990] sm:$0xff] }
 0x2a3   :  { %5174 = vmatpush1.bf16.msra.mxu1 %v14189_v32  ;;  %5093 = vmatprep.subr.bf16.mxu0 %v14204_v38  ;;  %v2063_v32 = vld [vmem:[#allocation7 + $0x9d0] sm:$0xff]  ;;  %v2056_v38 = vld [vmem:[#allocation7 + $0x998] sm:$0xff] }
 0x2a4   :  { %5175 = vmatprep.subr.bf16.mxu1 %v14206_v41  ;;  %v2064_v41 = vld [vmem:[#allocation7 + $0x9d8] sm:$0xff]  ;;  %v14316_v47 = vcombine.high %v2055_v10, %v2063_v32  ;;  %v14315_v24 = vcombine.low %v2055_v10, %v2063_v32 }
 0x2a5   :  { %v14318_v48 = vcombine.high %v2056_v38, %v2064_v41  ;;  %v14317_v25 = vcombine.low %v2056_v38, %v2064_v41 }
 0x2a6   :  { %5094 = vmatpush1.bf16.msra.mxu0 %v14203_v19  ;;  %v2071_v19 = vld [vmem:[#allocation7 + $0xa10] sm:$0xff] }
 0x2a7   :  { %5176 = vmatpush1.bf16.msra.mxu1 %v14205_v20  ;;  %5095 = vmatprep.subr.bf16.mxu0 %v14220_v21  ;;  %v2079_v20 = vld [vmem:[#allocation7 + $0xa50] sm:$0xff]  ;;  %v2072_v21 = vld [vmem:[#allocation7 + $0xa18] sm:$0xff] }
 0x2a8   :  { %5177 = vmatprep.subr.bf16.mxu1 %v14222_v23  ;;  %v2080_v23 = vld [vmem:[#allocation7 + $0xa58] sm:$0xff]  ;;  %v14332_v49 = vcombine.high %v2071_v19, %v2079_v20  ;;  %v14331_v56 = vcombine.low %v2071_v19, %v2079_v20 }
 0x2a9   :  { %v14334_v50 = vcombine.high %v2072_v21, %v2080_v23  ;;  %v14333_v57 = vcombine.low %v2072_v21, %v2080_v23 }
 0x2aa   :  { %5096 = vmatpush1.bf16.msra.mxu0 %v14219_v51  ;;  %v2087_v51 = vld [vmem:[#allocation7 + $0xa90] sm:$0xff] }
 0x2ab   :  { %5178 = vmatpush1.bf16.msra.mxu1 %v14221_v54  ;;  %5097 = vmatprep.subr.bf16.mxu0 %v14236_v55  ;;  %v2095_v54 = vld [vmem:[#allocation7 + $0xad0] sm:$0xff]  ;;  %v2088_v55 = vld [vmem:[#allocation7 + $0xa98] sm:$0xff] }
 0x2ac   :  { %5179 = vmatprep.subr.bf16.mxu1 %v14238_v43  ;;  %v2096_v43 = vld [vmem:[#allocation7 + $0xad8] sm:$0xff]  ;;  %v14348_v58 = vcombine.high %v2087_v51, %v2095_v54  ;;  %v14347_v63 = vcombine.low %v2087_v51, %v2095_v54 }
 0x2ad   :  { %v14350_v59 = vcombine.high %v2088_v55, %v2096_v43  ;;  %v14349_v36 = vcombine.low %v2088_v55, %v2096_v43 }
 0x2ae   :  { %5098 = vmatpush1.bf16.msra.mxu0 %v14235_v60  ;;  %v2103_v60 = vld [vmem:[#allocation7 + $0xb10] sm:$0xff] }
 0x2af   :  { %5180 = vmatpush1.bf16.msra.mxu1 %v14237_v11  ;;  %5099 = vmatprep.subr.bf16.mxu0 %v14252_v61  ;;  %v2111_v11 = vld [vmem:[#allocation7 + $0xb50] sm:$0xff]  ;;  %v2104_v61 = vld [vmem:[#allocation7 + $0xb18] sm:$0xff] }
 0x2b0   :  { %5181 = vmatprep.subr.bf16.mxu1 %v14254_v62  ;;  %v2112_v62 = vld [vmem:[#allocation7 + $0xb58] sm:$0xff]  ;;  %v14364_v0 = vcombine.high %v2103_v60, %v2111_v11  ;;  %v14363_v4 = vcombine.low %v2103_v60, %v2111_v11 }
 0x2b1   :  { %v14366_v1 = vcombine.high %v2104_v61, %v2112_v62  ;;  %v14365_v5 = vcombine.low %v2104_v61, %v2112_v62 }
 0x2b2   :  { %5100 = vmatpush1.bf16.msra.mxu0 %v14251_v2  ;;  %v2119_v2 = vld [vmem:[#allocation7 + $0xb90] sm:$0xff] }
 0x2b3   :  { %5182 = vmatpush1.bf16.msra.mxu1 %v14253_v44  ;;  %5110 = vmatprep.subr.bf16.mxu0 %v14268_v3  ;;  %v2127_v44 = vld [vmem:[#allocation7 + $0xbd0] sm:$0xff]  ;;  %v2120_v3 = vld [vmem:[#allocation7 + $0xb98] sm:$0xff] }
 0x2b4   :  { %5192 = vmatprep.subr.bf16.mxu1 %v14270_v40  ;;  %v2128_v40 = vld [vmem:[#allocation7 + $0xbd8] sm:$0xff]  ;;  %v14379_v52 = vcombine.low %v2119_v2, %v2127_v44 }
 0x2b5   :  { %5102 = vmatmul.mubr.bf16.vlgmr.msra.gmra.mrb[20].mxu0 %v16433_v18  ;;  %v14382_v7 = vcombine.high %v2120_v3, %v2128_v40 }
 0x2b6   :  { %5184 = vmatmul.mubr.bf16.vlgmr.msra.gmra.mrb[20].mxu1 %v16433_v18  ;;  %5111 = vmatpush1.bf16.msra.mxu0 %v14267_v6  ;;  %v14380_v6 = vcombine.high %v2119_v2, %v2127_v44 }
 0x2b7   :  { %5142 = vmatprep.mubr.bf16.mxu0 %v16437_v8  ;;  %5193 = vmatpush1.bf16.msra.mxu1 %v14269_v13  ;;  %v2143_v13 = vld [vmem:[#allocation7 + $0xc50] sm:$0xff] }
 0x2b8   :  { %5224 = vmatprep.mubr.bf16.mxu1 %v16437_v8  ;;  %5112 = vmatprep.subr.bf16.mxu0 %v14284_v14  ;;  %v2136_v14 = vld [vmem:[#allocation7 + $0xc18] sm:$0xff]  ;;  %v14396_v22 = vcombine.high %v2135_v12, %v2143_v13  ;;  %v14395_v10 = vcombine.low %v2135_v12, %v2143_v13 }
 0x2b9   :  { %5194 = vmatprep.subr.bf16.mxu1 %v14286_v16  ;;  %v14381_v16 = vcombine.low %v2120_v3, %v2128_v40  ;;  %v14398_v26 = vcombine.high %v2136_v14, %v2144_v15  ;;  %v14397_v32 = vcombine.low %v2136_v14, %v2144_v15 }
 0x2ba   :  { %5113 = vmatpush1.bf16.msra.mxu0 %v14283_v35  ;;  %v2151_v35 = vld [vmem:[#allocation7 + $0xc90] sm:$0xff] }
 0x2bb   :  { %5195 = vmatpush1.bf16.msra.mxu1 %v14285_v27  ;;  %5114 = vmatprep.subr.bf16.mxu0 %v14300_v9  ;;  %v2159_v27 = vld [vmem:[#allocation7 + $0xcd0] sm:$0xff]  ;;  %v2152_v9 = vld [vmem:[#allocation7 + $0xc98] sm:$0xff] }
 0x2bc   :  { %5196 = vmatprep.subr.bf16.mxu1 %v14302_v28  ;;  %v2160_v28 = vld [vmem:[#allocation7 + $0xcd8] sm:$0xff]  ;;  %v14412_v38 = vcombine.high %v2151_v35, %v2159_v27  ;;  %v14411_v19 = vcombine.low %v2151_v35, %v2159_v27 }
 0x2bd   :  { %v14414_v41 = vcombine.high %v2152_v9, %v2160_v28  ;;  %v14413_v20 = vcombine.low %v2152_v9, %v2160_v28 }
 0x2be   :  { %5115 = vmatpush1.bf16.msra.mxu0 %v14299_v42  ;;  %v2167_v42 = vld [vmem:[#allocation7 + $0xd10] sm:$0xff] }
 0x2bf   :  { %5197 = vmatpush1.bf16.msra.mxu1 %v14301_v46  ;;  %5116 = vmatprep.subr.bf16.mxu0 %v14316_v47  ;;  %v2175_v46 = vld [vmem:[#allocation7 + $0xd50] sm:$0xff]  ;;  %v2168_v47 = vld [vmem:[#allocation7 + $0xd18] sm:$0xff] }
 0x2c0   :  { %5198 = vmatprep.subr.bf16.mxu1 %v14318_v48  ;;  %v2176_v48 = vld [vmem:[#allocation7 + $0xd58] sm:$0xff]  ;;  %v14428_v21 = vcombine.high %v2167_v42, %v2175_v46  ;;  %v14427_v51 = vcombine.low %v2167_v42, %v2175_v46 }
 0x2c1   :  { %v14430_v23 = vcombine.high %v2168_v47, %v2176_v48  ;;  %v14429_v54 = vcombine.low %v2168_v47, %v2176_v48 }
 0x2c2   :  { %5117 = vmatpush1.bf16.msra.mxu0 %v14315_v24  ;;  %v2183_v24 = vld [vmem:[#allocation7 + $0xd90] sm:$0xff] }
 0x2c3   :  { %5199 = vmatpush1.bf16.msra.mxu1 %v14317_v25  ;;  %5118 = vmatprep.subr.bf16.mxu0 %v14332_v49  ;;  %v2191_v25 = vld [vmem:[#allocation7 + $0xdd0] sm:$0xff]  ;;  %v2184_v49 = vld [vmem:[#allocation7 + $0xd98] sm:$0xff] }
 0x2c4   :  { %5200 = vmatprep.subr.bf16.mxu1 %v14334_v50  ;;  %v2192_v50 = vld [vmem:[#allocation7 + $0xdd8] sm:$0xff]  ;;  %v14444_v55 = vcombine.high %v2183_v24, %v2191_v25  ;;  %v14443_v60 = vcombine.low %v2183_v24, %v2191_v25  ;;  %v1778_v24 = vld [vmem:[#allocation7 + $0xe8] sm:$0xff] }
 0x2c5   :  { %v14446_v43 = vcombine.high %v2184_v49, %v2192_v50  ;;  %v14445_v11 = vcombine.low %v2184_v49, %v2192_v50  ;;  %v1785_v50 = vld [vmem:[#allocation7 + $0x120] sm:$0xff] }
 0x2c6   :  { %5119 = vmatpush1.bf16.msra.mxu0 %v14331_v56  ;;  %v2199_v56 = vld [vmem:[#allocation7 + $0xe10] sm:$0xff] }
 0x2c7   :  { %5201 = vmatpush1.bf16.msra.mxu1 %v14333_v57  ;;  %5120 = vmatprep.subr.bf16.mxu0 %v14348_v58  ;;  %v2207_v57 = vld [vmem:[#allocation7 + $0xe50] sm:$0xff]  ;;  %v2200_v58 = vld [vmem:[#allocation7 + $0xe18] sm:$0xff] }
 0x2c8   :  { %5202 = vmatprep.subr.bf16.mxu1 %v14350_v59  ;;  %v2208_v59 = vld [vmem:[#allocation7 + $0xe58] sm:$0xff]  ;;  %v14460_v61 = vcombine.high %v2199_v56, %v2207_v57  ;;  %v14459_v2 = vcombine.low %v2199_v56, %v2207_v57 }
 0x2c9   :  { %v14462_v62 = vcombine.high %v2200_v58, %v2208_v59  ;;  %v14461_v44 = vcombine.low %v2200_v58, %v2208_v59 }
 0x2ca   :  { %5121 = vmatpush1.bf16.msra.mxu0 %v14347_v63  ;;  %v2215_v63 = vld [vmem:[#allocation7 + $0xe90] sm:$0xff] }
 0x2cb   :  { %5203 = vmatpush1.bf16.msra.mxu1 %v14349_v36  ;;  %5122 = vmatprep.subr.bf16.mxu0 %v14364_v0  ;;  %v2223_v36 = vld [vmem:[#allocation7 + $0xed0] sm:$0xff]  ;;  %v2216_v0 = vld [vmem:[#allocation7 + $0xe98] sm:$0xff] }
 0x2cc   :  { %5204 = vmatprep.subr.bf16.mxu1 %v14366_v1  ;;  %v2224_v1 = vld [vmem:[#allocation7 + $0xed8] sm:$0xff]  ;;  %v14476_v3 = vcombine.high %v2215_v63, %v2223_v36  ;;  %v14475_v12 = vcombine.low %v2215_v63, %v2223_v36 }
 0x2cd   :  { %v14478_v40 = vcombine.high %v2216_v0, %v2224_v1  ;;  %v14477_v13 = vcombine.low %v2216_v0, %v2224_v1 }
 0x2ce   :  { %5123 = vmatpush1.bf16.msra.mxu0 %v14363_v4  ;;  %v2231_v4 = vld [vmem:[#allocation7 + $0xf10] sm:$0xff] }
 0x2cf   :  { %5205 = vmatpush1.bf16.msra.mxu1 %v14365_v5  ;;  %5124 = vmatprep.subr.bf16.mxu0 %v14380_v6  ;;  %v2239_v5 = vld [vmem:[#allocation7 + $0xf50] sm:$0xff]  ;;  %v2232_v6 = vld [vmem:[#allocation7 + $0xf18] sm:$0xff] }
 0x2d0   :  { %5206 = vmatprep.subr.bf16.mxu1 %v14382_v7  ;;  %v2240_v7 = vld [vmem:[#allocation7 + $0xf58] sm:$0xff]  ;;  %v14492_v14 = vcombine.high %v2231_v4, %v2239_v5  ;;  %v14491_v35 = vcombine.low %v2231_v4, %v2239_v5 }
 0x2d1   :  { %v14494_v15 = vcombine.high %v2232_v6, %v2240_v7  ;;  %v14493_v27 = vcombine.low %v2232_v6, %v2240_v7 }
 0x2d2   :  { %5125 = vmatpush1.bf16.msra.mxu0 %v14379_v52  ;;  %v2247_v52 = vld [vmem:[#allocation7 + $0xf90] sm:$0xff] }
 0x2d3   :  { %5207 = vmatpush1.bf16.msra.mxu1 %v14381_v16  ;;  %5126 = vmatprep.subr.bf16.mxu0 %v14396_v22  ;;  %v2255_v16 = vld [vmem:[#allocation7 + $0xfd0] sm:$0xff]  ;;  %v2248_v22 = vld [vmem:[#allocation7 + $0xf98] sm:$0xff] }
 0x2d4   :  { %5208 = vmatprep.subr.bf16.mxu1 %v14398_v26  ;;  %v2256_v26 = vld [vmem:[#allocation7 + $0xfd8] sm:$0xff]  ;;  %v14508_v9 = vcombine.high %v2247_v52, %v2255_v16  ;;  %v14507_v42 = vcombine.low %v2247_v52, %v2255_v16 }
 0x2d5   :  { %v14510_v28 = vcombine.high %v2248_v22, %v2256_v26  ;;  %v14509_v46 = vcombine.low %v2248_v22, %v2256_v26 }
 0x2d6   :  { %5127 = vmatpush1.bf16.msra.mxu0 %v14395_v10  ;;  %v1753_v10 = vld [vmem:[#allocation7 + $0x20] sm:$0xff] }
 0x2d7   :  { %5209 = vmatpush1.bf16.msra.mxu1 %v14397_v32  ;;  %5128 = vmatprep.subr.bf16.mxu0 %v14412_v38  ;;  %v1761_v32 = vld [vmem:[#allocation7 + $0x60] sm:$0xff]  ;;  %v1754_v38 = vld [vmem:[#allocation7 + $0x28] sm:$0xff] }
 0x2d8   :  { %5210 = vmatprep.subr.bf16.mxu1 %v14414_v41  ;;  %v1762_v41 = vld [vmem:[#allocation7 + $0x68] sm:$0xff]  ;;  %v14016_v47 = vcombine.high %v1753_v10, %v1761_v32 }
 0x2d9   :  { %v14018_v48 = vcombine.high %v1754_v38, %v1762_v41  ;;  %v14017_v25 = vcombine.low %v1754_v38, %v1762_v41 }
 0x2da   :  { %5129 = vmatpush1.bf16.msra.mxu0 %v14411_v19  ;;  %v1769_v19 = vld [vmem:[#allocation7 + $0xa0] sm:$0xff] }
 0x2db   :  { %5211 = vmatpush1.bf16.msra.mxu1 %v14413_v20  ;;  %5130 = vmatprep.subr.bf16.mxu0 %v14428_v21  ;;  %v1777_v20 = vld [vmem:[#allocation7 + $0xe0] sm:$0xff]  ;;  %v14015_v21 = vcombine.low %v1753_v10, %v1761_v32 }
 0x2dc   :  { %5212 = vmatprep.subr.bf16.mxu1 %v14430_v23  ;;  %v1770_v23 = vld [vmem:[#allocation7 + $0xa8] sm:$0xff]  ;;  %v14032_v49 = vcombine.high %v1769_v19, %v1777_v20  ;;  %v14031_v56 = vcombine.low %v1769_v19, %v1777_v20 }
 0x2dd   :  { %v14033_v57 = vcombine.low %v1770_v23, %v1778_v24 }
 0x2de   :  { %5131 = vmatpush1.bf16.msra.mxu0 %v14427_v51  ;;  %v1793_v51 = vld [vmem:[#allocation7 + $0x160] sm:$0xff] }
 0x2df   :  { %5213 = vmatpush1.bf16.msra.mxu1 %v14429_v54  ;;  %5132 = vmatprep.subr.bf16.mxu0 %v14444_v55  ;;  %v14034_v54 = vcombine.high %v1770_v23, %v1778_v24  ;;  %v1786_v55 = vld [vmem:[#allocation7 + $0x128] sm:$0xff]  ;;  %v14048_v58 = vcombine.high %v1785_v50, %v1793_v51  ;;  %v14047_v63 = vcombine.low %v1785_v50, %v1793_v51  ;;  %v1881_v24 = vld [vmem:[#allocation7 + $0x420] sm:$0xff] }
 0x2e0   :  { %5214 = vmatprep.subr.bf16.mxu1 %v14446_v43  ;;  %v1794_v43 = vld [vmem:[#allocation7 + $0x168] sm:$0xff] }
 0x2e1   :  { %v14050_v59 = vcombine.high %v1786_v55, %v1794_v43  ;;  %v14049_v36 = vcombine.low %v1786_v55, %v1794_v43  ;;  %v1890_v50 = vld [vmem:[#allocation7 + $0x468] sm:$0xff] }
 0x2e2   :  { %5133 = vmatpush1.bf16.msra.mxu0 %v14443_v60  ;;  %v1801_v60 = vld [vmem:[#allocation7 + $0x1a0] sm:$0xff] }
 0x2e3   :  { %5215 = vmatpush1.bf16.msra.mxu1 %v14445_v11  ;;  %5134 = vmatprep.subr.bf16.mxu0 %v14460_v61  ;;  %v1809_v11 = vld [vmem:[#allocation7 + $0x1e0] sm:$0xff]  ;;  %v1802_v61 = vld [vmem:[#allocation7 + $0x1a8] sm:$0xff] }
 0x2e4   :  { %5216 = vmatprep.subr.bf16.mxu1 %v14462_v62  ;;  %v1810_v62 = vld [vmem:[#allocation7 + $0x1e8] sm:$0xff]  ;;  %v14064_v0 = vcombine.high %v1801_v60, %v1809_v11  ;;  %v14063_v4 = vcombine.low %v1801_v60, %v1809_v11 }
 0x2e5   :  { %v14066_v1 = vcombine.high %v1802_v61, %v1810_v62  ;;  %v14065_v5 = vcombine.low %v1802_v61, %v1810_v62 }
 0x2e6   :  { %5135 = vmatpush1.bf16.msra.mxu0 %v14459_v2  ;;  %v1817_v2 = vld [vmem:[#allocation7 + $0x220] sm:$0xff] }
 0x2e7   :  { %5217 = vmatpush1.bf16.msra.mxu1 %v14461_v44  ;;  %5136 = vmatprep.subr.bf16.mxu0 %v14476_v3  ;;  %v1825_v44 = vld [vmem:[#allocation7 + $0x260] sm:$0xff]  ;;  %v1818_v3 = vld [vmem:[#allocation7 + $0x228] sm:$0xff] }
 0x2e8   :  { %5218 = vmatprep.subr.bf16.mxu1 %v14478_v40  ;;  %v1826_v40 = vld [vmem:[#allocation7 + $0x268] sm:$0xff]  ;;  %v14080_v6 = vcombine.high %v1817_v2, %v1825_v44  ;;  %v14079_v52 = vcombine.low %v1817_v2, %v1825_v44 }
 0x2e9   :  { %v14082_v7 = vcombine.high %v1818_v3, %v1826_v40  ;;  %v14081_v16 = vcombine.low %v1818_v3, %v1826_v40 }
 0x2ea   :  { %5137 = vmatpush1.bf16.msra.mxu0 %v14475_v12  ;;  %v1833_v12 = vld [vmem:[#allocation7 + $0x2a0] sm:$0xff] }
 0x2eb   :  { %5219 = vmatpush1.bf16.msra.mxu1 %v14477_v13  ;;  %5138 = vmatprep.subr.bf16.mxu0 %v14492_v14  ;;  %v1841_v13 = vld [vmem:[#allocation7 + $0x2e0] sm:$0xff]  ;;  %v1834_v14 = vld [vmem:[#allocation7 + $0x2a8] sm:$0xff] }
 0x2ec   :  { %5220 = vmatprep.subr.bf16.mxu1 %v14494_v15  ;;  %v1842_v15 = vld [vmem:[#allocation7 + $0x2e8] sm:$0xff]  ;;  %v14096_v22 = vcombine.high %v1833_v12, %v1841_v13  ;;  %v14095_v10 = vcombine.low %v1833_v12, %v1841_v13 }
 0x2ed   :  { %v14098_v26 = vcombine.high %v1834_v14, %v1842_v15  ;;  %v14097_v32 = vcombine.low %v1834_v14, %v1842_v15 }
 0x2ee   :  { %5139 = vmatpush1.bf16.msra.mxu0 %v14491_v35  ;;  %v1849_v35 = vld [vmem:[#allocation7 + $0x320] sm:$0xff] }
 0x2ef   :  { %5221 = vmatpush1.bf16.msra.mxu1 %v14493_v27  ;;  %5140 = vmatprep.subr.bf16.mxu0 %v14508_v9  ;;  %v1857_v27 = vld [vmem:[#allocation7 + $0x360] sm:$0xff]  ;;  %v1850_v9 = vld [vmem:[#allocation7 + $0x328] sm:$0xff] }
 0x2f0   :  { %5222 = vmatprep.subr.bf16.mxu1 %v14510_v28  ;;  %v1858_v28 = vld [vmem:[#allocation7 + $0x368] sm:$0xff]  ;;  %v14112_v38 = vcombine.high %v1849_v35, %v1857_v27  ;;  %v14111_v19 = vcombine.low %v1849_v35, %v1857_v27 }
 0x2f1   :  { %v14114_v41 = vcombine.high %v1850_v9, %v1858_v28  ;;  %v14113_v20 = vcombine.low %v1850_v9, %v1858_v28 }
 0x2f2   :  { %5141 = vmatpush1.bf16.msra.mxu0 %v14507_v42  ;;  %v1865_v42 = vld [vmem:[#allocation7 + $0x3a0] sm:$0xff] }
 0x2f3   :  { %5223 = vmatpush1.bf16.msra.mxu1 %v14509_v46  ;;  %5233 = vmatprep.subr.bf16.mxu0 %v14016_v47  ;;  %v1873_v46 = vld [vmem:[#allocation7 + $0x3e0] sm:$0xff]  ;;  %v1866_v47 = vld [vmem:[#allocation7 + $0x3a8] sm:$0xff] }
 0x2f4   :  { %5315 = vmatprep.subr.bf16.mxu1 %v14018_v48  ;;  %v1874_v48 = vld [vmem:[#allocation7 + $0x3e8] sm:$0xff]  ;;  %v14127_v51 = vcombine.low %v1865_v42, %v1873_v46 }
 0x2f5   :  { %5143 = vmatmul.mubr.bf16.vlgmr.msra.gmra.mrb[20].mxu0 %v16451_v53  ;;  %v14130_v23 = vcombine.high %v1866_v47, %v1874_v48 }
 0x2f6   :  { %5225 = vmatmul.mubr.bf16.vlgmr.msra.gmra.mrb[20].mxu1 %v16451_v53  ;;  %5234 = vmatpush1.bf16.msra.mxu0 %v14015_v21  ;;  %v14128_v21 = vcombine.high %v1865_v42, %v1873_v46 }
 0x2f7   :  { %5265 = vmatprep.mubr.bf16.mxu0 %v16431_v17  ;;  %5316 = vmatpush1.bf16.msra.mxu1 %v14017_v25  ;;  %v1889_v25 = vld [vmem:[#allocation7 + $0x460] sm:$0xff] }
 0x2f8   :  { %5347 = vmatprep.mubr.bf16.mxu1 %v16431_v17  ;;  %5235 = vmatprep.subr.bf16.mxu0 %v14032_v49  ;;  %v1882_v49 = vld [vmem:[#allocation7 + $0x428] sm:$0xff]  ;;  %v14144_v55 = vcombine.high %v1881_v24, %v1889_v25  ;;  %v14143_v60 = vcombine.low %v1881_v24, %v1889_v25 }
 0x2f9   :  { %5317 = vmatprep.subr.bf16.mxu1 %v14034_v54  ;;  %v14129_v54 = vcombine.low %v1866_v47, %v1874_v48  ;;  %v14146_v43 = vcombine.high %v1882_v49, %v1890_v50  ;;  %v14145_v11 = vcombine.low %v1882_v49, %v1890_v50 }
 0x2fa   :  { %5236 = vmatpush1.bf16.msra.mxu0 %v14031_v56  ;;  %v1897_v56 = vld [vmem:[#allocation7 + $0x4a0] sm:$0xff] }
 0x2fb   :  { %5318 = vmatpush1.bf16.msra.mxu1 %v14033_v57  ;;  %5237 = vmatprep.subr.bf16.mxu0 %v14048_v58  ;;  %v1905_v57 = vld [vmem:[#allocation7 + $0x4e0] sm:$0xff]  ;;  %v1898_v58 = vld [vmem:[#allocation7 + $0x4a8] sm:$0xff] }
 0x2fc   :  { %5319 = vmatprep.subr.bf16.mxu1 %v14050_v59  ;;  %v1906_v59 = vld [vmem:[#allocation7 + $0x4e8] sm:$0xff]  ;;  %v14160_v61 = vcombine.high %v1897_v56, %v1905_v57  ;;  %v14159_v2 = vcombine.low %v1897_v56, %v1905_v57 }
 0x2fd   :  { %v14162_v62 = vcombine.high %v1898_v58, %v1906_v59  ;;  %v14161_v44 = vcombine.low %v1898_v58, %v1906_v59 }
 0x2fe   :  { %5238 = vmatpush1.bf16.msra.mxu0 %v14047_v63  ;;  %v1913_v63 = vld [vmem:[#allocation7 + $0x520] sm:$0xff] }
 0x2ff   :  { %5320 = vmatpush1.bf16.msra.mxu1 %v14049_v36  ;;  %5239 = vmatprep.subr.bf16.mxu0 %v14064_v0  ;;  %v1921_v36 = vld [vmem:[#allocation7 + $0x560] sm:$0xff]  ;;  %v1914_v0 = vld [vmem:[#allocation7 + $0x528] sm:$0xff] }
 0x300   :  { %5321 = vmatprep.subr.bf16.mxu1 %v14066_v1  ;;  %v1922_v1 = vld [vmem:[#allocation7 + $0x568] sm:$0xff]  ;;  %v14176_v3 = vcombine.high %v1913_v63, %v1921_v36  ;;  %v14175_v12 = vcombine.low %v1913_v63, %v1921_v36 }
 0x301   :  { %v14178_v40 = vcombine.high %v1914_v0, %v1922_v1  ;;  %v14177_v13 = vcombine.low %v1914_v0, %v1922_v1 }
 0x302   :  { %5240 = vmatpush1.bf16.msra.mxu0 %v14063_v4  ;;  %v1929_v4 = vld [vmem:[#allocation7 + $0x5a0] sm:$0xff] }
 0x303   :  { %5322 = vmatpush1.bf16.msra.mxu1 %v14065_v5  ;;  %5241 = vmatprep.subr.bf16.mxu0 %v14080_v6  ;;  %v1937_v5 = vld [vmem:[#allocation7 + $0x5e0] sm:$0xff]  ;;  %v1930_v6 = vld [vmem:[#allocation7 + $0x5a8] sm:$0xff] }
 0x304   :  { %5323 = vmatprep.subr.bf16.mxu1 %v14082_v7  ;;  %v1938_v7 = vld [vmem:[#allocation7 + $0x5e8] sm:$0xff]  ;;  %v14192_v14 = vcombine.high %v1929_v4, %v1937_v5  ;;  %v14191_v35 = vcombine.low %v1929_v4, %v1937_v5 }
 0x305   :  { %v14194_v15 = vcombine.high %v1930_v6, %v1938_v7  ;;  %v14193_v27 = vcombine.low %v1930_v6, %v1938_v7  ;;  %v2034_v4 = vld [vmem:[#allocation7 + $0x8e8] sm:$0xff]  ;;  %v2041_v7 = vld [vmem:[#allocation7 + $0x920] sm:$0xff] }
 0x306   :  { %5242 = vmatpush1.bf16.msra.mxu0 %v14079_v52  ;;  %v1945_v52 = vld [vmem:[#allocation7 + $0x620] sm:$0xff] }
 0x307   :  { %5324 = vmatpush1.bf16.msra.mxu1 %v14081_v16  ;;  %5243 = vmatprep.subr.bf16.mxu0 %v14096_v22  ;;  %v1953_v16 = vld [vmem:[#allocation7 + $0x660] sm:$0xff]  ;;  %v1946_v22 = vld [vmem:[#allocation7 + $0x628] sm:$0xff] }
 0x308   :  { %5325 = vmatprep.subr.bf16.mxu1 %v14098_v26  ;;  %v1954_v26 = vld [vmem:[#allocation7 + $0x668] sm:$0xff]  ;;  %v14208_v9 = vcombine.high %v1945_v52, %v1953_v16  ;;  %v14207_v42 = vcombine.low %v1945_v52, %v1953_v16 }
 0x309   :  { %v14210_v28 = vcombine.high %v1946_v22, %v1954_v26  ;;  %v14209_v46 = vcombine.low %v1946_v22, %v1954_v26 }
 0x30a   :  { %5244 = vmatpush1.bf16.msra.mxu0 %v14095_v10  ;;  %v1961_v10 = vld [vmem:[#allocation7 + $0x6a0] sm:$0xff] }
 0x30b   :  { %5326 = vmatpush1.bf16.msra.mxu1 %v14097_v32  ;;  %5245 = vmatprep.subr.bf16.mxu0 %v14112_v38  ;;  %v1969_v32 = vld [vmem:[#allocation7 + $0x6e0] sm:$0xff]  ;;  %v1962_v38 = vld [vmem:[#allocation7 + $0x6a8] sm:$0xff] }
 0x30c   :  { %5327 = vmatprep.subr.bf16.mxu1 %v14114_v41  ;;  %v1970_v41 = vld [vmem:[#allocation7 + $0x6e8] sm:$0xff]  ;;  %v14224_v47 = vcombine.high %v1961_v10, %v1969_v32  ;;  %v14223_v24 = vcombine.low %v1961_v10, %v1969_v32 }
 0x30d   :  { %v14226_v48 = vcombine.high %v1962_v38, %v1970_v41  ;;  %v14225_v25 = vcombine.low %v1962_v38, %v1970_v41 }
 0x30e   :  { %5246 = vmatpush1.bf16.msra.mxu0 %v14111_v19  ;;  %v1977_v19 = vld [vmem:[#allocation7 + $0x720] sm:$0xff] }
 0x30f   :  { %5328 = vmatpush1.bf16.msra.mxu1 %v14113_v20  ;;  %5247 = vmatprep.subr.bf16.mxu0 %v14128_v21  ;;  %v1985_v20 = vld [vmem:[#allocation7 + $0x760] sm:$0xff]  ;;  %v1978_v21 = vld [vmem:[#allocation7 + $0x728] sm:$0xff] }
 0x310   :  { %5329 = vmatprep.subr.bf16.mxu1 %v14130_v23  ;;  %v1986_v23 = vld [vmem:[#allocation7 + $0x768] sm:$0xff]  ;;  %v14240_v49 = vcombine.high %v1977_v19, %v1985_v20  ;;  %v14239_v56 = vcombine.low %v1977_v19, %v1985_v20 }
 0x311   :  { %v14242_v50 = vcombine.high %v1978_v21, %v1986_v23  ;;  %v14241_v57 = vcombine.low %v1978_v21, %v1986_v23 }
 0x312   :  { %5248 = vmatpush1.bf16.msra.mxu0 %v14127_v51  ;;  %v1993_v51 = vld [vmem:[#allocation7 + $0x7a0] sm:$0xff] }
 0x313   :  { %5330 = vmatpush1.bf16.msra.mxu1 %v14129_v54  ;;  %5249 = vmatprep.subr.bf16.mxu0 %v14144_v55  ;;  %v2001_v54 = vld [vmem:[#allocation7 + $0x7e0] sm:$0xff]  ;;  %v1994_v55 = vld [vmem:[#allocation7 + $0x7a8] sm:$0xff] }
 0x314   :  { %5331 = vmatprep.subr.bf16.mxu1 %v14146_v43  ;;  %v2002_v43 = vld [vmem:[#allocation7 + $0x7e8] sm:$0xff]  ;;  %v14256_v58 = vcombine.high %v1993_v51, %v2001_v54  ;;  %v14255_v63 = vcombine.low %v1993_v51, %v2001_v54 }
 0x315   :  { %v14258_v59 = vcombine.high %v1994_v55, %v2002_v43  ;;  %v14257_v36 = vcombine.low %v1994_v55, %v2002_v43 }
 0x316   :  { %5250 = vmatpush1.bf16.msra.mxu0 %v14143_v60  ;;  %v2009_v60 = vld [vmem:[#allocation7 + $0x820] sm:$0xff] }
 0x317   :  { %5332 = vmatpush1.bf16.msra.mxu1 %v14145_v11  ;;  %5251 = vmatprep.subr.bf16.mxu0 %v14160_v61  ;;  %v2017_v11 = vld [vmem:[#allocation7 + $0x860] sm:$0xff]  ;;  %v2010_v61 = vld [vmem:[#allocation7 + $0x828] sm:$0xff] }
 0x318   :  { %5333 = vmatprep.subr.bf16.mxu1 %v14162_v62  ;;  %v2018_v62 = vld [vmem:[#allocation7 + $0x868] sm:$0xff]  ;;  %v14272_v0 = vcombine.high %v2009_v60, %v2017_v11 }
 0x319   :  { %v14274_v1 = vcombine.high %v2010_v61, %v2018_v62  ;;  %v14273_v5 = vcombine.low %v2010_v61, %v2018_v62 }
 0x31a   :  { %5252 = vmatpush1.bf16.msra.mxu0 %v14159_v2  ;;  %v2025_v2 = vld [vmem:[#allocation7 + $0x8a0] sm:$0xff] }
 0x31b   :  { %5334 = vmatpush1.bf16.msra.mxu1 %v14161_v44  ;;  %5253 = vmatprep.subr.bf16.mxu0 %v14176_v3  ;;  %v2033_v44 = vld [vmem:[#allocation7 + $0x8e0] sm:$0xff]  ;;  %v14271_v3 = vcombine.low %v2009_v60, %v2017_v11 }
 0x31c   :  { %5335 = vmatprep.subr.bf16.mxu1 %v14178_v40  ;;  %v2026_v40 = vld [vmem:[#allocation7 + $0x8a8] sm:$0xff]  ;;  %v14288_v6 = vcombine.high %v2025_v2, %v2033_v44  ;;  %v14287_v52 = vcombine.low %v2025_v2, %v2033_v44 }
 0x31d   :  { %v14289_v16 = vcombine.low %v2026_v40, %v2034_v4 }
 0x31e   :  { %5254 = vmatpush1.bf16.msra.mxu0 %v14175_v12  ;;  %v2049_v12 = vld [vmem:[#allocation7 + $0x960] sm:$0xff] }
 0x31f   :  { %5336 = vmatpush1.bf16.msra.mxu1 %v14177_v13  ;;  %5255 = vmatprep.subr.bf16.mxu0 %v14192_v14  ;;  %v14290_v13 = vcombine.high %v2026_v40, %v2034_v4  ;;  %v2042_v14 = vld [vmem:[#allocation7 + $0x928] sm:$0xff]  ;;  %v14304_v22 = vcombine.high %v2041_v7, %v2049_v12  ;;  %v14303_v10 = vcombine.low %v2041_v7, %v2049_v12 }
 0x320   :  { %5337 = vmatprep.subr.bf16.mxu1 %v14194_v15  ;;  %v2050_v15 = vld [vmem:[#allocation7 + $0x968] sm:$0xff] }
 0x321   :  { %v14306_v26 = vcombine.high %v2042_v14, %v2050_v15  ;;  %v14305_v32 = vcombine.low %v2042_v14, %v2050_v15  ;;  %v2130_v40 = vld [vmem:[#allocation7 + $0xbe8] sm:$0xff] }
 0x322   :  { %5256 = vmatpush1.bf16.msra.mxu0 %v14191_v35  ;;  %v2057_v35 = vld [vmem:[#allocation7 + $0x9a0] sm:$0xff] }
 0x323   :  { %5338 = vmatpush1.bf16.msra.mxu1 %v14193_v27  ;;  %5257 = vmatprep.subr.bf16.mxu0 %v14208_v9  ;;  %v2065_v27 = vld [vmem:[#allocation7 + $0x9e0] sm:$0xff]  ;;  %v2058_v9 = vld [vmem:[#allocation7 + $0x9a8] sm:$0xff] }
 0x324   :  { %5339 = vmatprep.subr.bf16.mxu1 %v14210_v28  ;;  %v2066_v28 = vld [vmem:[#allocation7 + $0x9e8] sm:$0xff]  ;;  %v14320_v38 = vcombine.high %v2057_v35, %v2065_v27  ;;  %v14319_v19 = vcombine.low %v2057_v35, %v2065_v27 }
 0x325   :  { %v14322_v41 = vcombine.high %v2058_v9, %v2066_v28  ;;  %v14321_v20 = vcombine.low %v2058_v9, %v2066_v28 }
 0x326   :  { %5258 = vmatpush1.bf16.msra.mxu0 %v14207_v42  ;;  %v2073_v42 = vld [vmem:[#allocation7 + $0xa20] sm:$0xff] }
 0x327   :  { %5340 = vmatpush1.bf16.msra.mxu1 %v14209_v46  ;;  %5259 = vmatprep.subr.bf16.mxu0 %v14224_v47  ;;  %v2081_v46 = vld [vmem:[#allocation7 + $0xa60] sm:$0xff]  ;;  %v2074_v47 = vld [vmem:[#allocation7 + $0xa28] sm:$0xff] }
 0x328   :  { %5341 = vmatprep.subr.bf16.mxu1 %v14226_v48  ;;  %v2082_v48 = vld [vmem:[#allocation7 + $0xa68] sm:$0xff]  ;;  %v14336_v21 = vcombine.high %v2073_v42, %v2081_v46  ;;  %v14335_v51 = vcombine.low %v2073_v42, %v2081_v46 }
 0x329   :  { %v14338_v23 = vcombine.high %v2074_v47, %v2082_v48  ;;  %v14337_v54 = vcombine.low %v2074_v47, %v2082_v48 }
 0x32a   :  { %5260 = vmatpush1.bf16.msra.mxu0 %v14223_v24  ;;  %v2089_v24 = vld [vmem:[#allocation7 + $0xaa0] sm:$0xff] }
 0x32b   :  { %5342 = vmatpush1.bf16.msra.mxu1 %v14225_v25  ;;  %5261 = vmatprep.subr.bf16.mxu0 %v14240_v49  ;;  %v2097_v25 = vld [vmem:[#allocation7 + $0xae0] sm:$0xff]  ;;  %v2090_v49 = vld [vmem:[#allocation7 + $0xaa8] sm:$0xff] }
 0x32c   :  { %5343 = vmatprep.subr.bf16.mxu1 %v14242_v50  ;;  %v2098_v50 = vld [vmem:[#allocation7 + $0xae8] sm:$0xff]  ;;  %v14352_v55 = vcombine.high %v2089_v24, %v2097_v25  ;;  %v14351_v60 = vcombine.low %v2089_v24, %v2097_v25 }
 0x32d   :  { %v14354_v43 = vcombine.high %v2090_v49, %v2098_v50  ;;  %v14353_v11 = vcombine.low %v2090_v49, %v2098_v50 }
 0x32e   :  { %5262 = vmatpush1.bf16.msra.mxu0 %v14239_v56  ;;  %v2105_v56 = vld [vmem:[#allocation7 + $0xb20] sm:$0xff] }
 0x32f   :  { %5344 = vmatpush1.bf16.msra.mxu1 %v14241_v57  ;;  %5263 = vmatprep.subr.bf16.mxu0 %v14256_v58  ;;  %v2113_v57 = vld [vmem:[#allocation7 + $0xb60] sm:$0xff]  ;;  %v2106_v58 = vld [vmem:[#allocation7 + $0xb28] sm:$0xff] }
 0x330   :  { %5345 = vmatprep.subr.bf16.mxu1 %v14258_v59  ;;  %v2114_v59 = vld [vmem:[#allocation7 + $0xb68] sm:$0xff]  ;;  %v14368_v61 = vcombine.high %v2105_v56, %v2113_v57 }
 0x332   :  { %5264 = vmatpush1.bf16.msra.mxu0 %v14255_v63 }
 0x333   :  { %5346 = vmatpush1.bf16.msra.mxu1 %v14257_v36  ;;  %5274 = vmatprep.subr.bf16.mxu0 %v14272_v0  ;;  %v14370_v36 = vcombine.high %v2106_v58, %v2114_v59  ;;  %v2121_v0 = vld [vmem:[#allocation7 + $0xba0] sm:$0xff] }
 0x334   :  { %5356 = vmatprep.subr.bf16.mxu1 %v14274_v1  ;;  %v2129_v1 = vld [vmem:[#allocation7 + $0xbe0] sm:$0xff] }
 0x335   :  { %5266 = vmatmul.mubr.bf16.vlgmr.msra.gmra.mrb[24].mxu0 %v16433_v18  ;;  %v14384_v14 = vcombine.high %v2121_v0, %v2129_v1  ;;  %v14383_v35 = vcombine.low %v2121_v0, %v2129_v1 }
 0x336   :  { %5348 = vmatmul.mubr.bf16.vlgmr.msra.gmra.mrb[24].mxu1 %v16433_v18  ;;  %5275 = vmatpush1.bf16.msra.mxu0 %v14271_v3  ;;  %v2122_v3 = vld [vmem:[#allocation7 + $0xba8] sm:$0xff] }
 0x337   :  { %5306 = vmatprep.mubr.bf16.mxu0 %v16437_v8  ;;  %5357 = vmatpush1.bf16.msra.mxu1 %v14273_v5  ;;  %v14386_v15 = vcombine.high %v2122_v3, %v2130_v40  ;;  %v14385_v27 = vcombine.low %v2122_v3, %v2130_v40 }
 0x338   :  { %5388 = vmatprep.mubr.bf16.mxu1 %v16437_v8  ;;  %5276 = vmatprep.subr.bf16.mxu0 %v14288_v6  ;;  %v14367_v6 = vcombine.low %v2105_v56, %v2113_v57 }
 0x339   :  { %5358 = vmatprep.subr.bf16.mxu1 %v14290_v13  ;;  %v14369_v13 = vcombine.low %v2106_v58, %v2114_v59 }
 0x33a   :  { %5277 = vmatpush1.bf16.msra.mxu0 %v14287_v52  ;;  %v2137_v52 = vld [vmem:[#allocation7 + $0xc20] sm:$0xff] }
 0x33b   :  { %5359 = vmatpush1.bf16.msra.mxu1 %v14289_v16  ;;  %5278 = vmatprep.subr.bf16.mxu0 %v14304_v22  ;;  %v2145_v16 = vld [vmem:[#allocation7 + $0xc60] sm:$0xff]  ;;  %v2138_v22 = vld [vmem:[#allocation7 + $0xc28] sm:$0xff] }
 0x33c   :  { %5360 = vmatprep.subr.bf16.mxu1 %v14306_v26  ;;  %v2146_v26 = vld [vmem:[#allocation7 + $0xc68] sm:$0xff]  ;;  %v14400_v9 = vcombine.high %v2137_v52, %v2145_v16  ;;  %v14399_v42 = vcombine.low %v2137_v52, %v2145_v16  ;;  %v2233_v52 = vld [vmem:[#allocation7 + $0xf20] sm:$0xff] }
 0x33d   :  { %v14402_v28 = vcombine.high %v2138_v22, %v2146_v26  ;;  %v14401_v46 = vcombine.low %v2138_v22, %v2146_v26  ;;  %v2241_v16 = vld [vmem:[#allocation7 + $0xf60] sm:$0xff]  ;;  %v2234_v22 = vld [vmem:[#allocation7 + $0xf28] sm:$0xff] }
 0x33e   :  { %5279 = vmatpush1.bf16.msra.mxu0 %v14303_v10  ;;  %v2153_v10 = vld [vmem:[#allocation7 + $0xca0] sm:$0xff]  ;;  %v2242_v26 = vld [vmem:[#allocation7 + $0xf68] sm:$0xff] }
 0x33f   :  { %5361 = vmatpush1.bf16.msra.mxu1 %v14305_v32  ;;  %5280 = vmatprep.subr.bf16.mxu0 %v14320_v38  ;;  %v2161_v32 = vld [vmem:[#allocation7 + $0xce0] sm:$0xff]  ;;  %v2154_v38 = vld [vmem:[#allocation7 + $0xca8] sm:$0xff] }
 0x340   :  { %5362 = vmatprep.subr.bf16.mxu1 %v14322_v41  ;;  %v2162_v41 = vld [vmem:[#allocation7 + $0xce8] sm:$0xff]  ;;  %v14416_v47 = vcombine.high %v2153_v10, %v2161_v32  ;;  %v14415_v24 = vcombine.low %v2153_v10, %v2161_v32  ;;  %v2249_v10 = vld [vmem:[#allocation7 + $0xfa0] sm:$0xff] }
 0x341   :  { %v14418_v48 = vcombine.high %v2154_v38, %v2162_v41  ;;  %v14417_v25 = vcombine.low %v2154_v38, %v2162_v41  ;;  %v2257_v32 = vld [vmem:[#allocation7 + $0xfe0] sm:$0xff]  ;;  %v2250_v38 = vld [vmem:[#allocation7 + $0xfa8] sm:$0xff] }
 0x342   :  { %5281 = vmatpush1.bf16.msra.mxu0 %v14319_v19  ;;  %v2169_v19 = vld [vmem:[#allocation7 + $0xd20] sm:$0xff]  ;;  %v2258_v41 = vld [vmem:[#allocation7 + $0xfe8] sm:$0xff] }
 0x343   :  { %5363 = vmatpush1.bf16.msra.mxu1 %v14321_v20  ;;  %5282 = vmatprep.subr.bf16.mxu0 %v14336_v21  ;;  %v2177_v20 = vld [vmem:[#allocation7 + $0xd60] sm:$0xff]  ;;  %v2170_v21 = vld [vmem:[#allocation7 + $0xd28] sm:$0xff] }
 0x344   :  { %5364 = vmatprep.subr.bf16.mxu1 %v14338_v23  ;;  %v2178_v23 = vld [vmem:[#allocation7 + $0xd68] sm:$0xff]  ;;  %v14432_v49 = vcombine.high %v2169_v19, %v2177_v20  ;;  %v14431_v56 = vcombine.low %v2169_v19, %v2177_v20  ;;  %v1755_v19 = vld [vmem:[#allocation7 + $0x30] sm:$0xff] }
 0x345   :  { %v14434_v50 = vcombine.high %v2170_v21, %v2178_v23  ;;  %v14433_v57 = vcombine.low %v2170_v21, %v2178_v23  ;;  %v1763_v20 = vld [vmem:[#allocation7 + $0x70] sm:$0xff]  ;;  %v1756_v21 = vld [vmem:[#allocation7 + $0x38] sm:$0xff] }
 0x346   :  { %5283 = vmatpush1.bf16.msra.mxu0 %v14335_v51  ;;  %v2185_v51 = vld [vmem:[#allocation7 + $0xda0] sm:$0xff]  ;;  %v1764_v23 = vld [vmem:[#allocation7 + $0x78] sm:$0xff] }
 0x347   :  { %5365 = vmatpush1.bf16.msra.mxu1 %v14337_v54  ;;  %5284 = vmatprep.subr.bf16.mxu0 %v14352_v55  ;;  %v2193_v54 = vld [vmem:[#allocation7 + $0xde0] sm:$0xff]  ;;  %v2186_v55 = vld [vmem:[#allocation7 + $0xda8] sm:$0xff] }
 0x348   :  { %v16469_v62 = vpop.f32.mrb[16].mxu0  ;;  %v16471_v63 = vpop.f32.mrb[16].mxu1  ;;  %5366 = vmatprep.subr.bf16.mxu1 %v14354_v43  ;;  %v2194_v43 = vld [vmem:[#allocation7 + $0xde8] sm:$0xff]  ;;  %v14448_v58 = vcombine.high %v2185_v51, %v2193_v54  ;;  %v14447_v0 = vcombine.low %v2185_v51, %v2193_v54  ;;  %v1771_v51 = vld [vmem:[#allocation7 + $0xb0] sm:$0xff] }
 0x349   :  { %v16473_v2 = vpop.f32.mrb[17].mxu0  ;;  %v16475_v44 = vpop.f32.mrb[17].mxu1  ;;  %v14450_v59 = vcombine.high %v2186_v55, %v2194_v43  ;;  %v14449_v1 = vcombine.low %v2186_v55, %v2194_v43  ;;  %v1779_v54 = vld [vmem:[#allocation7 + $0xf0] sm:$0xff]  ;;  %v14019_v55 = vcombine.low %v1755_v19, %v1763_v20  ;;  %v1772_v43 = vld [vmem:[#allocation7 + $0xb8] sm:$0xff] }
 0x34a   :  { %v4984_v4 = vpop.f32.mrb[18].mxu0  ;;  %v5066_v5 = vpop.f32.mrb[18].mxu1  ;;  %5285 = vmatpush1.bf16.msra.mxu0 %v14351_v60  ;;  %v2201_v60 = vld [vmem:[#allocation7 + $0xe20] sm:$0xff] }
 0x34b   :  { %5367 = vmatpush1.bf16.msra.mxu1 %v14353_v11  ;;  %v4985_v7 = vpop.f32.mrb[19].mxu0  ;;  %v5067_v12 = vpop.f32.mrb[19].mxu1  ;;  %5286 = vmatprep.subr.bf16.mxu0 %v14368_v61  ;;  %v2209_v11 = vld [vmem:[#allocation7 + $0xe60] sm:$0xff]  ;;  %v2202_v61 = vld [vmem:[#allocation7 + $0xe28] sm:$0xff] }
 0x34c   :  { %5368 = vmatprep.subr.bf16.mxu1 %v14370_v36  ;;  %v2210_v36 = vld [vmem:[#allocation7 + $0xe68] sm:$0xff]  ;;  %v14464_v3 = vcombine.high %v2201_v60, %v2209_v11  ;;  %v2217_v4 = vld [vmem:[#allocation7 + $0xea0] sm:$0xff]  ;;  %v14463_v12 = vcombine.low %v2201_v60, %v2209_v11  ;;  %v1795_v60 = vld [vmem:[#allocation7 + $0x170] sm:$0xff] }
 0x34d   :  { %v14466_v40 = vcombine.high %v2202_v61, %v2210_v36  ;;  %v2225_v5 = vld [vmem:[#allocation7 + $0xee0] sm:$0xff]  ;;  %v2226_v7 = vld [vmem:[#allocation7 + $0xee8] sm:$0xff] }
 0x34e   :  { %5287 = vmatpush1.bf16.msra.mxu0 %v14367_v6  ;;  %v2218_v6 = vld [vmem:[#allocation7 + $0xea8] sm:$0xff] }
 0x34f   :  { %5369 = vmatpush1.bf16.msra.mxu1 %v14369_v13  ;;  %5288 = vmatprep.subr.bf16.mxu0 %v14384_v14  ;;  %v14465_v13 = vcombine.low %v2202_v61, %v2210_v36  ;;  %v14480_v14 = vcombine.high %v2217_v4, %v2225_v5  ;;  %v1788_v61 = vld [vmem:[#allocation7 + $0x138] sm:$0xff] }
 0x350   :  { %5370 = vmatprep.subr.bf16.mxu1 %v14386_v15  ;;  %v14482_v15 = vcombine.high %v2218_v6, %v2226_v7  ;;  %v1796_v36 = vld [vmem:[#allocation7 + $0x178] sm:$0xff] }
 0x352   :  { %5289 = vmatpush1.bf16.msra.mxu0 %v14383_v35  ;;  %v14479_v35 = vcombine.low %v2217_v4, %v2225_v5  ;;  %v1803_v4 = vld [vmem:[#allocation7 + $0x1b0] sm:$0xff] }
 0x353   :  { %5371 = vmatpush1.bf16.msra.mxu1 %v14385_v27  ;;  %5290 = vmatprep.subr.bf16.mxu0 %v14400_v9  ;;  %v14481_v27 = vcombine.low %v2218_v6, %v2226_v7  ;;  %v14496_v9 = vcombine.high %v2233_v52, %v2241_v16  ;;  %v1811_v5 = vld [vmem:[#allocation7 + $0x1f0] sm:$0xff]  ;;  %v1804_v6 = vld [vmem:[#allocation7 + $0x1b8] sm:$0xff] }
 0x354   :  { %5372 = vmatprep.subr.bf16.mxu1 %v14402_v28  ;;  %v14498_v28 = vcombine.high %v2234_v22, %v2242_v26  ;;  %v1812_v7 = vld [vmem:[#allocation7 + $0x1f8] sm:$0xff] }
 0x356   :  { %5291 = vmatpush1.bf16.msra.mxu0 %v14399_v42  ;;  %v14495_v42 = vcombine.low %v2233_v52, %v2241_v16  ;;  %v1819_v52 = vld [vmem:[#allocation7 + $0x230] sm:$0xff] }
 0x357   :  { %5373 = vmatpush1.bf16.msra.mxu1 %v14401_v46  ;;  %5292 = vmatprep.subr.bf16.mxu0 %v14416_v47  ;;  %v14497_v46 = vcombine.low %v2234_v22, %v2242_v26  ;;  %v14512_v47 = vcombine.high %v2249_v10, %v2257_v32  ;;  %v1827_v16 = vld [vmem:[#allocation7 + $0x270] sm:$0xff]  ;;  %v1820_v22 = vld [vmem:[#allocation7 + $0x238] sm:$0xff] }
 0x358   :  { %5374 = vmatprep.subr.bf16.mxu1 %v14418_v48  ;;  %v14514_v48 = vcombine.high %v2250_v38, %v2258_v41  ;;  %v1828_v26 = vld [vmem:[#allocation7 + $0x278] sm:$0xff] }
 0x35a   :  { %5293 = vmatpush1.bf16.msra.mxu0 %v14415_v24  ;;  %v14511_v24 = vcombine.low %v2249_v10, %v2257_v32  ;;  %v1843_v10 = vld [vmem:[#allocation7 + $0x2f0] sm:$0xff]  ;;  %v1836_v32 = vld [vmem:[#allocation7 + $0x2b8] sm:$0xff] }
 0x35b   :  { %5375 = vmatpush1.bf16.msra.mxu1 %v14417_v25  ;;  %5294 = vmatprep.subr.bf16.mxu0 %v14432_v49  ;;  %v14513_v25 = vcombine.low %v2250_v38, %v2258_v41  ;;  %v14020_v49 = vcombine.high %v1755_v19, %v1763_v20  ;;  %v1844_v38 = vld [vmem:[#allocation7 + $0x2f8] sm:$0xff]  ;;  %v14083_v41 = vcombine.low %v1819_v52, %v1827_v16  ;;  %v1859_v19 = vld [vmem:[#allocation7 + $0x370] sm:$0xff] }
 0x35c   :  { %5376 = vmatprep.subr.bf16.mxu1 %v14434_v50  ;;  %v14022_v50 = vcombine.high %v1756_v21, %v1764_v23  ;;  %v1852_v20 = vld [vmem:[#allocation7 + $0x338] sm:$0xff] }
 0x35e   :  { %5295 = vmatpush1.bf16.msra.mxu0 %v14431_v56  ;;  %v1780_v56 = vld [vmem:[#allocation7 + $0xf8] sm:$0xff] }
 0x35f   :  { %5377 = vmatpush1.bf16.msra.mxu1 %v14433_v57  ;;  %5296 = vmatprep.subr.bf16.mxu0 %v14448_v58  ;;  %v14021_v57 = vcombine.low %v1756_v21, %v1764_v23  ;;  %v14036_v58 = vcombine.high %v1771_v51, %v1779_v54  ;;  %v14038_v11 = vcombine.high %v1772_v43, %v1780_v56  ;;  %v1860_v21 = vld [vmem:[#allocation7 + $0x378] sm:$0xff] }
 0x360   :  { %5378 = vmatprep.subr.bf16.mxu1 %v14450_v59  ;;  %v1787_v59 = vld [vmem:[#allocation7 + $0x130] sm:$0xff] }
 0x362   :  { %5297 = vmatpush1.bf16.msra.mxu0 %v14447_v0  ;;  %v14035_v0 = vcombine.low %v1771_v51, %v1779_v54  ;;  %v1875_v51 = vld [vmem:[#allocation7 + $0x3f0] sm:$0xff]  ;;  %v1868_v54 = vld [vmem:[#allocation7 + $0x3b8] sm:$0xff] }
 0x363   :  { %5379 = vmatpush1.bf16.msra.mxu1 %v14449_v1  ;;  %5298 = vmatprep.subr.bf16.mxu0 %v14464_v3  ;;  %v14037_v1 = vcombine.low %v1772_v43, %v1780_v56  ;;  %v14052_v3 = vcombine.high %v1787_v59, %v1795_v60  ;;  %v14117_v56 = vcombine.low %v1852_v20, %v1860_v21 }
 0x364   :  { %5380 = vmatprep.subr.bf16.mxu1 %v14466_v40  ;;  %v14054_v40 = vcombine.high %v1788_v61, %v1796_v36 }
 0x366   :  { %5299 = vmatpush1.bf16.msra.mxu0 %v14463_v12  ;;  %v14051_v12 = vcombine.low %v1787_v59, %v1795_v60  ;;  %v1883_v59 = vld [vmem:[#allocation7 + $0x430] sm:$0xff] }
 0x367   :  { %5381 = vmatpush1.bf16.msra.mxu1 %v14465_v13  ;;  %5300 = vmatprep.subr.bf16.mxu0 %v14480_v14  ;;  %v14053_v13 = vcombine.low %v1788_v61, %v1796_v36  ;;  %v14068_v14 = vcombine.high %v1803_v4, %v1811_v5  ;;  %v1891_v60 = vld [vmem:[#allocation7 + $0x470] sm:$0xff]  ;;  %v1892_v61 = vld [vmem:[#allocation7 + $0x478] sm:$0xff] }
 0x368   :  { %5382 = vmatprep.subr.bf16.mxu1 %v14482_v15  ;;  %v14070_v15 = vcombine.high %v1804_v6, %v1812_v7 }
 0x36a   :  { %5301 = vmatpush1.bf16.msra.mxu0 %v14479_v35  ;;  %v14069_v35 = vcombine.low %v1804_v6, %v1812_v7  ;;  %v1908_v6 = vld [vmem:[#allocation7 + $0x4f8] sm:$0xff]  ;;  %v14147_v7 = vcombine.low %v1883_v59, %v1891_v60 }
 0x36b   :  { %5383 = vmatpush1.bf16.msra.mxu1 %v14481_v27  ;;  %5302 = vmatprep.subr.bf16.mxu0 %v14496_v9  ;;  %v14084_v27 = vcombine.high %v1819_v52, %v1827_v16  ;;  %v14086_v9 = vcombine.high %v1820_v22, %v1828_v26  ;;  %v1923_v52 = vld [vmem:[#allocation7 + $0x570] sm:$0xff]  ;;  %v1916_v16 = vld [vmem:[#allocation7 + $0x538] sm:$0xff] }
 0x36c   :  { %5384 = vmatprep.subr.bf16.mxu1 %v14498_v28  ;;  %v1835_v28 = vld [vmem:[#allocation7 + $0x2b0] sm:$0xff] }
 0x36d   :  { %v14099_v23 = vcombine.low %v1835_v28, %v1843_v10 }
 0x36e   :  { %5303 = vmatpush1.bf16.msra.mxu0 %v14495_v42  ;;  %v14085_v42 = vcombine.low %v1820_v22, %v1828_v26  ;;  %v1924_v22 = vld [vmem:[#allocation7 + $0x578] sm:$0xff] }
 0x36f   :  { %5385 = vmatpush1.bf16.msra.mxu1 %v14497_v46  ;;  %5304 = vmatprep.subr.bf16.mxu0 %v14512_v47  ;;  %v14100_v46 = vcombine.high %v1835_v28, %v1843_v10  ;;  %v14102_v47 = vcombine.high %v1836_v32, %v1844_v38  ;;  %v1939_v28 = vld [vmem:[#allocation7 + $0x5f0] sm:$0xff]  ;;  %v1932_v10 = vld [vmem:[#allocation7 + $0x5b8] sm:$0xff] }
 0x370   :  { %5386 = vmatprep.subr.bf16.mxu1 %v14514_v48  ;;  %v1851_v48 = vld [vmem:[#allocation7 + $0x330] sm:$0xff] }
 0x371   :  { %v14115_v43 = vcombine.low %v1851_v48, %v1859_v19 }
 0x372   :  { %5305 = vmatpush1.bf16.msra.mxu0 %v14511_v24  ;;  %v14101_v24 = vcombine.low %v1836_v32, %v1844_v38  ;;  %v1940_v32 = vld [vmem:[#allocation7 + $0x5f8] sm:$0xff] }
 0x373   :  { %5387 = vmatpush1.bf16.msra.mxu1 %v14513_v25  ;;  %5397 = vmatprep.subr.bf16.mxu0 %v14020_v49  ;;  %v14116_v25 = vcombine.high %v1851_v48, %v1859_v19  ;;  %v14118_v49 = vcombine.high %v1852_v20, %v1860_v21  ;;  %v1955_v48 = vld [vmem:[#allocation7 + $0x670] sm:$0xff]  ;;  %v1948_v19 = vld [vmem:[#allocation7 + $0x638] sm:$0xff] }
 0x374   :  { %5479 = vmatprep.subr.bf16.mxu1 %v14022_v50  ;;  %v1867_v50 = vld [vmem:[#allocation7 + $0x3b0] sm:$0xff]  ;;  %v1956_v20 = vld [vmem:[#allocation7 + $0x678] sm:$0xff] }
 0x375   :  { %5307 = vmatmul.mubr.bf16.vlgmr.msra.gmra.mrb[24].mxu0 %v16451_v53  ;;  %v14131_v36 = vcombine.low %v1867_v50, %v1875_v51 }
 0x376   :  { %5389 = vmatmul.mubr.bf16.vlgmr.msra.gmra.mrb[24].mxu1 %v16451_v53  ;;  %5398 = vmatpush1.bf16.msra.mxu0 %v14019_v55  ;;  %v1876_v55 = vld [vmem:[#allocation7 + $0x3f8] sm:$0xff] }
 0x377   :  { %5429 = vmatprep.mubr.bf16.mxu0 %v16431_v17  ;;  %5480 = vmatpush1.bf16.msra.mxu1 %v14021_v57  ;;  %v14132_v57 = vcombine.high %v1867_v50, %v1875_v51  ;;  %v1971_v50 = vld [vmem:[#allocation7 + $0x6f0] sm:$0xff]  ;;  %v1964_v51 = vld [vmem:[#allocation7 + $0x6b8] sm:$0xff] }
 0x378   :  { %5511 = vmatprep.mubr.bf16.mxu1 %v16431_v17  ;;  %5399 = vmatprep.subr.bf16.mxu0 %v14036_v58  ;;  %v14067_v17 = vcombine.low %v1803_v4, %v1811_v5  ;;  %v14134_v58 = vcombine.high %v1868_v54, %v1876_v55  ;;  %v1907_v4 = vld [vmem:[#allocation7 + $0x4f0] sm:$0xff]  ;;  %v1900_v5 = vld [vmem:[#allocation7 + $0x4b8] sm:$0xff] }
 0x379   :  { %5481 = vmatprep.subr.bf16.mxu1 %v14038_v11  ;;  %v1884_v11 = vld [vmem:[#allocation7 + $0x438] sm:$0xff] }
 0x37a   :  { %5400 = vmatpush1.bf16.msra.mxu0 %v14035_v0  ;;  %v14133_v0 = vcombine.low %v1868_v54, %v1876_v55  ;;  %v1972_v54 = vld [vmem:[#allocation7 + $0x6f8] sm:$0xff] }
 0x37b   :  { %5482 = vmatpush1.bf16.msra.mxu1 %v14037_v1  ;;  %5401 = vmatprep.subr.bf16.mxu0 %v14052_v3  ;;  %v14148_v1 = vcombine.high %v1883_v59, %v1891_v60  ;;  %v14150_v3 = vcombine.high %v1884_v11, %v1892_v61  ;;  %v1987_v59 = vld [vmem:[#allocation7 + $0x770] sm:$0xff]  ;;  %v1980_v60 = vld [vmem:[#allocation7 + $0x738] sm:$0xff] }
 0x37c   :  { %5483 = vmatprep.subr.bf16.mxu1 %v14054_v40  ;;  %v1899_v40 = vld [vmem:[#allocation7 + $0x4b0] sm:$0xff] }
 0x37d   :  { %v14163_v26 = vcombine.low %v1899_v40, %v1907_v4 }
 0x37e   :  { %5402 = vmatpush1.bf16.msra.mxu0 %v14051_v12  ;;  %v14149_v12 = vcombine.low %v1884_v11, %v1892_v61  ;;  %v1988_v11 = vld [vmem:[#allocation7 + $0x778] sm:$0xff] }
 0x37f   :  { %5484 = vmatpush1.bf16.msra.mxu1 %v14053_v13  ;;  %5403 = vmatprep.subr.bf16.mxu0 %v14068_v14  ;;  %v14164_v13 = vcombine.high %v1899_v40, %v1907_v4  ;;  %v14166_v14 = vcombine.high %v1900_v5, %v1908_v6  ;;  %v2003_v40 = vld [vmem:[#allocation7 + $0x7f0] sm:$0xff]  ;;  %v1996_v4 = vld [vmem:[#allocation7 + $0x7b8] sm:$0xff] }
 0x380   :  { %5485 = vmatprep.subr.bf16.mxu1 %v14070_v15  ;;  %v1915_v15 = vld [vmem:[#allocation7 + $0x530] sm:$0xff] }
 0x381   :  { %v14179_v38 = vcombine.low %v1915_v15, %v1923_v52 }
 0x382   :  { %5404 = vmatpush1.bf16.msra.mxu0 %v14067_v17  ;;  %v14165_v17 = vcombine.low %v1900_v5, %v1908_v6  ;;  %v2004_v5 = vld [vmem:[#allocation7 + $0x7f8] sm:$0xff] }
 0x383   :  { %5486 = vmatpush1.bf16.msra.mxu1 %v14069_v35  ;;  %5405 = vmatprep.subr.bf16.mxu0 %v14084_v27  ;;  %v14180_v35 = vcombine.high %v1915_v15, %v1923_v52  ;;  %v14182_v27 = vcombine.high %v1916_v16, %v1924_v22  ;;  %v2019_v15 = vld [vmem:[#allocation7 + $0x870] sm:$0xff]  ;;  %v2012_v52 = vld [vmem:[#allocation7 + $0x838] sm:$0xff] }
 0x384   :  { %5487 = vmatprep.subr.bf16.mxu1 %v14086_v9  ;;  %v1931_v9 = vld [vmem:[#allocation7 + $0x5b0] sm:$0xff] }
 0x385   :  { %v14195_v21 = vcombine.low %v1931_v9, %v1939_v28 }
 0x386   :  { %5406 = vmatpush1.bf16.msra.mxu0 %v14083_v41  ;;  %v14181_v41 = vcombine.low %v1916_v16, %v1924_v22  ;;  %v2020_v16 = vld [vmem:[#allocation7 + $0x878] sm:$0xff] }
 0x387   :  { %5488 = vmatpush1.bf16.msra.mxu1 %v14085_v42  ;;  %5407 = vmatprep.subr.bf16.mxu0 %v14100_v46  ;;  %v14196_v42 = vcombine.high %v1931_v9, %v1939_v28  ;;  %v14198_v46 = vcombine.high %v1932_v10, %v1940_v32  ;;  %v2035_v9 = vld [vmem:[#allocation7 + $0x8f0] sm:$0xff] }
 0x388   :  { %5489 = vmatprep.subr.bf16.mxu1 %v14102_v47  ;;  %v1947_v47 = vld [vmem:[#allocation7 + $0x630] sm:$0xff] }
 0x389   :  { %v14211_v55 = vcombine.low %v1947_v47, %v1955_v48 }
 0x38a   :  { %5408 = vmatpush1.bf16.msra.mxu0 %v14099_v23  ;;  %v14197_v23 = vcombine.low %v1932_v10, %v1940_v32  ;;  %v2028_v10 = vld [vmem:[#allocation7 + $0x8b8] sm:$0xff] }
 0x38b   :  { %5490 = vmatpush1.bf16.msra.mxu1 %v14101_v24  ;;  %5409 = vmatprep.subr.bf16.mxu0 %v14116_v25  ;;  %v14212_v24 = vcombine.high %v1947_v47, %v1955_v48  ;;  %v14214_v25 = vcombine.high %v1948_v19, %v1956_v20  ;;  %v2036_v32 = vld [vmem:[#allocation7 + $0x8f8] sm:$0xff] }
 0x38c   :  { %5491 = vmatprep.subr.bf16.mxu1 %v14118_v49  ;;  %v1963_v49 = vld [vmem:[#allocation7 + $0x6b0] sm:$0xff]  ;;  %v14294_v47 = vcombine.high %v2028_v10, %v2036_v32  ;;  %v2044_v48 = vld [vmem:[#allocation7 + $0x938] sm:$0xff] }
 0x38d   :  { %v14227_v61 = vcombine.low %v1963_v49, %v1971_v50 }
 0x38e   :  { %5410 = vmatpush1.bf16.msra.mxu0 %v14115_v43  ;;  %v14213_v43 = vcombine.low %v1948_v19, %v1956_v20  ;;  %v2052_v19 = vld [vmem:[#allocation7 + $0x978] sm:$0xff] }
 0x38f   :  { %5492 = vmatpush1.bf16.msra.mxu1 %v14117_v56  ;;  %5411 = vmatprep.subr.bf16.mxu0 %v14132_v57  ;;  %v14228_v56 = vcombine.high %v1963_v49, %v1971_v50  ;;  %v14230_v57 = vcombine.high %v1964_v51, %v1972_v54  ;;  %v2067_v49 = vld [vmem:[#allocation7 + $0x9f0] sm:$0xff]  ;;  %v2060_v50 = vld [vmem:[#allocation7 + $0x9b8] sm:$0xff] }
 0x390   :  { %5493 = vmatprep.subr.bf16.mxu1 %v14134_v58  ;;  %v1979_v58 = vld [vmem:[#allocation7 + $0x730] sm:$0xff] }
 0x391   :  { %v14243_v6 = vcombine.low %v1979_v58, %v1987_v59 }
 0x392   :  { %5412 = vmatpush1.bf16.msra.mxu0 %v14131_v36  ;;  %v14229_v36 = vcombine.low %v1964_v51, %v1972_v54  ;;  %v2068_v51 = vld [vmem:[#allocation7 + $0x9f8] sm:$0xff] }
 0x393   :  { %5494 = vmatpush1.bf16.msra.mxu1 %v14133_v0  ;;  %5413 = vmatprep.subr.bf16.mxu0 %v14148_v1  ;;  %v14244_v0 = vcombine.high %v1979_v58, %v1987_v59  ;;  %v14246_v1 = vcombine.high %v1980_v60, %v1988_v11  ;;  %v2076_v58 = vld [vmem:[#allocation7 + $0xa38] sm:$0xff] }
 0x394   :  { %5495 = vmatprep.subr.bf16.mxu1 %v14150_v3  ;;  %v1995_v3 = vld [vmem:[#allocation7 + $0x7b0] sm:$0xff]  ;;  %v2084_v59 = vld [vmem:[#allocation7 + $0xa78] sm:$0xff] }
 0x395   :  { %v14259_v22 = vcombine.low %v1995_v3, %v2003_v40 }
 0x396   :  { %5414 = vmatpush1.bf16.msra.mxu0 %v14147_v7  ;;  %v14245_v7 = vcombine.low %v1980_v60, %v1988_v11  ;;  %v14325_v60 = vcombine.low %v2060_v50, %v2068_v51 }
 0x397   :  { %5496 = vmatpush1.bf16.msra.mxu1 %v14149_v12  ;;  %5415 = vmatprep.subr.bf16.mxu0 %v14164_v13  ;;  %v14260_v12 = vcombine.high %v1995_v3, %v2003_v40  ;;  %v14262_v13 = vcombine.high %v1996_v4, %v2004_v5  ;;  %v2100_v3 = vld [vmem:[#allocation7 + $0xaf8] sm:$0xff] }
 0x398   :  { %5497 = vmatprep.subr.bf16.mxu1 %v14166_v14  ;;  %v2011_v14 = vld [vmem:[#allocation7 + $0x830] sm:$0xff] }
 0x399   :  { %v14275_v28 = vcombine.low %v2011_v14, %v2019_v15 }
 0x39a   :  { %5416 = vmatpush1.bf16.msra.mxu0 %v14163_v26  ;;  %v14261_v26 = vcombine.low %v1996_v4, %v2004_v5  ;;  %v14341_v4 = vcombine.low %v2076_v58, %v2084_v59 }
 0x39b   :  { %5498 = vmatpush1.bf16.msra.mxu1 %v14165_v17  ;;  %5417 = vmatprep.subr.bf16.mxu0 %v14180_v35  ;;  %v14276_v17 = vcombine.high %v2011_v14, %v2019_v15  ;;  %v14278_v35 = vcombine.high %v2012_v52, %v2020_v16  ;;  %v2116_v14 = vld [vmem:[#allocation7 + $0xb78] sm:$0xff] }
 0x39c   :  { %5499 = vmatprep.subr.bf16.mxu1 %v14182_v27  ;;  %v2027_v27 = vld [vmem:[#allocation7 + $0x8b0] sm:$0xff] }
 0x39d   :  { %v14291_v20 = vcombine.low %v2027_v27, %v2035_v9 }
 0x39e   :  { %5418 = vmatpush1.bf16.msra.mxu0 %v14179_v38  ;;  %v14277_v38 = vcombine.low %v2012_v52, %v2020_v16 }
 0x39f   :  { %5500 = vmatpush1.bf16.msra.mxu1 %v14181_v41  ;;  %5419 = vmatprep.subr.bf16.mxu0 %v14196_v42  ;;  %v14292_v41 = vcombine.high %v2027_v27, %v2035_v9  ;;  %v2043_v42 = vld [vmem:[#allocation7 + $0x930] sm:$0xff] }
 0x3a0   :  { %5501 = vmatprep.subr.bf16.mxu1 %v14198_v46  ;;  %v2051_v46 = vld [vmem:[#allocation7 + $0x970] sm:$0xff] }
 0x3a1   :  { %v14307_v54 = vcombine.low %v2043_v42, %v2051_v46 }
 0x3a2   :  { %5420 = vmatpush1.bf16.msra.mxu0 %v14195_v21  ;;  %v14293_v21 = vcombine.low %v2028_v10, %v2036_v32  ;;  %v2132_v10 = vld [vmem:[#allocation7 + $0xbf8] sm:$0xff] }
 0x3a3   :  { %5502 = vmatpush1.bf16.msra.mxu1 %v14197_v23  ;;  %5421 = vmatprep.subr.bf16.mxu0 %v14212_v24  ;;  %v14308_v23 = vcombine.high %v2043_v42, %v2051_v46  ;;  %v14310_v24 = vcombine.high %v2044_v48, %v2052_v19 }
 0x3a4   :  { %5503 = vmatprep.subr.bf16.mxu1 %v14214_v25  ;;  %v2059_v25 = vld [vmem:[#allocation7 + $0x9b0] sm:$0xff] }
 0x3a6   :  { %5422 = vmatpush1.bf16.msra.mxu0 %v14211_v55  ;;  %v14324_v55 = vcombine.high %v2059_v25, %v2067_v49 }
 0x3a7   :  { %5504 = vmatpush1.bf16.msra.mxu1 %v14213_v43  ;;  %5423 = vmatprep.subr.bf16.mxu0 %v14228_v56  ;;  %v14326_v43 = vcombine.high %v2060_v50, %v2068_v51  ;;  %v2075_v56 = vld [vmem:[#allocation7 + $0xa30] sm:$0xff] }
 0x3a8   :  { %5505 = vmatprep.subr.bf16.mxu1 %v14230_v57  ;;  %v2083_v57 = vld [vmem:[#allocation7 + $0xa70] sm:$0xff] }
 0x3a9   :  { %v14340_v11 = vcombine.high %v2075_v56, %v2083_v57  ;;  %v14339_v40 = vcombine.low %v2075_v56, %v2083_v57  ;;  %v2164_v56 = vld [vmem:[#allocation7 + $0xcf8] sm:$0xff] }
 0x3aa   :  { %5424 = vmatpush1.bf16.msra.mxu0 %v14227_v61  ;;  %v14342_v61 = vcombine.high %v2076_v58, %v2084_v59 }
 0x3ab   :  { %5506 = vmatpush1.bf16.msra.mxu1 %v14229_v36  ;;  %5425 = vmatprep.subr.bf16.mxu0 %v14244_v0  ;;  %v2091_v36 = vld [vmem:[#allocation7 + $0xab0] sm:$0xff] }
 0x3ac   :  { %5507 = vmatprep.subr.bf16.mxu1 %v14246_v1  ;;  %v2099_v0 = vld [vmem:[#allocation7 + $0xaf0] sm:$0xff]  ;;  %v2092_v1 = vld [vmem:[#allocation7 + $0xab8] sm:$0xff] }
 0x3ad   :  { %v14356_v5 = vcombine.high %v2091_v36, %v2099_v0  ;;  %v14355_v15 = vcombine.low %v2091_v36, %v2099_v0  ;;  %v14357_v52 = vcombine.low %v2092_v1, %v2100_v3  ;;  %v2180_v36 = vld [vmem:[#allocation7 + $0xd78] sm:$0xff] }
 0x3ae   :  { %5426 = vmatpush1.bf16.msra.mxu0 %v14243_v6  ;;  %v14358_v6 = vcombine.high %v2092_v1, %v2100_v3 }
 0x3af   :  { %5508 = vmatpush1.bf16.msra.mxu1 %v14245_v7  ;;  %5427 = vmatprep.subr.bf16.mxu0 %v14260_v12  ;;  %v2107_v7 = vld [vmem:[#allocation7 + $0xb30] sm:$0xff] }
 0x3b0   :  { %5509 = vmatprep.subr.bf16.mxu1 %v14262_v13  ;;  %v2115_v12 = vld [vmem:[#allocation7 + $0xb70] sm:$0xff]  ;;  %v2108_v13 = vld [vmem:[#allocation7 + $0xb38] sm:$0xff] }
 0x3b1   :  { %v14372_v16 = vcombine.high %v2107_v7, %v2115_v12 }
 0x3b2   :  { %5428 = vmatpush1.bf16.msra.mxu0 %v14259_v22 }
 0x3b3   :  { %5510 = vmatpush1.bf16.msra.mxu1 %v14261_v26  ;;  %5438 = vmatprep.subr.bf16.mxu0 %v14276_v17  ;;  %v14374_v26 = vcombine.high %v2108_v13, %v2116_v14  ;;  %v2123_v17 = vld [vmem:[#allocation7 + $0xbb0] sm:$0xff] }
 0x3b4   :  { %5520 = vmatprep.subr.bf16.mxu1 %v14278_v35  ;;  %v2131_v35 = vld [vmem:[#allocation7 + $0xbf0] sm:$0xff] }
 0x3b5   :  { %5430 = vmatmul.mubr.bf16.vlgmr.msra.gmra.mrb[28].mxu0 %v16433_v18 }
 0x3b6   :  { %5512 = vmatmul.mubr.bf16.vlgmr.msra.gmra.mrb[28].mxu1 %v16433_v18  ;;  %5439 = vmatpush1.bf16.msra.mxu0 %v14275_v28  ;;  %v14309_v18 = vcombine.low %v2044_v48, %v2052_v19  ;;  %v2124_v28 = vld [vmem:[#allocation7 + $0xbb8] sm:$0xff]  ;;  %v14388_v48 = vcombine.high %v2123_v17, %v2131_v35 }
 0x3b7   :  { %5470 = vmatprep.mubr.bf16.mxu0 %v16437_v8  ;;  %5521 = vmatpush1.bf16.msra.mxu1 %v14277_v38  ;;  %v14389_v50 = vcombine.low %v2124_v28, %v2132_v10 }
 0x3b8   :  { %5552 = vmatprep.mubr.bf16.mxu1 %v16437_v8  ;;  %5440 = vmatprep.subr.bf16.mxu0 %v14292_v41  ;;  %v14323_v8 = vcombine.low %v2059_v25, %v2067_v49  ;;  %v14371_v41 = vcombine.low %v2107_v7, %v2115_v12  ;;  %v2148_v25 = vld [vmem:[#allocation7 + $0xc78] sm:$0xff]  ;;  %v14387_v49 = vcombine.low %v2123_v17, %v2131_v35 }
 0x3b9   :  { %5522 = vmatprep.subr.bf16.mxu1 %v14294_v47  ;;  %v14373_v47 = vcombine.low %v2108_v13, %v2116_v14  ;;  %v2196_v7 = vld [vmem:[#allocation7 + $0xdf8] sm:$0xff] }
 0x3ba   :  { %5441 = vmatpush1.bf16.msra.mxu0 %v14291_v20  ;;  %v14390_v20 = vcombine.high %v2124_v28, %v2132_v10  ;;  %v2212_v17 = vld [vmem:[#allocation7 + $0xe78] sm:$0xff] }
 0x3bb   :  { %5523 = vmatpush1.bf16.msra.mxu1 %v14293_v21  ;;  %5442 = vmatprep.subr.bf16.mxu0 %v14308_v23  ;;  %v2139_v21 = vld [vmem:[#allocation7 + $0xc30] sm:$0xff] }
 0x3bc   :  { %5524 = vmatprep.subr.bf16.mxu1 %v14310_v24  ;;  %v2147_v23 = vld [vmem:[#allocation7 + $0xc70] sm:$0xff]  ;;  %v2140_v24 = vld [vmem:[#allocation7 + $0xc38] sm:$0xff] }
 0x3bd   :  { %v14404_v51 = vcombine.high %v2139_v21, %v2147_v23  ;;  %v14403_v57 = vcombine.low %v2139_v21, %v2147_v23  ;;  %v14405_v58 = vcombine.low %v2140_v24, %v2148_v25  ;;  %v2235_v23 = vld [vmem:[#allocation7 + $0xf30] sm:$0xff] }
 0x3be   :  { %5443 = vmatpush1.bf16.msra.mxu0 %v14307_v54  ;;  %v14406_v54 = vcombine.high %v2140_v24, %v2148_v25  ;;  %v2243_v24 = vld [vmem:[#allocation7 + $0xf70] sm:$0xff]  ;;  %v2236_v25 = vld [vmem:[#allocation7 + $0xf38] sm:$0xff] }
 0x3bf   :  { %5525 = vmatpush1.bf16.msra.mxu1 %v14309_v18  ;;  %5444 = vmatprep.subr.bf16.mxu0 %v14324_v55  ;;  %v2155_v18 = vld [vmem:[#allocation7 + $0xcb0] sm:$0xff] }
 0x3c0   :  { %5526 = vmatprep.subr.bf16.mxu1 %v14326_v43  ;;  %v2163_v55 = vld [vmem:[#allocation7 + $0xcf0] sm:$0xff]  ;;  %v2156_v43 = vld [vmem:[#allocation7 + $0xcb8] sm:$0xff] }
 0x3c1   :  { %v14420_v59 = vcombine.high %v2155_v18, %v2163_v55  ;;  %v14419_v0 = vcombine.low %v2155_v18, %v2163_v55  ;;  %v14421_v1 = vcombine.low %v2156_v43, %v2164_v56  ;;  %v14500_v18 = vcombine.high %v2235_v23, %v2243_v24 }
 0x3c2   :  { %5445 = vmatpush1.bf16.msra.mxu0 %v14323_v8  ;;  %v14422_v8 = vcombine.high %v2156_v43, %v2164_v56  ;;  %v2251_v43 = vld [vmem:[#allocation7 + $0xfb0] sm:$0xff] }
 0x3c3   :  { %5527 = vmatpush1.bf16.msra.mxu1 %v14325_v60  ;;  %5446 = vmatprep.subr.bf16.mxu0 %v14340_v11  ;;  %v2171_v60 = vld [vmem:[#allocation7 + $0xd30] sm:$0xff] }
 0x3c4   :  { %5528 = vmatprep.subr.bf16.mxu1 %v14342_v61  ;;  %v2179_v11 = vld [vmem:[#allocation7 + $0xd70] sm:$0xff]  ;;  %v2172_v61 = vld [vmem:[#allocation7 + $0xd38] sm:$0xff] }
 0x3c5   :  { %v14436_v3 = vcombine.high %v2171_v60, %v2179_v11  ;;  %v14435_v12 = vcombine.low %v2171_v60, %v2179_v11  ;;  %v14437_v13 = vcombine.low %v2172_v61, %v2180_v36  ;;  %v2259_v56 = vld [vmem:[#allocation7 + $0xff0] sm:$0xff] }
 0x3c6   :  { %5447 = vmatpush1.bf16.msra.mxu0 %v14339_v40  ;;  %v14438_v40 = vcombine.high %v2172_v61, %v2180_v36  ;;  %v14516_v11 = vcombine.high %v2251_v43, %v2259_v56  ;;  %v5593_v36 = vld [vmem:[#allocation10] sm:$0xff] }
 0x3c7   :  { %5529 = vmatpush1.bf16.msra.mxu1 %v14341_v4  ;;  %5448 = vmatprep.subr.bf16.mxu0 %v14356_v5  ;;  %v2187_v4 = vld [vmem:[#allocation7 + $0xdb0] sm:$0xff] }
 0x3c8   :  { %v16485_v22 = vpop.f32.mrb[20].mxu0  ;;  %5530 = vmatprep.subr.bf16.mxu1 %v14358_v6  ;;  %v2195_v5 = vld [vmem:[#allocation7 + $0xdf0] sm:$0xff]  ;;  %v2188_v6 = vld [vmem:[#allocation7 + $0xdb8] sm:$0xff] }
 0x3c9   :  { %v16487_v27 = vpop.f32.mrb[20].mxu1  ;;  %v16489_v9 = vpop.f32.mrb[21].mxu0  ;;  %v14452_v14 = vcombine.high %v2187_v4, %v2195_v5  ;;  %v14451_v35 = vcombine.low %v2187_v4, %v2195_v5  ;;  %v14453_v28 = vcombine.low %v2188_v6, %v2196_v7  ;;  %v14515_v4 = vcombine.low %v2251_v43, %v2259_v56 }
 0x3ca   :  { %v16491_v32 = vpop.f32.mrb[21].mxu1  ;;  %v5148_v38 = vpop.f32.mrb[22].mxu0  ;;  %5449 = vmatpush1.bf16.msra.mxu0 %v14355_v15  ;;  %v14454_v15 = vcombine.high %v2188_v6, %v2196_v7 }
 0x3cb   :  { %v5230_v42 = vpop.f32.mrb[22].mxu1  ;;  %5531 = vmatpush1.bf16.msra.mxu1 %v14357_v52  ;;  %v5149_v46 = vpop.f32.mrb[23].mxu0  ;;  %5450 = vmatprep.subr.bf16.mxu0 %v14372_v16  ;;  %v2203_v52 = vld [vmem:[#allocation7 + $0xe30] sm:$0xff] }
 0x3cc   :  { %v5231_v19 = vpop.f32.mrb[23].mxu1  ;;  %5532 = vmatprep.subr.bf16.mxu1 %v14374_v26  ;;  %v2211_v16 = vld [vmem:[#allocation7 + $0xe70] sm:$0xff]  ;;  %v2204_v26 = vld [vmem:[#allocation7 + $0xe38] sm:$0xff] }
 0x3cd   :  { %v14468_v10 = vcombine.high %v2203_v52, %v2211_v16  ;;  %v14470_v38 = vcombine.high %v2204_v26, %v2212_v17  ;;  %v2227_v42 = vld [vmem:[#allocation7 + $0xef0] sm:$0xff]  ;;  %v2220_v46 = vld [vmem:[#allocation7 + $0xeb8] sm:$0xff]  ;;  %v14469_v19 = vcombine.low %v2204_v26, %v2212_v17 }
 0x3ce   :  { %5451 = vmatpush1.bf16.msra.mxu0 %v14371_v41  ;;  %v2219_v41 = vld [vmem:[#allocation7 + $0xeb0] sm:$0xff] }
 0x3cf   :  { %5533 = vmatpush1.bf16.msra.mxu1 %v14373_v47  ;;  %5452 = vmatprep.subr.bf16.mxu0 %v14388_v48  ;;  %v2228_v47 = vld [vmem:[#allocation7 + $0xef8] sm:$0xff]  ;;  %v14467_v48 = vcombine.low %v2203_v52, %v2211_v16  ;;  %v5609_v17 = vld [vmem:[#allocation10 + $0x80] sm:$0xff] }
 0x3d0   :  { %5534 = vmatprep.subr.bf16.mxu1 %v14390_v20  ;;  %v14484_v20 = vcombine.high %v2219_v41, %v2227_v42  ;;  %v14486_v21 = vcombine.high %v2220_v46, %v2228_v47  ;;  %v5602_v52 = vld [vmem:[#allocation10 + $0x48] sm:$0xff] }
 0x3d1   :  { %v5606_v16 = vld [vmem:[#allocation10 + $0x68] sm:$0xff] }
 0x3d2   :  { %5453 = vmatpush1.bf16.msra.mxu0 %v14387_v49  ;;  %v2244_v49 = vld [vmem:[#allocation7 + $0xf78] sm:$0xff] }
 0x3d3   :  { %5535 = vmatpush1.bf16.msra.mxu1 %v14389_v50  ;;  %5454 = vmatprep.subr.bf16.mxu0 %v14404_v51  ;;  %v16493_v50 = vld [vmem:[#allocation8] sm:$0xff]  ;;  %v14483_v51 = vcombine.low %v2219_v41, %v2227_v42  ;;  %v14502_v55 = vcombine.high %v2236_v25, %v2244_v49  ;;  %v14501_v60 = vcombine.low %v2236_v25, %v2244_v49  ;;  %v5614_v41 = vld [vmem:[#allocation10 + $0xa8] sm:$0xff] }
 0x3d4   :  { %5536 = vmatprep.subr.bf16.mxu1 %v14406_v54  ;;  %v14485_v54 = vcombine.low %v2220_v46, %v2228_v47  ;;  %v14529_v46 = vcombine.low %v5602_v52, %v5606_v16 }
 0x3d6   :  { %5455 = vmatpush1.bf16.msra.mxu0 %v14403_v57  ;;  %v2272_v57 = vrot.slane %v16493_v50, %v16399_v33 }
 0x3d7   :  { %5537 = vmatpush1.bf16.msra.mxu1 %v14405_v58  ;;  %5456 = vmatprep.subr.bf16.mxu0 %v14420_v59  ;;  %v2252_v58 = vld [vmem:[#allocation7 + $0xfb8] sm:$0xff] }
 0x3d8   :  { %5538 = vmatprep.subr.bf16.mxu1 %v14422_v8  ;;  %v2260_v59 = vld [vmem:[#allocation7 + $0xff8] sm:$0xff]  ;;  %v14499_v8 = vcombine.low %v2235_v23, %v2243_v24 }
 0x3d9   :  { %v14518_v61 = vcombine.high %v2252_v58, %v2260_v59  ;;  %v14517_v5 = vcombine.low %v2252_v58, %v2260_v59  ;;  %v5622_v23 = vld [vmem:[#allocation10 + $0xe8] sm:$0xff]  ;;  %v5633_v59 = vld [vmem:[#allocation10 + $0x140] sm:$0xff] }
 0x3da   :  { %5457 = vmatpush1.bf16.msra.mxu0 %v14419_v0  ;;  %v5597_v0 = vld [vmem:[#allocation10 + $0x20] sm:$0xff] }
 0x3db   :  { %5539 = vmatpush1.bf16.msra.mxu1 %v14421_v1  ;;  %5458 = vmatprep.subr.bf16.mxu0 %v14436_v3  ;;  %v15697_v1 = vadd.f32 %v16473_v2, %v2272_v57  ;;  %v5594_v3 = vld [vmem:[#allocation10 + $0x8] sm:$0xff]  ;;  %v14520_v6 = vcombine.high %v5593_v36, %v5597_v0 }
 0x3dc   :  { %5540 = vmatprep.subr.bf16.mxu1 %v14438_v40  ;;  %v5598_v40 = vld [vmem:[#allocation10 + $0x28] sm:$0xff] }
 0x3dd   :  { %v14522_v7 = vcombine.high %v5594_v3, %v5598_v40  ;;  %v14521_v2 = vcombine.low %v5594_v3, %v5598_v40  ;;  %v5641_v3 = vld [vmem:[#allocation10 + $0x180] sm:$0xff] }
 0x3de   :  { %5459 = vmatpush1.bf16.msra.mxu0 %v14435_v12  ;;  %v5562_v12 = vmax.f32 %v15697_v1, 0.0  ;;  %v5645_v40 = vld [vmem:[#allocation10 + $0x1a0] sm:$0xff] }
 0x3df   :  { %5541 = vmatpush1.bf16.msra.mxu1 %v14437_v13  ;;  %5460 = vmatprep.subr.bf16.mxu0 %v14452_v14  ;;  %v5601_v13 = vld [vmem:[#allocation10 + $0x40] sm:$0xff] }
 0x3e0   :  { %5542 = vmatprep.subr.bf16.mxu1 %v14454_v15  ;;  %v5605_v14 = vld [vmem:[#allocation10 + $0x60] sm:$0xff]  ;;  %v14519_v15 = vcombine.low %v5593_v36, %v5597_v0 }
 0x3e1   :  { %v14528_v26 = vcombine.high %v5601_v13, %v5605_v14  ;;  %v14527_v42 = vcombine.low %v5601_v13, %v5605_v14  ;;  %v5649_v14 = vld [vmem:[#allocation10 + $0x1c0] sm:$0xff] }
 0x3e2   :  { %5461 = vmatpush1.bf16.msra.mxu0 %v14451_v35  ;;  %v5613_v35 = vld [vmem:[#allocation10 + $0xa0] sm:$0xff] }
 0x3e3   :  { %5543 = vmatpush1.bf16.msra.mxu1 %v14453_v28  ;;  %5462 = vmatprep.subr.bf16.mxu0 %v14468_v10  ;;  %v16498_v28 = vpack.c.bf16 %v5562_v12, %v5562_v12  ;;  %v14530_v10 = vcombine.high %v5602_v52, %v5606_v16  ;;  %v14536_v47 = vcombine.high %v5609_v17, %v5613_v35  ;;  %v5650_v52 = vld [vmem:[#allocation10 + $0x1c8] sm:$0xff] }
 0x3e4   :  { %5544 = vmatprep.subr.bf16.mxu1 %v14470_v38  ;;  %v5610_v38 = vld [vmem:[#allocation10 + $0x88] sm:$0xff]  ;;  %v14535_v24 = vcombine.low %v5609_v17, %v5613_v35  ;;  %v14568_v12 = vcombine.high %v5641_v3, %v5645_v40 }
 0x3e5   :  { %v5654_v16 = vld [vmem:[#allocation10 + $0x1e8] sm:$0xff] }
 0x3e6   :  { %5463 = vmatpush1.bf16.msra.mxu0 %v14467_v48  ;;  %v14538_v48 = vcombine.high %v5610_v38, %v5614_v41  ;;  %v14578_v35 = vcombine.high %v5650_v52, %v5654_v16 }
 0x3e7   :  { %5545 = vmatpush1.bf16.msra.mxu1 %v14469_v19  ;;  %5464 = vmatprep.subr.bf16.mxu0 %v14484_v20  ;;  %v5617_v19 = vld [vmem:[#allocation10 + $0xc0] sm:$0xff] }
 0x3e8   :  { %5546 = vmatprep.subr.bf16.mxu1 %v14486_v21  ;;  %v5621_v20 = vld [vmem:[#allocation10 + $0xe0] sm:$0xff]  ;;  %v5618_v21 = vld [vmem:[#allocation10 + $0xc8] sm:$0xff] }
 0x3e9   :  { %v14544_v25 = vcombine.high %v5617_v19, %v5621_v20  ;;  %v14546_v49 = vcombine.high %v5618_v21, %v5622_v23  ;;  %v14543_v43 = vcombine.low %v5617_v19, %v5621_v20  ;;  %v14545_v56 = vcombine.low %v5618_v21, %v5622_v23  ;;  %v5665_v20 = vld [vmem:[#allocation10 + $0x240] sm:$0xff]  ;;  %v5666_v23 = vld [vmem:[#allocation10 + $0x248] sm:$0xff] }
 0x3ea   :  { %5465 = vmatpush1.bf16.msra.mxu0 %v14483_v51  ;;  %v5625_v51 = vld [vmem:[#allocation10 + $0x100] sm:$0xff] }
 0x3eb   :  { %5547 = vmatpush1.bf16.msra.mxu1 %v14485_v54  ;;  %5466 = vmatprep.subr.bf16.mxu0 %v14500_v18  ;;  %v5629_v54 = vld [vmem:[#allocation10 + $0x120] sm:$0xff]  ;;  %v5626_v18 = vld [vmem:[#allocation10 + $0x108] sm:$0xff] }
 0x3ec   :  { %5548 = vmatprep.subr.bf16.mxu1 %v14502_v55  ;;  %v5630_v55 = vld [vmem:[#allocation10 + $0x128] sm:$0xff]  ;;  %v14552_v57 = vcombine.high %v5625_v51, %v5629_v54  ;;  %v5669_v21 = vld [vmem:[#allocation10 + $0x260] sm:$0xff] }
 0x3ed   :  { %v14554_v58 = vcombine.high %v5626_v18, %v5630_v55  ;;  %v14553_v36 = vcombine.low %v5626_v18, %v5630_v55  ;;  %v5677_v18 = vld [vmem:[#allocation10 + $0x2a0] sm:$0xff]  ;;  %v5674_v55 = vld [vmem:[#allocation10 + $0x288] sm:$0xff] }
 0x3ee   :  { %5467 = vmatpush1.bf16.msra.mxu0 %v14499_v8  ;;  %v5637_v8 = vld [vmem:[#allocation10 + $0x160] sm:$0xff] }
 0x3ef   :  { %5549 = vmatpush1.bf16.msra.mxu1 %v14501_v60  ;;  %5468 = vmatprep.subr.bf16.mxu0 %v14516_v11  ;;  %v5634_v60 = vld [vmem:[#allocation10 + $0x148] sm:$0xff]  ;;  %v14560_v0 = vcombine.high %v5633_v59, %v5637_v8 }
 0x3f0   :  { %5550 = vmatprep.subr.bf16.mxu1 %v14518_v61  ;;  %v5638_v11 = vld [vmem:[#allocation10 + $0x168] sm:$0xff]  ;;  %v14551_v61 = vcombine.low %v5625_v51, %v5629_v54  ;;  %v5673_v54 = vld [vmem:[#allocation10 + $0x280] sm:$0xff] }
 0x3f1   :  { %v14562_v1 = vcombine.high %v5634_v60, %v5638_v11 }
 0x3f2   :  { %5469 = vmatpush1.bf16.msra.mxu0 %v14515_v4  ;;  %v5642_v4 = vld [vmem:[#allocation10 + $0x188] sm:$0xff] }
 0x3f3   :  { %5551 = vmatpush1.bf16.msra.mxu1 %v14517_v5  ;;  %11779 = vmatprep.subr.bf16.mxu0 %v14520_v6  ;;  %v5646_v5 = vld [vmem:[#allocation10 + $0x1a8] sm:$0xff]  ;;  %v14559_v6 = vcombine.low %v5633_v59, %v5637_v8  ;;  %v5681_v8 = vld [vmem:[#allocation10 + $0x2c0] sm:$0xff] }
 0x3f4   :  { %12107 = vmatprep.subr.bf16.mxu1 %v14522_v7  ;;  %v14561_v7 = vcombine.low %v5634_v60, %v5638_v11  ;;  %v14570_v13 = vcombine.high %v5642_v4, %v5646_v5  ;;  %v5685_v60 = vld [vmem:[#allocation10 + $0x2e0] sm:$0xff]  ;;  %v5682_v11 = vld [vmem:[#allocation10 + $0x2c8] sm:$0xff] }
 0x3f5   :  { %5471 = vmatmul.mubr.bf16.vlgmr.msra.gmra.mrb[28].mxu0 %v16451_v53 }
 0x3f6   :  { %5553 = vmatmul.mubr.bf16.vlgmr.msra.gmra.mrb[28].mxu1 %v16451_v53  ;;  %11780 = vmatpush1.bf16.msra.mxu0 %v14519_v15  ;;  %v14537_v53 = vcombine.low %v5610_v38, %v5614_v41  ;;  %v5653_v15 = vld [vmem:[#allocation10 + $0x1e0] sm:$0xff]  ;;  %v5658_v41 = vld [vmem:[#allocation10 + $0x208] sm:$0xff] }
 0x3f7   :  { %11811 = vmatprep.mubr.bf16.mxu0 %v16498_v28  ;;  %12108 = vmatpush1.bf16.msra.mxu1 %v14521_v2  ;;  %v14567_v2 = vcombine.low %v5641_v3, %v5645_v40  ;;  %v14576_v17 = vcombine.high %v5649_v14, %v5653_v15  ;;  %v5661_v38 = vld [vmem:[#allocation10 + $0x220] sm:$0xff] }
 0x3f8   :  { %12139 = vmatprep.mubr.bf16.mxu1 %v16498_v28  ;;  %11781 = vmatprep.subr.bf16.mxu0 %v14528_v26  ;;  %v14569_v26 = vcombine.low %v5642_v4, %v5646_v5  ;;  %v5689_v40 = vld [vmem:[#allocation10 + $0x300] sm:$0xff]  ;;  %v5690_v5 = vld [vmem:[#allocation10 + $0x308] sm:$0xff] }
 0x3f9   :  { %12109 = vmatprep.subr.bf16.mxu1 %v14530_v10  ;;  %v5657_v10 = vld [vmem:[#allocation10 + $0x200] sm:$0xff] }
 0x3fa   :  { %11782 = vmatpush1.bf16.msra.mxu0 %v14527_v42  ;;  %v5662_v42 = vld [vmem:[#allocation10 + $0x228] sm:$0xff]  ;;  %v5693_v4 = vld [vmem:[#allocation10 + $0x320] sm:$0xff] }
 0x3fb   :  { %12110 = vmatpush1.bf16.msra.mxu1 %v14529_v46  ;;  %11783 = vmatprep.subr.bf16.mxu0 %v14536_v47  ;;  %v14575_v46 = vcombine.low %v5649_v14, %v5653_v15  ;;  %v14577_v47 = vcombine.low %v5650_v52, %v5654_v16  ;;  %v14586_v19 = vcombine.high %v5658_v41, %v5662_v42  ;;  %v5697_v15 = vld [vmem:[#allocation10 + $0x340] sm:$0xff]  ;;  %v5698_v16 = vld [vmem:[#allocation10 + $0x348] sm:$0xff] }
 0x3fc   :  { %12111 = vmatprep.subr.bf16.mxu1 %v14538_v48  ;;  %v14584_v48 = vcombine.high %v5657_v10, %v5661_v38  ;;  %v5701_v52 = vld [vmem:[#allocation10 + $0x360] sm:$0xff] }
 0x3fe   :  { %11784 = vmatpush1.bf16.msra.mxu0 %v14535_v24  ;;  %v5670_v24 = vld [vmem:[#allocation10 + $0x268] sm:$0xff] }
 0x3ff   :  { %12112 = vmatpush1.bf16.msra.mxu1 %v14537_v53  ;;  %11785 = vmatprep.subr.bf16.mxu0 %v14544_v25  ;;  %v14583_v53 = vcombine.low %v5657_v10, %v5661_v38  ;;  %v14585_v25 = vcombine.low %v5658_v41, %v5662_v42  ;;  %v14594_v51 = vcombine.high %v5666_v23, %v5670_v24  ;;  %v5705_v38 = vld [vmem:[#allocation10 + $0x380] sm:$0xff]  ;;  %v5706_v42 = vld [vmem:[#allocation10 + $0x388] sm:$0xff] }
 0x400   :  { %12113 = vmatprep.subr.bf16.mxu1 %v14546_v49  ;;  %v14592_v49 = vcombine.high %v5665_v20, %v5669_v21  ;;  %v5709_v41 = vld [vmem:[#allocation10 + $0x3a0] sm:$0xff] }
 0x402   :  { %11786 = vmatpush1.bf16.msra.mxu0 %v14543_v43  ;;  %v5678_v43 = vld [vmem:[#allocation10 + $0x2a8] sm:$0xff] }
 0x403   :  { %12114 = vmatpush1.bf16.msra.mxu1 %v14545_v56  ;;  %11787 = vmatprep.subr.bf16.mxu0 %v14552_v57  ;;  %v14591_v56 = vcombine.low %v5665_v20, %v5669_v21  ;;  %v14593_v57 = vcombine.low %v5666_v23, %v5670_v24  ;;  %v14602_v59 = vcombine.high %v5674_v55, %v5678_v43  ;;  %v5713_v23 = vld [vmem:[#allocation10 + $0x3c0] sm:$0xff] }
 0x404   :  { %12115 = vmatprep.subr.bf16.mxu1 %v14554_v58  ;;  %v14600_v58 = vcombine.high %v5673_v54, %v5677_v18  ;;  %v14632_v20 = vcombine.high %v5705_v38, %v5709_v41  ;;  %v5717_v24 = vld [vmem:[#allocation10 + $0x3e0] sm:$0xff] }
 0x406   :  { %11788 = vmatpush1.bf16.msra.mxu0 %v14551_v61  ;;  %v5686_v61 = vld [vmem:[#allocation10 + $0x2e8] sm:$0xff] }
 0x407   :  { %12116 = vmatpush1.bf16.msra.mxu1 %v14553_v36  ;;  %11789 = vmatprep.subr.bf16.mxu0 %v14560_v0  ;;  %v14599_v36 = vcombine.low %v5673_v54, %v5677_v18  ;;  %v14601_v0 = vcombine.low %v5674_v55, %v5678_v43  ;;  %v14610_v3 = vcombine.high %v5682_v11, %v5686_v61 }
 0x408   :  { %12117 = vmatprep.subr.bf16.mxu1 %v14562_v1  ;;  %v14608_v1 = vcombine.high %v5681_v8, %v5685_v60  ;;  %v14640_v55 = vcombine.high %v5713_v23, %v5717_v24 }
 0x40a   :  { %11790 = vmatpush1.bf16.msra.mxu0 %v14559_v6  ;;  %v5694_v6 = vld [vmem:[#allocation10 + $0x328] sm:$0xff] }
 0x40b   :  { %12118 = vmatpush1.bf16.msra.mxu1 %v14561_v7  ;;  %11791 = vmatprep.subr.bf16.mxu0 %v14568_v12  ;;  %v14607_v7 = vcombine.low %v5681_v8, %v5685_v60  ;;  %v14609_v12 = vcombine.low %v5682_v11, %v5686_v61  ;;  %v14618_v14 = vcombine.high %v5690_v5, %v5694_v6  ;;  %v5726_v8 = vld [vmem:[#allocation10 + $0x428] sm:$0xff] }
 0x40c   :  { %12119 = vmatprep.subr.bf16.mxu1 %v14570_v13  ;;  %v14616_v13 = vcombine.high %v5689_v40, %v5693_v4  ;;  %v14639_v60 = vcombine.low %v5713_v23, %v5717_v24  ;;  %v5754_v23 = vld [vmem:[#allocation10 + $0x508] sm:$0xff] }
 0x40d   :  { %v5758_v24 = vld [vmem:[#allocation10 + $0x528] sm:$0xff] }
 0x40e   :  { %11792 = vmatpush1.bf16.msra.mxu0 %v14567_v2  ;;  %v5702_v2 = vld [vmem:[#allocation10 + $0x368] sm:$0xff] }
 0x40f   :  { %12120 = vmatpush1.bf16.msra.mxu1 %v14569_v26  ;;  %11793 = vmatprep.subr.bf16.mxu0 %v14576_v17  ;;  %v14615_v26 = vcombine.low %v5689_v40, %v5693_v4  ;;  %v14617_v17 = vcombine.low %v5690_v5, %v5694_v6  ;;  %v14626_v10 = vcombine.high %v5698_v16, %v5702_v2  ;;  %v5730_v4 = vld [vmem:[#allocation10 + $0x448] sm:$0xff] }
 0x410   :  { %12121 = vmatprep.subr.bf16.mxu1 %v14578_v35  ;;  %v14624_v35 = vcombine.high %v5697_v15, %v5701_v52  ;;  %v5734_v5 = vld [vmem:[#allocation10 + $0x468] sm:$0xff] }
 0x412   :  { %11794 = vmatpush1.bf16.msra.mxu0 %v14575_v46  ;;  %v5710_v46 = vld [vmem:[#allocation10 + $0x3a8] sm:$0xff] }
 0x413   :  { %12122 = vmatpush1.bf16.msra.mxu1 %v14577_v47  ;;  %11795 = vmatprep.subr.bf16.mxu0 %v14584_v48  ;;  %v14623_v47 = vcombine.low %v5697_v15, %v5701_v52  ;;  %v2268_v48 = vrot.slane %v16493_v50, %v16395_v30  ;;  %v14634_v21 = vcombine.high %v5706_v42, %v5710_v46  ;;  %v5738_v52 = vld [vmem:[#allocation10 + $0x488] sm:$0xff] }
 0x414   :  { %12123 = vmatprep.subr.bf16.mxu1 %v14586_v19  ;;  %v14625_v19 = vcombine.low %v5698_v16, %v5702_v2  ;;  %v14633_v18 = vcombine.low %v5706_v42, %v5710_v46  ;;  %v14658_v15 = vcombine.high %v5730_v4, %v5734_v5  ;;  %v5742_v16 = vld [vmem:[#allocation10 + $0x4a8] sm:$0xff] }
 0x415   :  { %v15696_v54 = vadd.f32 %v16469_v62, %v2268_v48  ;;  %v5750_v42 = vld [vmem:[#allocation10 + $0x4e8] sm:$0xff] }
 0x416   :  { %11796 = vmatpush1.bf16.msra.mxu0 %v14583_v53  ;;  %v2280_v53 = vrot.slane %v16493_v50, %v16397_v31 }
 0x417   :  { %12124 = vmatpush1.bf16.msra.mxu1 %v14585_v25  ;;  %11797 = vmatprep.subr.bf16.mxu0 %v14592_v49  ;;  %v5714_v25 = vld [vmem:[#allocation10 + $0x3c8] sm:$0xff]  ;;  %v5561_v11 = vmax.f32 %v15696_v54, 0.0  ;;  %v5761_v54 = vld [vmem:[#allocation10 + $0x540] sm:$0xff] }
 0x418   :  { %12125 = vmatprep.subr.bf16.mxu1 %v14594_v51  ;;  %v5718_v49 = vld [vmem:[#allocation10 + $0x3e8] sm:$0xff]  ;;  %v14631_v51 = vcombine.low %v5705_v38, %v5709_v41  ;;  %v5749_v38 = vld [vmem:[#allocation10 + $0x4e0] sm:$0xff] }
 0x419   :  { %v14642_v43 = vcombine.high %v5714_v25, %v5718_v49  ;;  %v14641_v61 = vcombine.low %v5714_v25, %v5718_v49  ;;  %v16510_v6 = vpack.c.bf16 %v5561_v11, %v5561_v11  ;;  %v5746_v41 = vld [vmem:[#allocation10 + $0x4c8] sm:$0xff] }
 0x41a   :  { %11798 = vmatpush1.bf16.msra.mxu0 %v14591_v56  ;;  %v5721_v56 = vld [vmem:[#allocation10 + $0x400] sm:$0xff]  ;;  %v14673_v25 = vcombine.low %v5746_v41, %v5750_v42  ;;  %v5770_v11 = vld [vmem:[#allocation10 + $0x588] sm:$0xff] }
 0x41b   :  { %12126 = vmatpush1.bf16.msra.mxu1 %v14593_v57  ;;  %11799 = vmatprep.subr.bf16.mxu0 %v14600_v58  ;;  %v5725_v57 = vld [vmem:[#allocation10 + $0x420] sm:$0xff]  ;;  %v15699_v58 = vadd.f32 %v16475_v44, %v2280_v53 }
 0x41c   :  { %12127 = vmatprep.subr.bf16.mxu1 %v14602_v59  ;;  %v5722_v59 = vld [vmem:[#allocation10 + $0x408] sm:$0xff]  ;;  %v14647_v40 = vcombine.low %v5721_v56, %v5725_v57 }
 0x41d   :  { %v14650_v62 = vcombine.high %v5722_v59, %v5726_v8  ;;  %v14649_v44 = vcombine.low %v5722_v59, %v5726_v8  ;;  %v5769_v8 = vld [vmem:[#allocation10 + $0x580] sm:$0xff] }
 0x41e   :  { %11800 = vmatpush1.bf16.msra.mxu0 %v14599_v36  ;;  %v14648_v36 = vcombine.high %v5721_v56, %v5725_v57  ;;  %v14681_v57 = vcombine.low %v5754_v23, %v5758_v24 }
 0x41f   :  { %12128 = vmatpush1.bf16.msra.mxu1 %v14601_v0  ;;  %11801 = vmatprep.subr.bf16.mxu0 %v14608_v1  ;;  %v5564_v0 = vmax.f32 %v15699_v58, 0.0  ;;  %v5729_v1 = vld [vmem:[#allocation10 + $0x440] sm:$0xff] }
 0x420   :  { %12129 = vmatprep.subr.bf16.mxu1 %v14610_v3  ;;  %v5733_v3 = vld [vmem:[#allocation10 + $0x460] sm:$0xff] }
 0x421   :  { %v14655_v2 = vcombine.low %v5729_v1, %v5733_v3 }
 0x422   :  { %11802 = vmatpush1.bf16.msra.mxu0 %v14607_v7  ;;  %v14656_v7 = vcombine.high %v5729_v1, %v5733_v3 }
 0x423   :  { %12130 = vmatpush1.bf16.msra.mxu1 %v14609_v12  ;;  %11803 = vmatprep.subr.bf16.mxu0 %v14616_v13  ;;  %v5737_v12 = vld [vmem:[#allocation10 + $0x480] sm:$0xff] }
 0x424   :  { %12131 = vmatprep.subr.bf16.mxu1 %v14618_v14  ;;  %v5741_v13 = vld [vmem:[#allocation10 + $0x4a0] sm:$0xff]  ;;  %v16512_v14 = vpack.c.bf16 %v5564_v0, %v5564_v0 }
 0x425   :  { %v14663_v46 = vcombine.low %v5737_v12, %v5741_v13 }
 0x426   :  { %11804 = vmatpush1.bf16.msra.mxu0 %v14615_v26  ;;  %v14657_v26 = vcombine.low %v5730_v4, %v5734_v5  ;;  %v5781_v4 = vld [vmem:[#allocation10 + $0x5e0] sm:$0xff] }
 0x427   :  { %12132 = vmatpush1.bf16.msra.mxu1 %v14617_v17  ;;  %11805 = vmatprep.subr.bf16.mxu0 %v14624_v35  ;;  %v14664_v17 = vcombine.high %v5737_v12, %v5741_v13  ;;  %v14666_v35 = vcombine.high %v5738_v52, %v5742_v16  ;;  %v5782_v12 = vld [vmem:[#allocation10 + $0x5e8] sm:$0xff] }
 0x428   :  { %12133 = vmatprep.subr.bf16.mxu1 %v14626_v10  ;;  %v5745_v10 = vld [vmem:[#allocation10 + $0x4c0] sm:$0xff] }
 0x429   :  { %v14672_v48 = vcombine.high %v5745_v10, %v5749_v38  ;;  %v14671_v53 = vcombine.low %v5745_v10, %v5749_v38  ;;  %v5785_v38 = vld [vmem:[#allocation10 + $0x600] sm:$0xff] }
 0x42a   :  { %11806 = vmatpush1.bf16.msra.mxu0 %v14623_v47  ;;  %v14665_v47 = vcombine.low %v5738_v52, %v5742_v16 }
 0x42b   :  { %12134 = vmatpush1.bf16.msra.mxu1 %v14625_v19  ;;  %11807 = vmatprep.subr.bf16.mxu0 %v14632_v20  ;;  %v14674_v19 = vcombine.high %v5746_v41, %v5750_v42  ;;  %v5753_v20 = vld [vmem:[#allocation10 + $0x500] sm:$0xff]  ;;  %v5786_v42 = vld [vmem:[#allocation10 + $0x608] sm:$0xff] }
 0x42c   :  { %12135 = vmatprep.subr.bf16.mxu1 %v14634_v21  ;;  %v5757_v21 = vld [vmem:[#allocation10 + $0x520] sm:$0xff] }
 0x42d   :  { %v14680_v49 = vcombine.high %v5753_v20, %v5757_v21  ;;  %v14679_v56 = vcombine.low %v5753_v20, %v5757_v21  ;;  %v5789_v41 = vld [vmem:[#allocation10 + $0x620] sm:$0xff] }
 0x42e   :  { %11808 = vmatpush1.bf16.msra.mxu0 %v14631_v51  ;;  %v14682_v51 = vcombine.high %v5754_v23, %v5758_v24  ;;  %v5793_v21 = vld [vmem:[#allocation10 + $0x640] sm:$0xff]  ;;  %v5794_v24 = vld [vmem:[#allocation10 + $0x648] sm:$0xff] }
 0x42f   :  { %12136 = vmatpush1.bf16.msra.mxu1 %v14633_v18  ;;  %11809 = vmatprep.subr.bf16.mxu0 %v14640_v55  ;;  %v5765_v18 = vld [vmem:[#allocation10 + $0x560] sm:$0xff]  ;;  %v5762_v55 = vld [vmem:[#allocation10 + $0x548] sm:$0xff] }
 0x430   :  { %12137 = vmatprep.subr.bf16.mxu1 %v14642_v43  ;;  %v5766_v43 = vld [vmem:[#allocation10 + $0x568] sm:$0xff]  ;;  %v14688_v58 = vcombine.high %v5761_v54, %v5765_v18  ;;  %v5797_v23 = vld [vmem:[#allocation10 + $0x660] sm:$0xff] }
 0x431   :  { %v14690_v59 = vcombine.high %v5762_v55, %v5766_v43 }
 0x432   :  { %11810 = vmatpush1.bf16.msra.mxu0 %v14639_v60  ;;  %v5773_v60 = vld [vmem:[#allocation10 + $0x5a0] sm:$0xff] }
 0x433   :  { %12138 = vmatpush1.bf16.msra.mxu1 %v14641_v61  ;;  %11820 = vmatprep.subr.bf16.mxu0 %v14648_v36  ;;  %v5774_v61 = vld [vmem:[#allocation10 + $0x5a8] sm:$0xff]  ;;  %v14687_v36 = vcombine.low %v5761_v54, %v5765_v18  ;;  %v14696_v0 = vcombine.high %v5769_v8, %v5773_v60  ;;  %v14695_v52 = vcombine.low %v5769_v8, %v5773_v60  ;;  %v5801_v18 = vld [vmem:[#allocation10 + $0x680] sm:$0xff] }
 0x434   :  { %12148 = vmatprep.subr.bf16.mxu1 %v14650_v62  ;;  %v14689_v62 = vcombine.low %v5762_v55, %v5766_v43  ;;  %v14698_v3 = vcombine.high %v5770_v11, %v5774_v61  ;;  %v5805_v55 = vld [vmem:[#allocation10 + $0x6a0] sm:$0xff]  ;;  %v5802_v43 = vld [vmem:[#allocation10 + $0x688] sm:$0xff] }
 0x435   :  { %11812 = vmatmul.mubr.bf16.vlgmr.msra.gmra.mrb[32].mxu0 %v16510_v6  ;;  %v5809_v60 = vld [vmem:[#allocation10 + $0x6c0] sm:$0xff] }
 0x436   :  { %12140 = vmatmul.mubr.bf16.vlgmr.msra.gmra.mrb[32].mxu1 %v16510_v6  ;;  %11821 = vmatpush1.bf16.msra.mxu0 %v14647_v40  ;;  %v5777_v40 = vld [vmem:[#allocation10 + $0x5c0] sm:$0xff] }
 0x437   :  { %11852 = vmatprep.mubr.bf16.mxu0 %v16512_v14  ;;  %12149 = vmatpush1.bf16.msra.mxu1 %v14649_v44 }
 0x438   :  { %12180 = vmatprep.mubr.bf16.mxu1 %v16512_v14  ;;  %11822 = vmatprep.subr.bf16.mxu0 %v14656_v7  ;;  %v5778_v7 = vld [vmem:[#allocation10 + $0x5c8] sm:$0xff] }
 0x439   :  { %12150 = vmatprep.subr.bf16.mxu1 %v14658_v15  ;;  %v14706_v10 = vcombine.high %v5778_v7, %v5782_v12 }
 0x43a   :  { %11823 = vmatpush1.bf16.msra.mxu0 %v14655_v2 }
 0x43b   :  { %12151 = vmatpush1.bf16.msra.mxu1 %v14657_v26  ;;  %11824 = vmatprep.subr.bf16.mxu0 %v14664_v17  ;;  %v14697_v26 = vcombine.low %v5770_v11, %v5774_v61  ;;  %v14704_v17 = vcombine.high %v5777_v40, %v5781_v4  ;;  %v5813_v11 = vld [vmem:[#allocation10 + $0x6e0] sm:$0xff]  ;;  %v5810_v61 = vld [vmem:[#allocation10 + $0x6c8] sm:$0xff] }
 0x43c   :  { %12152 = vmatprep.subr.bf16.mxu1 %v14666_v35 }
 0x43e   :  { %11825 = vmatpush1.bf16.msra.mxu0 %v14663_v46  ;;  %v5790_v46 = vld [vmem:[#allocation10 + $0x628] sm:$0xff] }
 0x43f   :  { %12153 = vmatpush1.bf16.msra.mxu1 %v14665_v47  ;;  %11826 = vmatprep.subr.bf16.mxu0 %v14672_v48  ;;  %v14703_v47 = vcombine.low %v5777_v40, %v5781_v4  ;;  %v14705_v48 = vcombine.low %v5778_v7, %v5782_v12  ;;  %v14714_v20 = vcombine.high %v5786_v42, %v5790_v46  ;;  %v5817_v4 = vld [vmem:[#allocation10 + $0x700] sm:$0xff]  ;;  %v5818_v12 = vld [vmem:[#allocation10 + $0x708] sm:$0xff] }
 0x440   :  { %12154 = vmatprep.subr.bf16.mxu1 %v14674_v19  ;;  %v14712_v19 = vcombine.high %v5785_v38, %v5789_v41  ;;  %v5821_v7 = vld [vmem:[#allocation10 + $0x720] sm:$0xff] }
 0x442   :  { %11827 = vmatpush1.bf16.msra.mxu0 %v14671_v53  ;;  %v5798_v53 = vld [vmem:[#allocation10 + $0x668] sm:$0xff] }
 0x443   :  { %12155 = vmatpush1.bf16.msra.mxu1 %v14673_v25  ;;  %11828 = vmatprep.subr.bf16.mxu0 %v14680_v49  ;;  %v14711_v25 = vcombine.low %v5785_v38, %v5789_v41  ;;  %v14713_v49 = vcombine.low %v5786_v42, %v5790_v46  ;;  %v14722_v54 = vcombine.high %v5794_v24, %v5798_v53  ;;  %v5830_v38 = vld [vmem:[#allocation10 + $0x768] sm:$0xff] }
 0x444   :  { %12156 = vmatprep.subr.bf16.mxu1 %v14682_v51  ;;  %v14720_v51 = vcombine.high %v5793_v21, %v5797_v23  ;;  %v14743_v41 = vcombine.low %v5817_v4, %v5821_v7 }
 0x446   :  { %11829 = vmatpush1.bf16.msra.mxu0 %v14679_v56  ;;  %v5806_v56 = vld [vmem:[#allocation10 + $0x6a8] sm:$0xff] }
 0x447   :  { %12157 = vmatpush1.bf16.msra.mxu1 %v14681_v57  ;;  %11830 = vmatprep.subr.bf16.mxu0 %v14688_v58  ;;  %v14719_v57 = vcombine.low %v5793_v21, %v5797_v23  ;;  %v14721_v58 = vcombine.low %v5794_v24, %v5798_v53  ;;  %v14730_v8 = vcombine.high %v5802_v43, %v5806_v56  ;;  %v5838_v21 = vld [vmem:[#allocation10 + $0x7a8] sm:$0xff] }
 0x448   :  { %v16518_v1 = vpop.f32.mrb[24].mxu0  ;;  %12158 = vmatprep.subr.bf16.mxu1 %v14690_v59  ;;  %v14728_v59 = vcombine.high %v5801_v18, %v5805_v55  ;;  %v2276_v24 = vrot.slane %v16493_v50, %v16393_v29 }
 0x449   :  { %v16520_v5 = vpop.f32.mrb[24].mxu1  ;;  %v16522_v44 = vpop.f32.mrb[25].mxu0 }
 0x44a   :  { %v16524_v13 = vpop.f32.mrb[25].mxu1  ;;  %v5312_v15 = vpop.f32.mrb[26].mxu0  ;;  %11831 = vmatpush1.bf16.msra.mxu0 %v14687_v36  ;;  %v5814_v36 = vld [vmem:[#allocation10 + $0x6e8] sm:$0xff] }
 0x44b   :  { %v5394_v16 = vpop.f32.mrb[26].mxu1  ;;  %12159 = vmatpush1.bf16.msra.mxu1 %v14689_v62  ;;  %v5313_v2 = vpop.f32.mrb[27].mxu0  ;;  %11832 = vmatprep.subr.bf16.mxu0 %v14696_v0  ;;  %v14727_v62 = vcombine.low %v5801_v18, %v5805_v55  ;;  %v14729_v0 = vcombine.low %v5802_v43, %v5806_v56  ;;  %v14738_v40 = vcombine.high %v5810_v61, %v5814_v36  ;;  %v5822_v15 = vld [vmem:[#allocation10 + $0x728] sm:$0xff] }
 0x44c   :  { %v5395_v35 = vpop.f32.mrb[27].mxu1  ;;  %12160 = vmatprep.subr.bf16.mxu1 %v14698_v3  ;;  %v14736_v3 = vcombine.high %v5809_v60, %v5813_v11  ;;  %v14737_v16 = vcombine.low %v5810_v61, %v5814_v36  ;;  %v14744_v2 = vcombine.high %v5817_v4, %v5821_v7  ;;  %v14745_v42 = vcombine.low %v5818_v12, %v5822_v15  ;;  %v5842_v55 = vld [vmem:[#allocation10 + $0x7c8] sm:$0xff]  ;;  %v5857_v7 = vld [vmem:[#allocation10 + $0x840] sm:$0xff] }
 0x44d   :  { %v5829_v35 = vld [vmem:[#allocation10 + $0x760] sm:$0xff]  ;;  %v2288_v18 = vrot.slane %v16493_v50, %v16403_v37  ;;  %v5846_v43 = vld [vmem:[#allocation10 + $0x7e8] sm:$0xff] }
 0x44e   :  { %11833 = vmatpush1.bf16.msra.mxu0 %v14695_v52  ;;  %v14735_v52 = vcombine.low %v5809_v60, %v5813_v11  ;;  %v5849_v60 = vld [vmem:[#allocation10 + $0x800] sm:$0xff]  ;;  %v5850_v36 = vld [vmem:[#allocation10 + $0x808] sm:$0xff] }
 0x44f   :  { %12161 = vmatpush1.bf16.msra.mxu1 %v14697_v26  ;;  %11834 = vmatprep.subr.bf16.mxu0 %v14704_v17  ;;  %v14746_v26 = vcombine.high %v5818_v12, %v5822_v15  ;;  %v5825_v17 = vld [vmem:[#allocation10 + $0x740] sm:$0xff]  ;;  %v15701_v61 = vadd.f32 %v16489_v9, %v2288_v18 }
 0x450   :  { %12162 = vmatprep.subr.bf16.mxu1 %v14706_v10  ;;  %v5826_v10 = vld [vmem:[#allocation10 + $0x748] sm:$0xff]  ;;  %v14752_v46 = vcombine.high %v5825_v17, %v5829_v35  ;;  %v14751_v23 = vcombine.low %v5825_v17, %v5829_v35  ;;  %v5853_v11 = vld [vmem:[#allocation10 + $0x820] sm:$0xff] }
 0x451   :  { %v14753_v53 = vcombine.low %v5826_v10, %v5830_v38  ;;  %v5566_v4 = vmax.f32 %v15701_v61, 0.0  ;;  %v5861_v12 = vld [vmem:[#allocation10 + $0x860] sm:$0xff]  ;;  %v14775_v15 = vcombine.low %v5849_v60, %v5853_v11  ;;  %v5894_v61 = vld [vmem:[#allocation10 + $0x968] sm:$0xff] }
 0x452   :  { %11835 = vmatpush1.bf16.msra.mxu0 %v14703_v47  ;;  %v14754_v47 = vcombine.high %v5826_v10, %v5830_v38  ;;  %v5865_v17 = vld [vmem:[#allocation10 + $0x880] sm:$0xff] }
 0x453   :  { %12163 = vmatpush1.bf16.msra.mxu1 %v14705_v48  ;;  %11836 = vmatprep.subr.bf16.mxu0 %v14712_v19  ;;  %v5833_v48 = vld [vmem:[#allocation10 + $0x780] sm:$0xff]  ;;  %v16534_v10 = vpack.c.bf16 %v5566_v4, %v5566_v4  ;;  %v5902_v4 = vld [vmem:[#allocation10 + $0x9a8] sm:$0xff] }
 0x454   :  { %12164 = vmatprep.subr.bf16.mxu1 %v14714_v20  ;;  %v5837_v19 = vld [vmem:[#allocation10 + $0x7a0] sm:$0xff]  ;;  %v5834_v20 = vld [vmem:[#allocation10 + $0x788] sm:$0xff] }
 0x455   :  { %v14759_v56 = vcombine.low %v5833_v48, %v5837_v19  ;;  %v5869_v35 = vld [vmem:[#allocation10 + $0x8a0] sm:$0xff] }
 0x456   :  { %11837 = vmatpush1.bf16.msra.mxu0 %v14711_v25  ;;  %v14760_v25 = vcombine.high %v5833_v48, %v5837_v19  ;;  %v14792_v48 = vcombine.high %v5865_v17, %v5869_v35  ;;  %v5885_v18 = vld [vmem:[#allocation10 + $0x920] sm:$0xff] }
 0x457   :  { %12165 = vmatpush1.bf16.msra.mxu1 %v14713_v49  ;;  %11838 = vmatprep.subr.bf16.mxu0 %v14720_v51  ;;  %v14762_v49 = vcombine.high %v5834_v20, %v5838_v21  ;;  %v5841_v51 = vld [vmem:[#allocation10 + $0x7c0] sm:$0xff] }
 0x458   :  { %12166 = vmatprep.subr.bf16.mxu1 %v14722_v54  ;;  %v5845_v54 = vld [vmem:[#allocation10 + $0x7e0] sm:$0xff] }
 0x459   :  { %v14767_v50 = vcombine.low %v5841_v51, %v5845_v54 }
 0x45a   :  { %11839 = vmatpush1.bf16.msra.mxu0 %v14719_v57  ;;  %v15698_v57 = vadd.f32 %v16471_v63, %v2276_v24  ;;  %v5878_v24 = vld [vmem:[#allocation10 + $0x8e8] sm:$0xff] }
 0x45b   :  { %12167 = vmatpush1.bf16.msra.mxu1 %v14721_v58  ;;  %11840 = vmatprep.subr.bf16.mxu0 %v14728_v59  ;;  %v14761_v58 = vcombine.low %v5834_v20, %v5838_v21  ;;  %v14768_v59 = vcombine.high %v5841_v51, %v5845_v54  ;;  %v5873_v20 = vld [vmem:[#allocation10 + $0x8c0] sm:$0xff] }
 0x45c   :  { %12168 = vmatprep.subr.bf16.mxu1 %v14730_v8  ;;  %v14770_v8 = vcombine.high %v5842_v55, %v5846_v43  ;;  %v5877_v21 = vld [vmem:[#allocation10 + $0x8e0] sm:$0xff] }
 0x45d   :  { %v5881_v54 = vld [vmem:[#allocation10 + $0x900] sm:$0xff] }
 0x45e   :  { %11841 = vmatpush1.bf16.msra.mxu0 %v14727_v62  ;;  %v5854_v62 = vld [vmem:[#allocation10 + $0x828] sm:$0xff] }
 0x45f   :  { %12169 = vmatpush1.bf16.msra.mxu1 %v14729_v0  ;;  %11842 = vmatprep.subr.bf16.mxu0 %v14736_v3  ;;  %v5563_v0 = vmax.f32 %v15698_v57, 0.0  ;;  %v14769_v3 = vcombine.low %v5842_v55, %v5846_v43  ;;  %v14778_v63 = vcombine.high %v5850_v36, %v5854_v62  ;;  %v14777_v9 = vcombine.low %v5850_v36, %v5854_v62  ;;  %v5882_v55 = vld [vmem:[#allocation10 + $0x908] sm:$0xff] }
 0x460   :  { %12170 = vmatprep.subr.bf16.mxu1 %v14738_v40  ;;  %v14776_v40 = vcombine.high %v5849_v60, %v5853_v11  ;;  %v5886_v43 = vld [vmem:[#allocation10 + $0x928] sm:$0xff]  ;;  %v5893_v60 = vld [vmem:[#allocation10 + $0x960] sm:$0xff]  ;;  %v14807_v36 = vcombine.low %v5881_v54, %v5885_v18 }
 0x461   :  { %v5890_v11 = vld [vmem:[#allocation10 + $0x948] sm:$0xff]  ;;  %v14809_v62 = vcombine.low %v5882_v55, %v5886_v43 }
 0x462   :  { %11843 = vmatpush1.bf16.msra.mxu0 %v14735_v52  ;;  %v5858_v52 = vld [vmem:[#allocation10 + $0x848] sm:$0xff] }
 0x463   :  { %12171 = vmatpush1.bf16.msra.mxu1 %v14737_v16  ;;  %11844 = vmatprep.subr.bf16.mxu0 %v14744_v2  ;;  %v5862_v16 = vld [vmem:[#allocation10 + $0x868] sm:$0xff]  ;;  %v16532_v2 = vpack.c.bf16 %v5563_v0, %v5563_v0  ;;  %v14818_v0 = vcombine.high %v5890_v11, %v5894_v61 }
 0x464   :  { %12172 = vmatprep.subr.bf16.mxu1 %v14746_v26  ;;  %v14784_v26 = vcombine.high %v5857_v7, %v5861_v12  ;;  %v14786_v38 = vcombine.high %v5858_v52, %v5862_v16 }
 0x466   :  { %11845 = vmatpush1.bf16.msra.mxu0 %v14743_v41  ;;  %v5866_v41 = vld [vmem:[#allocation10 + $0x888] sm:$0xff] }
 0x467   :  { %12173 = vmatpush1.bf16.msra.mxu1 %v14745_v42  ;;  %11846 = vmatprep.subr.bf16.mxu0 %v14752_v46  ;;  %v5870_v42 = vld [vmem:[#allocation10 + $0x8a8] sm:$0xff]  ;;  %v14783_v46 = vcombine.low %v5857_v7, %v5861_v12  ;;  %v14817_v12 = vcombine.low %v5890_v11, %v5894_v61 }
 0x468   :  { %12174 = vmatprep.subr.bf16.mxu1 %v14754_v47  ;;  %v14785_v47 = vcombine.low %v5858_v52, %v5862_v16  ;;  %v14794_v19 = vcombine.high %v5866_v41, %v5870_v42  ;;  %v5905_v16 = vld [vmem:[#allocation10 + $0x9c0] sm:$0xff] }
 0x46a   :  { %11847 = vmatpush1.bf16.msra.mxu0 %v14751_v23  ;;  %v5874_v23 = vld [vmem:[#allocation10 + $0x8c8] sm:$0xff] }
 0x46b   :  { %12175 = vmatpush1.bf16.msra.mxu1 %v14753_v53  ;;  %11848 = vmatprep.subr.bf16.mxu0 %v14760_v25  ;;  %v14791_v53 = vcombine.low %v5865_v17, %v5869_v35  ;;  %v14793_v25 = vcombine.low %v5866_v41, %v5870_v42  ;;  %v14802_v51 = vcombine.high %v5874_v23, %v5878_v24  ;;  %v5910_v17 = vld [vmem:[#allocation10 + $0x9e8] sm:$0xff] }
 0x46c   :  { %12176 = vmatprep.subr.bf16.mxu1 %v14762_v49  ;;  %v14800_v49 = vcombine.high %v5873_v20, %v5877_v21  ;;  %v14801_v57 = vcombine.low %v5874_v23, %v5878_v24 }
 0x46e   :  { %11849 = vmatpush1.bf16.msra.mxu0 %v14759_v56  ;;  %v14799_v56 = vcombine.low %v5873_v20, %v5877_v21 }
 0x46f   :  { %12177 = vmatpush1.bf16.msra.mxu1 %v14761_v58  ;;  %11850 = vmatprep.subr.bf16.mxu0 %v14768_v59  ;;  %v14808_v58 = vcombine.high %v5881_v54, %v5885_v18  ;;  %v14810_v59 = vcombine.high %v5882_v55, %v5886_v43 }
 0x470   :  { %12178 = vmatprep.subr.bf16.mxu1 %v14770_v8  ;;  %v5889_v8 = vld [vmem:[#allocation10 + $0x940] sm:$0xff] }
 0x471   :  { %v14815_v7 = vcombine.low %v5889_v8, %v5893_v60 }
 0x472   :  { %11851 = vmatpush1.bf16.msra.mxu0 %v14767_v50  ;;  %v14816_v50 = vcombine.high %v5889_v8, %v5893_v60 }
 0x473   :  { %12179 = vmatpush1.bf16.msra.mxu1 %v14769_v3  ;;  %11861 = vmatprep.subr.bf16.mxu0 %v14776_v40  ;;  %v5897_v3 = vld [vmem:[#allocation10 + $0x980] sm:$0xff] }
 0x474   :  { %12189 = vmatprep.subr.bf16.mxu1 %v14778_v63  ;;  %v5901_v40 = vld [vmem:[#allocation10 + $0x9a0] sm:$0xff]  ;;  %v5898_v63 = vld [vmem:[#allocation10 + $0x988] sm:$0xff] }
 0x475   :  { %11853 = vmatmul.mubr.bf16.vlgmr.msra.gmra.mrb[32].mxu0 %v16532_v2  ;;  %v14826_v52 = vcombine.high %v5898_v63, %v5902_v4  ;;  %v14823_v35 = vcombine.low %v5897_v3, %v5901_v40 }
 0x476   :  { %12181 = vmatmul.mubr.bf16.vlgmr.msra.gmra.mrb[32].mxu1 %v16532_v2  ;;  %11862 = vmatpush1.bf16.msra.mxu0 %v14775_v15  ;;  %v14824_v15 = vcombine.high %v5897_v3, %v5901_v40 }
 0x477   :  { %11893 = vmatprep.mubr.bf16.mxu0 %v16534_v10  ;;  %12190 = vmatpush1.bf16.msra.mxu1 %v14777_v9  ;;  %v5909_v9 = vld [vmem:[#allocation10 + $0x9e0] sm:$0xff] }
 0x478   :  { %12221 = vmatprep.mubr.bf16.mxu1 %v16534_v10  ;;  %11863 = vmatprep.subr.bf16.mxu0 %v14784_v26  ;;  %v5906_v26 = vld [vmem:[#allocation10 + $0x9c8] sm:$0xff]  ;;  %v14832_v41 = vcombine.high %v5905_v16, %v5909_v9  ;;  %v14831_v20 = vcombine.low %v5905_v16, %v5909_v9 }
 0x479   :  { %12191 = vmatprep.subr.bf16.mxu1 %v14786_v38  ;;  %v14825_v38 = vcombine.low %v5898_v63, %v5902_v4  ;;  %v14834_v42 = vcombine.high %v5906_v26, %v5910_v17  ;;  %v14833_v21 = vcombine.low %v5906_v26, %v5910_v17 }
 0x47a   :  { %11864 = vmatpush1.bf16.msra.mxu0 %v14783_v46  ;;  %v5913_v46 = vld [vmem:[#allocation10 + $0xa00] sm:$0xff] }
 0x47b   :  { %12192 = vmatpush1.bf16.msra.mxu1 %v14785_v47  ;;  %11865 = vmatprep.subr.bf16.mxu0 %v14792_v48  ;;  %v5917_v47 = vld [vmem:[#allocation10 + $0xa20] sm:$0xff]  ;;  %v5914_v48 = vld [vmem:[#allocation10 + $0xa08] sm:$0xff] }
 0x47c   :  { %12193 = vmatprep.subr.bf16.mxu1 %v14794_v19  ;;  %v5918_v19 = vld [vmem:[#allocation10 + $0xa28] sm:$0xff]  ;;  %v14840_v23 = vcombine.high %v5913_v46, %v5917_v47  ;;  %v14839_v54 = vcombine.low %v5913_v46, %v5917_v47 }
 0x47d   :  { %v14842_v24 = vcombine.high %v5914_v48, %v5918_v19  ;;  %v14841_v18 = vcombine.low %v5914_v48, %v5918_v19 }
 0x47e   :  { %11866 = vmatpush1.bf16.msra.mxu0 %v14791_v53  ;;  %v5921_v53 = vld [vmem:[#allocation10 + $0xa40] sm:$0xff] }
 0x47f   :  { %12194 = vmatpush1.bf16.msra.mxu1 %v14793_v25  ;;  %11867 = vmatprep.subr.bf16.mxu0 %v14800_v49  ;;  %v5925_v25 = vld [vmem:[#allocation10 + $0xa60] sm:$0xff]  ;;  %v5922_v49 = vld [vmem:[#allocation10 + $0xa48] sm:$0xff] }
 0x480   :  { %12195 = vmatprep.subr.bf16.mxu1 %v14802_v51  ;;  %v5926_v51 = vld [vmem:[#allocation10 + $0xa68] sm:$0xff]  ;;  %v14848_v55 = vcombine.high %v5921_v53, %v5925_v25  ;;  %v14847_v8 = vcombine.low %v5921_v53, %v5925_v25  ;;  %v16540_v25 = vld [vmem:[#allocation8] sm:$0xff] }
 0x481   :  { %v14850_v43 = vcombine.high %v5922_v49, %v5926_v51  ;;  %v14849_v60 = vcombine.low %v5922_v49, %v5926_v51  ;;  %v2284_v49 = vrot.slane %v16540_v25, %v16401_v34 }
 0x482   :  { %11868 = vmatpush1.bf16.msra.mxu0 %v14799_v56  ;;  %v5929_v56 = vld [vmem:[#allocation10 + $0xa80] sm:$0xff] }
 0x483   :  { %12196 = vmatpush1.bf16.msra.mxu1 %v14801_v57  ;;  %11869 = vmatprep.subr.bf16.mxu0 %v14808_v58  ;;  %v5933_v57 = vld [vmem:[#allocation10 + $0xaa0] sm:$0xff]  ;;  %v5930_v58 = vld [vmem:[#allocation10 + $0xa88] sm:$0xff] }
 0x484   :  { %12197 = vmatprep.subr.bf16.mxu1 %v14810_v59  ;;  %v5934_v59 = vld [vmem:[#allocation10 + $0xaa8] sm:$0xff]  ;;  %v14856_v11 = vcombine.high %v5929_v56, %v5933_v57  ;;  %v14855_v3 = vcombine.low %v5929_v56, %v5933_v57  ;;  %v2296_v56 = vrot.slane %v16540_v25, %v16410_v45 }
 0x485   :  { %v14858_v61 = vcombine.high %v5930_v58, %v5934_v59  ;;  %v14857_v40 = vcombine.low %v5930_v58, %v5934_v59  ;;  %v5970_v57 = vld [vmem:[#allocation10 + $0xbc8] sm:$0xff] }
 0x486   :  { %11870 = vmatpush1.bf16.msra.mxu0 %v14807_v36  ;;  %v5937_v36 = vld [vmem:[#allocation10 + $0xac0] sm:$0xff]  ;;  %v5974_v58 = vld [vmem:[#allocation10 + $0xbe8] sm:$0xff] }
 0x487   :  { %12198 = vmatpush1.bf16.msra.mxu1 %v14809_v62  ;;  %11871 = vmatprep.subr.bf16.mxu0 %v14816_v50  ;;  %v5941_v62 = vld [vmem:[#allocation10 + $0xae0] sm:$0xff]  ;;  %v5938_v50 = vld [vmem:[#allocation10 + $0xac8] sm:$0xff] }
 0x488   :  { %12199 = vmatprep.subr.bf16.mxu1 %v14818_v0  ;;  %v5942_v0 = vld [vmem:[#allocation10 + $0xae8] sm:$0xff]  ;;  %v14864_v63 = vcombine.high %v5937_v36, %v5941_v62  ;;  %v14863_v16 = vcombine.low %v5937_v36, %v5941_v62  ;;  %v5977_v36 = vld [vmem:[#allocation10 + $0xc00] sm:$0xff] }
 0x489   :  { %v14866_v4 = vcombine.high %v5938_v50, %v5942_v0  ;;  %v14865_v9 = vcombine.low %v5938_v50, %v5942_v0  ;;  %v5981_v62 = vld [vmem:[#allocation10 + $0xc20] sm:$0xff]  ;;  %v15703_v50 = vadd.f32 %v16491_v32, %v2296_v56  ;;  %v5978_v0 = vld [vmem:[#allocation10 + $0xc08] sm:$0xff] }
 0x48a   :  { %11872 = vmatpush1.bf16.msra.mxu0 %v14815_v7  ;;  %v5945_v7 = vld [vmem:[#allocation10 + $0xb00] sm:$0xff] }
 0x48b   :  { %12200 = vmatpush1.bf16.msra.mxu1 %v14817_v12  ;;  %11873 = vmatprep.subr.bf16.mxu0 %v14824_v15  ;;  %v5949_v12 = vld [vmem:[#allocation10 + $0xb20] sm:$0xff]  ;;  %v5946_v15 = vld [vmem:[#allocation10 + $0xb08] sm:$0xff] }
 0x48c   :  { %12201 = vmatprep.subr.bf16.mxu1 %v14826_v52  ;;  %v5950_v52 = vld [vmem:[#allocation10 + $0xb28] sm:$0xff]  ;;  %v14872_v26 = vcombine.high %v5945_v7, %v5949_v12  ;;  %v14871_v46 = vcombine.low %v5945_v7, %v5949_v12  ;;  %v14904_v7 = vcombine.high %v5977_v36, %v5981_v62  ;;  %v5568_v12 = vmax.f32 %v15703_v50, 0.0  ;;  %v6009_v56 = vld [vmem:[#allocation10 + $0xd00] sm:$0xff] }
 0x48d   :  { %v14874_v17 = vcombine.high %v5946_v15, %v5950_v52  ;;  %v14873_v47 = vcombine.low %v5946_v15, %v5950_v52  ;;  %v5985_v15 = vld [vmem:[#allocation10 + $0xc40] sm:$0xff]  ;;  %v6018_v50 = vld [vmem:[#allocation10 + $0xd48] sm:$0xff] }
 0x48e   :  { %11874 = vmatpush1.bf16.msra.mxu0 %v14823_v35  ;;  %v5953_v35 = vld [vmem:[#allocation10 + $0xb40] sm:$0xff] }
 0x48f   :  { %12202 = vmatpush1.bf16.msra.mxu1 %v14825_v38  ;;  %11875 = vmatprep.subr.bf16.mxu0 %v14832_v41  ;;  %v5957_v38 = vld [vmem:[#allocation10 + $0xb60] sm:$0xff]  ;;  %v5954_v41 = vld [vmem:[#allocation10 + $0xb48] sm:$0xff] }
 0x490   :  { %12203 = vmatprep.subr.bf16.mxu1 %v14834_v42  ;;  %v5958_v42 = vld [vmem:[#allocation10 + $0xb68] sm:$0xff]  ;;  %v14880_v48 = vcombine.high %v5953_v35, %v5957_v38  ;;  %v14879_v53 = vcombine.low %v5953_v35, %v5957_v38  ;;  %v5989_v52 = vld [vmem:[#allocation10 + $0xc60] sm:$0xff] }
 0x491   :  { %v14882_v19 = vcombine.high %v5954_v41, %v5958_v42  ;;  %v14881_v51 = vcombine.low %v5954_v41, %v5958_v42  ;;  %v14912_v35 = vcombine.high %v5985_v15, %v5989_v52  ;;  %v5993_v38 = vld [vmem:[#allocation10 + $0xc80] sm:$0xff]  ;;  %v16550_v42 = vpack.c.bf16 %v5568_v12, %v5568_v12  ;;  %v6026_v12 = vld [vmem:[#allocation10 + $0xd88] sm:$0xff] }
 0x492   :  { %11876 = vmatpush1.bf16.msra.mxu0 %v14831_v20  ;;  %v5961_v20 = vld [vmem:[#allocation10 + $0xb80] sm:$0xff] }
 0x493   :  { %12204 = vmatpush1.bf16.msra.mxu1 %v14833_v21  ;;  %11877 = vmatprep.subr.bf16.mxu0 %v14840_v23  ;;  %v5965_v21 = vld [vmem:[#allocation10 + $0xba0] sm:$0xff]  ;;  %v5962_v23 = vld [vmem:[#allocation10 + $0xb88] sm:$0xff] }
 0x494   :  { %12205 = vmatprep.subr.bf16.mxu1 %v14842_v24  ;;  %v5966_v24 = vld [vmem:[#allocation10 + $0xba8] sm:$0xff]  ;;  %v14887_v59 = vcombine.low %v5961_v20, %v5965_v21  ;;  %v5997_v41 = vld [vmem:[#allocation10 + $0xca0] sm:$0xff] }
 0x496   :  { %11878 = vmatpush1.bf16.msra.mxu0 %v14839_v54  ;;  %v14888_v54 = vcombine.high %v5961_v20, %v5965_v21  ;;  %v14920_v21 = vcombine.high %v5993_v38, %v5997_v41 }
 0x497   :  { %12206 = vmatpush1.bf16.msra.mxu1 %v14841_v18  ;;  %11879 = vmatprep.subr.bf16.mxu0 %v14848_v55  ;;  %v14890_v18 = vcombine.high %v5962_v23, %v5966_v24  ;;  %v5969_v55 = vld [vmem:[#allocation10 + $0xbc0] sm:$0xff] }
 0x498   :  { %12207 = vmatprep.subr.bf16.mxu1 %v14850_v43  ;;  %v5973_v43 = vld [vmem:[#allocation10 + $0xbe0] sm:$0xff] }
 0x49a   :  { %11880 = vmatpush1.bf16.msra.mxu0 %v14847_v8  ;;  %v15700_v8 = vadd.f32 %v16485_v22, %v2284_v49  ;;  %v6002_v49 = vld [vmem:[#allocation10 + $0xcc8] sm:$0xff] }
 0x49b   :  { %12208 = vmatpush1.bf16.msra.mxu1 %v14849_v60  ;;  %11881 = vmatprep.subr.bf16.mxu0 %v14856_v11  ;;  %v14889_v60 = vcombine.low %v5962_v23, %v5966_v24  ;;  %v14896_v11 = vcombine.high %v5969_v55, %v5973_v43  ;;  %v6001_v24 = vld [vmem:[#allocation10 + $0xcc0] sm:$0xff] }
 0x49c   :  { %12209 = vmatprep.subr.bf16.mxu1 %v14858_v61  ;;  %v14898_v61 = vcombine.high %v5970_v57, %v5974_v58 }
 0x49e   :  { %11882 = vmatpush1.bf16.msra.mxu0 %v14855_v3  ;;  %v5982_v3 = vld [vmem:[#allocation10 + $0xc28] sm:$0xff] }
 0x49f   :  { %12210 = vmatpush1.bf16.msra.mxu1 %v14857_v40  ;;  %11883 = vmatprep.subr.bf16.mxu0 %v14864_v63  ;;  %v14895_v40 = vcombine.low %v5969_v55, %v5973_v43  ;;  %v5565_v63 = vmax.f32 %v15700_v8, 0.0  ;;  %v14906_v22 = vcombine.high %v5978_v0, %v5982_v3  ;;  %v14905_v32 = vcombine.low %v5978_v0, %v5982_v3  ;;  %v6022_v0 = vld [vmem:[#allocation10 + $0xd68] sm:$0xff] }
 0x4a0   :  { %12211 = vmatprep.subr.bf16.mxu1 %v14866_v4  ;;  %v14897_v4 = vcombine.low %v5970_v57, %v5974_v58  ;;  %v6013_v57 = vld [vmem:[#allocation10 + $0xd20] sm:$0xff]  ;;  %v6010_v58 = vld [vmem:[#allocation10 + $0xd08] sm:$0xff] }
 0x4a1   :  { %v14935_v3 = vcombine.low %v6009_v56, %v6013_v57 }
 0x4a2   :  { %11884 = vmatpush1.bf16.msra.mxu0 %v14863_v16  ;;  %v14903_v16 = vcombine.low %v5977_v36, %v5981_v62  ;;  %v6017_v36 = vld [vmem:[#allocation10 + $0xd40] sm:$0xff] }
 0x4a3   :  { %12212 = vmatpush1.bf16.msra.mxu1 %v14865_v9  ;;  %11885 = vmatprep.subr.bf16.mxu0 %v14872_v26  ;;  %v5986_v9 = vld [vmem:[#allocation10 + $0xc48] sm:$0xff]  ;;  %v6021_v62 = vld [vmem:[#allocation10 + $0xd60] sm:$0xff] }
 0x4a4   :  { %12213 = vmatprep.subr.bf16.mxu1 %v14874_v17  ;;  %v5990_v26 = vld [vmem:[#allocation10 + $0xc68] sm:$0xff]  ;;  %v16548_v17 = vpack.c.bf16 %v5565_v63, %v5565_v63  ;;  %v14944_v63 = vcombine.high %v6017_v36, %v6021_v62 }
 0x4a5   :  { %v14913_v20 = vcombine.low %v5986_v9, %v5990_v26 }
 0x4a6   :  { %11886 = vmatpush1.bf16.msra.mxu0 %v14871_v46  ;;  %v14914_v46 = vcombine.high %v5986_v9, %v5990_v26 }
 0x4a7   :  { %12214 = vmatpush1.bf16.msra.mxu1 %v14873_v47  ;;  %11887 = vmatprep.subr.bf16.mxu0 %v14880_v48  ;;  %v5994_v47 = vld [vmem:[#allocation10 + $0xc88] sm:$0xff] }
 0x4a8   :  { %12215 = vmatprep.subr.bf16.mxu1 %v14882_v19  ;;  %v5998_v48 = vld [vmem:[#allocation10 + $0xca8] sm:$0xff]  ;;  %v14911_v19 = vcombine.low %v5985_v15, %v5989_v52  ;;  %v14943_v52 = vcombine.low %v6017_v36, %v6021_v62 }
 0x4a9   :  { %v14922_v23 = vcombine.high %v5994_v47, %v5998_v48  ;;  %v6030_v15 = vld [vmem:[#allocation10 + $0xda8] sm:$0xff] }
 0x4aa   :  { %11888 = vmatpush1.bf16.msra.mxu0 %v14879_v53  ;;  %v6005_v53 = vld [vmem:[#allocation10 + $0xce0] sm:$0xff]  ;;  %v6054_v36 = vld [vmem:[#allocation10 + $0xe68] sm:$0xff] }
 0x4ab   :  { %12216 = vmatpush1.bf16.msra.mxu1 %v14881_v51  ;;  %11889 = vmatprep.subr.bf16.mxu0 %v14888_v54  ;;  %v6006_v51 = vld [vmem:[#allocation10 + $0xce8] sm:$0xff]  ;;  %v14919_v54 = vcombine.low %v5993_v38, %v5997_v41  ;;  %v14928_v55 = vcombine.high %v6001_v24, %v6005_v53  ;;  %v14927_v8 = vcombine.low %v6001_v24, %v6005_v53  ;;  %v6037_v38 = vld [vmem:[#allocation10 + $0xde0] sm:$0xff] }
 0x4ac   :  { %12217 = vmatprep.subr.bf16.mxu1 %v14890_v18  ;;  %v14921_v18 = vcombine.low %v5994_v47, %v5998_v48  ;;  %v14930_v43 = vcombine.high %v6002_v49, %v6006_v51  ;;  %v6034_v47 = vld [vmem:[#allocation10 + $0xdc8] sm:$0xff]  ;;  %v14953_v53 = vcombine.low %v6026_v12, %v6030_v15 }
 0x4ad   :  { %v6038_v48 = vld [vmem:[#allocation10 + $0xde8] sm:$0xff] }
 0x4ae   :  { %11890 = vmatpush1.bf16.msra.mxu0 %v14887_v59  ;;  %v6014_v59 = vld [vmem:[#allocation10 + $0xd28] sm:$0xff] }
 0x4af   :  { %12218 = vmatpush1.bf16.msra.mxu1 %v14889_v60  ;;  %11891 = vmatprep.subr.bf16.mxu0 %v14896_v11  ;;  %v14929_v60 = vcombine.low %v6002_v49, %v6006_v51  ;;  %v14936_v11 = vcombine.high %v6009_v56, %v6013_v57  ;;  %v6046_v56 = vld [vmem:[#allocation10 + $0xe28] sm:$0xff] }
 0x4b0   :  { %12219 = vmatprep.subr.bf16.mxu1 %v14898_v61  ;;  %v14938_v61 = vcombine.high %v6010_v58, %v6014_v59 }
 0x4b2   :  { %11892 = vmatpush1.bf16.msra.mxu0 %v14895_v40  ;;  %v14937_v40 = vcombine.low %v6010_v58, %v6014_v59  ;;  %v14961_v58 = vcombine.low %v6034_v47, %v6038_v48 }
 0x4b3   :  { %12220 = vmatpush1.bf16.msra.mxu1 %v14897_v4  ;;  %11902 = vmatprep.subr.bf16.mxu0 %v14904_v7  ;;  %v14946_v4 = vcombine.high %v6018_v50, %v6022_v0  ;;  %v6025_v7 = vld [vmem:[#allocation10 + $0xd80] sm:$0xff] }
 0x4b4   :  { %12230 = vmatprep.subr.bf16.mxu1 %v14906_v22  ;;  %v6029_v22 = vld [vmem:[#allocation10 + $0xda0] sm:$0xff] }
 0x4b5   :  { %11894 = vmatmul.mubr.bf16.vlgmr.msra.gmra.mrb[32].mxu0 %v16548_v17  ;;  %v14952_v9 = vcombine.high %v6025_v7, %v6029_v22 }
 0x4b6   :  { %12222 = vmatmul.mubr.bf16.vlgmr.msra.gmra.mrb[32].mxu1 %v16548_v17  ;;  %11903 = vmatpush1.bf16.msra.mxu0 %v14903_v16  ;;  %v14945_v16 = vcombine.low %v6018_v50, %v6022_v0 }
 0x4b7   :  { %11934 = vmatprep.mubr.bf16.mxu0 %v16550_v42  ;;  %12231 = vmatpush1.bf16.msra.mxu1 %v14905_v32  ;;  %v14954_v32 = vcombine.high %v6026_v12, %v6030_v15 }
 0x4b8   :  { %12262 = vmatprep.mubr.bf16.mxu1 %v16550_v42  ;;  %11904 = vmatprep.subr.bf16.mxu0 %v14912_v35  ;;  %v6033_v35 = vld [vmem:[#allocation10 + $0xdc0] sm:$0xff] }
 0x4b9   :  { %12232 = vmatprep.subr.bf16.mxu1 %v14914_v46  ;;  %v14960_v49 = vcombine.high %v6033_v35, %v6037_v38  ;;  %v14959_v57 = vcombine.low %v6033_v35, %v6037_v38  ;;  %v6070_v35 = vld [vmem:[#allocation10 + $0xee8] sm:$0xff] }
 0x4ba   :  { %11905 = vmatpush1.bf16.msra.mxu0 %v14911_v19 }
 0x4bb   :  { %12233 = vmatpush1.bf16.msra.mxu1 %v14913_v20  ;;  %11906 = vmatprep.subr.bf16.mxu0 %v14920_v21  ;;  %v14951_v21 = vcombine.low %v6025_v7, %v6029_v22  ;;  %v6062_v7 = vld [vmem:[#allocation10 + $0xea8] sm:$0xff] }
 0x4bc   :  { %12234 = vmatprep.subr.bf16.mxu1 %v14922_v23 }
 0x4be   :  { %11907 = vmatpush1.bf16.msra.mxu0 %v14919_v54  ;;  %v14962_v54 = vcombine.high %v6034_v47, %v6038_v48 }
 0x4bf   :  { %12235 = vmatpush1.bf16.msra.mxu1 %v14921_v18  ;;  %11908 = vmatprep.subr.bf16.mxu0 %v14928_v55  ;;  %v6041_v18 = vld [vmem:[#allocation10 + $0xe00] sm:$0xff] }
 0x4c0   :  { %12236 = vmatprep.subr.bf16.mxu1 %v14930_v43  ;;  %v6045_v55 = vld [vmem:[#allocation10 + $0xe20] sm:$0xff]  ;;  %v6042_v43 = vld [vmem:[#allocation10 + $0xe08] sm:$0xff] }
 0x4c1   :  { %v14968_v59 = vcombine.high %v6041_v18, %v6045_v55  ;;  %v14967_v62 = vcombine.low %v6041_v18, %v6045_v55  ;;  %v14969_v50 = vcombine.low %v6042_v43, %v6046_v56  ;;  %v6081_v55 = vld [vmem:[#allocation10 + $0xf40] sm:$0xff] }
 0x4c2   :  { %11909 = vmatpush1.bf16.msra.mxu0 %v14927_v8  ;;  %v14970_v8 = vcombine.high %v6042_v43, %v6046_v56  ;;  %v6085_v43 = vld [vmem:[#allocation10 + $0xf60] sm:$0xff]  ;;  %v6082_v56 = vld [vmem:[#allocation10 + $0xf48] sm:$0xff] }
 0x4c3   :  { %12237 = vmatpush1.bf16.msra.mxu1 %v14929_v60  ;;  %11910 = vmatprep.subr.bf16.mxu0 %v14936_v11  ;;  %v6049_v60 = vld [vmem:[#allocation10 + $0xe40] sm:$0xff] }
 0x4c4   :  { %12238 = vmatprep.subr.bf16.mxu1 %v14938_v61  ;;  %v6053_v11 = vld [vmem:[#allocation10 + $0xe60] sm:$0xff]  ;;  %v6050_v61 = vld [vmem:[#allocation10 + $0xe48] sm:$0xff] }
 0x4c5   :  { %v14976_v0 = vcombine.high %v6049_v60, %v6053_v11  ;;  %v14975_v22 = vcombine.low %v6049_v60, %v6053_v11  ;;  %v14977_v12 = vcombine.low %v6050_v61, %v6054_v36  ;;  %v6089_v11 = vld [vmem:[#allocation10 + $0xf80] sm:$0xff] }
 0x4c6   :  { %11911 = vmatpush1.bf16.msra.mxu0 %v14935_v3  ;;  %v14978_v3 = vcombine.high %v6050_v61, %v6054_v36  ;;  %v6093_v61 = vld [vmem:[#allocation10 + $0xfa0] sm:$0xff]  ;;  %v6090_v36 = vld [vmem:[#allocation10 + $0xf88] sm:$0xff] }
 0x4c7   :  { %12239 = vmatpush1.bf16.msra.mxu1 %v14937_v40  ;;  %11912 = vmatprep.subr.bf16.mxu0 %v14944_v63  ;;  %v6057_v40 = vld [vmem:[#allocation10 + $0xe80] sm:$0xff] }
 0x4c8   :  { %v16556_v26 = vpop.f32.mrb[28].mxu0  ;;  %12240 = vmatprep.subr.bf16.mxu1 %v14946_v4  ;;  %v6061_v63 = vld [vmem:[#allocation10 + $0xea0] sm:$0xff]  ;;  %v6058_v4 = vld [vmem:[#allocation10 + $0xe88] sm:$0xff] }
 0x4c9   :  { %v16558_v41 = vpop.f32.mrb[28].mxu1  ;;  %v16560_v46 = vpop.f32.mrb[29].mxu0  ;;  %v14984_v15 = vcombine.high %v6057_v40, %v6061_v63  ;;  %v14983_v38 = vcombine.low %v6057_v40, %v6061_v63  ;;  %v14985_v47 = vcombine.low %v6058_v4, %v6062_v7  ;;  %v15016_v63 = vcombine.high %v6089_v11, %v6093_v61 }
 0x4ca   :  { %v16562_v19 = vpop.f32.mrb[29].mxu1  ;;  %v5476_v20 = vpop.f32.mrb[30].mxu0  ;;  %11913 = vmatpush1.bf16.msra.mxu0 %v14943_v52  ;;  %v14986_v52 = vcombine.high %v6058_v4, %v6062_v7  ;;  %v6097_v7 = vld [vmem:[#allocation10 + $0xfc0] sm:$0xff] }
 0x4cb   :  { %v5558_v23 = vpop.f32.mrb[30].mxu1  ;;  %12241 = vmatpush1.bf16.msra.mxu1 %v14945_v16  ;;  %v5477_v24 = vpop.f32.mrb[31].mxu0  ;;  %11914 = vmatprep.subr.bf16.mxu0 %v14952_v9  ;;  %v6065_v16 = vld [vmem:[#allocation10 + $0xec0] sm:$0xff] }
 0x4cc   :  { %v5559_v51 = vpop.f32.mrb[31].mxu1  ;;  %12242 = vmatprep.subr.bf16.mxu1 %v14954_v32  ;;  %v6069_v9 = vld [vmem:[#allocation10 + $0xee0] sm:$0xff]  ;;  %v6066_v32 = vld [vmem:[#allocation10 + $0xec8] sm:$0xff] }
 0x4cd   :  { %v14992_v48 = vcombine.high %v6065_v16, %v6069_v9  ;;  %v14994_v20 = vcombine.high %v6066_v32, %v6070_v35  ;;  %v6077_v23 = vld [vmem:[#allocation10 + $0xf20] sm:$0xff]  ;;  %v6074_v24 = vld [vmem:[#allocation10 + $0xf08] sm:$0xff]  ;;  %v14993_v51 = vcombine.low %v6066_v32, %v6070_v35 }
 0x4ce   :  { %11915 = vmatpush1.bf16.msra.mxu0 %v14951_v21  ;;  %v6073_v21 = vld [vmem:[#allocation10 + $0xf00] sm:$0xff] }
 0x4cf   :  { %12243 = vmatpush1.bf16.msra.mxu1 %v14953_v53  ;;  %11916 = vmatprep.subr.bf16.mxu0 %v14960_v49  ;;  %v6078_v53 = vld [vmem:[#allocation10 + $0xf28] sm:$0xff]  ;;  %v14991_v49 = vcombine.low %v6065_v16, %v6069_v9  ;;  %v15015_v16 = vcombine.low %v6089_v11, %v6093_v61 }
 0x4d0   :  { %12244 = vmatprep.subr.bf16.mxu1 %v14962_v54  ;;  %v15000_v54 = vcombine.high %v6073_v21, %v6077_v23  ;;  %v15002_v18 = vcombine.high %v6074_v24, %v6078_v53  ;;  %v6122_v61 = vld [vmem:[#allocation10 + $0x1088] sm:$0xff] }
 0x4d2   :  { %11917 = vmatpush1.bf16.msra.mxu0 %v14959_v57  ;;  %v6086_v57 = vld [vmem:[#allocation10 + $0xf68] sm:$0xff] }
 0x4d3   :  { %12245 = vmatpush1.bf16.msra.mxu1 %v14961_v58  ;;  %11918 = vmatprep.subr.bf16.mxu0 %v14968_v59  ;;  %v14999_v58 = vcombine.low %v6073_v21, %v6077_v23  ;;  %v15001_v59 = vcombine.low %v6074_v24, %v6078_v53  ;;  %v15010_v60 = vcombine.high %v6082_v56, %v6086_v57  ;;  %v6110_v21 = vld [vmem:[#allocation10 + $0x1028] sm:$0xff] }
 0x4d4   :  { %12246 = vmatprep.subr.bf16.mxu1 %v14970_v8  ;;  %v15008_v8 = vcombine.high %v6081_v55, %v6085_v43  ;;  %v15009_v40 = vcombine.low %v6082_v56, %v6086_v57  ;;  %v6118_v56 = vld [vmem:[#allocation10 + $0x1068] sm:$0xff] }
 0x4d6   :  { %11919 = vmatpush1.bf16.msra.mxu0 %v14967_v62  ;;  %v6094_v62 = vld [vmem:[#allocation10 + $0xfa8] sm:$0xff] }
 0x4d7   :  { %12247 = vmatpush1.bf16.msra.mxu1 %v14969_v50  ;;  %11920 = vmatprep.subr.bf16.mxu0 %v14976_v0  ;;  %v16564_v50 = vld [vmem:[#allocation8 + $0x8] sm:$0xff]  ;;  %v15007_v0 = vcombine.low %v6081_v55, %v6085_v43  ;;  %v15018_v4 = vcombine.high %v6090_v36, %v6094_v62  ;;  %v6114_v43 = vld [vmem:[#allocation10 + $0x1048] sm:$0xff] }
 0x4d8   :  { %12248 = vmatprep.subr.bf16.mxu1 %v14978_v3  ;;  %v2292_v3 = vrot.slane %v16540_v25, %v16406_v39  ;;  %v15017_v25 = vcombine.low %v6090_v36, %v6094_v62  ;;  %v15042_v11 = vcombine.high %v6114_v43, %v6118_v56  ;;  %v6126_v36 = vld [vmem:[#allocation10 + $0x10a8] sm:$0xff] }
 0x4da   :  { %11921 = vmatpush1.bf16.msra.mxu0 %v14975_v22  ;;  %v6101_v22 = vld [vmem:[#allocation10 + $0xfe0] sm:$0xff]  ;;  %v15702_v9 = vadd.f32 %v16487_v27, %v2292_v3 }
 0x4db   :  { %12249 = vmatpush1.bf16.msra.mxu1 %v14977_v12  ;;  %11922 = vmatprep.subr.bf16.mxu0 %v14984_v15  ;;  %v2304_v12 = vrot.slane %v16564_v50, %v16399_v33  ;;  %v6098_v15 = vld [vmem:[#allocation10 + $0xfc8] sm:$0xff]  ;;  %v15024_v32 = vcombine.high %v6097_v7, %v6101_v22  ;;  %v15023_v23 = vcombine.low %v6097_v7, %v6101_v22 }
 0x4dc   :  { %12250 = vmatprep.subr.bf16.mxu1 %v14986_v52  ;;  %v6102_v52 = vld [vmem:[#allocation10 + $0xfe8] sm:$0xff]  ;;  %v5567_v24 = vmax.f32 %v15702_v9, 0.0  ;;  %v6137_v9 = vld [vmem:[#allocation10 + $0x1100] sm:$0xff] }
 0x4dd   :  { %v15026_v35 = vcombine.high %v6098_v15, %v6102_v52  ;;  %v15025_v53 = vcombine.low %v6098_v15, %v6102_v52  ;;  %v6130_v7 = vld [vmem:[#allocation10 + $0x10c8] sm:$0xff]  ;;  %v15049_v15 = vcombine.low %v6122_v61, %v6126_v36 }
 0x4de   :  { %11923 = vmatpush1.bf16.msra.mxu0 %v14983_v38  ;;  %v6105_v38 = vld [vmem:[#allocation10 + $0x1000] sm:$0xff]  ;;  %v16572_v57 = vpack.c.bf16 %v5567_v24, %v5567_v24  ;;  %v6134_v22 = vld [vmem:[#allocation10 + $0x10e8] sm:$0xff] }
 0x4df   :  { %12251 = vmatpush1.bf16.msra.mxu1 %v14985_v47  ;;  %11924 = vmatprep.subr.bf16.mxu0 %v14992_v48  ;;  %v6109_v47 = vld [vmem:[#allocation10 + $0x1020] sm:$0xff]  ;;  %v15705_v48 = vadd.f32 %v16522_v44, %v2304_v12  ;;  %v6146_v24 = vld [vmem:[#allocation10 + $0x1148] sm:$0xff] }
 0x4e0   :  { %12252 = vmatprep.subr.bf16.mxu1 %v14994_v20  ;;  %v6106_v20 = vld [vmem:[#allocation10 + $0x1008] sm:$0xff]  ;;  %v15031_v55 = vcombine.low %v6105_v38, %v6109_v47 }
 0x4e1   :  { %v15034_v27 = vcombine.high %v6106_v20, %v6110_v21  ;;  %v15033_v44 = vcombine.low %v6106_v20, %v6110_v21  ;;  %v6145_v21 = vld [vmem:[#allocation10 + $0x1140] sm:$0xff] }
 0x4e2   :  { %11925 = vmatpush1.bf16.msra.mxu0 %v14991_v49  ;;  %v15032_v49 = vcombine.high %v6105_v38, %v6109_v47  ;;  %v15057_v47 = vcombine.low %v6130_v7, %v6134_v22 }
 0x4e3   :  { %12253 = vmatpush1.bf16.msra.mxu1 %v14993_v51  ;;  %11926 = vmatprep.subr.bf16.mxu0 %v15000_v54  ;;  %v5570_v51 = vmax.f32 %v15705_v48, 0.0  ;;  %v6113_v54 = vld [vmem:[#allocation10 + $0x1040] sm:$0xff] }
 0x4e4   :  { %12254 = vmatprep.subr.bf16.mxu1 %v15002_v18  ;;  %v6117_v18 = vld [vmem:[#allocation10 + $0x1060] sm:$0xff] }
 0x4e5   :  { %v15039_v62 = vcombine.low %v6113_v54, %v6117_v18 }
 0x4e6   :  { %11927 = vmatpush1.bf16.msra.mxu0 %v14999_v58  ;;  %v15040_v58 = vcombine.high %v6113_v54, %v6117_v18  ;;  %v6153_v18 = vld [vmem:[#allocation10 + $0x1180] sm:$0xff] }
 0x4e7   :  { %12255 = vmatpush1.bf16.msra.mxu1 %v15001_v59  ;;  %11928 = vmatprep.subr.bf16.mxu0 %v15008_v8  ;;  %v6121_v59 = vld [vmem:[#allocation10 + $0x1080] sm:$0xff] }
 0x4e8   :  { %12256 = vmatprep.subr.bf16.mxu1 %v15010_v60  ;;  %v6125_v8 = vld [vmem:[#allocation10 + $0x10a0] sm:$0xff]  ;;  %v16574_v60 = vpack.c.bf16 %v5570_v51, %v5570_v51 }
 0x4e9   :  { %v15048_v3 = vcombine.high %v6121_v59, %v6125_v8  ;;  %v15047_v12 = vcombine.low %v6121_v59, %v6125_v8 }
 0x4ea   :  { %11929 = vmatpush1.bf16.msra.mxu0 %v15007_v0  ;;  %v15041_v0 = vcombine.low %v6114_v43, %v6118_v56  ;;  %v6154_v43 = vld [vmem:[#allocation10 + $0x1188] sm:$0xff] }
 0x4eb   :  { %12257 = vmatpush1.bf16.msra.mxu1 %v15009_v40  ;;  %11930 = vmatprep.subr.bf16.mxu0 %v15016_v63  ;;  %v15050_v40 = vcombine.high %v6122_v61, %v6126_v36  ;;  %v6129_v63 = vld [vmem:[#allocation10 + $0x10c0] sm:$0xff]  ;;  %v6158_v56 = vld [vmem:[#allocation10 + $0x11a8] sm:$0xff] }
 0x4ec   :  { %12258 = vmatprep.subr.bf16.mxu1 %v15018_v4  ;;  %v6133_v4 = vld [vmem:[#allocation10 + $0x10e0] sm:$0xff]  ;;  %v15082_v8 = vcombine.high %v6154_v43, %v6158_v56  ;;  %v6162_v36 = vld [vmem:[#allocation10 + $0x11c8] sm:$0xff] }
 0x4ed   :  { %v15056_v52 = vcombine.high %v6129_v63, %v6133_v4  ;;  %v15055_v38 = vcombine.low %v6129_v63, %v6133_v4  ;;  %v6165_v61 = vld [vmem:[#allocation10 + $0x11e0] sm:$0xff] }
 0x4ee   :  { %11931 = vmatpush1.bf16.msra.mxu0 %v15015_v16  ;;  %v15058_v16 = vcombine.high %v6130_v7, %v6134_v22  ;;  %v6169_v4 = vld [vmem:[#allocation10 + $0x1200] sm:$0xff]  ;;  %v6170_v22 = vld [vmem:[#allocation10 + $0x1208] sm:$0xff] }
 0x4ef   :  { %12259 = vmatpush1.bf16.msra.mxu1 %v15017_v25  ;;  %11932 = vmatprep.subr.bf16.mxu0 %v15024_v32  ;;  %v6141_v25 = vld [vmem:[#allocation10 + $0x1120] sm:$0xff]  ;;  %v6138_v32 = vld [vmem:[#allocation10 + $0x1108] sm:$0xff] }
 0x4f0   :  { %12260 = vmatprep.subr.bf16.mxu1 %v15026_v35  ;;  %v6142_v35 = vld [vmem:[#allocation10 + $0x1128] sm:$0xff]  ;;  %v15064_v48 = vcombine.high %v6137_v9, %v6141_v25  ;;  %v6173_v7 = vld [vmem:[#allocation10 + $0x1220] sm:$0xff] }
 0x4f1   :  { %v15066_v20 = vcombine.high %v6138_v32, %v6142_v35 }
 0x4f2   :  { %11933 = vmatpush1.bf16.msra.mxu0 %v15023_v23  ;;  %v6149_v23 = vld [vmem:[#allocation10 + $0x1160] sm:$0xff] }
 0x4f3   :  { %12261 = vmatpush1.bf16.msra.mxu1 %v15025_v53  ;;  %11943 = vmatprep.subr.bf16.mxu0 %v15032_v49  ;;  %v6150_v53 = vld [vmem:[#allocation10 + $0x1168] sm:$0xff]  ;;  %v15063_v49 = vcombine.low %v6137_v9, %v6141_v25  ;;  %v15072_v51 = vcombine.high %v6145_v21, %v6149_v23  ;;  %v6177_v25 = vld [vmem:[#allocation10 + $0x1240] sm:$0xff] }
 0x4f4   :  { %12271 = vmatprep.subr.bf16.mxu1 %v15034_v27  ;;  %v15065_v27 = vcombine.low %v6138_v32, %v6142_v35  ;;  %v15074_v54 = vcombine.high %v6146_v24, %v6150_v53  ;;  %v6181_v32 = vld [vmem:[#allocation10 + $0x1260] sm:$0xff]  ;;  %v6178_v35 = vld [vmem:[#allocation10 + $0x1248] sm:$0xff] }
 0x4f5   :  { %11935 = vmatmul.mubr.bf16.vlgmr.msra.gmra.mrb[32].mxu0 %v16572_v57 }
 0x4f6   :  { %12263 = vmatmul.mubr.bf16.vlgmr.msra.gmra.mrb[32].mxu1 %v16572_v57  ;;  %11944 = vmatpush1.bf16.msra.mxu0 %v15031_v55  ;;  %v6157_v55 = vld [vmem:[#allocation10 + $0x11a0] sm:$0xff] }
 0x4f7   :  { %11975 = vmatprep.mubr.bf16.mxu0 %v16574_v60  ;;  %12272 = vmatpush1.bf16.msra.mxu1 %v15033_v44  ;;  %v15071_v44 = vcombine.low %v6145_v21, %v6149_v23  ;;  %v15080_v59 = vcombine.high %v6153_v18, %v6157_v55  ;;  %v6185_v23 = vld [vmem:[#allocation10 + $0x1280] sm:$0xff] }
 0x4f8   :  { %12303 = vmatprep.mubr.bf16.mxu1 %v16574_v60  ;;  %11945 = vmatprep.subr.bf16.mxu0 %v15040_v58  ;;  %v15073_v58 = vcombine.low %v6146_v24, %v6150_v53  ;;  %v6189_v24 = vld [vmem:[#allocation10 + $0x12a0] sm:$0xff]  ;;  %v6186_v53 = vld [vmem:[#allocation10 + $0x1288] sm:$0xff] }
 0x4f9   :  { %12273 = vmatprep.subr.bf16.mxu1 %v15042_v11  ;;  %v6161_v11 = vld [vmem:[#allocation10 + $0x11c0] sm:$0xff] }
 0x4fa   :  { %11946 = vmatpush1.bf16.msra.mxu0 %v15039_v62  ;;  %v6166_v62 = vld [vmem:[#allocation10 + $0x11e8] sm:$0xff] }
 0x4fb   :  { %12274 = vmatpush1.bf16.msra.mxu1 %v15041_v0  ;;  %11947 = vmatprep.subr.bf16.mxu0 %v15048_v3  ;;  %v15079_v0 = vcombine.low %v6153_v18, %v6157_v55  ;;  %v15081_v3 = vcombine.low %v6154_v43, %v6158_v56  ;;  %v15090_v63 = vcombine.high %v6162_v36, %v6166_v62  ;;  %v6193_v55 = vld [vmem:[#allocation10 + $0x12c0] sm:$0xff]  ;;  %v6194_v56 = vld [vmem:[#allocation10 + $0x12c8] sm:$0xff] }
 0x4fc   :  { %12275 = vmatprep.subr.bf16.mxu1 %v15050_v40  ;;  %v15088_v40 = vcombine.high %v6161_v11, %v6165_v61  ;;  %v6197_v43 = vld [vmem:[#allocation10 + $0x12e0] sm:$0xff] }
 0x4fe   :  { %11948 = vmatpush1.bf16.msra.mxu0 %v15047_v12  ;;  %v6174_v12 = vld [vmem:[#allocation10 + $0x1228] sm:$0xff] }
 0x4ff   :  { %12276 = vmatpush1.bf16.msra.mxu1 %v15049_v15  ;;  %11949 = vmatprep.subr.bf16.mxu0 %v15056_v52  ;;  %v15087_v15 = vcombine.low %v6161_v11, %v6165_v61  ;;  %v15089_v52 = vcombine.low %v6162_v36, %v6166_v62  ;;  %v15098_v9 = vcombine.high %v6170_v22, %v6174_v12  ;;  %v6201_v61 = vld [vmem:[#allocation10 + $0x1300] sm:$0xff]  ;;  %v6202_v62 = vld [vmem:[#allocation10 + $0x1308] sm:$0xff] }
 0x500   :  { %12277 = vmatprep.subr.bf16.mxu1 %v15058_v16  ;;  %v15096_v16 = vcombine.high %v6169_v4, %v6173_v7  ;;  %v6205_v36 = vld [vmem:[#allocation10 + $0x1320] sm:$0xff] }
 0x502   :  { %11950 = vmatpush1.bf16.msra.mxu0 %v15055_v38  ;;  %v6182_v38 = vld [vmem:[#allocation10 + $0x1268] sm:$0xff] }
 0x503   :  { %12278 = vmatpush1.bf16.msra.mxu1 %v15057_v47  ;;  %11951 = vmatprep.subr.bf16.mxu0 %v15064_v48  ;;  %v15095_v47 = vcombine.low %v6169_v4, %v6173_v7  ;;  %v15097_v48 = vcombine.low %v6170_v22, %v6174_v12  ;;  %v15106_v21 = vcombine.high %v6178_v35, %v6182_v38  ;;  %v6209_v7 = vld [vmem:[#allocation10 + $0x1340] sm:$0xff]  ;;  %v6210_v12 = vld [vmem:[#allocation10 + $0x1348] sm:$0xff] }
 0x504   :  { %12279 = vmatprep.subr.bf16.mxu1 %v15066_v20  ;;  %v15104_v20 = vcombine.high %v6177_v25, %v6181_v32  ;;  %v6213_v22 = vld [vmem:[#allocation10 + $0x1360] sm:$0xff] }
 0x506   :  { %11952 = vmatpush1.bf16.msra.mxu0 %v15063_v49  ;;  %v6190_v49 = vld [vmem:[#allocation10 + $0x12a8] sm:$0xff] }
 0x507   :  { %12280 = vmatpush1.bf16.msra.mxu1 %v15065_v27  ;;  %11953 = vmatprep.subr.bf16.mxu0 %v15072_v51  ;;  %v15103_v27 = vcombine.low %v6177_v25, %v6181_v32  ;;  %v15105_v51 = vcombine.low %v6178_v35, %v6182_v38  ;;  %v15114_v18 = vcombine.high %v6186_v53, %v6190_v49  ;;  %v6217_v32 = vld [vmem:[#allocation10 + $0x1380] sm:$0xff]  ;;  %v6218_v38 = vld [vmem:[#allocation10 + $0x1388] sm:$0xff] }
 0x508   :  { %12281 = vmatprep.subr.bf16.mxu1 %v15074_v54  ;;  %v15112_v54 = vcombine.high %v6185_v23, %v6189_v24  ;;  %v6221_v35 = vld [vmem:[#allocation10 + $0x13a0] sm:$0xff] }
 0x50a   :  { %11954 = vmatpush1.bf16.msra.mxu0 %v15071_v44  ;;  %v6198_v44 = vld [vmem:[#allocation10 + $0x12e8] sm:$0xff] }
 0x50b   :  { %12282 = vmatpush1.bf16.msra.mxu1 %v15073_v58  ;;  %11955 = vmatprep.subr.bf16.mxu0 %v15080_v59  ;;  %v15111_v58 = vcombine.low %v6185_v23, %v6189_v24  ;;  %v15113_v59 = vcombine.low %v6186_v53, %v6190_v49  ;;  %v15122_v11 = vcombine.high %v6194_v56, %v6198_v44  ;;  %v6225_v53 = vld [vmem:[#allocation10 + $0x13c0] sm:$0xff] }
 0x50c   :  { %12283 = vmatprep.subr.bf16.mxu1 %v15082_v8  ;;  %v15120_v8 = vcombine.high %v6193_v55, %v6197_v43  ;;  %v15144_v23 = vcombine.high %v6217_v32, %v6221_v35  ;;  %v6229_v49 = vld [vmem:[#allocation10 + $0x13e0] sm:$0xff] }
 0x50e   :  { %11956 = vmatpush1.bf16.msra.mxu0 %v15079_v0  ;;  %v6206_v0 = vld [vmem:[#allocation10 + $0x1328] sm:$0xff] }
 0x50f   :  { %12284 = vmatpush1.bf16.msra.mxu1 %v15081_v3  ;;  %11957 = vmatprep.subr.bf16.mxu0 %v15088_v40  ;;  %v15119_v3 = vcombine.low %v6193_v55, %v6197_v43  ;;  %v15121_v40 = vcombine.low %v6194_v56, %v6198_v44  ;;  %v15130_v4 = vcombine.high %v6202_v62, %v6206_v0 }
 0x510   :  { %12285 = vmatprep.subr.bf16.mxu1 %v15090_v63  ;;  %v15128_v63 = vcombine.high %v6201_v61, %v6205_v36  ;;  %v15152_v56 = vcombine.high %v6225_v53, %v6229_v49 }
 0x512   :  { %11958 = vmatpush1.bf16.msra.mxu0 %v15087_v15  ;;  %v6214_v15 = vld [vmem:[#allocation10 + $0x1368] sm:$0xff] }
 0x513   :  { %12286 = vmatpush1.bf16.msra.mxu1 %v15089_v52  ;;  %11959 = vmatprep.subr.bf16.mxu0 %v15096_v16  ;;  %v15127_v52 = vcombine.low %v6201_v61, %v6205_v36  ;;  %v15129_v16 = vcombine.low %v6202_v62, %v6206_v0  ;;  %v15138_v25 = vcombine.high %v6210_v12, %v6214_v15  ;;  %v6238_v61 = vld [vmem:[#allocation10 + $0x1428] sm:$0xff] }
 0x514   :  { %12287 = vmatprep.subr.bf16.mxu1 %v15098_v9  ;;  %v15136_v9 = vcombine.high %v6209_v7, %v6213_v22  ;;  %v15151_v36 = vcombine.low %v6225_v53, %v6229_v49  ;;  %v6258_v53 = vld [vmem:[#allocation10 + $0x14c8] sm:$0xff] }
 0x515   :  { %v6262_v49 = vld [vmem:[#allocation10 + $0x14e8] sm:$0xff] }
 0x516   :  { %11960 = vmatpush1.bf16.msra.mxu0 %v15095_v47  ;;  %v6222_v47 = vld [vmem:[#allocation10 + $0x13a8] sm:$0xff] }
 0x517   :  { %12288 = vmatpush1.bf16.msra.mxu1 %v15097_v48  ;;  %11961 = vmatprep.subr.bf16.mxu0 %v15104_v20  ;;  %v15135_v48 = vcombine.low %v6209_v7, %v6213_v22  ;;  %v2300_v20 = vrot.slane %v16564_v50, %v16395_v30  ;;  %v15146_v24 = vcombine.high %v6218_v38, %v6222_v47  ;;  %v6242_v22 = vld [vmem:[#allocation10 + $0x1448] sm:$0xff] }
 0x518   :  { %12289 = vmatprep.subr.bf16.mxu1 %v15106_v21  ;;  %v15137_v21 = vcombine.low %v6210_v12, %v6214_v15  ;;  %v15145_v43 = vcombine.low %v6218_v38, %v6222_v47  ;;  %v6246_v12 = vld [vmem:[#allocation10 + $0x1468] sm:$0xff] }
 0x519   :  { %v15704_v55 = vadd.f32 %v16518_v1, %v2300_v20  ;;  %v6254_v38 = vld [vmem:[#allocation10 + $0x14a8] sm:$0xff] }
 0x51a   :  { %11962 = vmatpush1.bf16.msra.mxu0 %v15103_v27  ;;  %v2312_v27 = vrot.slane %v16564_v50, %v16397_v31 }
 0x51b   :  { %12290 = vmatpush1.bf16.msra.mxu1 %v15105_v51  ;;  %11963 = vmatprep.subr.bf16.mxu0 %v15112_v54  ;;  %v6226_v51 = vld [vmem:[#allocation10 + $0x13c8] sm:$0xff]  ;;  %v5569_v62 = vmax.f32 %v15704_v55, 0.0  ;;  %v6265_v55 = vld [vmem:[#allocation10 + $0x1500] sm:$0xff] }
 0x51c   :  { %12291 = vmatprep.subr.bf16.mxu1 %v15114_v18  ;;  %v6230_v54 = vld [vmem:[#allocation10 + $0x13e8] sm:$0xff]  ;;  %v15143_v18 = vcombine.low %v6217_v32, %v6221_v35  ;;  %v15170_v32 = vcombine.high %v6242_v22, %v6246_v12 }
 0x51d   :  { %v15154_v44 = vcombine.high %v6226_v51, %v6230_v54  ;;  %v15153_v0 = vcombine.low %v6226_v51, %v6230_v54  ;;  %v16586_v15 = vpack.c.bf16 %v5569_v62, %v5569_v62  ;;  %v6250_v35 = vld [vmem:[#allocation10 + $0x1488] sm:$0xff] }
 0x51e   :  { %11964 = vmatpush1.bf16.msra.mxu0 %v15111_v58  ;;  %v6233_v58 = vld [vmem:[#allocation10 + $0x1400] sm:$0xff]  ;;  %v15177_v51 = vcombine.low %v6250_v35, %v6254_v38  ;;  %v6274_v62 = vld [vmem:[#allocation10 + $0x1548] sm:$0xff] }
 0x51f   :  { %12292 = vmatpush1.bf16.msra.mxu1 %v15113_v59  ;;  %11965 = vmatprep.subr.bf16.mxu0 %v15120_v8  ;;  %v6237_v59 = vld [vmem:[#allocation10 + $0x1420] sm:$0xff]  ;;  %v15707_v8 = vadd.f32 %v16524_v13, %v2312_v27 }
 0x520   :  { %12293 = vmatprep.subr.bf16.mxu1 %v15122_v11  ;;  %v6234_v11 = vld [vmem:[#allocation10 + $0x1408] sm:$0xff]  ;;  %v15159_v7 = vcombine.low %v6233_v58, %v6237_v59 }
 0x521   :  { %v15162_v1 = vcombine.high %v6234_v11, %v6238_v61  ;;  %v15161_v13 = vcombine.low %v6234_v11, %v6238_v61  ;;  %v6273_v61 = vld [vmem:[#allocation10 + $0x1540] sm:$0xff] }
 0x522   :  { %11966 = vmatpush1.bf16.msra.mxu0 %v15119_v3  ;;  %v15160_v3 = vcombine.high %v6233_v58, %v6237_v59  ;;  %v15185_v59 = vcombine.low %v6258_v53, %v6262_v49 }
 0x523   :  { %12294 = vmatpush1.bf16.msra.mxu1 %v15121_v40  ;;  %11967 = vmatprep.subr.bf16.mxu0 %v15128_v63  ;;  %v5572_v40 = vmax.f32 %v15707_v8, 0.0  ;;  %v6241_v63 = vld [vmem:[#allocation10 + $0x1440] sm:$0xff] }
 0x524   :  { %12295 = vmatprep.subr.bf16.mxu1 %v15130_v4  ;;  %v6245_v4 = vld [vmem:[#allocation10 + $0x1460] sm:$0xff] }
 0x525   :  { %v15167_v47 = vcombine.low %v6241_v63, %v6245_v4 }
 0x526   :  { %11968 = vmatpush1.bf16.msra.mxu0 %v15127_v52  ;;  %v15168_v52 = vcombine.high %v6241_v63, %v6245_v4  ;;  %v6281_v4 = vld [vmem:[#allocation10 + $0x1580] sm:$0xff] }
 0x527   :  { %12296 = vmatpush1.bf16.msra.mxu1 %v15129_v16  ;;  %11969 = vmatprep.subr.bf16.mxu0 %v15136_v9  ;;  %v6249_v16 = vld [vmem:[#allocation10 + $0x1480] sm:$0xff] }
 0x528   :  { %12297 = vmatprep.subr.bf16.mxu1 %v15138_v25  ;;  %v6253_v9 = vld [vmem:[#allocation10 + $0x14a0] sm:$0xff]  ;;  %v16588_v25 = vpack.c.bf16 %v5572_v40, %v5572_v40 }
 0x529   :  { %v15176_v20 = vcombine.high %v6249_v16, %v6253_v9  ;;  %v15175_v27 = vcombine.low %v6249_v16, %v6253_v9 }
 0x52a   :  { %11970 = vmatpush1.bf16.msra.mxu0 %v15135_v48  ;;  %v15169_v48 = vcombine.low %v6242_v22, %v6246_v12  ;;  %v6282_v22 = vld [vmem:[#allocation10 + $0x1588] sm:$0xff] }
 0x52b   :  { %12298 = vmatpush1.bf16.msra.mxu1 %v15137_v21  ;;  %11971 = vmatprep.subr.bf16.mxu0 %v15144_v23  ;;  %v15178_v21 = vcombine.high %v6250_v35, %v6254_v38  ;;  %v6257_v23 = vld [vmem:[#allocation10 + $0x14c0] sm:$0xff]  ;;  %v6286_v12 = vld [vmem:[#allocation10 + $0x15a8] sm:$0xff] }
 0x52c   :  { %12299 = vmatprep.subr.bf16.mxu1 %v15146_v24  ;;  %v6261_v24 = vld [vmem:[#allocation10 + $0x14e0] sm:$0xff]  ;;  %v15210_v9 = vcombine.high %v6282_v22, %v6286_v12  ;;  %v6290_v38 = vld [vmem:[#allocation10 + $0x15c8] sm:$0xff] }
 0x52d   :  { %v15184_v54 = vcombine.high %v6257_v23, %v6261_v24  ;;  %v15183_v58 = vcombine.low %v6257_v23, %v6261_v24  ;;  %v6293_v35 = vld [vmem:[#allocation10 + $0x15e0] sm:$0xff] }
 0x52e   :  { %11972 = vmatpush1.bf16.msra.mxu0 %v15143_v18  ;;  %v15186_v18 = vcombine.high %v6258_v53, %v6262_v49  ;;  %v6297_v24 = vld [vmem:[#allocation10 + $0x1600] sm:$0xff]  ;;  %v6298_v49 = vld [vmem:[#allocation10 + $0x1608] sm:$0xff] }
 0x52f   :  { %12300 = vmatpush1.bf16.msra.mxu1 %v15145_v43  ;;  %11973 = vmatprep.subr.bf16.mxu0 %v15152_v56  ;;  %v6269_v43 = vld [vmem:[#allocation10 + $0x1520] sm:$0xff]  ;;  %v6266_v56 = vld [vmem:[#allocation10 + $0x1508] sm:$0xff] }
 0x530   :  { %12301 = vmatprep.subr.bf16.mxu1 %v15154_v44  ;;  %v6270_v44 = vld [vmem:[#allocation10 + $0x1528] sm:$0xff]  ;;  %v15192_v8 = vcombine.high %v6265_v55, %v6269_v43  ;;  %v6301_v53 = vld [vmem:[#allocation10 + $0x1620] sm:$0xff] }
 0x531   :  { %v15194_v11 = vcombine.high %v6266_v56, %v6270_v44 }
 0x532   :  { %11974 = vmatpush1.bf16.msra.mxu0 %v15151_v36  ;;  %v6277_v36 = vld [vmem:[#allocation10 + $0x1560] sm:$0xff] }
 0x533   :  { %12302 = vmatpush1.bf16.msra.mxu1 %v15153_v0  ;;  %11984 = vmatprep.subr.bf16.mxu0 %v15160_v3  ;;  %v6278_v0 = vld [vmem:[#allocation10 + $0x1568] sm:$0xff]  ;;  %v15191_v3 = vcombine.low %v6265_v55, %v6269_v43  ;;  %v15200_v40 = vcombine.high %v6273_v61, %v6277_v36  ;;  %v6305_v43 = vld [vmem:[#allocation10 + $0x1640] sm:$0xff] }
 0x534   :  { %12312 = vmatprep.subr.bf16.mxu1 %v15162_v1  ;;  %v15193_v1 = vcombine.low %v6266_v56, %v6270_v44  ;;  %v15202_v63 = vcombine.high %v6274_v62, %v6278_v0  ;;  %v6309_v56 = vld [vmem:[#allocation10 + $0x1660] sm:$0xff]  ;;  %v6306_v44 = vld [vmem:[#allocation10 + $0x1648] sm:$0xff] }
 0x535   :  { %11976 = vmatmul.mubr.bf16.vlgmr.msra.gmra.mrb[32].mxu0 %v16586_v15 }
 0x536   :  { %12304 = vmatmul.mubr.bf16.vlgmr.msra.gmra.mrb[32].mxu1 %v16586_v15  ;;  %11985 = vmatpush1.bf16.msra.mxu0 %v15159_v7  ;;  %v6285_v7 = vld [vmem:[#allocation10 + $0x15a0] sm:$0xff] }
 0x537   :  { %12016 = vmatprep.mubr.bf16.mxu0 %v16588_v25  ;;  %12313 = vmatpush1.bf16.msra.mxu1 %v15161_v13  ;;  %v15199_v13 = vcombine.low %v6273_v61, %v6277_v36  ;;  %v15208_v16 = vcombine.high %v6281_v4, %v6285_v7  ;;  %v6313_v36 = vld [vmem:[#allocation10 + $0x1680] sm:$0xff] }
 0x538   :  { %12344 = vmatprep.mubr.bf16.mxu1 %v16588_v25  ;;  %11986 = vmatprep.subr.bf16.mxu0 %v15168_v52  ;;  %v15201_v52 = vcombine.low %v6274_v62, %v6278_v0  ;;  %v6317_v62 = vld [vmem:[#allocation10 + $0x16a0] sm:$0xff]  ;;  %v6314_v0 = vld [vmem:[#allocation10 + $0x1688] sm:$0xff] }
 0x539   :  { %12314 = vmatprep.subr.bf16.mxu1 %v15170_v32  ;;  %v6289_v32 = vld [vmem:[#allocation10 + $0x15c0] sm:$0xff] }
 0x53a   :  { %11987 = vmatpush1.bf16.msra.mxu0 %v15167_v47  ;;  %v6294_v47 = vld [vmem:[#allocation10 + $0x15e8] sm:$0xff] }
 0x53b   :  { %12315 = vmatpush1.bf16.msra.mxu1 %v15169_v48  ;;  %11988 = vmatprep.subr.bf16.mxu0 %v15176_v20  ;;  %v15207_v48 = vcombine.low %v6281_v4, %v6285_v7  ;;  %v15209_v20 = vcombine.low %v6282_v22, %v6286_v12  ;;  %v15218_v23 = vcombine.high %v6290_v38, %v6294_v47  ;;  %v6321_v7 = vld [vmem:[#allocation10 + $0x16c0] sm:$0xff]  ;;  %v6322_v12 = vld [vmem:[#allocation10 + $0x16c8] sm:$0xff] }
 0x53c   :  { %12316 = vmatprep.subr.bf16.mxu1 %v15178_v21  ;;  %v15216_v21 = vcombine.high %v6289_v32, %v6293_v35  ;;  %v6325_v22 = vld [vmem:[#allocation10 + $0x16e0] sm:$0xff] }
 0x53e   :  { %11989 = vmatpush1.bf16.msra.mxu0 %v15175_v27  ;;  %v6302_v27 = vld [vmem:[#allocation10 + $0x1628] sm:$0xff] }
 0x53f   :  { %12317 = vmatpush1.bf16.msra.mxu1 %v15177_v51  ;;  %11990 = vmatprep.subr.bf16.mxu0 %v15184_v54  ;;  %v15215_v51 = vcombine.low %v6289_v32, %v6293_v35  ;;  %v15217_v54 = vcombine.low %v6290_v38, %v6294_v47  ;;  %v15226_v55 = vcombine.high %v6298_v49, %v6302_v27  ;;  %v6329_v35 = vld [vmem:[#allocation10 + $0x1700] sm:$0xff]  ;;  %v6330_v47 = vld [vmem:[#allocation10 + $0x1708] sm:$0xff] }
 0x540   :  { %12318 = vmatprep.subr.bf16.mxu1 %v15186_v18  ;;  %v15224_v18 = vcombine.high %v6297_v24, %v6301_v53  ;;  %v6333_v38 = vld [vmem:[#allocation10 + $0x1720] sm:$0xff] }
 0x542   :  { %11991 = vmatpush1.bf16.msra.mxu0 %v15183_v58  ;;  %v6310_v58 = vld [vmem:[#allocation10 + $0x1668] sm:$0xff] }
 0x543   :  { %12319 = vmatpush1.bf16.msra.mxu1 %v15185_v59  ;;  %11992 = vmatprep.subr.bf16.mxu0 %v15192_v8  ;;  %v15223_v59 = vcombine.low %v6297_v24, %v6301_v53  ;;  %v15225_v8 = vcombine.low %v6298_v49, %v6302_v27  ;;  %v15234_v61 = vcombine.high %v6306_v44, %v6310_v58  ;;  %v6337_v53 = vld [vmem:[#allocation10 + $0x1740] sm:$0xff]  ;;  %v6338_v27 = vld [vmem:[#allocation10 + $0x1748] sm:$0xff] }
 0x544   :  { %12320 = vmatprep.subr.bf16.mxu1 %v15194_v11  ;;  %v15232_v11 = vcombine.high %v6305_v43, %v6309_v56  ;;  %v6341_v49 = vld [vmem:[#allocation10 + $0x1760] sm:$0xff] }
 0x546   :  { %11993 = vmatpush1.bf16.msra.mxu0 %v15191_v3  ;;  %v6318_v3 = vld [vmem:[#allocation10 + $0x16a8] sm:$0xff] }
 0x547   :  { %12321 = vmatpush1.bf16.msra.mxu1 %v15193_v1  ;;  %11994 = vmatprep.subr.bf16.mxu0 %v15200_v40  ;;  %v15231_v1 = vcombine.low %v6305_v43, %v6309_v56  ;;  %v15233_v40 = vcombine.low %v6306_v44, %v6310_v58  ;;  %v15242_v4 = vcombine.high %v6314_v0, %v6318_v3  ;;  %v6345_v56 = vld [vmem:[#allocation10 + $0x1780] sm:$0xff]  ;;  %v6346_v58 = vld [vmem:[#allocation10 + $0x1788] sm:$0xff] }
 0x548   :  { %12322 = vmatprep.subr.bf16.mxu1 %v15202_v63  ;;  %v15240_v63 = vcombine.high %v6313_v36, %v6317_v62  ;;  %v6349_v44 = vld [vmem:[#allocation10 + $0x17a0] sm:$0xff] }
 0x54a   :  { %11995 = vmatpush1.bf16.msra.mxu0 %v15199_v13  ;;  %v6326_v13 = vld [vmem:[#allocation10 + $0x16e8] sm:$0xff] }
 0x54b   :  { %12323 = vmatpush1.bf16.msra.mxu1 %v15201_v52  ;;  %11996 = vmatprep.subr.bf16.mxu0 %v15208_v16  ;;  %v15239_v52 = vcombine.low %v6313_v36, %v6317_v62  ;;  %v15241_v16 = vcombine.low %v6314_v0, %v6318_v3  ;;  %v15250_v32 = vcombine.high %v6322_v12, %v6326_v13  ;;  %v6353_v0 = vld [vmem:[#allocation10 + $0x17c0] sm:$0xff] }
 0x54c   :  { %12324 = vmatprep.subr.bf16.mxu1 %v15210_v9  ;;  %v15248_v9 = vcombine.high %v6321_v7, %v6325_v22  ;;  %v15272_v36 = vcombine.high %v6345_v56, %v6349_v44  ;;  %v6357_v3 = vld [vmem:[#allocation10 + $0x17e0] sm:$0xff] }
 0x54e   :  { %11997 = vmatpush1.bf16.msra.mxu0 %v15207_v48  ;;  %v6334_v48 = vld [vmem:[#allocation10 + $0x1728] sm:$0xff] }
 0x54f   :  { %12325 = vmatpush1.bf16.msra.mxu1 %v15209_v20  ;;  %11998 = vmatprep.subr.bf16.mxu0 %v15216_v21  ;;  %v15247_v20 = vcombine.low %v6321_v7, %v6325_v22  ;;  %v15249_v21 = vcombine.low %v6322_v12, %v6326_v13  ;;  %v15258_v24 = vcombine.high %v6330_v47, %v6334_v48 }
 0x550   :  { %12326 = vmatprep.subr.bf16.mxu1 %v15218_v23  ;;  %v15256_v23 = vcombine.high %v6329_v35, %v6333_v38  ;;  %v15280_v12 = vcombine.high %v6353_v0, %v6357_v3 }
 0x552   :  { %11999 = vmatpush1.bf16.msra.mxu0 %v15215_v51  ;;  %v6342_v51 = vld [vmem:[#allocation10 + $0x1768] sm:$0xff] }
 0x553   :  { %12327 = vmatpush1.bf16.msra.mxu1 %v15217_v54  ;;  %12000 = vmatprep.subr.bf16.mxu0 %v15224_v18  ;;  %v15255_v54 = vcombine.low %v6329_v35, %v6333_v38  ;;  %v15257_v18 = vcombine.low %v6330_v47, %v6334_v48  ;;  %v15266_v43 = vcombine.high %v6338_v27, %v6342_v51  ;;  %v6366_v35 = vld [vmem:[#allocation10 + $0x1828] sm:$0xff] }
 0x554   :  { %12328 = vmatprep.subr.bf16.mxu1 %v15226_v55  ;;  %v15264_v55 = vcombine.high %v6337_v53, %v6341_v49 }
 0x556   :  { %12001 = vmatpush1.bf16.msra.mxu0 %v15223_v59  ;;  %v6350_v59 = vld [vmem:[#allocation10 + $0x17a8] sm:$0xff] }
 0x557   :  { %12329 = vmatpush1.bf16.msra.mxu1 %v15225_v8  ;;  %12002 = vmatprep.subr.bf16.mxu0 %v15232_v11  ;;  %v15263_v8 = vcombine.low %v6337_v53, %v6341_v49  ;;  %v2308_v11 = vrot.slane %v16564_v50, %v16393_v29  ;;  %v15274_v62 = vcombine.high %v6346_v58, %v6350_v59  ;;  %v6370_v53 = vld [vmem:[#allocation10 + $0x1848] sm:$0xff] }
 0x558   :  { %12330 = vmatprep.subr.bf16.mxu1 %v15234_v61  ;;  %v15265_v61 = vcombine.low %v6338_v27, %v6342_v51  ;;  %v15273_v22 = vcombine.low %v6346_v58, %v6350_v59  ;;  %v6374_v49 = vld [vmem:[#allocation10 + $0x1868] sm:$0xff] }
 0x559   :  { %v15706_v7 = vadd.f32 %v16520_v5, %v2308_v11  ;;  %v15297_v59 = vcombine.low %v6370_v53, %v6374_v49 }
 0x55a   :  { %12003 = vmatpush1.bf16.msra.mxu0 %v15231_v1  ;;  %v2320_v1 = vrot.slane %v16564_v50, %v16403_v37  ;;  %v15279_v50 = vcombine.low %v6353_v0, %v6357_v3  ;;  %v6390_v0 = vld [vmem:[#allocation10 + $0x18e8] sm:$0xff] }
 0x55b   :  { %12331 = vmatpush1.bf16.msra.mxu1 %v15233_v40  ;;  %12004 = vmatprep.subr.bf16.mxu0 %v15240_v63  ;;  %v6354_v40 = vld [vmem:[#allocation10 + $0x17c8] sm:$0xff]  ;;  %v5571_v38 = vmax.f32 %v15706_v7, 0.0  ;;  %v6397_v7 = vld [vmem:[#allocation10 + $0x1920] sm:$0xff] }
 0x55c   :  { %12332 = vmatprep.subr.bf16.mxu1 %v15242_v4  ;;  %v6358_v63 = vld [vmem:[#allocation10 + $0x17e8] sm:$0xff]  ;;  %v15271_v4 = vcombine.low %v6345_v56, %v6349_v44 }
 0x55d   :  { %v15282_v13 = vcombine.high %v6354_v40, %v6358_v63  ;;  %v15281_v47 = vcombine.low %v6354_v40, %v6358_v63  ;;  %v16600_v27 = vpack.c.bf16 %v5571_v38, %v5571_v38  ;;  %v6378_v56 = vld [vmem:[#allocation10 + $0x1888] sm:$0xff] }
 0x55e   :  { %12005 = vmatpush1.bf16.msra.mxu0 %v15239_v52  ;;  %v6361_v52 = vld [vmem:[#allocation10 + $0x1800] sm:$0xff]  ;;  %v6382_v44 = vld [vmem:[#allocation10 + $0x18a8] sm:$0xff] }
 0x55f   :  { %12333 = vmatpush1.bf16.msra.mxu1 %v15241_v16  ;;  %12006 = vmatprep.subr.bf16.mxu0 %v15248_v9  ;;  %v6365_v16 = vld [vmem:[#allocation10 + $0x1820] sm:$0xff]  ;;  %v15709_v9 = vadd.f32 %v16560_v46, %v2320_v1  ;;  %v15306_v11 = vcombine.high %v6378_v56, %v6382_v44  ;;  %v15305_v1 = vcombine.low %v6378_v56, %v6382_v44  ;;  %v6406_v38 = vld [vmem:[#allocation10 + $0x1968] sm:$0xff] }
 0x560   :  { %12334 = vmatprep.subr.bf16.mxu1 %v15250_v32  ;;  %v6362_v32 = vld [vmem:[#allocation10 + $0x1808] sm:$0xff]  ;;  %v15288_v48 = vcombine.high %v6361_v52, %v6365_v16 }
 0x561   :  { %v15290_v5 = vcombine.high %v6362_v32, %v6366_v35  ;;  %v15289_v46 = vcombine.low %v6362_v32, %v6366_v35  ;;  %v6401_v32 = vld [vmem:[#allocation10 + $0x1940] sm:$0xff]  ;;  %v6418_v56 = vld [vmem:[#allocation10 + $0x19c8] sm:$0xff] }
 0x562   :  { %12007 = vmatpush1.bf16.msra.mxu0 %v15247_v20  ;;  %v5574_v20 = vmax.f32 %v15709_v9, 0.0  ;;  %v6405_v35 = vld [vmem:[#allocation10 + $0x1960] sm:$0xff]  ;;  %v6422_v44 = vld [vmem:[#allocation10 + $0x19e8] sm:$0xff] }
 0x563   :  { %12335 = vmatpush1.bf16.msra.mxu1 %v15249_v21  ;;  %12008 = vmatprep.subr.bf16.mxu0 %v15256_v23  ;;  %v6369_v21 = vld [vmem:[#allocation10 + $0x1840] sm:$0xff] }
 0x564   :  { %12336 = vmatprep.subr.bf16.mxu1 %v15258_v24  ;;  %v6373_v23 = vld [vmem:[#allocation10 + $0x1860] sm:$0xff]  ;;  %v15287_v24 = vcombine.low %v6361_v52, %v6365_v16 }
 0x565   :  { %v15296_v51 = vcombine.high %v6369_v21, %v6373_v23  ;;  %v15295_v58 = vcombine.low %v6369_v21, %v6373_v23  ;;  %v6409_v21 = vld [vmem:[#allocation10 + $0x1980] sm:$0xff] }
 0x566   :  { %12009 = vmatpush1.bf16.msra.mxu0 %v15255_v54  ;;  %v6377_v54 = vld [vmem:[#allocation10 + $0x1880] sm:$0xff] }
 0x567   :  { %12337 = vmatpush1.bf16.msra.mxu1 %v15257_v18  ;;  %12010 = vmatprep.subr.bf16.mxu0 %v15264_v55  ;;  %v6381_v18 = vld [vmem:[#allocation10 + $0x18a0] sm:$0xff]  ;;  %v16602_v55 = vpack.c.bf16 %v5574_v20, %v5574_v20 }
 0x568   :  { %12338 = vmatprep.subr.bf16.mxu1 %v15266_v43  ;;  %v15298_v43 = vcombine.high %v6370_v53, %v6374_v49  ;;  %v15303_v3 = vcombine.low %v6377_v54, %v6381_v18  ;;  %v6413_v23 = vld [vmem:[#allocation10 + $0x19a0] sm:$0xff]  ;;  %v6414_v53 = vld [vmem:[#allocation10 + $0x19a8] sm:$0xff]  ;;  %v15327_v49 = vcombine.low %v6401_v32, %v6405_v35 }
 0x56a   :  { %12011 = vmatpush1.bf16.msra.mxu0 %v15263_v8  ;;  %v15304_v8 = vcombine.high %v6377_v54, %v6381_v18  ;;  %v6417_v18 = vld [vmem:[#allocation10 + $0x19c0] sm:$0xff] }
 0x56b   :  { %12339 = vmatpush1.bf16.msra.mxu1 %v15265_v61  ;;  %12012 = vmatprep.subr.bf16.mxu0 %v15272_v36  ;;  %v6385_v61 = vld [vmem:[#allocation10 + $0x18c0] sm:$0xff] }
 0x56c   :  { %12340 = vmatprep.subr.bf16.mxu1 %v15274_v62  ;;  %v6389_v36 = vld [vmem:[#allocation10 + $0x18e0] sm:$0xff]  ;;  %v6386_v62 = vld [vmem:[#allocation10 + $0x18c8] sm:$0xff] }
 0x56d   :  { %v15312_v40 = vcombine.high %v6385_v61, %v6389_v36  ;;  %v15314_v63 = vcombine.high %v6386_v62, %v6390_v0  ;;  %v15313_v52 = vcombine.low %v6386_v62, %v6390_v0  ;;  %v6426_v62 = vld [vmem:[#allocation10 + $0x1a08] sm:$0xff] }
 0x56e   :  { %12013 = vmatpush1.bf16.msra.mxu0 %v15271_v4  ;;  %v6393_v4 = vld [vmem:[#allocation10 + $0x1900] sm:$0xff]  ;;  %v6430_v0 = vld [vmem:[#allocation10 + $0x1a28] sm:$0xff] }
 0x56f   :  { %12341 = vmatpush1.bf16.msra.mxu1 %v15273_v22  ;;  %12014 = vmatprep.subr.bf16.mxu0 %v15280_v12  ;;  %v6394_v22 = vld [vmem:[#allocation10 + $0x1908] sm:$0xff]  ;;  %v15320_v16 = vcombine.high %v6393_v4, %v6397_v7 }
 0x570   :  { %12342 = vmatprep.subr.bf16.mxu1 %v15282_v13  ;;  %v6398_v12 = vld [vmem:[#allocation10 + $0x1928] sm:$0xff]  ;;  %v15311_v13 = vcombine.low %v6385_v61, %v6389_v36  ;;  %v6425_v61 = vld [vmem:[#allocation10 + $0x1a00] sm:$0xff] }
 0x571   :  { %v15322_v9 = vcombine.high %v6394_v22, %v6398_v12  ;;  %v6429_v36 = vld [vmem:[#allocation10 + $0x1a20] sm:$0xff] }
 0x572   :  { %12015 = vmatpush1.bf16.msra.mxu0 %v15279_v50  ;;  %v6402_v50 = vld [vmem:[#allocation10 + $0x1948] sm:$0xff] }
 0x573   :  { %12343 = vmatpush1.bf16.msra.mxu1 %v15281_v47  ;;  %12025 = vmatprep.subr.bf16.mxu0 %v15288_v48  ;;  %v15319_v47 = vcombine.low %v6393_v4, %v6397_v7  ;;  %v15321_v48 = vcombine.low %v6394_v22, %v6398_v12  ;;  %v15330_v20 = vcombine.high %v6402_v50, %v6406_v38  ;;  %v6433_v4 = vld [vmem:[#allocation10 + $0x1a40] sm:$0xff]  ;;  %v6434_v22 = vld [vmem:[#allocation10 + $0x1a48] sm:$0xff] }
 0x574   :  { %12353 = vmatprep.subr.bf16.mxu1 %v15290_v5  ;;  %v15328_v5 = vcombine.high %v6401_v32, %v6405_v35  ;;  %v6437_v7 = vld [vmem:[#allocation10 + $0x1a60] sm:$0xff]  ;;  %v6438_v12 = vld [vmem:[#allocation10 + $0x1a68] sm:$0xff] }
 0x575   :  { %12017 = vmatmul.mubr.bf16.vlgmr.msra.gmra.mrb[32].mxu0 %v16600_v27  ;;  %v6441_v32 = vld [vmem:[#allocation10 + $0x1a80] sm:$0xff] }
 0x576   :  { %12345 = vmatmul.mubr.bf16.vlgmr.msra.gmra.mrb[32].mxu1 %v16600_v27  ;;  %12026 = vmatpush1.bf16.msra.mxu0 %v15287_v24  ;;  %v6410_v24 = vld [vmem:[#allocation10 + $0x1988] sm:$0xff]  ;;  %v6445_v35 = vld [vmem:[#allocation10 + $0x1aa0] sm:$0xff] }
 0x577   :  { %12057 = vmatprep.mubr.bf16.mxu0 %v16602_v55  ;;  %12354 = vmatpush1.bf16.msra.mxu1 %v15289_v46  ;;  %v15329_v46 = vcombine.low %v6402_v50, %v6406_v38  ;;  %v15338_v54 = vcombine.high %v6410_v24, %v6414_v53  ;;  %v6442_v50 = vld [vmem:[#allocation10 + $0x1a88] sm:$0xff] }
 0x578   :  { %12385 = vmatprep.mubr.bf16.mxu1 %v16602_v55  ;;  %12027 = vmatprep.subr.bf16.mxu0 %v15296_v51  ;;  %v15336_v51 = vcombine.high %v6409_v21, %v6413_v23  ;;  %v6446_v38 = vld [vmem:[#allocation10 + $0x1aa8] sm:$0xff] }
 0x579   :  { %12355 = vmatprep.subr.bf16.mxu1 %v15298_v43  ;;  %v6421_v43 = vld [vmem:[#allocation10 + $0x19e0] sm:$0xff] }
 0x57a   :  { %12028 = vmatpush1.bf16.msra.mxu0 %v15295_v58  ;;  %v15335_v58 = vcombine.low %v6409_v21, %v6413_v23  ;;  %v6449_v21 = vld [vmem:[#allocation10 + $0x1ac0] sm:$0xff] }
 0x57b   :  { %12356 = vmatpush1.bf16.msra.mxu1 %v15297_v59  ;;  %12029 = vmatprep.subr.bf16.mxu0 %v15304_v8  ;;  %v15337_v59 = vcombine.low %v6410_v24, %v6414_v53  ;;  %v15344_v8 = vcombine.high %v6417_v18, %v6421_v43  ;;  %v6453_v23 = vld [vmem:[#allocation10 + $0x1ae0] sm:$0xff]  ;;  %v6450_v24 = vld [vmem:[#allocation10 + $0x1ac8] sm:$0xff] }
 0x57c   :  { %12357 = vmatprep.subr.bf16.mxu1 %v15306_v11  ;;  %v15346_v11 = vcombine.high %v6418_v56, %v6422_v44  ;;  %v6454_v53 = vld [vmem:[#allocation10 + $0x1ae8] sm:$0xff] }
 0x57e   :  { %12030 = vmatpush1.bf16.msra.mxu0 %v15303_v3  ;;  %v15343_v3 = vcombine.low %v6417_v18, %v6421_v43  ;;  %v6457_v18 = vld [vmem:[#allocation10 + $0x1b00] sm:$0xff] }
 0x57f   :  { %12358 = vmatpush1.bf16.msra.mxu1 %v15305_v1  ;;  %12031 = vmatprep.subr.bf16.mxu0 %v15312_v40  ;;  %v15345_v1 = vcombine.low %v6418_v56, %v6422_v44  ;;  %v15352_v40 = vcombine.high %v6425_v61, %v6429_v36  ;;  %v6461_v43 = vld [vmem:[#allocation10 + $0x1b20] sm:$0xff]  ;;  %v6458_v56 = vld [vmem:[#allocation10 + $0x1b08] sm:$0xff] }
 0x580   :  { %12359 = vmatprep.subr.bf16.mxu1 %v15314_v63  ;;  %v15354_v63 = vcombine.high %v6426_v62, %v6430_v0  ;;  %v6462_v44 = vld [vmem:[#allocation10 + $0x1b28] sm:$0xff] }
 0x582   :  { %12032 = vmatpush1.bf16.msra.mxu0 %v15311_v13  ;;  %v15351_v13 = vcombine.low %v6425_v61, %v6429_v36  ;;  %v6465_v61 = vld [vmem:[#allocation10 + $0x1b40] sm:$0xff] }
 0x583   :  { %12360 = vmatpush1.bf16.msra.mxu1 %v15313_v52  ;;  %12033 = vmatprep.subr.bf16.mxu0 %v15320_v16  ;;  %v15353_v52 = vcombine.low %v6426_v62, %v6430_v0  ;;  %v15360_v16 = vcombine.high %v6433_v4, %v6437_v7  ;;  %v6469_v36 = vld [vmem:[#allocation10 + $0x1b60] sm:$0xff]  ;;  %v6466_v62 = vld [vmem:[#allocation10 + $0x1b48] sm:$0xff] }
 0x584   :  { %12361 = vmatprep.subr.bf16.mxu1 %v15322_v9  ;;  %v15362_v9 = vcombine.high %v6434_v22, %v6438_v12  ;;  %v6470_v0 = vld [vmem:[#allocation10 + $0x1b68] sm:$0xff] }
 0x586   :  { %12034 = vmatpush1.bf16.msra.mxu0 %v15319_v47  ;;  %v15359_v47 = vcombine.low %v6433_v4, %v6437_v7  ;;  %v6473_v4 = vld [vmem:[#allocation10 + $0x1b80] sm:$0xff] }
 0x587   :  { %12362 = vmatpush1.bf16.msra.mxu1 %v15321_v48  ;;  %12035 = vmatprep.subr.bf16.mxu0 %v15328_v5  ;;  %v15361_v48 = vcombine.low %v6434_v22, %v6438_v12  ;;  %v15368_v5 = vcombine.high %v6441_v32, %v6445_v35  ;;  %v6477_v7 = vld [vmem:[#allocation10 + $0x1ba0] sm:$0xff]  ;;  %v6474_v22 = vld [vmem:[#allocation10 + $0x1b88] sm:$0xff] }
 0x588   :  { %12363 = vmatprep.subr.bf16.mxu1 %v15330_v20  ;;  %v15370_v20 = vcombine.high %v6442_v50, %v6446_v38  ;;  %v6478_v12 = vld [vmem:[#allocation10 + $0x1ba8] sm:$0xff] }
 0x58a   :  { %12036 = vmatpush1.bf16.msra.mxu0 %v15327_v49  ;;  %v15367_v49 = vcombine.low %v6441_v32, %v6445_v35  ;;  %v15400_v32 = vcombine.high %v6473_v4, %v6477_v7  ;;  %v15402_v35 = vcombine.high %v6474_v22, %v6478_v12 }
 0x58b   :  { %12364 = vmatpush1.bf16.msra.mxu1 %v15329_v46  ;;  %12037 = vmatprep.subr.bf16.mxu0 %v15336_v51  ;;  %v15369_v46 = vcombine.low %v6442_v50, %v6446_v38  ;;  %v15376_v51 = vcombine.high %v6449_v21, %v6453_v23  ;;  %v6481_v50 = vld [vmem:[#allocation10 + $0x1bc0] sm:$0xff] }
 0x58c   :  { %12365 = vmatprep.subr.bf16.mxu1 %v15338_v54  ;;  %v15378_v54 = vcombine.high %v6450_v24, %v6454_v53  ;;  %v6485_v38 = vld [vmem:[#allocation10 + $0x1be0] sm:$0xff] }
 0x58e   :  { %12038 = vmatpush1.bf16.msra.mxu0 %v15335_v58  ;;  %v15375_v58 = vcombine.low %v6449_v21, %v6453_v23  ;;  %v15401_v23 = vcombine.low %v6474_v22, %v6478_v12  ;;  %v6510_v22 = vld [vmem:[#allocation10 + $0x1ca8] sm:$0xff] }
 0x58f   :  { %12366 = vmatpush1.bf16.msra.mxu1 %v15337_v59  ;;  %12039 = vmatprep.subr.bf16.mxu0 %v15344_v8  ;;  %v15377_v59 = vcombine.low %v6450_v24, %v6454_v53  ;;  %v15384_v8 = vcombine.high %v6457_v18, %v6461_v43  ;;  %v15408_v24 = vcombine.high %v6481_v50, %v6485_v38 }
 0x590   :  { %12367 = vmatprep.subr.bf16.mxu1 %v15346_v11  ;;  %v15386_v11 = vcombine.high %v6458_v56, %v6462_v44 }
 0x592   :  { %12040 = vmatpush1.bf16.msra.mxu0 %v15343_v3  ;;  %v15383_v3 = vcombine.low %v6457_v18, %v6461_v43  ;;  %v6494_v18 = vld [vmem:[#allocation10 + $0x1c28] sm:$0xff]  ;;  %v15407_v43 = vcombine.low %v6481_v50, %v6485_v38 }
 0x593   :  { %12368 = vmatpush1.bf16.msra.mxu1 %v15345_v1  ;;  %12041 = vmatprep.subr.bf16.mxu0 %v15352_v40  ;;  %v15385_v1 = vcombine.low %v6458_v56, %v6462_v44  ;;  %v15392_v40 = vcombine.high %v6465_v61, %v6469_v36  ;;  %v6514_v50 = vld [vmem:[#allocation10 + $0x1cc8] sm:$0xff] }
 0x594   :  { %12369 = vmatprep.subr.bf16.mxu1 %v15354_v63  ;;  %v15394_v63 = vcombine.high %v6466_v62, %v6470_v0  ;;  %v6518_v38 = vld [vmem:[#allocation10 + $0x1ce8] sm:$0xff] }
 0x596   :  { %12042 = vmatpush1.bf16.msra.mxu0 %v15351_v13  ;;  %v15391_v13 = vcombine.low %v6465_v61, %v6469_v36  ;;  %v6498_v36 = vld [vmem:[#allocation10 + $0x1c48] sm:$0xff] }
 0x597   :  { %12370 = vmatpush1.bf16.msra.mxu1 %v15353_v52  ;;  %12043 = vmatprep.subr.bf16.mxu0 %v15360_v16  ;;  %v16608_v52 = vld [vmem:[#allocation8 + $0x8] sm:$0xff] }
 0x598   :  { %12371 = vmatprep.subr.bf16.mxu1 %v15362_v9  ;;  %v2316_v16 = vrot.slane %v16608_v52, %v16401_v34  ;;  %v15393_v9 = vcombine.low %v6466_v62, %v6470_v0  ;;  %v6502_v62 = vld [vmem:[#allocation10 + $0x1c68] sm:$0xff] }
 0x59a   :  { %12044 = vmatpush1.bf16.msra.mxu0 %v15359_v47  ;;  %v2328_v47 = vrot.slane %v16608_v52, %v16410_v45  ;;  %v15708_v21 = vadd.f32 %v16556_v26, %v2316_v16 }
 0x59b   :  { %12372 = vmatpush1.bf16.msra.mxu1 %v15361_v48  ;;  %12045 = vmatprep.subr.bf16.mxu0 %v15368_v5  ;;  %v6482_v48 = vld [vmem:[#allocation10 + $0x1bc8] sm:$0xff] }
 0x59c   :  { %12373 = vmatprep.subr.bf16.mxu1 %v15370_v20  ;;  %v6486_v5 = vld [vmem:[#allocation10 + $0x1be8] sm:$0xff]  ;;  %v15399_v20 = vcombine.low %v6473_v4, %v6477_v7  ;;  %v5573_v56 = vmax.f32 %v15708_v21, 0.0  ;;  %v15426_v4 = vcombine.high %v6498_v36, %v6502_v62  ;;  %v6521_v21 = vld [vmem:[#allocation10 + $0x1d00] sm:$0xff] }
 0x59d   :  { %v15410_v53 = vcombine.high %v6482_v48, %v6486_v5  ;;  %v15409_v44 = vcombine.low %v6482_v48, %v6486_v5  ;;  %v6506_v7 = vld [vmem:[#allocation10 + $0x1c88] sm:$0xff] }
 0x59e   :  { %12046 = vmatpush1.bf16.msra.mxu0 %v15367_v49  ;;  %v6489_v49 = vld [vmem:[#allocation10 + $0x1c00] sm:$0xff]  ;;  %v16616_v0 = vpack.c.bf16 %v5573_v56, %v5573_v56  ;;  %v15433_v48 = vcombine.low %v6506_v7, %v6510_v22  ;;  %v6530_v56 = vld [vmem:[#allocation10 + $0x1d48] sm:$0xff] }
 0x59f   :  { %12374 = vmatpush1.bf16.msra.mxu1 %v15369_v46  ;;  %12047 = vmatprep.subr.bf16.mxu0 %v15376_v51  ;;  %v6493_v46 = vld [vmem:[#allocation10 + $0x1c20] sm:$0xff]  ;;  %v15711_v51 = vadd.f32 %v16562_v19, %v2328_v47 }
 0x5a0   :  { %12375 = vmatprep.subr.bf16.mxu1 %v15378_v54  ;;  %v6490_v54 = vld [vmem:[#allocation10 + $0x1c08] sm:$0xff]  ;;  %v15415_v61 = vcombine.low %v6489_v49, %v6493_v46 }
 0x5a1   :  { %v15418_v26 = vcombine.high %v6490_v54, %v6494_v18  ;;  %v15417_v19 = vcombine.low %v6490_v54, %v6494_v18  ;;  %v6529_v18 = vld [vmem:[#allocation10 + $0x1d40] sm:$0xff] }
 0x5a2   :  { %12048 = vmatpush1.bf16.msra.mxu0 %v15375_v58  ;;  %v15416_v58 = vcombine.high %v6489_v49, %v6493_v46  ;;  %v15441_v46 = vcombine.low %v6514_v50, %v6518_v38 }
 0x5a3   :  { %12376 = vmatpush1.bf16.msra.mxu1 %v15377_v59  ;;  %12049 = vmatprep.subr.bf16.mxu0 %v15384_v8  ;;  %v5576_v59 = vmax.f32 %v15711_v51, 0.0  ;;  %v6497_v8 = vld [vmem:[#allocation10 + $0x1c40] sm:$0xff] }
 0x5a4   :  { %12377 = vmatprep.subr.bf16.mxu1 %v15386_v11  ;;  %v6501_v11 = vld [vmem:[#allocation10 + $0x1c60] sm:$0xff] }
 0x5a5   :  { %v15423_v12 = vcombine.low %v6497_v8, %v6501_v11 }
 0x5a6   :  { %12050 = vmatpush1.bf16.msra.mxu0 %v15383_v3  ;;  %v15424_v3 = vcombine.high %v6497_v8, %v6501_v11  ;;  %v6537_v11 = vld [vmem:[#allocation10 + $0x1d80] sm:$0xff] }
 0x5a7   :  { %12378 = vmatpush1.bf16.msra.mxu1 %v15385_v1  ;;  %12051 = vmatprep.subr.bf16.mxu0 %v15392_v40  ;;  %v6505_v1 = vld [vmem:[#allocation10 + $0x1c80] sm:$0xff] }
 0x5a8   :  { %12379 = vmatprep.subr.bf16.mxu1 %v15394_v63  ;;  %v6509_v40 = vld [vmem:[#allocation10 + $0x1ca0] sm:$0xff]  ;;  %v16618_v63 = vpack.c.bf16 %v5576_v59, %v5576_v59 }
 0x5a9   :  { %v15432_v16 = vcombine.high %v6505_v1, %v6509_v40  ;;  %v15431_v47 = vcombine.low %v6505_v1, %v6509_v40 }
 0x5aa   :  { %12052 = vmatpush1.bf16.msra.mxu0 %v15391_v13  ;;  %v15425_v13 = vcombine.low %v6498_v36, %v6502_v62  ;;  %v6538_v36 = vld [vmem:[#allocation10 + $0x1d88] sm:$0xff] }
 0x5ab   :  { %12380 = vmatpush1.bf16.msra.mxu1 %v15393_v9  ;;  %12053 = vmatprep.subr.bf16.mxu0 %v15400_v32  ;;  %v15434_v9 = vcombine.high %v6506_v7, %v6510_v22  ;;  %v6513_v32 = vld [vmem:[#allocation10 + $0x1cc0] sm:$0xff]  ;;  %v6542_v62 = vld [vmem:[#allocation10 + $0x1da8] sm:$0xff] }
 0x5ac   :  { %12381 = vmatprep.subr.bf16.mxu1 %v15402_v35  ;;  %v6517_v35 = vld [vmem:[#allocation10 + $0x1ce0] sm:$0xff]  ;;  %v15466_v40 = vcombine.high %v6538_v36, %v6542_v62  ;;  %v6546_v22 = vld [vmem:[#allocation10 + $0x1dc8] sm:$0xff] }
 0x5ad   :  { %v15440_v5 = vcombine.high %v6513_v32, %v6517_v35  ;;  %v15439_v49 = vcombine.low %v6513_v32, %v6517_v35  ;;  %v6549_v7 = vld [vmem:[#allocation10 + $0x1de0] sm:$0xff] }
 0x5ae   :  { %12054 = vmatpush1.bf16.msra.mxu0 %v15399_v20  ;;  %v15442_v20 = vcombine.high %v6514_v50, %v6518_v38  ;;  %v6553_v35 = vld [vmem:[#allocation10 + $0x1e00] sm:$0xff]  ;;  %v6554_v38 = vld [vmem:[#allocation10 + $0x1e08] sm:$0xff] }
 0x5af   :  { %12382 = vmatpush1.bf16.msra.mxu1 %v15401_v23  ;;  %12055 = vmatprep.subr.bf16.mxu0 %v15408_v24  ;;  %v6525_v23 = vld [vmem:[#allocation10 + $0x1d20] sm:$0xff]  ;;  %v6522_v24 = vld [vmem:[#allocation10 + $0x1d08] sm:$0xff] }
 0x5b0   :  { %12383 = vmatprep.subr.bf16.mxu1 %v15410_v53  ;;  %v6526_v53 = vld [vmem:[#allocation10 + $0x1d28] sm:$0xff]  ;;  %v15448_v51 = vcombine.high %v6521_v21, %v6525_v23  ;;  %v6557_v50 = vld [vmem:[#allocation10 + $0x1e20] sm:$0xff] }
 0x5b1   :  { %v15450_v54 = vcombine.high %v6522_v24, %v6526_v53 }
 0x5b2   :  { %12056 = vmatpush1.bf16.msra.mxu0 %v15407_v43  ;;  %v6533_v43 = vld [vmem:[#allocation10 + $0x1d60] sm:$0xff] }
 0x5b3   :  { %12384 = vmatpush1.bf16.msra.mxu1 %v15409_v44  ;;  %12066 = vmatprep.subr.bf16.mxu0 %v15416_v58  ;;  %v6534_v44 = vld [vmem:[#allocation10 + $0x1d68] sm:$0xff]  ;;  %v15447_v58 = vcombine.low %v6521_v21, %v6525_v23  ;;  %v15456_v59 = vcombine.high %v6529_v18, %v6533_v43  ;;  %v6561_v23 = vld [vmem:[#allocation10 + $0x1e40] sm:$0xff] }
 0x5b4   :  { %12394 = vmatprep.subr.bf16.mxu1 %v15418_v26  ;;  %v15449_v26 = vcombine.low %v6522_v24, %v6526_v53  ;;  %v15458_v8 = vcombine.high %v6530_v56, %v6534_v44  ;;  %v6565_v24 = vld [vmem:[#allocation10 + $0x1e60] sm:$0xff]  ;;  %v6562_v53 = vld [vmem:[#allocation10 + $0x1e48] sm:$0xff] }
 0x5b5   :  { %12058 = vmatmul.mubr.bf16.vlgmr.msra.gmra.mrb[32].mxu0 %v16616_v0 }
 0x5b6   :  { %12386 = vmatmul.mubr.bf16.vlgmr.msra.gmra.mrb[32].mxu1 %v16616_v0  ;;  %12067 = vmatpush1.bf16.msra.mxu0 %v15415_v61  ;;  %v6541_v61 = vld [vmem:[#allocation10 + $0x1da0] sm:$0xff] }
 0x5b7   :  { %12098 = vmatprep.mubr.bf16.mxu0 %v16618_v63  ;;  %12395 = vmatpush1.bf16.msra.mxu1 %v15417_v19  ;;  %v15455_v19 = vcombine.low %v6529_v18, %v6533_v43  ;;  %v15464_v1 = vcombine.high %v6537_v11, %v6541_v61  ;;  %v6569_v43 = vld [vmem:[#allocation10 + $0x1e80] sm:$0xff] }
 0x5b8   :  { %12426 = vmatprep.mubr.bf16.mxu1 %v16618_v63  ;;  %12068 = vmatprep.subr.bf16.mxu0 %v15424_v3  ;;  %v15457_v3 = vcombine.low %v6530_v56, %v6534_v44  ;;  %v6573_v56 = vld [vmem:[#allocation10 + $0x1ea0] sm:$0xff]  ;;  %v6570_v44 = vld [vmem:[#allocation10 + $0x1e88] sm:$0xff] }
 0x5b9   :  { %12396 = vmatprep.subr.bf16.mxu1 %v15426_v4  ;;  %v6545_v4 = vld [vmem:[#allocation10 + $0x1dc0] sm:$0xff] }
 0x5ba   :  { %12069 = vmatpush1.bf16.msra.mxu0 %v15423_v12  ;;  %v6550_v12 = vld [vmem:[#allocation10 + $0x1de8] sm:$0xff] }
 0x5bb   :  { %12397 = vmatpush1.bf16.msra.mxu1 %v15425_v13  ;;  %12070 = vmatprep.subr.bf16.mxu0 %v15432_v16  ;;  %v15463_v13 = vcombine.low %v6537_v11, %v6541_v61  ;;  %v15465_v16 = vcombine.low %v6538_v36, %v6542_v62  ;;  %v15474_v32 = vcombine.high %v6546_v22, %v6550_v12  ;;  %v6577_v61 = vld [vmem:[#allocation10 + $0x1ec0] sm:$0xff]  ;;  %v6578_v62 = vld [vmem:[#allocation10 + $0x1ec8] sm:$0xff] }
 0x5bc   :  { %12398 = vmatprep.subr.bf16.mxu1 %v15434_v9  ;;  %v15472_v9 = vcombine.high %v6545_v4, %v6549_v7  ;;  %v6581_v36 = vld [vmem:[#allocation10 + $0x1ee0] sm:$0xff] }
 0x5be   :  { %12071 = vmatpush1.bf16.msra.mxu0 %v15431_v47  ;;  %v6558_v47 = vld [vmem:[#allocation10 + $0x1e28] sm:$0xff] }
 0x5bf   :  { %12399 = vmatpush1.bf16.msra.mxu1 %v15433_v48  ;;  %12072 = vmatprep.subr.bf16.mxu0 %v15440_v5  ;;  %v15471_v48 = vcombine.low %v6545_v4, %v6549_v7  ;;  %v15473_v5 = vcombine.low %v6546_v22, %v6550_v12  ;;  %v15482_v21 = vcombine.high %v6554_v38, %v6558_v47  ;;  %v6585_v7 = vld [vmem:[#allocation10 + $0x1f00] sm:$0xff]  ;;  %v6586_v12 = vld [vmem:[#allocation10 + $0x1f08] sm:$0xff] }
 0x5c0   :  { %12400 = vmatprep.subr.bf16.mxu1 %v15442_v20  ;;  %v15480_v20 = vcombine.high %v6553_v35, %v6557_v50  ;;  %v6589_v22 = vld [vmem:[#allocation10 + $0x1f20] sm:$0xff] }
 0x5c2   :  { %12073 = vmatpush1.bf16.msra.mxu0 %v15439_v49  ;;  %v6566_v49 = vld [vmem:[#allocation10 + $0x1e68] sm:$0xff] }
 0x5c3   :  { %12401 = vmatpush1.bf16.msra.mxu1 %v15441_v46  ;;  %12074 = vmatprep.subr.bf16.mxu0 %v15448_v51  ;;  %v15479_v46 = vcombine.low %v6553_v35, %v6557_v50  ;;  %v15481_v51 = vcombine.low %v6554_v38, %v6558_v47  ;;  %v15490_v18 = vcombine.high %v6562_v53, %v6566_v49  ;;  %v6593_v50 = vld [vmem:[#allocation10 + $0x1f40] sm:$0xff]  ;;  %v6594_v47 = vld [vmem:[#allocation10 + $0x1f48] sm:$0xff] }
 0x5c4   :  { %12402 = vmatprep.subr.bf16.mxu1 %v15450_v54  ;;  %v15488_v54 = vcombine.high %v6561_v23, %v6565_v24  ;;  %v6597_v38 = vld [vmem:[#allocation10 + $0x1f60] sm:$0xff] }
 0x5c6   :  { %12075 = vmatpush1.bf16.msra.mxu0 %v15447_v58  ;;  %v6574_v58 = vld [vmem:[#allocation10 + $0x1ea8] sm:$0xff] }
 0x5c7   :  { %12403 = vmatpush1.bf16.msra.mxu1 %v15449_v26  ;;  %12076 = vmatprep.subr.bf16.mxu0 %v15456_v59  ;;  %v15487_v26 = vcombine.low %v6561_v23, %v6565_v24  ;;  %v15489_v59 = vcombine.low %v6562_v53, %v6566_v49  ;;  %v15498_v11 = vcombine.high %v6570_v44, %v6574_v58  ;;  %v6601_v24 = vld [vmem:[#allocation10 + $0x1f80] sm:$0xff]  ;;  %v6602_v49 = vld [vmem:[#allocation10 + $0x1f88] sm:$0xff] }
 0x5c8   :  { %12404 = vmatprep.subr.bf16.mxu1 %v15458_v8  ;;  %v15496_v8 = vcombine.high %v6569_v43, %v6573_v56  ;;  %v6605_v53 = vld [vmem:[#allocation10 + $0x1fa0] sm:$0xff] }
 0x5ca   :  { %12077 = vmatpush1.bf16.msra.mxu0 %v15455_v19  ;;  %v6582_v19 = vld [vmem:[#allocation10 + $0x1ee8] sm:$0xff] }
 0x5cb   :  { %12405 = vmatpush1.bf16.msra.mxu1 %v15457_v3  ;;  %12078 = vmatprep.subr.bf16.mxu0 %v15464_v1  ;;  %v15495_v3 = vcombine.low %v6569_v43, %v6573_v56  ;;  %v15497_v1 = vcombine.low %v6570_v44, %v6574_v58  ;;  %v15506_v4 = vcombine.high %v6578_v62, %v6582_v19  ;;  %v6609_v44 = vld [vmem:[#allocation10 + $0x1fc0] sm:$0xff] }
 0x5cc   :  { %12406 = vmatprep.subr.bf16.mxu1 %v15466_v40  ;;  %v15504_v40 = vcombine.high %v6577_v61, %v6581_v36  ;;  %v15528_v43 = vcombine.high %v6601_v24, %v6605_v53  ;;  %v6613_v58 = vld [vmem:[#allocation10 + $0x1fe0] sm:$0xff] }
 0x5ce   :  { %12079 = vmatpush1.bf16.msra.mxu0 %v15463_v13  ;;  %v6590_v13 = vld [vmem:[#allocation10 + $0x1f28] sm:$0xff] }
 0x5cf   :  { %12407 = vmatpush1.bf16.msra.mxu1 %v15465_v16  ;;  %12080 = vmatprep.subr.bf16.mxu0 %v15472_v9  ;;  %v15503_v16 = vcombine.low %v6577_v61, %v6581_v36  ;;  %v15505_v9 = vcombine.low %v6578_v62, %v6582_v19  ;;  %v15514_v35 = vcombine.high %v6586_v12, %v6590_v13  ;;  %v5595_v62 = vld [vmem:[#allocation10 + $0x10] sm:$0xff] }
 0x5d0   :  { %12408 = vmatprep.subr.bf16.mxu1 %v15474_v32  ;;  %v15512_v32 = vcombine.high %v6585_v7, %v6589_v22  ;;  %v15536_v36 = vcombine.high %v6609_v44, %v6613_v58  ;;  %v5599_v19 = vld [vmem:[#allocation10 + $0x30] sm:$0xff] }
 0x5d2   :  { %12081 = vmatpush1.bf16.msra.mxu0 %v15471_v48  ;;  %v6598_v48 = vld [vmem:[#allocation10 + $0x1f68] sm:$0xff] }
 0x5d3   :  { %12409 = vmatpush1.bf16.msra.mxu1 %v15473_v5  ;;  %12082 = vmatprep.subr.bf16.mxu0 %v15480_v20  ;;  %v15511_v5 = vcombine.low %v6585_v7, %v6589_v22  ;;  %v15513_v20 = vcombine.low %v6586_v12, %v6590_v13  ;;  %v15522_v23 = vcombine.high %v6594_v47, %v6598_v48  ;;  %v5607_v13 = vld [vmem:[#allocation10 + $0x70] sm:$0xff] }
 0x5d4   :  { %12410 = vmatprep.subr.bf16.mxu1 %v15482_v21  ;;  %v15520_v21 = vcombine.high %v6593_v50, %v6597_v38  ;;  %v14524_v22 = vcombine.high %v5595_v62, %v5599_v19 }
 0x5d6   :  { %12083 = vmatpush1.bf16.msra.mxu0 %v15479_v46  ;;  %v6606_v46 = vld [vmem:[#allocation10 + $0x1fa8] sm:$0xff] }
 0x5d7   :  { %12411 = vmatpush1.bf16.msra.mxu1 %v15481_v51  ;;  %12084 = vmatprep.subr.bf16.mxu0 %v15488_v54  ;;  %v15519_v51 = vcombine.low %v6593_v50, %v6597_v38  ;;  %v2324_v54 = vrot.slane %v16608_v52, %v16406_v39  ;;  %v15530_v56 = vcombine.high %v6602_v49, %v6606_v46 }
 0x5d8   :  { %12412 = vmatprep.subr.bf16.mxu1 %v15490_v18  ;;  %v15521_v18 = vcombine.low %v6594_v47, %v6598_v48  ;;  %v15529_v61 = vcombine.low %v6602_v49, %v6606_v46  ;;  %v5611_v47 = vld [vmem:[#allocation10 + $0x90] sm:$0xff] }
 0x5d9   :  { %v5615_v48 = vld [vmem:[#allocation10 + $0xb0] sm:$0xff] }
 0x5da   :  { %12085 = vmatpush1.bf16.msra.mxu0 %v15487_v26  ;;  %v6610_v26 = vld [vmem:[#allocation10 + $0x1fc8] sm:$0xff]  ;;  %v5619_v46 = vld [vmem:[#allocation10 + $0xd0] sm:$0xff] }
 0x5db   :  { %12413 = vmatpush1.bf16.msra.mxu1 %v15489_v59  ;;  %12086 = vmatprep.subr.bf16.mxu0 %v15496_v8  ;;  %v6614_v59 = vld [vmem:[#allocation10 + $0x1fe8] sm:$0xff]  ;;  %v15527_v8 = vcombine.low %v6601_v24, %v6605_v53  ;;  %v14540_v53 = vcombine.high %v5611_v47, %v5615_v48 }
 0x5dc   :  { %12414 = vmatprep.subr.bf16.mxu1 %v15498_v11  ;;  %v15710_v11 = vadd.f32 %v16558_v41, %v2324_v54  ;;  %v15538_v52 = vcombine.high %v6610_v26, %v6614_v59  ;;  %v15537_v7 = vcombine.low %v6610_v26, %v6614_v59  ;;  %v5603_v41 = vld [vmem:[#allocation10 + $0x50] sm:$0xff]  ;;  %v5620_v54 = vld [vmem:[#allocation10 + $0xd8] sm:$0xff] }
 0x5dd   :  { %v14532_v38 = vcombine.high %v5603_v41, %v5607_v13  ;;  %v5627_v26 = vld [vmem:[#allocation10 + $0x110] sm:$0xff] }
 0x5de   :  { %12087 = vmatpush1.bf16.msra.mxu0 %v15495_v3  ;;  %v5596_v3 = vld [vmem:[#allocation10 + $0x18] sm:$0xff]  ;;  %v5631_v59 = vld [vmem:[#allocation10 + $0x130] sm:$0xff] }
 0x5df   :  { %12415 = vmatpush1.bf16.msra.mxu1 %v15497_v1  ;;  %12088 = vmatprep.subr.bf16.mxu0 %v15504_v40  ;;  %v5600_v1 = vld [vmem:[#allocation10 + $0x38] sm:$0xff]  ;;  %v15535_v40 = vcombine.low %v6609_v44, %v6613_v58 }
 0x5e0   :  { %12416 = vmatprep.subr.bf16.mxu1 %v15506_v4  ;;  %v5575_v4 = vmax.f32 %v15710_v11, 0.0  ;;  %v14526_v12 = vcombine.high %v5596_v3, %v5600_v1  ;;  %v14525_v50 = vcombine.low %v5596_v3, %v5600_v1  ;;  %v5632_v11 = vld [vmem:[#allocation10 + $0x138] sm:$0xff] }
 0x5e1   :  { %v5636_v3 = vld [vmem:[#allocation10 + $0x158] sm:$0xff] }
 0x5e2   :  { %12089 = vmatpush1.bf16.msra.mxu0 %v15503_v16  ;;  %v14523_v16 = vcombine.low %v5595_v62, %v5599_v19  ;;  %v5635_v62 = vld [vmem:[#allocation10 + $0x150] sm:$0xff]  ;;  %v5640_v1 = vld [vmem:[#allocation10 + $0x178] sm:$0xff] }
 0x5e3   :  { %12417 = vmatpush1.bf16.msra.mxu1 %v15505_v9  ;;  %12090 = vmatprep.subr.bf16.mxu0 %v15512_v32  ;;  %v5604_v9 = vld [vmem:[#allocation10 + $0x58] sm:$0xff]  ;;  %v5639_v19 = vld [vmem:[#allocation10 + $0x170] sm:$0xff] }
 0x5e4   :  { %12418 = vmatprep.subr.bf16.mxu1 %v15514_v35  ;;  %v5608_v32 = vld [vmem:[#allocation10 + $0x78] sm:$0xff]  ;;  %v16627_v35 = vpack.c.bf16 %v5575_v4, %v5575_v4 }
 0x5e5   :  { %v14533_v24 = vcombine.low %v5604_v9, %v5608_v32 }
 0x5e6   :  { %12091 = vmatpush1.bf16.msra.mxu0 %v15511_v5  ;;  %v14534_v5 = vcombine.high %v5604_v9, %v5608_v32  ;;  %v14563_v9 = vcombine.low %v5635_v62, %v5639_v19  ;;  %v14565_v32 = vcombine.low %v5636_v3, %v5640_v1 }
 0x5e7   :  { %12419 = vmatpush1.bf16.msra.mxu1 %v15513_v20  ;;  %12092 = vmatprep.subr.bf16.mxu0 %v15520_v21  ;;  %v5612_v20 = vld [vmem:[#allocation10 + $0x98] sm:$0xff] }
 0x5e8   :  { %12420 = vmatprep.subr.bf16.mxu1 %v15522_v23  ;;  %v5616_v21 = vld [vmem:[#allocation10 + $0xb8] sm:$0xff]  ;;  %v14531_v23 = vcombine.low %v5603_v41, %v5607_v13  ;;  %v5647_v41 = vld [vmem:[#allocation10 + $0x1b0] sm:$0xff] }
 0x5e9   :  { %v14542_v49 = vcombine.high %v5612_v20, %v5616_v21  ;;  %v5644_v13 = vld [vmem:[#allocation10 + $0x198] sm:$0xff] }
 0x5ea   :  { %12093 = vmatpush1.bf16.msra.mxu0 %v15519_v51  ;;  %v5623_v51 = vld [vmem:[#allocation10 + $0xf0] sm:$0xff] }
 0x5eb   :  { %12421 = vmatpush1.bf16.msra.mxu1 %v15521_v18  ;;  %12094 = vmatprep.subr.bf16.mxu0 %v15528_v43  ;;  %v5624_v18 = vld [vmem:[#allocation10 + $0xf8] sm:$0xff]  ;;  %v14539_v43 = vcombine.low %v5611_v47, %v5615_v48  ;;  %v14548_v44 = vcombine.high %v5619_v46, %v5623_v51  ;;  %v5651_v47 = vld [vmem:[#allocation10 + $0x1d0] sm:$0xff] }
 0x5ec   :  { %12422 = vmatprep.subr.bf16.mxu1 %v15530_v56  ;;  %v14541_v56 = vcombine.low %v5612_v20, %v5616_v21  ;;  %v14550_v58 = vcombine.high %v5620_v54, %v5624_v18  ;;  %v5655_v48 = vld [vmem:[#allocation10 + $0x1f0] sm:$0xff]  ;;  %v5656_v20 = vld [vmem:[#allocation10 + $0x1f8] sm:$0xff] }
 0x5ee   :  { %12095 = vmatpush1.bf16.msra.mxu0 %v15527_v8  ;;  %v5628_v8 = vld [vmem:[#allocation10 + $0x118] sm:$0xff] }
 0x5ef   :  { %12423 = vmatpush1.bf16.msra.mxu1 %v15529_v61  ;;  %12096 = vmatprep.subr.bf16.mxu0 %v15536_v36  ;;  %v14549_v61 = vcombine.low %v5620_v54, %v5624_v18  ;;  %v14556_v36 = vcombine.high %v5627_v26, %v5631_v59  ;;  %v14557_v4 = vcombine.low %v5628_v8, %v5632_v11  ;;  %v5664_v54 = vld [vmem:[#allocation10 + $0x238] sm:$0xff] }
 0x5f0   :  { %12424 = vmatprep.subr.bf16.mxu1 %v15538_v52  ;;  %v14558_v52 = vcombine.high %v5628_v8, %v5632_v11  ;;  %v14579_v18 = vcombine.low %v5651_v47, %v5655_v48  ;;  %v5672_v8 = vld [vmem:[#allocation10 + $0x278] sm:$0xff] }
 0x5f2   :  { %12097 = vmatpush1.bf16.msra.mxu0 %v15535_v40  ;;  %v14555_v40 = vcombine.low %v5627_v26, %v5631_v59  ;;  %v5671_v26 = vld [vmem:[#allocation10 + $0x270] sm:$0xff]  ;;  %v5668_v59 = vld [vmem:[#allocation10 + $0x258] sm:$0xff] }
 0x5f3   :  { %12425 = vmatpush1.bf16.msra.mxu1 %v15537_v7  ;;  %12435 = vmatprep.subr.bf16.mxu0 %v14524_v22  ;;  %v14564_v7 = vcombine.high %v5635_v62, %v5639_v19  ;;  %v14566_v22 = vcombine.high %v5636_v3, %v5640_v1  ;;  %v5679_v62 = vld [vmem:[#allocation10 + $0x2b0] sm:$0xff]  ;;  %v5676_v19 = vld [vmem:[#allocation10 + $0x298] sm:$0xff] }
 0x5f4   :  { %12763 = vmatprep.subr.bf16.mxu1 %v14526_v12  ;;  %v5643_v12 = vld [vmem:[#allocation10 + $0x190] sm:$0xff]  ;;  %v5680_v3 = vld [vmem:[#allocation10 + $0x2b8] sm:$0xff] }
 0x5f5   :  { %12099 = vmatmul.mubr.bf16.vlgmr.msra.gmra.mrb[32].mxu0 %v16627_v35  ;;  %v14571_v21 = vcombine.low %v5643_v12, %v5647_v41 }
 0x5f6   :  { %12427 = vmatmul.mubr.bf16.vlgmr.msra.gmra.mrb[32].mxu1 %v16627_v35  ;;  %12436 = vmatpush1.bf16.msra.mxu0 %v14523_v16  ;;  %v5648_v16 = vld [vmem:[#allocation10 + $0x1b8] sm:$0xff] }
 0x5f7   :  { %12467 = vmatprep.mubr.bf16.mxu0 %v16498_v28  ;;  %12764 = vmatpush1.bf16.msra.mxu1 %v14525_v50  ;;  %v14572_v50 = vcombine.high %v5643_v12, %v5647_v41  ;;  %v5687_v12 = vld [vmem:[#allocation10 + $0x2f0] sm:$0xff]  ;;  %v5684_v41 = vld [vmem:[#allocation10 + $0x2d8] sm:$0xff] }
 0x5f8   :  { %12795 = vmatprep.mubr.bf16.mxu1 %v16498_v28  ;;  %12437 = vmatprep.subr.bf16.mxu0 %v14532_v38  ;;  %v14547_v28 = vcombine.low %v5619_v46, %v5623_v51  ;;  %v14574_v38 = vcombine.high %v5644_v13, %v5648_v16  ;;  %v5663_v46 = vld [vmem:[#allocation10 + $0x230] sm:$0xff]  ;;  %v5660_v51 = vld [vmem:[#allocation10 + $0x218] sm:$0xff] }
 0x5f9   :  { %12765 = vmatprep.subr.bf16.mxu1 %v14534_v5  ;;  %v5652_v5 = vld [vmem:[#allocation10 + $0x1d8] sm:$0xff] }
 0x5fa   :  { %12438 = vmatpush1.bf16.msra.mxu0 %v14531_v23  ;;  %v14573_v23 = vcombine.low %v5644_v13, %v5648_v16  ;;  %v5688_v13 = vld [vmem:[#allocation10 + $0x2f8] sm:$0xff] }
 0x5fb   :  { %12766 = vmatpush1.bf16.msra.mxu1 %v14533_v24  ;;  %12439 = vmatprep.subr.bf16.mxu0 %v14540_v53  ;;  %v14580_v24 = vcombine.high %v5651_v47, %v5655_v48  ;;  %v14582_v53 = vcombine.high %v5652_v5, %v5656_v20  ;;  %v5695_v47 = vld [vmem:[#allocation10 + $0x330] sm:$0xff]  ;;  %v5692_v48 = vld [vmem:[#allocation10 + $0x318] sm:$0xff] }
 0x5fc   :  { %12767 = vmatprep.subr.bf16.mxu1 %v14542_v49  ;;  %v5659_v49 = vld [vmem:[#allocation10 + $0x210] sm:$0xff] }
 0x5fd   :  { %v14587_v11 = vcombine.low %v5659_v49, %v5663_v46 }
 0x5fe   :  { %12440 = vmatpush1.bf16.msra.mxu0 %v14539_v43  ;;  %v14581_v43 = vcombine.low %v5652_v5, %v5656_v20  ;;  %v5696_v5 = vld [vmem:[#allocation10 + $0x338] sm:$0xff] }
 0x5ff   :  { %12768 = vmatpush1.bf16.msra.mxu1 %v14541_v56  ;;  %12441 = vmatprep.subr.bf16.mxu0 %v14548_v44  ;;  %v14588_v56 = vcombine.high %v5659_v49, %v5663_v46  ;;  %v14590_v44 = vcombine.high %v5660_v51, %v5664_v54  ;;  %v5703_v49 = vld [vmem:[#allocation10 + $0x370] sm:$0xff]  ;;  %v5700_v46 = vld [vmem:[#allocation10 + $0x358] sm:$0xff] }
 0x600   :  { %12769 = vmatprep.subr.bf16.mxu1 %v14550_v58  ;;  %v5667_v58 = vld [vmem:[#allocation10 + $0x250] sm:$0xff] }
 0x601   :  { %v14595_v1 = vcombine.low %v5667_v58, %v5671_v26 }
 0x602   :  { %12442 = vmatpush1.bf16.msra.mxu0 %v14547_v28  ;;  %v14589_v28 = vcombine.low %v5660_v51, %v5664_v54  ;;  %v5704_v51 = vld [vmem:[#allocation10 + $0x378] sm:$0xff] }
 0x603   :  { %12770 = vmatpush1.bf16.msra.mxu1 %v14549_v61  ;;  %12443 = vmatprep.subr.bf16.mxu0 %v14556_v36  ;;  %v14596_v61 = vcombine.high %v5667_v58, %v5671_v26  ;;  %v14598_v36 = vcombine.high %v5668_v59, %v5672_v8  ;;  %v5711_v58 = vld [vmem:[#allocation10 + $0x3b0] sm:$0xff]  ;;  %v5708_v26 = vld [vmem:[#allocation10 + $0x398] sm:$0xff] }
 0x604   :  { %12771 = vmatprep.subr.bf16.mxu1 %v14558_v52  ;;  %v5675_v52 = vld [vmem:[#allocation10 + $0x290] sm:$0xff] }
 0x605   :  { %v14603_v16 = vcombine.low %v5675_v52, %v5679_v62 }
 0x606   :  { %12444 = vmatpush1.bf16.msra.mxu0 %v14555_v40  ;;  %v14597_v40 = vcombine.low %v5668_v59, %v5672_v8  ;;  %v5712_v59 = vld [vmem:[#allocation10 + $0x3b8] sm:$0xff] }
 0x607   :  { %12772 = vmatpush1.bf16.msra.mxu1 %v14557_v4  ;;  %12445 = vmatprep.subr.bf16.mxu0 %v14564_v7  ;;  %v14604_v4 = vcombine.high %v5675_v52, %v5679_v62  ;;  %v14606_v7 = vcombine.high %v5676_v19, %v5680_v3  ;;  %v5719_v52 = vld [vmem:[#allocation10 + $0x3f0] sm:$0xff]  ;;  %v5716_v62 = vld [vmem:[#allocation10 + $0x3d8] sm:$0xff] }
 0x608   :  { %12773 = vmatprep.subr.bf16.mxu1 %v14566_v22  ;;  %v5683_v22 = vld [vmem:[#allocation10 + $0x2d0] sm:$0xff] }
 0x609   :  { %v14611_v20 = vcombine.low %v5683_v22, %v5687_v12 }
 0x60a   :  { %12446 = vmatpush1.bf16.msra.mxu0 %v14563_v9  ;;  %v14605_v9 = vcombine.low %v5676_v19, %v5680_v3  ;;  %v5720_v19 = vld [vmem:[#allocation10 + $0x3f8] sm:$0xff] }
 0x60b   :  { %12774 = vmatpush1.bf16.msra.mxu1 %v14565_v32  ;;  %12447 = vmatprep.subr.bf16.mxu0 %v14572_v50  ;;  %v14612_v32 = vcombine.high %v5683_v22, %v5687_v12  ;;  %v14614_v50 = vcombine.high %v5684_v41, %v5688_v13  ;;  %v5727_v22 = vld [vmem:[#allocation10 + $0x430] sm:$0xff]  ;;  %v5724_v12 = vld [vmem:[#allocation10 + $0x418] sm:$0xff] }
 0x60c   :  { %12775 = vmatprep.subr.bf16.mxu1 %v14574_v38  ;;  %v5691_v38 = vld [vmem:[#allocation10 + $0x310] sm:$0xff] }
 0x60d   :  { %v14619_v54 = vcombine.low %v5691_v38, %v5695_v47 }
 0x60e   :  { %12448 = vmatpush1.bf16.msra.mxu0 %v14571_v21  ;;  %v14613_v21 = vcombine.low %v5684_v41, %v5688_v13  ;;  %v5728_v41 = vld [vmem:[#allocation10 + $0x438] sm:$0xff] }
 0x60f   :  { %12776 = vmatpush1.bf16.msra.mxu1 %v14573_v23  ;;  %12449 = vmatprep.subr.bf16.mxu0 %v14580_v24  ;;  %v14620_v23 = vcombine.high %v5691_v38, %v5695_v47  ;;  %v14622_v24 = vcombine.high %v5692_v48, %v5696_v5  ;;  %v5735_v38 = vld [vmem:[#allocation10 + $0x470] sm:$0xff] }
 0x610   :  { %12777 = vmatprep.subr.bf16.mxu1 %v14582_v53  ;;  %v5699_v53 = vld [vmem:[#allocation10 + $0x350] sm:$0xff] }
 0x611   :  { %v14627_v8 = vcombine.low %v5699_v53, %v5703_v49 }
 0x612   :  { %12450 = vmatpush1.bf16.msra.mxu0 %v14579_v18  ;;  %v14621_v18 = vcombine.low %v5692_v48, %v5696_v5  ;;  %v5732_v48 = vld [vmem:[#allocation10 + $0x458] sm:$0xff] }
 0x613   :  { %12778 = vmatpush1.bf16.msra.mxu1 %v14581_v43  ;;  %12451 = vmatprep.subr.bf16.mxu0 %v14588_v56  ;;  %v14628_v43 = vcombine.high %v5699_v53, %v5703_v49  ;;  %v14630_v56 = vcombine.high %v5700_v46, %v5704_v51  ;;  %v5736_v5 = vld [vmem:[#allocation10 + $0x478] sm:$0xff] }
 0x614   :  { %12779 = vmatprep.subr.bf16.mxu1 %v14590_v44  ;;  %v5707_v44 = vld [vmem:[#allocation10 + $0x390] sm:$0xff]  ;;  %v14662_v53 = vcombine.high %v5732_v48, %v5736_v5  ;;  %v5740_v49 = vld [vmem:[#allocation10 + $0x498] sm:$0xff] }
 0x615   :  { %v14635_v3 = vcombine.low %v5707_v44, %v5711_v58 }
 0x616   :  { %12452 = vmatpush1.bf16.msra.mxu0 %v14587_v11  ;;  %v14629_v11 = vcombine.low %v5700_v46, %v5704_v51  ;;  %v5744_v46 = vld [vmem:[#allocation10 + $0x4b8] sm:$0xff] }
 0x617   :  { %12780 = vmatpush1.bf16.msra.mxu1 %v14589_v28  ;;  %12453 = vmatprep.subr.bf16.mxu0 %v14596_v61  ;;  %v14636_v28 = vcombine.high %v5707_v44, %v5711_v58  ;;  %v14638_v61 = vcombine.high %v5708_v26, %v5712_v59  ;;  %v5751_v44 = vld [vmem:[#allocation10 + $0x4f0] sm:$0xff]  ;;  %v5748_v58 = vld [vmem:[#allocation10 + $0x4d8] sm:$0xff] }
 0x618   :  { %12781 = vmatprep.subr.bf16.mxu1 %v14598_v36  ;;  %v5715_v36 = vld [vmem:[#allocation10 + $0x3d0] sm:$0xff] }
 0x619   :  { %v14643_v13 = vcombine.low %v5715_v36, %v5719_v52 }
 0x61a   :  { %12454 = vmatpush1.bf16.msra.mxu0 %v14595_v1  ;;  %v14637_v1 = vcombine.low %v5708_v26, %v5712_v59  ;;  %v5752_v26 = vld [vmem:[#allocation10 + $0x4f8] sm:$0xff] }
 0x61b   :  { %12782 = vmatpush1.bf16.msra.mxu1 %v14597_v40  ;;  %12455 = vmatprep.subr.bf16.mxu0 %v14604_v4  ;;  %v14644_v40 = vcombine.high %v5715_v36, %v5719_v52  ;;  %v14646_v4 = vcombine.high %v5716_v62, %v5720_v19  ;;  %v5756_v36 = vld [vmem:[#allocation10 + $0x518] sm:$0xff] }
 0x61c   :  { %12783 = vmatprep.subr.bf16.mxu1 %v14606_v7  ;;  %v5723_v7 = vld [vmem:[#allocation10 + $0x410] sm:$0xff]  ;;  %v5760_v52 = vld [vmem:[#allocation10 + $0x538] sm:$0xff] }
 0x61d   :  { %v14651_v47 = vcombine.low %v5723_v7, %v5727_v22 }
 0x61e   :  { %12456 = vmatpush1.bf16.msra.mxu0 %v14603_v16  ;;  %v14645_v16 = vcombine.low %v5716_v62, %v5720_v19  ;;  %v14677_v62 = vcombine.low %v5748_v58, %v5752_v26 }
 0x61f   :  { %12784 = vmatpush1.bf16.msra.mxu1 %v14605_v9  ;;  %12457 = vmatprep.subr.bf16.mxu0 %v14612_v32  ;;  %v14652_v9 = vcombine.high %v5723_v7, %v5727_v22  ;;  %v14654_v32 = vcombine.high %v5724_v12, %v5728_v41  ;;  %v5768_v7 = vld [vmem:[#allocation10 + $0x578] sm:$0xff] }
 0x620   :  { %12785 = vmatprep.subr.bf16.mxu1 %v14614_v50  ;;  %v5731_v50 = vld [vmem:[#allocation10 + $0x450] sm:$0xff] }
 0x621   :  { %v14659_v51 = vcombine.low %v5731_v50, %v5735_v38 }
 0x622   :  { %12458 = vmatpush1.bf16.msra.mxu0 %v14611_v20  ;;  %v14653_v20 = vcombine.low %v5724_v12, %v5728_v41  ;;  %v14685_v12 = vcombine.low %v5756_v36, %v5760_v52 }
 0x623   :  { %12786 = vmatpush1.bf16.msra.mxu1 %v14613_v21  ;;  %12459 = vmatprep.subr.bf16.mxu0 %v14620_v23  ;;  %v14660_v21 = vcombine.high %v5731_v50, %v5735_v38  ;;  %v5739_v23 = vld [vmem:[#allocation10 + $0x490] sm:$0xff]  ;;  %v5776_v50 = vld [vmem:[#allocation10 + $0x5b8] sm:$0xff] }
 0x624   :  { %12787 = vmatprep.subr.bf16.mxu1 %v14622_v24  ;;  %v5743_v24 = vld [vmem:[#allocation10 + $0x4b0] sm:$0xff] }
 0x625   :  { %v14667_v59 = vcombine.low %v5739_v23, %v5743_v24 }
 0x626   :  { %12460 = vmatpush1.bf16.msra.mxu0 %v14619_v54  ;;  %v14661_v54 = vcombine.low %v5732_v48, %v5736_v5 }
 0x627   :  { %12788 = vmatpush1.bf16.msra.mxu1 %v14621_v18  ;;  %12461 = vmatprep.subr.bf16.mxu0 %v14628_v43  ;;  %v14668_v18 = vcombine.high %v5739_v23, %v5743_v24  ;;  %v14670_v43 = vcombine.high %v5740_v49, %v5744_v46  ;;  %v5780_v23 = vld [vmem:[#allocation10 + $0x5d8] sm:$0xff] }
 0x628   :  { %12789 = vmatprep.subr.bf16.mxu1 %v14630_v56  ;;  %v5747_v56 = vld [vmem:[#allocation10 + $0x4d0] sm:$0xff]  ;;  %v5784_v24 = vld [vmem:[#allocation10 + $0x5f8] sm:$0xff] }
 0x62a   :  { %12462 = vmatpush1.bf16.msra.mxu0 %v14627_v8  ;;  %v14676_v8 = vcombine.high %v5747_v56, %v5751_v44 }
 0x62b   :  { %12790 = vmatpush1.bf16.msra.mxu1 %v14629_v11  ;;  %12463 = vmatprep.subr.bf16.mxu0 %v14636_v28  ;;  %v14678_v11 = vcombine.high %v5748_v58, %v5752_v26  ;;  %v5755_v28 = vld [vmem:[#allocation10 + $0x510] sm:$0xff]  ;;  %v14709_v58 = vcombine.low %v5780_v23, %v5784_v24 }
 0x62c   :  { %12791 = vmatprep.subr.bf16.mxu1 %v14638_v61  ;;  %v5759_v61 = vld [vmem:[#allocation10 + $0x530] sm:$0xff] }
 0x62d   :  { %v14684_v19 = vcombine.high %v5755_v28, %v5759_v61  ;;  %v14683_v22 = vcombine.low %v5755_v28, %v5759_v61  ;;  %v5800_v28 = vld [vmem:[#allocation10 + $0x678] sm:$0xff] }
 0x62e   :  { %12464 = vmatpush1.bf16.msra.mxu0 %v14635_v3  ;;  %v14686_v3 = vcombine.high %v5756_v36, %v5760_v52 }
 0x62f   :  { %12792 = vmatpush1.bf16.msra.mxu1 %v14637_v1  ;;  %12465 = vmatprep.subr.bf16.mxu0 %v14644_v40  ;;  %v5763_v1 = vld [vmem:[#allocation10 + $0x550] sm:$0xff] }
 0x630   :  { %12793 = vmatprep.subr.bf16.mxu1 %v14646_v4  ;;  %v5767_v40 = vld [vmem:[#allocation10 + $0x570] sm:$0xff]  ;;  %v5764_v4 = vld [vmem:[#allocation10 + $0x558] sm:$0xff] }
 0x631   :  { %v14692_v41 = vcombine.high %v5763_v1, %v5767_v40  ;;  %v14691_v38 = vcombine.low %v5763_v1, %v5767_v40  ;;  %v5808_v1 = vld [vmem:[#allocation10 + $0x6b8] sm:$0xff] }
 0x632   :  { %12466 = vmatpush1.bf16.msra.mxu0 %v14643_v13  ;;  %v14694_v13 = vcombine.high %v5764_v4, %v5768_v7 }
 0x633   :  { %12794 = vmatpush1.bf16.msra.mxu1 %v14645_v16  ;;  %12476 = vmatprep.subr.bf16.mxu0 %v14652_v9  ;;  %v5771_v16 = vld [vmem:[#allocation10 + $0x590] sm:$0xff] }
 0x634   :  { %12804 = vmatprep.subr.bf16.mxu1 %v14654_v32  ;;  %v5775_v9 = vld [vmem:[#allocation10 + $0x5b0] sm:$0xff]  ;;  %v5772_v32 = vld [vmem:[#allocation10 + $0x598] sm:$0xff] }
 0x635   :  { %12468 = vmatmul.mubr.bf16.vlgmr.msra.gmra.mrb[36].mxu0 %v16510_v6  ;;  %v14700_v48 = vcombine.high %v5771_v16, %v5775_v9  ;;  %v14702_v5 = vcombine.high %v5772_v32, %v5776_v50 }
 0x636   :  { %12796 = vmatmul.mubr.bf16.vlgmr.msra.gmra.mrb[36].mxu1 %v16510_v6  ;;  %12477 = vmatpush1.bf16.msra.mxu0 %v14651_v47  ;;  %v14669_v6 = vcombine.low %v5740_v49, %v5744_v46  ;;  %v14693_v47 = vcombine.low %v5764_v4, %v5768_v7  ;;  %v14701_v49 = vcombine.low %v5772_v32, %v5776_v50 }
 0x637   :  { %12508 = vmatprep.mubr.bf16.mxu0 %v16512_v14  ;;  %12805 = vmatpush1.bf16.msra.mxu1 %v14653_v20  ;;  %v5779_v20 = vld [vmem:[#allocation10 + $0x5d0] sm:$0xff] }
 0x638   :  { %12836 = vmatprep.mubr.bf16.mxu1 %v16512_v14  ;;  %12478 = vmatprep.subr.bf16.mxu0 %v14660_v21  ;;  %v14675_v14 = vcombine.low %v5747_v56, %v5751_v44  ;;  %v5783_v21 = vld [vmem:[#allocation10 + $0x5f0] sm:$0xff]  ;;  %v5792_v56 = vld [vmem:[#allocation10 + $0x638] sm:$0xff] }
 0x639   :  { %12806 = vmatprep.subr.bf16.mxu1 %v14662_v53  ;;  %v14699_v53 = vcombine.low %v5771_v16, %v5775_v9  ;;  %v14708_v46 = vcombine.high %v5779_v20, %v5783_v21  ;;  %v14707_v44 = vcombine.low %v5779_v20, %v5783_v21  ;;  %v5816_v16 = vld [vmem:[#allocation10 + $0x6f8] sm:$0xff] }
 0x63a   :  { %12479 = vmatpush1.bf16.msra.mxu0 %v14659_v51  ;;  %v14710_v51 = vcombine.high %v5780_v23, %v5784_v24  ;;  %v5824_v20 = vld [vmem:[#allocation10 + $0x738] sm:$0xff] }
 0x63b   :  { %12807 = vmatpush1.bf16.msra.mxu1 %v14661_v54  ;;  %12480 = vmatprep.subr.bf16.mxu0 %v14668_v18  ;;  %v5787_v54 = vld [vmem:[#allocation10 + $0x610] sm:$0xff] }
 0x63c   :  { %12808 = vmatprep.subr.bf16.mxu1 %v14670_v43  ;;  %v5791_v18 = vld [vmem:[#allocation10 + $0x630] sm:$0xff]  ;;  %v5788_v43 = vld [vmem:[#allocation10 + $0x618] sm:$0xff] }
 0x63d   :  { %v14716_v26 = vcombine.high %v5787_v54, %v5791_v18  ;;  %v14715_v61 = vcombine.low %v5787_v54, %v5791_v18  ;;  %v14717_v36 = vcombine.low %v5788_v43, %v5792_v56  ;;  %v5832_v54 = vld [vmem:[#allocation10 + $0x778] sm:$0xff] }
 0x63e   :  { %12481 = vmatpush1.bf16.msra.mxu0 %v14667_v59  ;;  %v14718_v59 = vcombine.high %v5788_v43, %v5792_v56 }
 0x63f   :  { %12809 = vmatpush1.bf16.msra.mxu1 %v14669_v6  ;;  %12482 = vmatprep.subr.bf16.mxu0 %v14676_v8  ;;  %v5795_v6 = vld [vmem:[#allocation10 + $0x650] sm:$0xff] }
 0x640   :  { %12810 = vmatprep.subr.bf16.mxu1 %v14678_v11  ;;  %v5799_v8 = vld [vmem:[#allocation10 + $0x670] sm:$0xff]  ;;  %v5796_v11 = vld [vmem:[#allocation10 + $0x658] sm:$0xff] }
 0x641   :  { %v14724_v52 = vcombine.high %v5795_v6, %v5799_v8  ;;  %v14723_v40 = vcombine.low %v5795_v6, %v5799_v8  ;;  %v14725_v4 = vcombine.low %v5796_v11, %v5800_v28  ;;  %v5840_v6 = vld [vmem:[#allocation10 + $0x7b8] sm:$0xff] }
 0x642   :  { %12483 = vmatpush1.bf16.msra.mxu0 %v14675_v14  ;;  %v14726_v14 = vcombine.high %v5796_v11, %v5800_v28 }
 0x643   :  { %12811 = vmatpush1.bf16.msra.mxu1 %v14677_v62  ;;  %12484 = vmatprep.subr.bf16.mxu0 %v14684_v19  ;;  %v5803_v62 = vld [vmem:[#allocation10 + $0x690] sm:$0xff] }
 0x644   :  { %12812 = vmatprep.subr.bf16.mxu1 %v14686_v3  ;;  %v5807_v19 = vld [vmem:[#allocation10 + $0x6b0] sm:$0xff]  ;;  %v5804_v3 = vld [vmem:[#allocation10 + $0x698] sm:$0xff] }
 0x645   :  { %v14732_v7 = vcombine.high %v5803_v62, %v5807_v19  ;;  %v14731_v9 = vcombine.low %v5803_v62, %v5807_v19  ;;  %v14733_v32 = vcombine.low %v5804_v3, %v5808_v1  ;;  %v5848_v62 = vld [vmem:[#allocation10 + $0x7f8] sm:$0xff] }
 0x646   :  { %12485 = vmatpush1.bf16.msra.mxu0 %v14683_v22  ;;  %v14734_v22 = vcombine.high %v5804_v3, %v5808_v1 }
 0x647   :  { %12813 = vmatpush1.bf16.msra.mxu1 %v14685_v12  ;;  %12486 = vmatprep.subr.bf16.mxu0 %v14692_v41  ;;  %v5811_v12 = vld [vmem:[#allocation10 + $0x6d0] sm:$0xff] }
 0x648   :  { %12814 = vmatprep.subr.bf16.mxu1 %v14694_v13  ;;  %v5815_v41 = vld [vmem:[#allocation10 + $0x6f0] sm:$0xff]  ;;  %v5812_v13 = vld [vmem:[#allocation10 + $0x6d8] sm:$0xff] }
 0x649   :  { %v14740_v50 = vcombine.high %v5811_v12, %v5815_v41  ;;  %v14739_v21 = vcombine.low %v5811_v12, %v5815_v41  ;;  %v14741_v23 = vcombine.low %v5812_v13, %v5816_v16  ;;  %v5856_v12 = vld [vmem:[#allocation10 + $0x838] sm:$0xff] }
 0x64a   :  { %12487 = vmatpush1.bf16.msra.mxu0 %v14691_v38  ;;  %v14742_v38 = vcombine.high %v5812_v13, %v5816_v16 }
 0x64b   :  { %12815 = vmatpush1.bf16.msra.mxu1 %v14693_v47  ;;  %12488 = vmatprep.subr.bf16.mxu0 %v14700_v48  ;;  %v5819_v47 = vld [vmem:[#allocation10 + $0x710] sm:$0xff] }
 0x64c   :  { %12816 = vmatprep.subr.bf16.mxu1 %v14702_v5  ;;  %v5823_v48 = vld [vmem:[#allocation10 + $0x730] sm:$0xff]  ;;  %v5820_v5 = vld [vmem:[#allocation10 + $0x718] sm:$0xff] }
 0x64d   :  { %v14748_v24 = vcombine.high %v5819_v47, %v5823_v48  ;;  %v14747_v18 = vcombine.low %v5819_v47, %v5823_v48  ;;  %v14749_v43 = vcombine.low %v5820_v5, %v5824_v20  ;;  %v5860_v47 = vld [vmem:[#allocation10 + $0x858] sm:$0xff] }
 0x64e   :  { %12489 = vmatpush1.bf16.msra.mxu0 %v14699_v53  ;;  %v14750_v53 = vcombine.high %v5820_v5, %v5824_v20  ;;  %v5864_v48 = vld [vmem:[#allocation10 + $0x878] sm:$0xff] }
 0x64f   :  { %12817 = vmatpush1.bf16.msra.mxu1 %v14701_v49  ;;  %12490 = vmatprep.subr.bf16.mxu0 %v14708_v46  ;;  %v5827_v49 = vld [vmem:[#allocation10 + $0x750] sm:$0xff] }
 0x650   :  { %12818 = vmatprep.subr.bf16.mxu1 %v14710_v51  ;;  %v5831_v46 = vld [vmem:[#allocation10 + $0x770] sm:$0xff]  ;;  %v5828_v51 = vld [vmem:[#allocation10 + $0x758] sm:$0xff] }
 0x651   :  { %v14756_v56 = vcombine.high %v5827_v49, %v5831_v46  ;;  %v14755_v8 = vcombine.low %v5827_v49, %v5831_v46  ;;  %v14757_v11 = vcombine.low %v5828_v51, %v5832_v54  ;;  %v5872_v49 = vld [vmem:[#allocation10 + $0x8b8] sm:$0xff] }
 0x652   :  { %12491 = vmatpush1.bf16.msra.mxu0 %v14707_v44  ;;  %v14758_v44 = vcombine.high %v5828_v51, %v5832_v54  ;;  %v14789_v51 = vcombine.low %v5860_v47, %v5864_v48 }
 0x653   :  { %12819 = vmatpush1.bf16.msra.mxu1 %v14709_v58  ;;  %12492 = vmatprep.subr.bf16.mxu0 %v14716_v26  ;;  %v5835_v58 = vld [vmem:[#allocation10 + $0x790] sm:$0xff] }
 0x654   :  { %12820 = vmatprep.subr.bf16.mxu1 %v14718_v59  ;;  %v5839_v26 = vld [vmem:[#allocation10 + $0x7b0] sm:$0xff]  ;;  %v5836_v59 = vld [vmem:[#allocation10 + $0x798] sm:$0xff] }
 0x655   :  { %v14764_v28 = vcombine.high %v5835_v58, %v5839_v26  ;;  %v14763_v19 = vcombine.low %v5835_v58, %v5839_v26  ;;  %v14765_v3 = vcombine.low %v5836_v59, %v5840_v6  ;;  %v5880_v58 = vld [vmem:[#allocation10 + $0x8f8] sm:$0xff] }
 0x656   :  { %12493 = vmatpush1.bf16.msra.mxu0 %v14715_v61  ;;  %v14766_v61 = vcombine.high %v5836_v59, %v5840_v6 }
 0x657   :  { %12821 = vmatpush1.bf16.msra.mxu1 %v14717_v36  ;;  %12494 = vmatprep.subr.bf16.mxu0 %v14724_v52  ;;  %v5843_v36 = vld [vmem:[#allocation10 + $0x7d0] sm:$0xff] }
 0x658   :  { %12822 = vmatprep.subr.bf16.mxu1 %v14726_v14  ;;  %v5847_v52 = vld [vmem:[#allocation10 + $0x7f0] sm:$0xff]  ;;  %v5844_v14 = vld [vmem:[#allocation10 + $0x7d8] sm:$0xff] }
 0x659   :  { %v14772_v1 = vcombine.high %v5843_v36, %v5847_v52  ;;  %v14771_v41 = vcombine.low %v5843_v36, %v5847_v52  ;;  %v14773_v13 = vcombine.low %v5844_v14, %v5848_v62 }
 0x65a   :  { %12495 = vmatpush1.bf16.msra.mxu0 %v14723_v40  ;;  %v14774_v40 = vcombine.high %v5844_v14, %v5848_v62  ;;  %v5891_v62 = vld [vmem:[#allocation10 + $0x950] sm:$0xff] }
 0x65b   :  { %12823 = vmatpush1.bf16.msra.mxu1 %v14725_v4  ;;  %12496 = vmatprep.subr.bf16.mxu0 %v14732_v7  ;;  %v5851_v4 = vld [vmem:[#allocation10 + $0x810] sm:$0xff] }
 0x65c   :  { %12824 = vmatprep.subr.bf16.mxu1 %v14734_v22  ;;  %v5855_v7 = vld [vmem:[#allocation10 + $0x830] sm:$0xff]  ;;  %v5852_v22 = vld [vmem:[#allocation10 + $0x818] sm:$0xff] }
 0x65d   :  { %v14780_v16 = vcombine.high %v5851_v4, %v5855_v7  ;;  %v14781_v5 = vcombine.low %v5852_v22, %v5856_v12 }
 0x65e   :  { %12497 = vmatpush1.bf16.msra.mxu0 %v14731_v9  ;;  %v14782_v9 = vcombine.high %v5852_v22, %v5856_v12  ;;  %v5899_v12 = vld [vmem:[#allocation10 + $0x990] sm:$0xff] }
 0x65f   :  { %12825 = vmatpush1.bf16.msra.mxu1 %v14733_v32  ;;  %12498 = vmatprep.subr.bf16.mxu0 %v14740_v50  ;;  %v5859_v32 = vld [vmem:[#allocation10 + $0x850] sm:$0xff] }
 0x660   :  { %12826 = vmatprep.subr.bf16.mxu1 %v14742_v38  ;;  %v5863_v50 = vld [vmem:[#allocation10 + $0x870] sm:$0xff]  ;;  %v14779_v38 = vcombine.low %v5851_v4, %v5855_v7 }
 0x661   :  { %v14788_v20 = vcombine.high %v5859_v32, %v5863_v50  ;;  %v14787_v46 = vcombine.low %v5859_v32, %v5863_v50 }
 0x662   :  { %12499 = vmatpush1.bf16.msra.mxu0 %v14739_v21  ;;  %v5867_v21 = vld [vmem:[#allocation10 + $0x890] sm:$0xff] }
 0x663   :  { %12827 = vmatpush1.bf16.msra.mxu1 %v14741_v23  ;;  %12500 = vmatprep.subr.bf16.mxu0 %v14748_v24  ;;  %v5871_v23 = vld [vmem:[#allocation10 + $0x8b0] sm:$0xff]  ;;  %v14790_v24 = vcombine.high %v5860_v47, %v5864_v48 }
 0x664   :  { %12828 = vmatprep.subr.bf16.mxu1 %v14750_v53  ;;  %v5868_v53 = vld [vmem:[#allocation10 + $0x898] sm:$0xff]  ;;  %v14796_v54 = vcombine.high %v5867_v21, %v5871_v23  ;;  %v14795_v26 = vcombine.low %v5867_v21, %v5871_v23  ;;  %v5907_v47 = vld [vmem:[#allocation10 + $0x9d0] sm:$0xff] }
 0x665   :  { %v5911_v48 = vld [vmem:[#allocation10 + $0x9f0] sm:$0xff] }
 0x666   :  { %12501 = vmatpush1.bf16.msra.mxu0 %v14747_v18  ;;  %v14798_v18 = vcombine.high %v5868_v53, %v5872_v49 }
 0x667   :  { %12829 = vmatpush1.bf16.msra.mxu1 %v14749_v43  ;;  %12502 = vmatprep.subr.bf16.mxu0 %v14756_v56  ;;  %v5875_v43 = vld [vmem:[#allocation10 + $0x8d0] sm:$0xff] }
 0x668   :  { %12830 = vmatprep.subr.bf16.mxu1 %v14758_v44  ;;  %v5879_v56 = vld [vmem:[#allocation10 + $0x8f0] sm:$0xff]  ;;  %v5876_v44 = vld [vmem:[#allocation10 + $0x8d8] sm:$0xff] }
 0x669   :  { %v14804_v59 = vcombine.high %v5875_v43, %v5879_v56  ;;  %v14806_v6 = vcombine.high %v5876_v44, %v5880_v58  ;;  %v14805_v36 = vcombine.low %v5876_v44, %v5880_v58  ;;  %v5923_v58 = vld [vmem:[#allocation10 + $0xa50] sm:$0xff] }
 0x66a   :  { %12503 = vmatpush1.bf16.msra.mxu0 %v14755_v8  ;;  %v5883_v8 = vld [vmem:[#allocation10 + $0x910] sm:$0xff] }
 0x66b   :  { %12831 = vmatpush1.bf16.msra.mxu1 %v14757_v11  ;;  %12504 = vmatprep.subr.bf16.mxu0 %v14764_v28  ;;  %v5887_v11 = vld [vmem:[#allocation10 + $0x930] sm:$0xff]  ;;  %v5884_v28 = vld [vmem:[#allocation10 + $0x918] sm:$0xff] }
 0x66c   :  { %12832 = vmatprep.subr.bf16.mxu1 %v14766_v61  ;;  %v5888_v61 = vld [vmem:[#allocation10 + $0x938] sm:$0xff]  ;;  %v14812_v52 = vcombine.high %v5883_v8, %v5887_v11 }
 0x66d   :  { %v14814_v14 = vcombine.high %v5884_v28, %v5888_v61  ;;  %v14813_v4 = vcombine.low %v5884_v28, %v5888_v61  ;;  %v5931_v61 = vld [vmem:[#allocation10 + $0xa90] sm:$0xff] }
 0x66e   :  { %12505 = vmatpush1.bf16.msra.mxu0 %v14763_v19  ;;  %v5895_v19 = vld [vmem:[#allocation10 + $0x970] sm:$0xff] }
 0x66f   :  { %12833 = vmatpush1.bf16.msra.mxu1 %v14765_v3  ;;  %12506 = vmatprep.subr.bf16.mxu0 %v14772_v1  ;;  %v5892_v3 = vld [vmem:[#allocation10 + $0x958] sm:$0xff]  ;;  %v14820_v7 = vcombine.high %v5891_v62, %v5895_v19 }
 0x670   :  { %12834 = vmatprep.subr.bf16.mxu1 %v14774_v40  ;;  %v5896_v1 = vld [vmem:[#allocation10 + $0x978] sm:$0xff]  ;;  %v14811_v40 = vcombine.low %v5883_v8, %v5887_v11 }
 0x671   :  { %v14822_v22 = vcombine.high %v5892_v3, %v5896_v1  ;;  %v14821_v32 = vcombine.low %v5892_v3, %v5896_v1  ;;  %v5939_v1 = vld [vmem:[#allocation10 + $0xad0] sm:$0xff] }
 0x672   :  { %12507 = vmatpush1.bf16.msra.mxu0 %v14771_v41  ;;  %v5903_v41 = vld [vmem:[#allocation10 + $0x9b0] sm:$0xff] }
 0x673   :  { %12835 = vmatpush1.bf16.msra.mxu1 %v14773_v13  ;;  %12517 = vmatprep.subr.bf16.mxu0 %v14780_v16  ;;  %v5900_v13 = vld [vmem:[#allocation10 + $0x998] sm:$0xff]  ;;  %v14828_v50 = vcombine.high %v5899_v12, %v5903_v41  ;;  %v14827_v21 = vcombine.low %v5899_v12, %v5903_v41 }
 0x674   :  { %12845 = vmatprep.subr.bf16.mxu1 %v14782_v9  ;;  %v5904_v16 = vld [vmem:[#allocation10 + $0x9b8] sm:$0xff]  ;;  %v14819_v9 = vcombine.low %v5891_v62, %v5895_v19 }
 0x675   :  { %12509 = vmatmul.mubr.bf16.vlgmr.msra.gmra.mrb[36].mxu0 %v16532_v2  ;;  %v14829_v23 = vcombine.low %v5900_v13, %v5904_v16 }
 0x676   :  { %12837 = vmatmul.mubr.bf16.vlgmr.msra.gmra.mrb[36].mxu1 %v16532_v2  ;;  %12518 = vmatpush1.bf16.msra.mxu0 %v14779_v38  ;;  %v14797_v2 = vcombine.low %v5868_v53, %v5872_v49  ;;  %v14830_v38 = vcombine.high %v5900_v13, %v5904_v16  ;;  %v5915_v49 = vld [vmem:[#allocation10 + $0xa10] sm:$0xff] }
 0x677   :  { %12549 = vmatprep.mubr.bf16.mxu0 %v16534_v10  ;;  %12846 = vmatpush1.bf16.msra.mxu1 %v14781_v5  ;;  %v5908_v5 = vld [vmem:[#allocation10 + $0x9d8] sm:$0xff]  ;;  %v5947_v16 = vld [vmem:[#allocation10 + $0xb10] sm:$0xff] }
 0x678   :  { %12877 = vmatprep.mubr.bf16.mxu1 %v16534_v10  ;;  %12519 = vmatprep.subr.bf16.mxu0 %v14788_v20  ;;  %v14803_v10 = vcombine.low %v5875_v43, %v5879_v56  ;;  %v5912_v20 = vld [vmem:[#allocation10 + $0x9f8] sm:$0xff] }
 0x679   :  { %12847 = vmatprep.subr.bf16.mxu1 %v14790_v24  ;;  %v14836_v24 = vcombine.high %v5907_v47, %v5911_v48  ;;  %v14838_v53 = vcombine.high %v5908_v5, %v5912_v20  ;;  %v14837_v43 = vcombine.low %v5908_v5, %v5912_v20  ;;  %v5955_v20 = vld [vmem:[#allocation10 + $0xb50] sm:$0xff] }
 0x67a   :  { %12520 = vmatpush1.bf16.msra.mxu0 %v14787_v46  ;;  %v5919_v46 = vld [vmem:[#allocation10 + $0xa30] sm:$0xff] }
 0x67b   :  { %12848 = vmatpush1.bf16.msra.mxu1 %v14789_v51  ;;  %12521 = vmatprep.subr.bf16.mxu0 %v14796_v54  ;;  %v5916_v51 = vld [vmem:[#allocation10 + $0xa18] sm:$0xff]  ;;  %v14844_v56 = vcombine.high %v5915_v49, %v5919_v46 }
 0x67c   :  { %12849 = vmatprep.subr.bf16.mxu1 %v14798_v18  ;;  %v5920_v54 = vld [vmem:[#allocation10 + $0xa38] sm:$0xff]  ;;  %v14835_v18 = vcombine.low %v5907_v47, %v5911_v48 }
 0x67d   :  { %v14846_v44 = vcombine.high %v5916_v51, %v5920_v54  ;;  %v14845_v8 = vcombine.low %v5916_v51, %v5920_v54  ;;  %v5963_v54 = vld [vmem:[#allocation10 + $0xb90] sm:$0xff] }
 0x67e   :  { %12522 = vmatpush1.bf16.msra.mxu0 %v14795_v26  ;;  %v5927_v26 = vld [vmem:[#allocation10 + $0xa70] sm:$0xff] }
 0x67f   :  { %12850 = vmatpush1.bf16.msra.mxu1 %v14797_v2  ;;  %12523 = vmatprep.subr.bf16.mxu0 %v14804_v59  ;;  %v5924_v2 = vld [vmem:[#allocation10 + $0xa58] sm:$0xff]  ;;  %v14852_v11 = vcombine.high %v5923_v58, %v5927_v26 }
 0x680   :  { %12851 = vmatprep.subr.bf16.mxu1 %v14806_v6  ;;  %v5928_v59 = vld [vmem:[#allocation10 + $0xa78] sm:$0xff]  ;;  %v14843_v6 = vcombine.low %v5915_v49, %v5919_v46 }
 0x681   :  { %v14854_v28 = vcombine.high %v5924_v2, %v5928_v59  ;;  %v14853_v62 = vcombine.low %v5924_v2, %v5928_v59  ;;  %v5971_v59 = vld [vmem:[#allocation10 + $0xbd0] sm:$0xff] }
 0x682   :  { %12524 = vmatpush1.bf16.msra.mxu0 %v14803_v10  ;;  %v5935_v10 = vld [vmem:[#allocation10 + $0xab0] sm:$0xff] }
 0x683   :  { %12852 = vmatpush1.bf16.msra.mxu1 %v14805_v36  ;;  %12525 = vmatprep.subr.bf16.mxu0 %v14812_v52  ;;  %v5932_v36 = vld [vmem:[#allocation10 + $0xa98] sm:$0xff]  ;;  %v14860_v19 = vcombine.high %v5931_v61, %v5935_v10 }
 0x684   :  { %12853 = vmatprep.subr.bf16.mxu1 %v14814_v14  ;;  %v5936_v52 = vld [vmem:[#allocation10 + $0xab8] sm:$0xff]  ;;  %v14851_v14 = vcombine.low %v5923_v58, %v5927_v26 }
 0x685   :  { %v14862_v3 = vcombine.high %v5932_v36, %v5936_v52  ;;  %v14861_v12 = vcombine.low %v5932_v36, %v5936_v52  ;;  %v5979_v52 = vld [vmem:[#allocation10 + $0xc10] sm:$0xff] }
 0x686   :  { %12526 = vmatpush1.bf16.msra.mxu0 %v14811_v40  ;;  %v5943_v40 = vld [vmem:[#allocation10 + $0xaf0] sm:$0xff] }
 0x687   :  { %12854 = vmatpush1.bf16.msra.mxu1 %v14813_v4  ;;  %12527 = vmatprep.subr.bf16.mxu0 %v14820_v7  ;;  %v5940_v4 = vld [vmem:[#allocation10 + $0xad8] sm:$0xff]  ;;  %v14868_v41 = vcombine.high %v5939_v1, %v5943_v40 }
 0x688   :  { %12855 = vmatprep.subr.bf16.mxu1 %v14822_v22  ;;  %v5944_v7 = vld [vmem:[#allocation10 + $0xaf8] sm:$0xff]  ;;  %v14859_v22 = vcombine.low %v5931_v61, %v5935_v10 }
 0x689   :  { %v14870_v13 = vcombine.high %v5940_v4, %v5944_v7  ;;  %v14869_v47 = vcombine.low %v5940_v4, %v5944_v7  ;;  %v5987_v7 = vld [vmem:[#allocation10 + $0xc50] sm:$0xff] }
 0x68a   :  { %12528 = vmatpush1.bf16.msra.mxu0 %v14819_v9  ;;  %v5951_v9 = vld [vmem:[#allocation10 + $0xb30] sm:$0xff] }
 0x68b   :  { %12856 = vmatpush1.bf16.msra.mxu1 %v14821_v32  ;;  %12529 = vmatprep.subr.bf16.mxu0 %v14828_v50  ;;  %v5948_v32 = vld [vmem:[#allocation10 + $0xb18] sm:$0xff]  ;;  %v14876_v48 = vcombine.high %v5947_v16, %v5951_v9 }
 0x68c   :  { %12857 = vmatprep.subr.bf16.mxu1 %v14830_v38  ;;  %v5952_v50 = vld [vmem:[#allocation10 + $0xb38] sm:$0xff]  ;;  %v14867_v38 = vcombine.low %v5939_v1, %v5943_v40 }
 0x68d   :  { %v14878_v5 = vcombine.high %v5948_v32, %v5952_v50  ;;  %v14877_v49 = vcombine.low %v5948_v32, %v5952_v50  ;;  %v5995_v32 = vld [vmem:[#allocation10 + $0xc90] sm:$0xff] }
 0x68e   :  { %12530 = vmatpush1.bf16.msra.mxu0 %v14827_v21  ;;  %v5959_v21 = vld [vmem:[#allocation10 + $0xb70] sm:$0xff] }
 0x68f   :  { %12858 = vmatpush1.bf16.msra.mxu1 %v14829_v23  ;;  %12531 = vmatprep.subr.bf16.mxu0 %v14836_v24  ;;  %v5956_v23 = vld [vmem:[#allocation10 + $0xb58] sm:$0xff]  ;;  %v14884_v46 = vcombine.high %v5955_v20, %v5959_v21  ;;  %v5999_v50 = vld [vmem:[#allocation10 + $0xcb0] sm:$0xff] }
 0x690   :  { %12859 = vmatprep.subr.bf16.mxu1 %v14838_v53  ;;  %v5960_v24 = vld [vmem:[#allocation10 + $0xb78] sm:$0xff]  ;;  %v14875_v53 = vcombine.low %v5947_v16, %v5951_v9 }
 0x691   :  { %v14886_v51 = vcombine.high %v5956_v23, %v5960_v24  ;;  %v14885_v58 = vcombine.low %v5956_v23, %v5960_v24  ;;  %v6003_v24 = vld [vmem:[#allocation10 + $0xcd0] sm:$0xff] }
 0x692   :  { %12532 = vmatpush1.bf16.msra.mxu0 %v14835_v18  ;;  %v5967_v18 = vld [vmem:[#allocation10 + $0xbb0] sm:$0xff] }
 0x693   :  { %12860 = vmatpush1.bf16.msra.mxu1 %v14837_v43  ;;  %12533 = vmatprep.subr.bf16.mxu0 %v14844_v56  ;;  %v5964_v43 = vld [vmem:[#allocation10 + $0xb98] sm:$0xff]  ;;  %v14892_v26 = vcombine.high %v5963_v54, %v5967_v18 }
 0x694   :  { %12861 = vmatprep.subr.bf16.mxu1 %v14846_v44  ;;  %v5968_v56 = vld [vmem:[#allocation10 + $0xbb8] sm:$0xff]  ;;  %v14883_v44 = vcombine.low %v5955_v20, %v5959_v21  ;;  %v14924_v21 = vcombine.high %v5995_v32, %v5999_v50 }
 0x695   :  { %v14894_v2 = vcombine.high %v5964_v43, %v5968_v56  ;;  %v14893_v61 = vcombine.low %v5964_v43, %v5968_v56  ;;  %v6011_v43 = vld [vmem:[#allocation10 + $0xd10] sm:$0xff] }
 0x696   :  { %12534 = vmatpush1.bf16.msra.mxu0 %v14843_v6  ;;  %v5975_v6 = vld [vmem:[#allocation10 + $0xbf0] sm:$0xff] }
 0x697   :  { %12862 = vmatpush1.bf16.msra.mxu1 %v14845_v8  ;;  %12535 = vmatprep.subr.bf16.mxu0 %v14852_v11  ;;  %v5972_v8 = vld [vmem:[#allocation10 + $0xbd8] sm:$0xff]  ;;  %v14900_v10 = vcombine.high %v5971_v59, %v5975_v6  ;;  %v6015_v56 = vld [vmem:[#allocation10 + $0xd30] sm:$0xff] }
 0x698   :  { %12863 = vmatprep.subr.bf16.mxu1 %v14854_v28  ;;  %v5976_v11 = vld [vmem:[#allocation10 + $0xbf8] sm:$0xff]  ;;  %v14891_v28 = vcombine.low %v5963_v54, %v5967_v18 }
 0x699   :  { %v14902_v36 = vcombine.high %v5972_v8, %v5976_v11  ;;  %v14901_v1 = vcombine.low %v5972_v8, %v5976_v11  ;;  %v6023_v8 = vld [vmem:[#allocation10 + $0xd70] sm:$0xff]  ;;  %v6020_v11 = vld [vmem:[#allocation10 + $0xd58] sm:$0xff] }
 0x69a   :  { %12536 = vmatpush1.bf16.msra.mxu0 %v14851_v14  ;;  %v5983_v14 = vld [vmem:[#allocation10 + $0xc30] sm:$0xff] }
 0x69b   :  { %12864 = vmatpush1.bf16.msra.mxu1 %v14853_v62  ;;  %12537 = vmatprep.subr.bf16.mxu0 %v14860_v19  ;;  %v5980_v62 = vld [vmem:[#allocation10 + $0xc18] sm:$0xff]  ;;  %v14908_v40 = vcombine.high %v5979_v52, %v5983_v14 }
 0x69c   :  { %12865 = vmatprep.subr.bf16.mxu1 %v14862_v3  ;;  %v5984_v19 = vld [vmem:[#allocation10 + $0xc38] sm:$0xff]  ;;  %v14899_v3 = vcombine.low %v5971_v59, %v5975_v6  ;;  %v6019_v6 = vld [vmem:[#allocation10 + $0xd50] sm:$0xff] }
 0x69d   :  { %v14910_v4 = vcombine.high %v5980_v62, %v5984_v19  ;;  %v14909_v16 = vcombine.low %v5980_v62, %v5984_v19  ;;  %v6031_v62 = vld [vmem:[#allocation10 + $0xdb0] sm:$0xff]  ;;  %v6028_v19 = vld [vmem:[#allocation10 + $0xd98] sm:$0xff] }
 0x69e   :  { %12538 = vmatpush1.bf16.msra.mxu0 %v14859_v22  ;;  %v5991_v22 = vld [vmem:[#allocation10 + $0xc70] sm:$0xff] }
 0x69f   :  { %12866 = vmatpush1.bf16.msra.mxu1 %v14861_v12  ;;  %12539 = vmatprep.subr.bf16.mxu0 %v14868_v41  ;;  %v14907_v12 = vcombine.low %v5979_v52, %v5983_v14  ;;  %v5988_v41 = vld [vmem:[#allocation10 + $0xc58] sm:$0xff]  ;;  %v14916_v9 = vcombine.high %v5987_v7, %v5991_v22  ;;  %v6027_v14 = vld [vmem:[#allocation10 + $0xd90] sm:$0xff] }
 0x6a0   :  { %12867 = vmatprep.subr.bf16.mxu1 %v14870_v13  ;;  %v5992_v13 = vld [vmem:[#allocation10 + $0xc78] sm:$0xff] }
 0x6a1   :  { %v14917_v20 = vcombine.low %v5988_v41, %v5992_v13 }
 0x6a2   :  { %12540 = vmatpush1.bf16.msra.mxu0 %v14867_v38  ;;  %v14918_v38 = vcombine.high %v5988_v41, %v5992_v13  ;;  %v6039_v41 = vld [vmem:[#allocation10 + $0xdf0] sm:$0xff] }
 0x6a3   :  { %12868 = vmatpush1.bf16.msra.mxu1 %v14869_v47  ;;  %12541 = vmatprep.subr.bf16.mxu0 %v14876_v48  ;;  %v5996_v47 = vld [vmem:[#allocation10 + $0xc98] sm:$0xff] }
 0x6a4   :  { %12869 = vmatprep.subr.bf16.mxu1 %v14878_v5  ;;  %v6000_v48 = vld [vmem:[#allocation10 + $0xcb8] sm:$0xff]  ;;  %v14915_v5 = vcombine.low %v5987_v7, %v5991_v22 }
 0x6a5   :  { %v14926_v23 = vcombine.high %v5996_v47, %v6000_v48 }
 0x6a6   :  { %12542 = vmatpush1.bf16.msra.mxu0 %v14875_v53  ;;  %v6007_v53 = vld [vmem:[#allocation10 + $0xcf0] sm:$0xff] }
 0x6a7   :  { %12870 = vmatpush1.bf16.msra.mxu1 %v14877_v49  ;;  %12543 = vmatprep.subr.bf16.mxu0 %v14884_v46  ;;  %v6004_v49 = vld [vmem:[#allocation10 + $0xcd8] sm:$0xff]  ;;  %v14932_v54 = vcombine.high %v6003_v24, %v6007_v53 }
 0x6a8   :  { %12871 = vmatprep.subr.bf16.mxu1 %v14886_v51  ;;  %v6008_v46 = vld [vmem:[#allocation10 + $0xcf8] sm:$0xff]  ;;  %v14923_v51 = vcombine.low %v5995_v32, %v5999_v50 }
 0x6a9   :  { %v14934_v18 = vcombine.high %v6004_v49, %v6008_v46  ;;  %v6040_v32 = vld [vmem:[#allocation10 + $0xdf8] sm:$0xff] }
 0x6aa   :  { %12544 = vmatpush1.bf16.msra.mxu0 %v14883_v44  ;;  %v6012_v44 = vld [vmem:[#allocation10 + $0xd18] sm:$0xff] }
 0x6ab   :  { %12872 = vmatpush1.bf16.msra.mxu1 %v14885_v58  ;;  %12545 = vmatprep.subr.bf16.mxu0 %v14892_v26  ;;  %v6016_v58 = vld [vmem:[#allocation10 + $0xd38] sm:$0xff]  ;;  %v14933_v26 = vcombine.low %v6004_v49, %v6008_v46  ;;  %v6047_v49 = vld [vmem:[#allocation10 + $0xe30] sm:$0xff] }
 0x6ac   :  { %12873 = vmatprep.subr.bf16.mxu1 %v14894_v2  ;;  %v14940_v2 = vcombine.high %v6011_v43, %v6015_v56  ;;  %v14942_v59 = vcombine.high %v6012_v44, %v6016_v58  ;;  %v6044_v46 = vld [vmem:[#allocation10 + $0xe18] sm:$0xff] }
 0x6ae   :  { %12546 = vmatpush1.bf16.msra.mxu0 %v14891_v28  ;;  %v6024_v28 = vld [vmem:[#allocation10 + $0xd78] sm:$0xff] }
 0x6af   :  { %12874 = vmatpush1.bf16.msra.mxu1 %v14893_v61  ;;  %12547 = vmatprep.subr.bf16.mxu0 %v14900_v10  ;;  %v14939_v61 = vcombine.low %v6011_v43, %v6015_v56  ;;  %v14941_v10 = vcombine.low %v6012_v44, %v6016_v58  ;;  %v14950_v52 = vcombine.high %v6020_v11, %v6024_v28  ;;  %v6051_v56 = vld [vmem:[#allocation10 + $0xe50] sm:$0xff]  ;;  %v6052_v58 = vld [vmem:[#allocation10 + $0xe58] sm:$0xff] }
 0x6b0   :  { %12875 = vmatprep.subr.bf16.mxu1 %v14902_v36  ;;  %v14948_v36 = vcombine.high %v6019_v6, %v6023_v8  ;;  %v6055_v44 = vld [vmem:[#allocation10 + $0xe70] sm:$0xff] }
 0x6b2   :  { %12548 = vmatpush1.bf16.msra.mxu0 %v14899_v3  ;;  %v6032_v3 = vld [vmem:[#allocation10 + $0xdb8] sm:$0xff] }
 0x6b3   :  { %12876 = vmatpush1.bf16.msra.mxu1 %v14901_v1  ;;  %12558 = vmatprep.subr.bf16.mxu0 %v14908_v40  ;;  %v14947_v1 = vcombine.low %v6019_v6, %v6023_v8  ;;  %v14949_v40 = vcombine.low %v6020_v11, %v6024_v28  ;;  %v14958_v22 = vcombine.high %v6028_v19, %v6032_v3  ;;  %v6059_v8 = vld [vmem:[#allocation10 + $0xe90] sm:$0xff]  ;;  %v6060_v28 = vld [vmem:[#allocation10 + $0xe98] sm:$0xff] }
 0x6b4   :  { %12886 = vmatprep.subr.bf16.mxu1 %v14910_v4  ;;  %v14956_v4 = vcombine.high %v6027_v14, %v6031_v62  ;;  %v6063_v11 = vld [vmem:[#allocation10 + $0xeb0] sm:$0xff] }
 0x6b5   :  { %12550 = vmatmul.mubr.bf16.vlgmr.msra.gmra.mrb[36].mxu0 %v16548_v17 }
 0x6b6   :  { %12878 = vmatmul.mubr.bf16.vlgmr.msra.gmra.mrb[36].mxu1 %v16548_v17  ;;  %12559 = vmatpush1.bf16.msra.mxu0 %v14907_v12  ;;  %v14925_v17 = vcombine.low %v5996_v47, %v6000_v48  ;;  %v6035_v12 = vld [vmem:[#allocation10 + $0xdd0] sm:$0xff]  ;;  %v14955_v47 = vcombine.low %v6027_v14, %v6031_v62 }
 0x6b7   :  { %12590 = vmatprep.mubr.bf16.mxu0 %v16550_v42  ;;  %12887 = vmatpush1.bf16.msra.mxu1 %v14909_v16  ;;  %v6067_v62 = vld [vmem:[#allocation10 + $0xed0] sm:$0xff] }
 0x6b8   :  { %12918 = vmatprep.mubr.bf16.mxu1 %v16550_v42  ;;  %12560 = vmatprep.subr.bf16.mxu0 %v14916_v9  ;;  %v14931_v42 = vcombine.low %v6003_v24, %v6007_v53  ;;  %v6036_v9 = vld [vmem:[#allocation10 + $0xdd8] sm:$0xff]  ;;  %v6043_v53 = vld [vmem:[#allocation10 + $0xe10] sm:$0xff] }
 0x6b9   :  { %12888 = vmatprep.subr.bf16.mxu1 %v14918_v38  ;;  %v14966_v24 = vcombine.high %v6036_v9, %v6040_v32 }
 0x6ba   :  { %12561 = vmatpush1.bf16.msra.mxu0 %v14915_v5 }
 0x6bb   :  { %12889 = vmatpush1.bf16.msra.mxu1 %v14917_v20  ;;  %12562 = vmatprep.subr.bf16.mxu0 %v14924_v21  ;;  %v14957_v20 = vcombine.low %v6028_v19, %v6032_v3  ;;  %v14964_v21 = vcombine.high %v6035_v12, %v6039_v41  ;;  %v6071_v19 = vld [vmem:[#allocation10 + $0xef0] sm:$0xff]  ;;  %v6068_v3 = vld [vmem:[#allocation10 + $0xed8] sm:$0xff] }
 0x6bc   :  { %12890 = vmatprep.subr.bf16.mxu1 %v14926_v23 }
 0x6be   :  { %12563 = vmatpush1.bf16.msra.mxu0 %v14923_v51  ;;  %v6048_v51 = vld [vmem:[#allocation10 + $0xe38] sm:$0xff] }
 0x6bf   :  { %12891 = vmatpush1.bf16.msra.mxu1 %v14925_v17  ;;  %12564 = vmatprep.subr.bf16.mxu0 %v14932_v54  ;;  %v14963_v17 = vcombine.low %v6035_v12, %v6039_v41  ;;  %v14965_v54 = vcombine.low %v6036_v9, %v6040_v32  ;;  %v14974_v43 = vcombine.high %v6044_v46, %v6048_v51  ;;  %v6075_v41 = vld [vmem:[#allocation10 + $0xf10] sm:$0xff]  ;;  %v6076_v32 = vld [vmem:[#allocation10 + $0xf18] sm:$0xff] }
 0x6c0   :  { %12892 = vmatprep.subr.bf16.mxu1 %v14934_v18  ;;  %v14972_v18 = vcombine.high %v6043_v53, %v6047_v49  ;;  %v6079_v9 = vld [vmem:[#allocation10 + $0xf30] sm:$0xff] }
 0x6c2   :  { %12565 = vmatpush1.bf16.msra.mxu0 %v14931_v42  ;;  %v6056_v42 = vld [vmem:[#allocation10 + $0xe78] sm:$0xff] }
 0x6c3   :  { %12893 = vmatpush1.bf16.msra.mxu1 %v14933_v26  ;;  %12566 = vmatprep.subr.bf16.mxu0 %v14940_v2  ;;  %v14971_v26 = vcombine.low %v6043_v53, %v6047_v49  ;;  %v14973_v2 = vcombine.low %v6044_v46, %v6048_v51  ;;  %v14982_v6 = vcombine.high %v6052_v58, %v6056_v42  ;;  %v6088_v53 = vld [vmem:[#allocation10 + $0xf78] sm:$0xff] }
 0x6c4   :  { %12894 = vmatprep.subr.bf16.mxu1 %v14942_v59  ;;  %v14980_v59 = vcombine.high %v6051_v56, %v6055_v44  ;;  %v15003_v49 = vcombine.low %v6075_v41, %v6079_v9 }
 0x6c6   :  { %12567 = vmatpush1.bf16.msra.mxu0 %v14939_v61  ;;  %v6064_v61 = vld [vmem:[#allocation10 + $0xeb8] sm:$0xff] }
 0x6c7   :  { %12895 = vmatpush1.bf16.msra.mxu1 %v14941_v10  ;;  %12568 = vmatprep.subr.bf16.mxu0 %v14948_v36  ;;  %v14979_v10 = vcombine.low %v6051_v56, %v6055_v44  ;;  %v14981_v36 = vcombine.low %v6052_v58, %v6056_v42  ;;  %v14990_v14 = vcombine.high %v6060_v28, %v6064_v61  ;;  %v6096_v56 = vld [vmem:[#allocation10 + $0xfb8] sm:$0xff] }
 0x6c8   :  { %v16645_v7 = vpop.f32.mrb[32].mxu0  ;;  %12896 = vmatprep.subr.bf16.mxu1 %v14950_v52  ;;  %v14988_v52 = vcombine.high %v6059_v8, %v6063_v11 }
 0x6c9   :  { %v16647_v13 = vpop.f32.mrb[32].mxu1  ;;  %v16649_v16 = vpop.f32.mrb[33].mxu0 }
 0x6ca   :  { %v16651_v50 = vpop.f32.mrb[33].mxu1  ;;  %v12104_v38 = vpop.f32.mrb[34].mxu0  ;;  %12569 = vmatpush1.bf16.msra.mxu0 %v14947_v1  ;;  %v6072_v1 = vld [vmem:[#allocation10 + $0xef8] sm:$0xff] }
 0x6cb   :  { %v12432_v48 = vpop.f32.mrb[34].mxu1  ;;  %12897 = vmatpush1.bf16.msra.mxu1 %v14949_v40  ;;  %v12105_v5 = vpop.f32.mrb[35].mxu0  ;;  %12570 = vmatprep.subr.bf16.mxu0 %v14956_v4  ;;  %v14987_v40 = vcombine.low %v6059_v8, %v6063_v11  ;;  %v14989_v4 = vcombine.low %v6060_v28, %v6064_v61  ;;  %v14998_v12 = vcombine.high %v6068_v3, %v6072_v1  ;;  %v6080_v38 = vld [vmem:[#allocation10 + $0xf38] sm:$0xff] }
 0x6cc   :  { %v12433_v23 = vpop.f32.mrb[35].mxu1  ;;  %12898 = vmatprep.subr.bf16.mxu1 %v14958_v22  ;;  %v14996_v22 = vcombine.high %v6067_v62, %v6071_v19  ;;  %v14997_v48 = vcombine.low %v6068_v3, %v6072_v1  ;;  %v15004_v5 = vcombine.high %v6075_v41, %v6079_v9  ;;  %v15005_v46 = vcombine.low %v6076_v32, %v6080_v38  ;;  %v6104_v8 = vld [vmem:[#allocation10 + $0xff8] sm:$0xff] }
 0x6cd   :  { %v6087_v23 = vld [vmem:[#allocation10 + $0xf70] sm:$0xff]  ;;  %v6116_v41 = vld [vmem:[#allocation10 + $0x1058] sm:$0xff] }
 0x6ce   :  { %12571 = vmatpush1.bf16.msra.mxu0 %v14955_v47  ;;  %v14995_v47 = vcombine.low %v6067_v62, %v6071_v19  ;;  %v6112_v62 = vld [vmem:[#allocation10 + $0x1038] sm:$0xff] }
 0x6cf   :  { %12899 = vmatpush1.bf16.msra.mxu1 %v14957_v20  ;;  %12572 = vmatprep.subr.bf16.mxu0 %v14964_v21  ;;  %v15006_v20 = vcombine.high %v6076_v32, %v6080_v38  ;;  %v6083_v21 = vld [vmem:[#allocation10 + $0xf50] sm:$0xff]  ;;  %v6120_v9 = vld [vmem:[#allocation10 + $0x1078] sm:$0xff] }
 0x6d0   :  { %12900 = vmatprep.subr.bf16.mxu1 %v14966_v24  ;;  %v6084_v24 = vld [vmem:[#allocation10 + $0xf58] sm:$0xff]  ;;  %v15012_v51 = vcombine.high %v6083_v21, %v6087_v23  ;;  %v15011_v44 = vcombine.low %v6083_v21, %v6087_v23 }
 0x6d1   :  { %v15013_v58 = vcombine.low %v6084_v24, %v6088_v53  ;;  %v6128_v21 = vld [vmem:[#allocation10 + $0x10b8] sm:$0xff] }
 0x6d2   :  { %12573 = vmatpush1.bf16.msra.mxu0 %v14963_v17  ;;  %v15014_v17 = vcombine.high %v6084_v24, %v6088_v53  ;;  %v15045_v24 = vcombine.low %v6116_v41, %v6120_v9 }
 0x6d3   :  { %12901 = vmatpush1.bf16.msra.mxu1 %v14965_v54  ;;  %12574 = vmatprep.subr.bf16.mxu0 %v14972_v18  ;;  %v6091_v54 = vld [vmem:[#allocation10 + $0xf90] sm:$0xff] }
 0x6d4   :  { %12902 = vmatprep.subr.bf16.mxu1 %v14974_v43  ;;  %v6095_v18 = vld [vmem:[#allocation10 + $0xfb0] sm:$0xff]  ;;  %v6092_v43 = vld [vmem:[#allocation10 + $0xf98] sm:$0xff] }
 0x6d5   :  { %v15020_v42 = vcombine.high %v6091_v54, %v6095_v18  ;;  %v15019_v11 = vcombine.low %v6091_v54, %v6095_v18  ;;  %v15021_v28 = vcombine.low %v6092_v43, %v6096_v56  ;;  %v6136_v54 = vld [vmem:[#allocation10 + $0x10f8] sm:$0xff] }
 0x6d6   :  { %12575 = vmatpush1.bf16.msra.mxu0 %v14971_v26  ;;  %v15022_v26 = vcombine.high %v6092_v43, %v6096_v56 }
 0x6d7   :  { %12903 = vmatpush1.bf16.msra.mxu1 %v14973_v2  ;;  %12576 = vmatprep.subr.bf16.mxu0 %v14980_v59  ;;  %v6099_v2 = vld [vmem:[#allocation10 + $0xfd0] sm:$0xff] }
 0x6d8   :  { %12904 = vmatprep.subr.bf16.mxu1 %v14982_v6  ;;  %v6103_v59 = vld [vmem:[#allocation10 + $0xff0] sm:$0xff]  ;;  %v6100_v6 = vld [vmem:[#allocation10 + $0xfd8] sm:$0xff] }
 0x6d9   :  { %v15028_v61 = vcombine.high %v6099_v2, %v6103_v59  ;;  %v15027_v19 = vcombine.low %v6099_v2, %v6103_v59  ;;  %v15029_v3 = vcombine.low %v6100_v6, %v6104_v8 }
 0x6da   :  { %12577 = vmatpush1.bf16.msra.mxu0 %v14979_v10  ;;  %v15030_v10 = vcombine.high %v6100_v6, %v6104_v8  ;;  %v6147_v8 = vld [vmem:[#allocation10 + $0x1150] sm:$0xff] }
 0x6db   :  { %12905 = vmatpush1.bf16.msra.mxu1 %v14981_v36  ;;  %12578 = vmatprep.subr.bf16.mxu0 %v14988_v52  ;;  %v6107_v36 = vld [vmem:[#allocation10 + $0x1010] sm:$0xff] }
 0x6dc   :  { %12906 = vmatprep.subr.bf16.mxu1 %v14990_v14  ;;  %v6111_v52 = vld [vmem:[#allocation10 + $0x1030] sm:$0xff]  ;;  %v6108_v14 = vld [vmem:[#allocation10 + $0x1018] sm:$0xff] }
 0x6dd   :  { %v15036_v1 = vcombine.high %v6107_v36, %v6111_v52  ;;  %v15037_v32 = vcombine.low %v6108_v14, %v6112_v62 }
 0x6de   :  { %12579 = vmatpush1.bf16.msra.mxu0 %v14987_v40  ;;  %v15038_v40 = vcombine.high %v6108_v14, %v6112_v62  ;;  %v6155_v62 = vld [vmem:[#allocation10 + $0x1190] sm:$0xff] }
 0x6df   :  { %12907 = vmatpush1.bf16.msra.mxu1 %v14989_v4  ;;  %12580 = vmatprep.subr.bf16.mxu0 %v14996_v22  ;;  %v6115_v4 = vld [vmem:[#allocation10 + $0x1050] sm:$0xff] }
 0x6e0   :  { %12908 = vmatprep.subr.bf16.mxu1 %v14998_v12  ;;  %v6119_v22 = vld [vmem:[#allocation10 + $0x1070] sm:$0xff]  ;;  %v15035_v12 = vcombine.low %v6107_v36, %v6111_v52 }
 0x6e1   :  { %v15044_v38 = vcombine.high %v6115_v4, %v6119_v22  ;;  %v15043_v23 = vcombine.low %v6115_v4, %v6119_v22 }
 0x6e2   :  { %12581 = vmatpush1.bf16.msra.mxu0 %v14995_v47  ;;  %v6123_v47 = vld [vmem:[#allocation10 + $0x1090] sm:$0xff] }
 0x6e3   :  { %12909 = vmatpush1.bf16.msra.mxu1 %v14997_v48  ;;  %12582 = vmatprep.subr.bf16.mxu0 %v15004_v5  ;;  %v6127_v48 = vld [vmem:[#allocation10 + $0x10b0] sm:$0xff]  ;;  %v15046_v5 = vcombine.high %v6116_v41, %v6120_v9 }
 0x6e4   :  { %12910 = vmatprep.subr.bf16.mxu1 %v15006_v20  ;;  %v6124_v20 = vld [vmem:[#allocation10 + $0x1098] sm:$0xff]  ;;  %v15052_v53 = vcombine.high %v6123_v47, %v6127_v48  ;;  %v15051_v18 = vcombine.low %v6123_v47, %v6127_v48  ;;  %v6163_v41 = vld [vmem:[#allocation10 + $0x11d0] sm:$0xff] }
 0x6e5   :  { %v6167_v9 = vld [vmem:[#allocation10 + $0x11f0] sm:$0xff] }
 0x6e6   :  { %12583 = vmatpush1.bf16.msra.mxu0 %v15003_v49  ;;  %v15054_v49 = vcombine.high %v6124_v20, %v6128_v21 }
 0x6e7   :  { %12911 = vmatpush1.bf16.msra.mxu1 %v15005_v46  ;;  %12584 = vmatprep.subr.bf16.mxu0 %v15012_v51  ;;  %v6131_v46 = vld [vmem:[#allocation10 + $0x10d0] sm:$0xff] }
 0x6e8   :  { %12912 = vmatprep.subr.bf16.mxu1 %v15014_v17  ;;  %v6135_v51 = vld [vmem:[#allocation10 + $0x10f0] sm:$0xff]  ;;  %v6132_v17 = vld [vmem:[#allocation10 + $0x10d8] sm:$0xff] }
 0x6e9   :  { %v15060_v43 = vcombine.high %v6131_v46, %v6135_v51  ;;  %v15062_v56 = vcombine.high %v6132_v17, %v6136_v54  ;;  %v15061_v2 = vcombine.low %v6132_v17, %v6136_v54  ;;  %v6179_v54 = vld [vmem:[#allocation10 + $0x1250] sm:$0xff] }
 0x6ea   :  { %12585 = vmatpush1.bf16.msra.mxu0 %v15011_v44  ;;  %v6139_v44 = vld [vmem:[#allocation10 + $0x1110] sm:$0xff] }
 0x6eb   :  { %12913 = vmatpush1.bf16.msra.mxu1 %v15013_v58  ;;  %12586 = vmatprep.subr.bf16.mxu0 %v15020_v42  ;;  %v6143_v58 = vld [vmem:[#allocation10 + $0x1130] sm:$0xff]  ;;  %v6140_v42 = vld [vmem:[#allocation10 + $0x1118] sm:$0xff] }
 0x6ec   :  { %12914 = vmatprep.subr.bf16.mxu1 %v15022_v26  ;;  %v6144_v26 = vld [vmem:[#allocation10 + $0x1138] sm:$0xff]  ;;  %v15068_v59 = vcombine.high %v6139_v44, %v6143_v58 }
 0x6ed   :  { %v15070_v6 = vcombine.high %v6140_v42, %v6144_v26  ;;  %v15069_v36 = vcombine.low %v6140_v42, %v6144_v26  ;;  %v6187_v26 = vld [vmem:[#allocation10 + $0x1290] sm:$0xff] }
 0x6ee   :  { %12587 = vmatpush1.bf16.msra.mxu0 %v15019_v11  ;;  %v6151_v11 = vld [vmem:[#allocation10 + $0x1170] sm:$0xff] }
 0x6ef   :  { %12915 = vmatpush1.bf16.msra.mxu1 %v15021_v28  ;;  %12588 = vmatprep.subr.bf16.mxu0 %v15028_v61  ;;  %v6148_v28 = vld [vmem:[#allocation10 + $0x1158] sm:$0xff]  ;;  %v15076_v52 = vcombine.high %v6147_v8, %v6151_v11 }
 0x6f0   :  { %12916 = vmatprep.subr.bf16.mxu1 %v15030_v10  ;;  %v6152_v61 = vld [vmem:[#allocation10 + $0x1178] sm:$0xff]  ;;  %v15067_v10 = vcombine.low %v6139_v44, %v6143_v58 }
 0x6f1   :  { %v15078_v14 = vcombine.high %v6148_v28, %v6152_v61  ;;  %v15077_v4 = vcombine.low %v6148_v28, %v6152_v61  ;;  %v6195_v61 = vld [vmem:[#allocation10 + $0x12d0] sm:$0xff] }
 0x6f2   :  { %12589 = vmatpush1.bf16.msra.mxu0 %v15027_v19  ;;  %v6159_v19 = vld [vmem:[#allocation10 + $0x11b0] sm:$0xff] }
 0x6f3   :  { %12917 = vmatpush1.bf16.msra.mxu1 %v15029_v3  ;;  %12599 = vmatprep.subr.bf16.mxu0 %v15036_v1  ;;  %v6156_v3 = vld [vmem:[#allocation10 + $0x1198] sm:$0xff]  ;;  %v15084_v22 = vcombine.high %v6155_v62, %v6159_v19  ;;  %v15083_v47 = vcombine.low %v6155_v62, %v6159_v19 }
 0x6f4   :  { %12927 = vmatprep.subr.bf16.mxu1 %v15038_v40  ;;  %v6160_v1 = vld [vmem:[#allocation10 + $0x11b8] sm:$0xff]  ;;  %v15075_v40 = vcombine.low %v6147_v8, %v6151_v11 }
 0x6f5   :  { %12591 = vmatmul.mubr.bf16.vlgmr.msra.gmra.mrb[36].mxu0 %v16572_v57  ;;  %v15085_v48 = vcombine.low %v6156_v3, %v6160_v1 }
 0x6f6   :  { %12919 = vmatmul.mubr.bf16.vlgmr.msra.gmra.mrb[36].mxu1 %v16572_v57  ;;  %12600 = vmatpush1.bf16.msra.mxu0 %v15035_v12  ;;  %v15053_v57 = vcombine.low %v6124_v20, %v6128_v21  ;;  %v15086_v12 = vcombine.high %v6156_v3, %v6160_v1  ;;  %v6171_v21 = vld [vmem:[#allocation10 + $0x1210] sm:$0xff] }
 0x6f7   :  { %12631 = vmatprep.mubr.bf16.mxu0 %v16574_v60  ;;  %12928 = vmatpush1.bf16.msra.mxu1 %v15037_v32  ;;  %v6164_v32 = vld [vmem:[#allocation10 + $0x11d8] sm:$0xff]  ;;  %v6203_v1 = vld [vmem:[#allocation10 + $0x1310] sm:$0xff] }
 0x6f8   :  { %12959 = vmatprep.mubr.bf16.mxu1 %v16574_v60  ;;  %12601 = vmatprep.subr.bf16.mxu0 %v15044_v38  ;;  %v15059_v60 = vcombine.low %v6131_v46, %v6135_v51  ;;  %v6168_v38 = vld [vmem:[#allocation10 + $0x11f8] sm:$0xff] }
 0x6f9   :  { %12929 = vmatprep.subr.bf16.mxu1 %v15046_v5  ;;  %v15092_v5 = vcombine.high %v6163_v41, %v6167_v9  ;;  %v15094_v20 = vcombine.high %v6164_v32, %v6168_v38  ;;  %v15093_v46 = vcombine.low %v6164_v32, %v6168_v38  ;;  %v6211_v38 = vld [vmem:[#allocation10 + $0x1350] sm:$0xff] }
 0x6fa   :  { %12602 = vmatpush1.bf16.msra.mxu0 %v15043_v23  ;;  %v6175_v23 = vld [vmem:[#allocation10 + $0x1230] sm:$0xff] }
 0x6fb   :  { %12930 = vmatpush1.bf16.msra.mxu1 %v15045_v24  ;;  %12603 = vmatprep.subr.bf16.mxu0 %v15052_v53  ;;  %v6172_v24 = vld [vmem:[#allocation10 + $0x1218] sm:$0xff]  ;;  %v15100_v51 = vcombine.high %v6171_v21, %v6175_v23 }
 0x6fc   :  { %12931 = vmatprep.subr.bf16.mxu1 %v15054_v49  ;;  %v6176_v53 = vld [vmem:[#allocation10 + $0x1238] sm:$0xff]  ;;  %v15091_v49 = vcombine.low %v6163_v41, %v6167_v9 }
 0x6fd   :  { %v15102_v17 = vcombine.high %v6172_v24, %v6176_v53  ;;  %v15101_v44 = vcombine.low %v6172_v24, %v6176_v53  ;;  %v6219_v53 = vld [vmem:[#allocation10 + $0x1390] sm:$0xff] }
 0x6fe   :  { %12604 = vmatpush1.bf16.msra.mxu0 %v15051_v18  ;;  %v6183_v18 = vld [vmem:[#allocation10 + $0x1270] sm:$0xff] }
 0x6ff   :  { %12932 = vmatpush1.bf16.msra.mxu1 %v15053_v57  ;;  %12605 = vmatprep.subr.bf16.mxu0 %v15060_v43  ;;  %v6180_v57 = vld [vmem:[#allocation10 + $0x1258] sm:$0xff]  ;;  %v15108_v58 = vcombine.high %v6179_v54, %v6183_v18 }
 0x700   :  { %12933 = vmatprep.subr.bf16.mxu1 %v15062_v56  ;;  %v6184_v43 = vld [vmem:[#allocation10 + $0x1278] sm:$0xff]  ;;  %v15099_v56 = vcombine.low %v6171_v21, %v6175_v23 }
 0x701   :  { %v15110_v42 = vcombine.high %v6180_v57, %v6184_v43  ;;  %v15109_v8 = vcombine.low %v6180_v57, %v6184_v43  ;;  %v6227_v43 = vld [vmem:[#allocation10 + $0x13d0] sm:$0xff] }
 0x702   :  { %12606 = vmatpush1.bf16.msra.mxu0 %v15059_v60  ;;  %v6191_v60 = vld [vmem:[#allocation10 + $0x12b0] sm:$0xff] }
 0x703   :  { %12934 = vmatpush1.bf16.msra.mxu1 %v15061_v2  ;;  %12607 = vmatprep.subr.bf16.mxu0 %v15068_v59  ;;  %v6188_v2 = vld [vmem:[#allocation10 + $0x1298] sm:$0xff]  ;;  %v15116_v11 = vcombine.high %v6187_v26, %v6191_v60 }
 0x704   :  { %12935 = vmatprep.subr.bf16.mxu1 %v15070_v6  ;;  %v6192_v59 = vld [vmem:[#allocation10 + $0x12b8] sm:$0xff]  ;;  %v15107_v6 = vcombine.low %v6179_v54, %v6183_v18 }
 0x705   :  { %v15118_v28 = vcombine.high %v6188_v2, %v6192_v59  ;;  %v15117_v62 = vcombine.low %v6188_v2, %v6192_v59  ;;  %v6235_v59 = vld [vmem:[#allocation10 + $0x1410] sm:$0xff] }
 0x706   :  { %12608 = vmatpush1.bf16.msra.mxu0 %v15067_v10  ;;  %v6199_v10 = vld [vmem:[#allocation10 + $0x12f0] sm:$0xff] }
 0x707   :  { %12936 = vmatpush1.bf16.msra.mxu1 %v15069_v36  ;;  %12609 = vmatprep.subr.bf16.mxu0 %v15076_v52  ;;  %v6196_v36 = vld [vmem:[#allocation10 + $0x12d8] sm:$0xff]  ;;  %v15124_v19 = vcombine.high %v6195_v61, %v6199_v10 }
 0x708   :  { %12937 = vmatprep.subr.bf16.mxu1 %v15078_v14  ;;  %v6200_v52 = vld [vmem:[#allocation10 + $0x12f8] sm:$0xff]  ;;  %v15115_v14 = vcombine.low %v6187_v26, %v6191_v60 }
 0x709   :  { %v15126_v3 = vcombine.high %v6196_v36, %v6200_v52  ;;  %v15125_v41 = vcombine.low %v6196_v36, %v6200_v52  ;;  %v6243_v52 = vld [vmem:[#allocation10 + $0x1450] sm:$0xff] }
 0x70a   :  { %12610 = vmatpush1.bf16.msra.mxu0 %v15075_v40  ;;  %v6207_v40 = vld [vmem:[#allocation10 + $0x1330] sm:$0xff] }
 0x70b   :  { %12938 = vmatpush1.bf16.msra.mxu1 %v15077_v4  ;;  %12611 = vmatprep.subr.bf16.mxu0 %v15084_v22  ;;  %v6204_v4 = vld [vmem:[#allocation10 + $0x1318] sm:$0xff]  ;;  %v15132_v9 = vcombine.high %v6203_v1, %v6207_v40 }
 0x70c   :  { %12939 = vmatprep.subr.bf16.mxu1 %v15086_v12  ;;  %v6208_v22 = vld [vmem:[#allocation10 + $0x1338] sm:$0xff]  ;;  %v15123_v12 = vcombine.low %v6195_v61, %v6199_v10 }
 0x70d   :  { %v15134_v32 = vcombine.high %v6204_v4, %v6208_v22  ;;  %v15133_v21 = vcombine.low %v6204_v4, %v6208_v22  ;;  %v6251_v4 = vld [vmem:[#allocation10 + $0x1490] sm:$0xff] }
 0x70e   :  { %12612 = vmatpush1.bf16.msra.mxu0 %v15083_v47  ;;  %v6215_v47 = vld [vmem:[#allocation10 + $0x1370] sm:$0xff] }
 0x70f   :  { %12940 = vmatpush1.bf16.msra.mxu1 %v15085_v48  ;;  %12613 = vmatprep.subr.bf16.mxu0 %v15092_v5  ;;  %v6212_v48 = vld [vmem:[#allocation10 + $0x1358] sm:$0xff]  ;;  %v15140_v23 = vcombine.high %v6211_v38, %v6215_v47  ;;  %v6255_v22 = vld [vmem:[#allocation10 + $0x14b0] sm:$0xff] }
 0x710   :  { %12941 = vmatprep.subr.bf16.mxu1 %v15094_v20  ;;  %v6216_v5 = vld [vmem:[#allocation10 + $0x1378] sm:$0xff]  ;;  %v15131_v20 = vcombine.low %v6203_v1, %v6207_v40 }
 0x711   :  { %v15142_v24 = vcombine.high %v6212_v48, %v6216_v5  ;;  %v15141_v54 = vcombine.low %v6212_v48, %v6216_v5  ;;  %v6259_v5 = vld [vmem:[#allocation10 + $0x14d0] sm:$0xff] }
 0x712   :  { %12614 = vmatpush1.bf16.msra.mxu0 %v15091_v49  ;;  %v6223_v49 = vld [vmem:[#allocation10 + $0x13b0] sm:$0xff] }
 0x713   :  { %12942 = vmatpush1.bf16.msra.mxu1 %v15093_v46  ;;  %12615 = vmatprep.subr.bf16.mxu0 %v15100_v51  ;;  %v6220_v46 = vld [vmem:[#allocation10 + $0x1398] sm:$0xff]  ;;  %v15148_v18 = vcombine.high %v6219_v53, %v6223_v49 }
 0x714   :  { %12943 = vmatprep.subr.bf16.mxu1 %v15102_v17  ;;  %v6224_v51 = vld [vmem:[#allocation10 + $0x13b8] sm:$0xff]  ;;  %v15139_v17 = vcombine.low %v6211_v38, %v6215_v47  ;;  %v15180_v47 = vcombine.high %v6251_v4, %v6255_v22 }
 0x715   :  { %v15150_v57 = vcombine.high %v6220_v46, %v6224_v51  ;;  %v15149_v26 = vcombine.low %v6220_v46, %v6224_v51  ;;  %v6267_v46 = vld [vmem:[#allocation10 + $0x1510] sm:$0xff] }
 0x716   :  { %12616 = vmatpush1.bf16.msra.mxu0 %v15099_v56  ;;  %v6231_v56 = vld [vmem:[#allocation10 + $0x13f0] sm:$0xff] }
 0x717   :  { %12944 = vmatpush1.bf16.msra.mxu1 %v15101_v44  ;;  %12617 = vmatprep.subr.bf16.mxu0 %v15108_v58  ;;  %v6228_v44 = vld [vmem:[#allocation10 + $0x13d8] sm:$0xff]  ;;  %v15156_v60 = vcombine.high %v6227_v43, %v6231_v56  ;;  %v6271_v51 = vld [vmem:[#allocation10 + $0x1530] sm:$0xff] }
 0x718   :  { %12945 = vmatprep.subr.bf16.mxu1 %v15110_v42  ;;  %v6232_v58 = vld [vmem:[#allocation10 + $0x13f8] sm:$0xff]  ;;  %v15147_v42 = vcombine.low %v6219_v53, %v6223_v49 }
 0x719   :  { %v15158_v2 = vcombine.high %v6228_v44, %v6232_v58  ;;  %v15157_v61 = vcombine.low %v6228_v44, %v6232_v58  ;;  %v6279_v44 = vld [vmem:[#allocation10 + $0x1570] sm:$0xff]  ;;  %v6276_v58 = vld [vmem:[#allocation10 + $0x1558] sm:$0xff] }
 0x71a   :  { %12618 = vmatpush1.bf16.msra.mxu0 %v15107_v6  ;;  %v6239_v6 = vld [vmem:[#allocation10 + $0x1430] sm:$0xff] }
 0x71b   :  { %12946 = vmatpush1.bf16.msra.mxu1 %v15109_v8  ;;  %12619 = vmatprep.subr.bf16.mxu0 %v15116_v11  ;;  %v6236_v8 = vld [vmem:[#allocation10 + $0x1418] sm:$0xff]  ;;  %v15164_v10 = vcombine.high %v6235_v59, %v6239_v6 }
 0x71c   :  { %12947 = vmatprep.subr.bf16.mxu1 %v15118_v28  ;;  %v6240_v11 = vld [vmem:[#allocation10 + $0x1438] sm:$0xff]  ;;  %v15155_v28 = vcombine.low %v6227_v43, %v6231_v56  ;;  %v6275_v56 = vld [vmem:[#allocation10 + $0x1550] sm:$0xff] }
 0x71d   :  { %v15166_v36 = vcombine.high %v6236_v8, %v6240_v11  ;;  %v15165_v1 = vcombine.low %v6236_v8, %v6240_v11  ;;  %v6287_v8 = vld [vmem:[#allocation10 + $0x15b0] sm:$0xff]  ;;  %v6284_v11 = vld [vmem:[#allocation10 + $0x1598] sm:$0xff] }
 0x71e   :  { %12620 = vmatpush1.bf16.msra.mxu0 %v15115_v14  ;;  %v6247_v14 = vld [vmem:[#allocation10 + $0x1470] sm:$0xff] }
 0x71f   :  { %12948 = vmatpush1.bf16.msra.mxu1 %v15117_v62  ;;  %12621 = vmatprep.subr.bf16.mxu0 %v15124_v19  ;;  %v15163_v62 = vcombine.low %v6235_v59, %v6239_v6  ;;  %v6244_v19 = vld [vmem:[#allocation10 + $0x1458] sm:$0xff]  ;;  %v15172_v40 = vcombine.high %v6243_v52, %v6247_v14  ;;  %v6283_v6 = vld [vmem:[#allocation10 + $0x1590] sm:$0xff] }
 0x720   :  { %12949 = vmatprep.subr.bf16.mxu1 %v15126_v3  ;;  %v6248_v3 = vld [vmem:[#allocation10 + $0x1478] sm:$0xff] }
 0x721   :  { %v15173_v38 = vcombine.low %v6244_v19, %v6248_v3 }
 0x722   :  { %12622 = vmatpush1.bf16.msra.mxu0 %v15123_v12  ;;  %v15174_v12 = vcombine.high %v6244_v19, %v6248_v3  ;;  %v6292_v19 = vld [vmem:[#allocation10 + $0x15d8] sm:$0xff] }
 0x723   :  { %12950 = vmatpush1.bf16.msra.mxu1 %v15125_v41  ;;  %12623 = vmatprep.subr.bf16.mxu0 %v15132_v9  ;;  %v6252_v41 = vld [vmem:[#allocation10 + $0x1498] sm:$0xff] }
 0x724   :  { %12951 = vmatprep.subr.bf16.mxu1 %v15134_v32  ;;  %v6256_v9 = vld [vmem:[#allocation10 + $0x14b8] sm:$0xff]  ;;  %v15171_v32 = vcombine.low %v6243_v52, %v6247_v14  ;;  %v6291_v14 = vld [vmem:[#allocation10 + $0x15d0] sm:$0xff] }
 0x725   :  { %v15182_v48 = vcombine.high %v6252_v41, %v6256_v9  ;;  %v6296_v3 = vld [vmem:[#allocation10 + $0x15f8] sm:$0xff] }
 0x726   :  { %12624 = vmatpush1.bf16.msra.mxu0 %v15131_v20  ;;  %v6263_v20 = vld [vmem:[#allocation10 + $0x14f0] sm:$0xff] }
 0x727   :  { %12952 = vmatpush1.bf16.msra.mxu1 %v15133_v21  ;;  %12625 = vmatprep.subr.bf16.mxu0 %v15140_v23  ;;  %v6260_v21 = vld [vmem:[#allocation10 + $0x14d8] sm:$0xff]  ;;  %v15188_v53 = vcombine.high %v6259_v5, %v6263_v20 }
 0x728   :  { %12953 = vmatprep.subr.bf16.mxu1 %v15142_v24  ;;  %v6264_v23 = vld [vmem:[#allocation10 + $0x14f8] sm:$0xff]  ;;  %v15179_v24 = vcombine.low %v6251_v4, %v6255_v22  ;;  %v15222_v22 = vcombine.high %v6292_v19, %v6296_v3 }
 0x729   :  { %v15190_v49 = vcombine.high %v6260_v21, %v6264_v23 }
 0x72a   :  { %12626 = vmatpush1.bf16.msra.mxu0 %v15139_v17  ;;  %v6268_v17 = vld [vmem:[#allocation10 + $0x1518] sm:$0xff] }
 0x72b   :  { %12954 = vmatpush1.bf16.msra.mxu1 %v15141_v54  ;;  %12627 = vmatprep.subr.bf16.mxu0 %v15148_v18  ;;  %v6272_v54 = vld [vmem:[#allocation10 + $0x1538] sm:$0xff]  ;;  %v15189_v18 = vcombine.low %v6260_v21, %v6264_v23  ;;  %v6311_v21 = vld [vmem:[#allocation10 + $0x1670] sm:$0xff] }
 0x72c   :  { %12955 = vmatprep.subr.bf16.mxu1 %v15150_v57  ;;  %v15196_v57 = vcombine.high %v6267_v46, %v6271_v51  ;;  %v15198_v43 = vcombine.high %v6268_v17, %v6272_v54  ;;  %v6308_v23 = vld [vmem:[#allocation10 + $0x1658] sm:$0xff] }
 0x72e   :  { %12628 = vmatpush1.bf16.msra.mxu0 %v15147_v42  ;;  %v6280_v42 = vld [vmem:[#allocation10 + $0x1578] sm:$0xff] }
 0x72f   :  { %12956 = vmatpush1.bf16.msra.mxu1 %v15149_v26  ;;  %12629 = vmatprep.subr.bf16.mxu0 %v15156_v60  ;;  %v15195_v26 = vcombine.low %v6267_v46, %v6271_v51  ;;  %v15197_v60 = vcombine.low %v6268_v17, %v6272_v54  ;;  %v15206_v59 = vcombine.high %v6276_v58, %v6280_v42  ;;  %v6315_v51 = vld [vmem:[#allocation10 + $0x1690] sm:$0xff]  ;;  %v6316_v54 = vld [vmem:[#allocation10 + $0x1698] sm:$0xff] }
 0x730   :  { %12957 = vmatprep.subr.bf16.mxu1 %v15158_v2  ;;  %v15204_v2 = vcombine.high %v6275_v56, %v6279_v44  ;;  %v6319_v17 = vld [vmem:[#allocation10 + $0x16b0] sm:$0xff] }
 0x732   :  { %12630 = vmatpush1.bf16.msra.mxu0 %v15155_v28  ;;  %v6288_v28 = vld [vmem:[#allocation10 + $0x15b8] sm:$0xff] }
 0x733   :  { %12958 = vmatpush1.bf16.msra.mxu1 %v15157_v61  ;;  %12640 = vmatprep.subr.bf16.mxu0 %v15164_v10  ;;  %v15203_v61 = vcombine.low %v6275_v56, %v6279_v44  ;;  %v15205_v10 = vcombine.low %v6276_v58, %v6280_v42  ;;  %v15214_v52 = vcombine.high %v6284_v11, %v6288_v28  ;;  %v6323_v44 = vld [vmem:[#allocation10 + $0x16d0] sm:$0xff]  ;;  %v6324_v42 = vld [vmem:[#allocation10 + $0x16d8] sm:$0xff] }
 0x734   :  { %12968 = vmatprep.subr.bf16.mxu1 %v15166_v36  ;;  %v15212_v36 = vcombine.high %v6283_v6, %v6287_v8  ;;  %v6327_v58 = vld [vmem:[#allocation10 + $0x16f0] sm:$0xff] }
 0x735   :  { %12632 = vmatmul.mubr.bf16.vlgmr.msra.gmra.mrb[36].mxu0 %v16586_v15 }
 0x736   :  { %12960 = vmatmul.mubr.bf16.vlgmr.msra.gmra.mrb[36].mxu1 %v16586_v15  ;;  %12641 = vmatpush1.bf16.msra.mxu0 %v15163_v62  ;;  %v15181_v15 = vcombine.low %v6252_v41, %v6256_v9  ;;  %v6295_v62 = vld [vmem:[#allocation10 + $0x15f0] sm:$0xff]  ;;  %v6300_v9 = vld [vmem:[#allocation10 + $0x1618] sm:$0xff] }
 0x737   :  { %12672 = vmatprep.mubr.bf16.mxu0 %v16588_v25  ;;  %12969 = vmatpush1.bf16.msra.mxu1 %v15165_v1  ;;  %v15211_v1 = vcombine.low %v6283_v6, %v6287_v8  ;;  %v15220_v4 = vcombine.high %v6291_v14, %v6295_v62  ;;  %v6303_v41 = vld [vmem:[#allocation10 + $0x1630] sm:$0xff] }
 0x738   :  { %13000 = vmatprep.mubr.bf16.mxu1 %v16588_v25  ;;  %12642 = vmatprep.subr.bf16.mxu0 %v15172_v40  ;;  %v15187_v25 = vcombine.low %v6259_v5, %v6263_v20  ;;  %v15213_v40 = vcombine.low %v6284_v11, %v6288_v28  ;;  %v6307_v20 = vld [vmem:[#allocation10 + $0x1650] sm:$0xff]  ;;  %v6332_v28 = vld [vmem:[#allocation10 + $0x1718] sm:$0xff] }
 0x739   :  { %12970 = vmatprep.subr.bf16.mxu1 %v15174_v12  ;;  %v6299_v12 = vld [vmem:[#allocation10 + $0x1610] sm:$0xff] }
 0x73a   :  { %12643 = vmatpush1.bf16.msra.mxu0 %v15171_v32  ;;  %v6304_v32 = vld [vmem:[#allocation10 + $0x1638] sm:$0xff]  ;;  %v6331_v8 = vld [vmem:[#allocation10 + $0x1710] sm:$0xff] }
 0x73b   :  { %12971 = vmatpush1.bf16.msra.mxu1 %v15173_v38  ;;  %12644 = vmatprep.subr.bf16.mxu0 %v15180_v47  ;;  %v15219_v38 = vcombine.low %v6291_v14, %v6295_v62  ;;  %v15221_v47 = vcombine.low %v6292_v19, %v6296_v3  ;;  %v15230_v5 = vcombine.high %v6300_v9, %v6304_v32  ;;  %v6335_v11 = vld [vmem:[#allocation10 + $0x1730] sm:$0xff]  ;;  %v6340_v3 = vld [vmem:[#allocation10 + $0x1758] sm:$0xff] }
 0x73c   :  { %12972 = vmatprep.subr.bf16.mxu1 %v15182_v48  ;;  %v15228_v48 = vcombine.high %v6299_v12, %v6303_v41  ;;  %v6339_v62 = vld [vmem:[#allocation10 + $0x1750] sm:$0xff] }
 0x73d   :  { %v6343_v19 = vld [vmem:[#allocation10 + $0x1770] sm:$0xff] }
 0x73e   :  { %12645 = vmatpush1.bf16.msra.mxu0 %v15179_v24  ;;  %v6312_v24 = vld [vmem:[#allocation10 + $0x1678] sm:$0xff] }
 0x73f   :  { %12973 = vmatpush1.bf16.msra.mxu1 %v15181_v15  ;;  %12646 = vmatprep.subr.bf16.mxu0 %v15188_v53  ;;  %v15227_v15 = vcombine.low %v6299_v12, %v6303_v41  ;;  %v15229_v53 = vcombine.low %v6300_v9, %v6304_v32  ;;  %v15238_v46 = vcombine.high %v6308_v23, %v6312_v24  ;;  %v6347_v41 = vld [vmem:[#allocation10 + $0x1790] sm:$0xff]  ;;  %v6348_v32 = vld [vmem:[#allocation10 + $0x1798] sm:$0xff] }
 0x740   :  { %12974 = vmatprep.subr.bf16.mxu1 %v15190_v49  ;;  %v15236_v49 = vcombine.high %v6307_v20, %v6311_v21  ;;  %v6351_v9 = vld [vmem:[#allocation10 + $0x17b0] sm:$0xff] }
 0x742   :  { %12647 = vmatpush1.bf16.msra.mxu0 %v15187_v25  ;;  %v6320_v25 = vld [vmem:[#allocation10 + $0x16b8] sm:$0xff] }
 0x743   :  { %12975 = vmatpush1.bf16.msra.mxu1 %v15189_v18  ;;  %12648 = vmatprep.subr.bf16.mxu0 %v15196_v57  ;;  %v15235_v18 = vcombine.low %v6307_v20, %v6311_v21  ;;  %v15237_v57 = vcombine.low %v6308_v23, %v6312_v24  ;;  %v15246_v56 = vcombine.high %v6316_v54, %v6320_v25  ;;  %v6355_v21 = vld [vmem:[#allocation10 + $0x17d0] sm:$0xff]  ;;  %v6356_v24 = vld [vmem:[#allocation10 + $0x17d8] sm:$0xff] }
 0x744   :  { %12976 = vmatprep.subr.bf16.mxu1 %v15198_v43  ;;  %v15244_v43 = vcombine.high %v6315_v51, %v6319_v17  ;;  %v6359_v23 = vld [vmem:[#allocation10 + $0x17f0] sm:$0xff] }
 0x746   :  { %12649 = vmatpush1.bf16.msra.mxu0 %v15195_v26  ;;  %v6328_v26 = vld [vmem:[#allocation10 + $0x16f8] sm:$0xff] }
 0x747   :  { %12977 = vmatpush1.bf16.msra.mxu1 %v15197_v60  ;;  %12650 = vmatprep.subr.bf16.mxu0 %v15204_v2  ;;  %v15243_v60 = vcombine.low %v6315_v51, %v6319_v17  ;;  %v15245_v2 = vcombine.low %v6316_v54, %v6320_v25  ;;  %v15254_v6 = vcombine.high %v6324_v42, %v6328_v26  ;;  %v6363_v17 = vld [vmem:[#allocation10 + $0x1810] sm:$0xff]  ;;  %v6364_v25 = vld [vmem:[#allocation10 + $0x1818] sm:$0xff] }
 0x748   :  { %12978 = vmatprep.subr.bf16.mxu1 %v15206_v59  ;;  %v15252_v59 = vcombine.high %v6323_v44, %v6327_v58  ;;  %v6367_v54 = vld [vmem:[#allocation10 + $0x1830] sm:$0xff] }
 0x74a   :  { %12651 = vmatpush1.bf16.msra.mxu0 %v15203_v61  ;;  %v6336_v61 = vld [vmem:[#allocation10 + $0x1738] sm:$0xff] }
 0x74b   :  { %12979 = vmatpush1.bf16.msra.mxu1 %v15205_v10  ;;  %12652 = vmatprep.subr.bf16.mxu0 %v15212_v36  ;;  %v15251_v10 = vcombine.low %v6323_v44, %v6327_v58  ;;  %v15253_v36 = vcombine.low %v6324_v42, %v6328_v26  ;;  %v15262_v14 = vcombine.high %v6332_v28, %v6336_v61  ;;  %v6371_v58 = vld [vmem:[#allocation10 + $0x1850] sm:$0xff] }
 0x74c   :  { %12980 = vmatprep.subr.bf16.mxu1 %v15214_v52  ;;  %v15260_v52 = vcombine.high %v6331_v8, %v6335_v11  ;;  %v6375_v42 = vld [vmem:[#allocation10 + $0x1870] sm:$0xff]  ;;  %v15291_v26 = vcombine.low %v6363_v17, %v6367_v54 }
 0x74e   :  { %12653 = vmatpush1.bf16.msra.mxu0 %v15211_v1  ;;  %v6344_v1 = vld [vmem:[#allocation10 + $0x1778] sm:$0xff] }
 0x74f   :  { %12981 = vmatpush1.bf16.msra.mxu1 %v15213_v40  ;;  %12654 = vmatprep.subr.bf16.mxu0 %v15220_v4  ;;  %v15259_v40 = vcombine.low %v6331_v8, %v6335_v11  ;;  %v15261_v4 = vcombine.low %v6332_v28, %v6336_v61  ;;  %v15270_v12 = vcombine.high %v6340_v3, %v6344_v1  ;;  %v6379_v8 = vld [vmem:[#allocation10 + $0x1890] sm:$0xff]  ;;  %v6380_v61 = vld [vmem:[#allocation10 + $0x1898] sm:$0xff] }
 0x750   :  { %12982 = vmatprep.subr.bf16.mxu1 %v15222_v22  ;;  %v15268_v22 = vcombine.high %v6339_v62, %v6343_v19  ;;  %v6383_v11 = vld [vmem:[#allocation10 + $0x18b0] sm:$0xff] }
 0x752   :  { %12655 = vmatpush1.bf16.msra.mxu0 %v15219_v38  ;;  %v6352_v38 = vld [vmem:[#allocation10 + $0x17b8] sm:$0xff] }
 0x753   :  { %12983 = vmatpush1.bf16.msra.mxu1 %v15221_v47  ;;  %12656 = vmatprep.subr.bf16.mxu0 %v15228_v48  ;;  %v15267_v47 = vcombine.low %v6339_v62, %v6343_v19  ;;  %v15269_v48 = vcombine.low %v6340_v3, %v6344_v1  ;;  %v15278_v20 = vcombine.high %v6348_v32, %v6352_v38  ;;  %v6387_v19 = vld [vmem:[#allocation10 + $0x18d0] sm:$0xff]  ;;  %v6388_v1 = vld [vmem:[#allocation10 + $0x18d8] sm:$0xff] }
 0x754   :  { %12984 = vmatprep.subr.bf16.mxu1 %v15230_v5  ;;  %v15276_v5 = vcombine.high %v6347_v41, %v6351_v9  ;;  %v6391_v3 = vld [vmem:[#allocation10 + $0x18f0] sm:$0xff] }
 0x756   :  { %12657 = vmatpush1.bf16.msra.mxu0 %v15227_v15  ;;  %v6360_v15 = vld [vmem:[#allocation10 + $0x17f8] sm:$0xff] }
 0x757   :  { %12985 = vmatpush1.bf16.msra.mxu1 %v15229_v53  ;;  %12658 = vmatprep.subr.bf16.mxu0 %v15236_v49  ;;  %v15275_v53 = vcombine.low %v6347_v41, %v6351_v9  ;;  %v15277_v49 = vcombine.low %v6348_v32, %v6352_v38  ;;  %v15286_v51 = vcombine.high %v6356_v24, %v6360_v15  ;;  %v6395_v41 = vld [vmem:[#allocation10 + $0x1910] sm:$0xff]  ;;  %v6396_v32 = vld [vmem:[#allocation10 + $0x1918] sm:$0xff] }
 0x758   :  { %12986 = vmatprep.subr.bf16.mxu1 %v15238_v46  ;;  %v15284_v46 = vcombine.high %v6355_v21, %v6359_v23  ;;  %v6399_v9 = vld [vmem:[#allocation10 + $0x1930] sm:$0xff]  ;;  %v6400_v38 = vld [vmem:[#allocation10 + $0x1938] sm:$0xff] }
 0x75a   :  { %12659 = vmatpush1.bf16.msra.mxu0 %v15235_v18  ;;  %v6368_v18 = vld [vmem:[#allocation10 + $0x1838] sm:$0xff] }
 0x75b   :  { %12987 = vmatpush1.bf16.msra.mxu1 %v15237_v57  ;;  %12660 = vmatprep.subr.bf16.mxu0 %v15244_v43  ;;  %v15283_v57 = vcombine.low %v6355_v21, %v6359_v23  ;;  %v15285_v43 = vcombine.low %v6356_v24, %v6360_v15  ;;  %v15294_v44 = vcombine.high %v6364_v25, %v6368_v18  ;;  %v6407_v21 = vld [vmem:[#allocation10 + $0x1970] sm:$0xff]  ;;  %v6404_v23 = vld [vmem:[#allocation10 + $0x1958] sm:$0xff] }
 0x75c   :  { %12988 = vmatprep.subr.bf16.mxu1 %v15246_v56  ;;  %v15292_v56 = vcombine.high %v6363_v17, %v6367_v54  ;;  %v6408_v24 = vld [vmem:[#allocation10 + $0x1978] sm:$0xff]  ;;  %v15323_v15 = vcombine.low %v6395_v41, %v6399_v9  ;;  %v6415_v17 = vld [vmem:[#allocation10 + $0x19b0] sm:$0xff] }
 0x75d   :  { %v6412_v54 = vld [vmem:[#allocation10 + $0x1998] sm:$0xff] }
 0x75e   :  { %12661 = vmatpush1.bf16.msra.mxu0 %v15243_v60  ;;  %v6372_v60 = vld [vmem:[#allocation10 + $0x1858] sm:$0xff] }
 0x75f   :  { %12989 = vmatpush1.bf16.msra.mxu1 %v15245_v2  ;;  %12662 = vmatprep.subr.bf16.mxu0 %v15252_v59  ;;  %v6376_v2 = vld [vmem:[#allocation10 + $0x1878] sm:$0xff]  ;;  %v15293_v59 = vcombine.low %v6364_v25, %v6368_v18 }
 0x760   :  { %12990 = vmatprep.subr.bf16.mxu1 %v15254_v6  ;;  %v15300_v6 = vcombine.high %v6371_v58, %v6375_v42  ;;  %v15302_v28 = vcombine.high %v6372_v60, %v6376_v2  ;;  %v6416_v25 = vld [vmem:[#allocation10 + $0x19b8] sm:$0xff] }
 0x762   :  { %12663 = vmatpush1.bf16.msra.mxu0 %v15251_v10  ;;  %v6384_v10 = vld [vmem:[#allocation10 + $0x18b8] sm:$0xff] }
 0x763   :  { %12991 = vmatpush1.bf16.msra.mxu1 %v15253_v36  ;;  %12664 = vmatprep.subr.bf16.mxu0 %v15260_v52  ;;  %v15299_v36 = vcombine.low %v6371_v58, %v6375_v42  ;;  %v15301_v52 = vcombine.low %v6372_v60, %v6376_v2  ;;  %v15310_v62 = vcombine.high %v6380_v61, %v6384_v10  ;;  %v6423_v58 = vld [vmem:[#allocation10 + $0x19f0] sm:$0xff]  ;;  %v6420_v42 = vld [vmem:[#allocation10 + $0x19d8] sm:$0xff] }
 0x764   :  { %12992 = vmatprep.subr.bf16.mxu1 %v15262_v14  ;;  %v15308_v14 = vcombine.high %v6379_v8, %v6383_v11  ;;  %v15341_v2 = vcombine.low %v6412_v54, %v6416_v25 }
 0x766   :  { %12665 = vmatpush1.bf16.msra.mxu0 %v15259_v40  ;;  %v6392_v40 = vld [vmem:[#allocation10 + $0x18f8] sm:$0xff] }
 0x767   :  { %12993 = vmatpush1.bf16.msra.mxu1 %v15261_v4  ;;  %12666 = vmatprep.subr.bf16.mxu0 %v15268_v22  ;;  %v15307_v4 = vcombine.low %v6379_v8, %v6383_v11  ;;  %v15316_v22 = vcombine.high %v6387_v19, %v6391_v3  ;;  %v6427_v8 = vld [vmem:[#allocation10 + $0x1a10] sm:$0xff] }
 0x768   :  { %12994 = vmatprep.subr.bf16.mxu1 %v15270_v12  ;;  %v15318_v12 = vcombine.high %v6388_v1, %v6392_v40  ;;  %v6431_v11 = vld [vmem:[#allocation10 + $0x1a30] sm:$0xff] }
 0x76a   :  { %12667 = vmatpush1.bf16.msra.mxu0 %v15267_v47  ;;  %v15317_v47 = vcombine.low %v6388_v1, %v6392_v40  ;;  %v6440_v1 = vld [vmem:[#allocation10 + $0x1a78] sm:$0xff]  ;;  %v15355_v40 = vcombine.low %v6427_v8, %v6431_v11 }
 0x76b   :  { %12995 = vmatpush1.bf16.msra.mxu1 %v15269_v48  ;;  %12668 = vmatprep.subr.bf16.mxu0 %v15276_v5  ;;  %v15324_v48 = vcombine.high %v6395_v41, %v6399_v9  ;;  %v15326_v5 = vcombine.high %v6396_v32, %v6400_v38  ;;  %v6447_v41 = vld [vmem:[#allocation10 + $0x1ab0] sm:$0xff]  ;;  %v6444_v9 = vld [vmem:[#allocation10 + $0x1a98] sm:$0xff] }
 0x76c   :  { %12996 = vmatprep.subr.bf16.mxu1 %v15278_v20  ;;  %v6403_v20 = vld [vmem:[#allocation10 + $0x1950] sm:$0xff] }
 0x76d   :  { %v15331_v18 = vcombine.low %v6403_v20, %v6407_v21 }
 0x76e   :  { %12669 = vmatpush1.bf16.msra.mxu0 %v15275_v53  ;;  %v15325_v53 = vcombine.low %v6396_v32, %v6400_v38  ;;  %v6448_v32 = vld [vmem:[#allocation10 + $0x1ab8] sm:$0xff] }
 0x76f   :  { %12997 = vmatpush1.bf16.msra.mxu1 %v15277_v49  ;;  %12670 = vmatprep.subr.bf16.mxu0 %v15284_v46  ;;  %v15332_v49 = vcombine.high %v6403_v20, %v6407_v21  ;;  %v15334_v46 = vcombine.high %v6404_v23, %v6408_v24  ;;  %v6455_v20 = vld [vmem:[#allocation10 + $0x1af0] sm:$0xff]  ;;  %v6452_v21 = vld [vmem:[#allocation10 + $0x1ad8] sm:$0xff] }
 0x770   :  { %12998 = vmatprep.subr.bf16.mxu1 %v15286_v51  ;;  %v6411_v51 = vld [vmem:[#allocation10 + $0x1990] sm:$0xff] }
 0x771   :  { %v15339_v60 = vcombine.low %v6411_v51, %v6415_v17 }
 0x772   :  { %12671 = vmatpush1.bf16.msra.mxu0 %v15283_v57  ;;  %v15333_v57 = vcombine.low %v6404_v23, %v6408_v24  ;;  %v6456_v23 = vld [vmem:[#allocation10 + $0x1af8] sm:$0xff] }
 0x773   :  { %12999 = vmatpush1.bf16.msra.mxu1 %v15285_v43  ;;  %12681 = vmatprep.subr.bf16.mxu0 %v15292_v56  ;;  %v15340_v43 = vcombine.high %v6411_v51, %v6415_v17  ;;  %v15342_v56 = vcombine.high %v6412_v54, %v6416_v25  ;;  %v6463_v51 = vld [vmem:[#allocation10 + $0x1b30] sm:$0xff]  ;;  %v6460_v17 = vld [vmem:[#allocation10 + $0x1b18] sm:$0xff] }
 0x774   :  { %13009 = vmatprep.subr.bf16.mxu1 %v15294_v44  ;;  %v6419_v44 = vld [vmem:[#allocation10 + $0x19d0] sm:$0xff]  ;;  %v6464_v54 = vld [vmem:[#allocation10 + $0x1b38] sm:$0xff] }
 0x775   :  { %12673 = vmatmul.mubr.bf16.vlgmr.msra.gmra.mrb[36].mxu0 %v16600_v27 }
 0x776   :  { %13001 = vmatmul.mubr.bf16.vlgmr.msra.gmra.mrb[36].mxu1 %v16600_v27  ;;  %12682 = vmatpush1.bf16.msra.mxu0 %v15291_v26  ;;  %v15309_v27 = vcombine.low %v6380_v61, %v6384_v10  ;;  %v6424_v26 = vld [vmem:[#allocation10 + $0x19f8] sm:$0xff]  ;;  %v15347_v10 = vcombine.low %v6419_v44, %v6423_v58 }
 0x777   :  { %12713 = vmatprep.mubr.bf16.mxu0 %v16602_v55  ;;  %13010 = vmatpush1.bf16.msra.mxu1 %v15293_v59  ;;  %v15348_v59 = vcombine.high %v6419_v44, %v6423_v58  ;;  %v6432_v61 = vld [vmem:[#allocation10 + $0x1a38] sm:$0xff]  ;;  %v6471_v44 = vld [vmem:[#allocation10 + $0x1b70] sm:$0xff] }
 0x778   :  { %13041 = vmatprep.mubr.bf16.mxu1 %v16602_v55  ;;  %12683 = vmatprep.subr.bf16.mxu0 %v15300_v6  ;;  %v15315_v55 = vcombine.low %v6387_v19, %v6391_v3  ;;  %v15350_v6 = vcombine.high %v6420_v42, %v6424_v26  ;;  %v6439_v19 = vld [vmem:[#allocation10 + $0x1a70] sm:$0xff]  ;;  %v6436_v3 = vld [vmem:[#allocation10 + $0x1a58] sm:$0xff] }
 0x779   :  { %13011 = vmatprep.subr.bf16.mxu1 %v15302_v28  ;;  %v6428_v28 = vld [vmem:[#allocation10 + $0x1a18] sm:$0xff] }
 0x77a   :  { %12684 = vmatpush1.bf16.msra.mxu0 %v15299_v36  ;;  %v15349_v36 = vcombine.low %v6420_v42, %v6424_v26  ;;  %v6468_v58 = vld [vmem:[#allocation10 + $0x1b58] sm:$0xff] }
 0x77b   :  { %13012 = vmatpush1.bf16.msra.mxu1 %v15301_v52  ;;  %12685 = vmatprep.subr.bf16.mxu0 %v15308_v14  ;;  %v15356_v52 = vcombine.high %v6427_v8, %v6431_v11  ;;  %v15358_v14 = vcombine.high %v6428_v28, %v6432_v61  ;;  %v6472_v42 = vld [vmem:[#allocation10 + $0x1b78] sm:$0xff]  ;;  %v6479_v8 = vld [vmem:[#allocation10 + $0x1bb0] sm:$0xff] }
 0x77c   :  { %13013 = vmatprep.subr.bf16.mxu1 %v15310_v62  ;;  %v6435_v62 = vld [vmem:[#allocation10 + $0x1a50] sm:$0xff]  ;;  %v6476_v11 = vld [vmem:[#allocation10 + $0x1b98] sm:$0xff] }
 0x77d   :  { %v15363_v38 = vcombine.low %v6435_v62, %v6439_v19 }
 0x77e   :  { %12686 = vmatpush1.bf16.msra.mxu0 %v15307_v4  ;;  %v15357_v4 = vcombine.low %v6428_v28, %v6432_v61  ;;  %v6480_v28 = vld [vmem:[#allocation10 + $0x1bb8] sm:$0xff] }
 0x77f   :  { %13014 = vmatpush1.bf16.msra.mxu1 %v15309_v27  ;;  %12687 = vmatprep.subr.bf16.mxu0 %v15316_v22  ;;  %v15364_v27 = vcombine.high %v6435_v62, %v6439_v19  ;;  %v15366_v22 = vcombine.high %v6436_v3, %v6440_v1  ;;  %v6487_v62 = vld [vmem:[#allocation10 + $0x1bf0] sm:$0xff]  ;;  %v6484_v19 = vld [vmem:[#allocation10 + $0x1bd8] sm:$0xff] }
 0x780   :  { %13015 = vmatprep.subr.bf16.mxu1 %v15318_v12  ;;  %v6443_v12 = vld [vmem:[#allocation10 + $0x1a90] sm:$0xff] }
 0x781   :  { %v15371_v24 = vcombine.low %v6443_v12, %v6447_v41 }
 0x782   :  { %12688 = vmatpush1.bf16.msra.mxu0 %v15315_v55  ;;  %v15365_v55 = vcombine.low %v6436_v3, %v6440_v1  ;;  %v6488_v3 = vld [vmem:[#allocation10 + $0x1bf8] sm:$0xff] }
 0x783   :  { %13016 = vmatpush1.bf16.msra.mxu1 %v15317_v47  ;;  %12689 = vmatprep.subr.bf16.mxu0 %v15324_v48  ;;  %v15372_v47 = vcombine.high %v6443_v12, %v6447_v41  ;;  %v15374_v48 = vcombine.high %v6444_v9, %v6448_v32  ;;  %v6495_v12 = vld [vmem:[#allocation10 + $0x1c30] sm:$0xff]  ;;  %v6492_v41 = vld [vmem:[#allocation10 + $0x1c18] sm:$0xff] }
 0x784   :  { %13017 = vmatprep.subr.bf16.mxu1 %v15326_v5  ;;  %v6451_v5 = vld [vmem:[#allocation10 + $0x1ad0] sm:$0xff] }
 0x785   :  { %v15379_v25 = vcombine.low %v6451_v5, %v6455_v20 }
 0x786   :  { %12690 = vmatpush1.bf16.msra.mxu0 %v15323_v15  ;;  %v15373_v15 = vcombine.low %v6444_v9, %v6448_v32  ;;  %v6496_v9 = vld [vmem:[#allocation10 + $0x1c38] sm:$0xff] }
 0x787   :  { %13018 = vmatpush1.bf16.msra.mxu1 %v15325_v53  ;;  %12691 = vmatprep.subr.bf16.mxu0 %v15332_v49  ;;  %v15380_v53 = vcombine.high %v6451_v5, %v6455_v20  ;;  %v15382_v49 = vcombine.high %v6452_v21, %v6456_v23  ;;  %v6503_v5 = vld [vmem:[#allocation10 + $0x1c70] sm:$0xff] }
 0x788   :  { %13019 = vmatprep.subr.bf16.mxu1 %v15334_v46  ;;  %v6459_v46 = vld [vmem:[#allocation10 + $0x1b10] sm:$0xff] }
 0x789   :  { %v15387_v26 = vcombine.low %v6459_v46, %v6463_v51 }
 0x78a   :  { %12692 = vmatpush1.bf16.msra.mxu0 %v15331_v18  ;;  %v15381_v18 = vcombine.low %v6452_v21, %v6456_v23  ;;  %v6500_v21 = vld [vmem:[#allocation10 + $0x1c58] sm:$0xff] }
 0x78b   :  { %13020 = vmatpush1.bf16.msra.mxu1 %v15333_v57  ;;  %12693 = vmatprep.subr.bf16.mxu0 %v15340_v43  ;;  %v15388_v57 = vcombine.high %v6459_v46, %v6463_v51  ;;  %v15390_v43 = vcombine.high %v6460_v17, %v6464_v54  ;;  %v6504_v23 = vld [vmem:[#allocation10 + $0x1c78] sm:$0xff] }
 0x78c   :  { %13021 = vmatprep.subr.bf16.mxu1 %v15342_v56  ;;  %v6467_v56 = vld [vmem:[#allocation10 + $0x1b50] sm:$0xff]  ;;  %v15430_v46 = vcombine.high %v6500_v21, %v6504_v23  ;;  %v6508_v51 = vld [vmem:[#allocation10 + $0x1c98] sm:$0xff] }
 0x78d   :  { %v15395_v61 = vcombine.low %v6467_v56, %v6471_v44 }
 0x78e   :  { %12694 = vmatpush1.bf16.msra.mxu0 %v15339_v60  ;;  %v15389_v60 = vcombine.low %v6460_v17, %v6464_v54  ;;  %v6512_v17 = vld [vmem:[#allocation10 + $0x1cb8] sm:$0xff] }
 0x78f   :  { %13022 = vmatpush1.bf16.msra.mxu1 %v15341_v2  ;;  %12695 = vmatprep.subr.bf16.mxu0 %v15348_v59  ;;  %v15396_v2 = vcombine.high %v6467_v56, %v6471_v44  ;;  %v15398_v59 = vcombine.high %v6468_v58, %v6472_v42  ;;  %v6519_v56 = vld [vmem:[#allocation10 + $0x1cf0] sm:$0xff]  ;;  %v6516_v44 = vld [vmem:[#allocation10 + $0x1cd8] sm:$0xff] }
 0x790   :  { %13023 = vmatprep.subr.bf16.mxu1 %v15350_v6  ;;  %v6475_v6 = vld [vmem:[#allocation10 + $0x1b90] sm:$0xff] }
 0x791   :  { %v15403_v1 = vcombine.low %v6475_v6, %v6479_v8 }
 0x792   :  { %12696 = vmatpush1.bf16.msra.mxu0 %v15347_v10  ;;  %v15397_v10 = vcombine.low %v6468_v58, %v6472_v42  ;;  %v6520_v58 = vld [vmem:[#allocation10 + $0x1cf8] sm:$0xff] }
 0x793   :  { %13024 = vmatpush1.bf16.msra.mxu1 %v15349_v36  ;;  %12697 = vmatprep.subr.bf16.mxu0 %v15356_v52  ;;  %v15404_v36 = vcombine.high %v6475_v6, %v6479_v8  ;;  %v15406_v52 = vcombine.high %v6476_v11, %v6480_v28  ;;  %v6524_v6 = vld [vmem:[#allocation10 + $0x1d18] sm:$0xff] }
 0x794   :  { %13025 = vmatprep.subr.bf16.mxu1 %v15358_v14  ;;  %v6483_v14 = vld [vmem:[#allocation10 + $0x1bd0] sm:$0xff]  ;;  %v6528_v8 = vld [vmem:[#allocation10 + $0x1d38] sm:$0xff] }
 0x795   :  { %v15411_v32 = vcombine.low %v6483_v14, %v6487_v62 }
 0x796   :  { %12698 = vmatpush1.bf16.msra.mxu0 %v15355_v40  ;;  %v15405_v40 = vcombine.low %v6476_v11, %v6480_v28  ;;  %v15445_v11 = vcombine.low %v6516_v44, %v6520_v58 }
 0x797   :  { %13026 = vmatpush1.bf16.msra.mxu1 %v15357_v4  ;;  %12699 = vmatprep.subr.bf16.mxu0 %v15364_v27  ;;  %v15412_v4 = vcombine.high %v6483_v14, %v6487_v62  ;;  %v15414_v27 = vcombine.high %v6484_v19, %v6488_v3  ;;  %v6536_v14 = vld [vmem:[#allocation10 + $0x1d78] sm:$0xff] }
 0x798   :  { %13027 = vmatprep.subr.bf16.mxu1 %v15366_v22  ;;  %v6491_v22 = vld [vmem:[#allocation10 + $0x1c10] sm:$0xff] }
 0x799   :  { %v15419_v20 = vcombine.low %v6491_v22, %v6495_v12 }
 0x79a   :  { %12700 = vmatpush1.bf16.msra.mxu0 %v15363_v38  ;;  %v15413_v38 = vcombine.low %v6484_v19, %v6488_v3  ;;  %v15453_v19 = vcombine.low %v6524_v6, %v6528_v8 }
 0x79b   :  { %13028 = vmatpush1.bf16.msra.mxu1 %v15365_v55  ;;  %12701 = vmatprep.subr.bf16.mxu0 %v15372_v47  ;;  %v15420_v55 = vcombine.high %v6491_v22, %v6495_v12  ;;  %v15422_v47 = vcombine.high %v6492_v41, %v6496_v9  ;;  %v6544_v22 = vld [vmem:[#allocation10 + $0x1db8] sm:$0xff] }
 0x79c   :  { %13029 = vmatprep.subr.bf16.mxu1 %v15374_v48  ;;  %v6499_v48 = vld [vmem:[#allocation10 + $0x1c50] sm:$0xff] }
 0x79d   :  { %v15427_v54 = vcombine.low %v6499_v48, %v6503_v5 }
 0x79e   :  { %12702 = vmatpush1.bf16.msra.mxu0 %v15371_v24  ;;  %v15421_v24 = vcombine.low %v6492_v41, %v6496_v9 }
 0x79f   :  { %13030 = vmatpush1.bf16.msra.mxu1 %v15373_v15  ;;  %12703 = vmatprep.subr.bf16.mxu0 %v15380_v53  ;;  %v15428_v15 = vcombine.high %v6499_v48, %v6503_v5  ;;  %v6507_v53 = vld [vmem:[#allocation10 + $0x1c90] sm:$0xff]  ;;  %v6552_v48 = vld [vmem:[#allocation10 + $0x1df8] sm:$0xff] }
 0x7a0   :  { %13031 = vmatprep.subr.bf16.mxu1 %v15382_v49  ;;  %v6511_v49 = vld [vmem:[#allocation10 + $0x1cb0] sm:$0xff] }
 0x7a1   :  { %v15435_v42 = vcombine.low %v6507_v53, %v6511_v49 }
 0x7a2   :  { %12704 = vmatpush1.bf16.msra.mxu0 %v15379_v25  ;;  %v15429_v25 = vcombine.low %v6500_v21, %v6504_v23 }
 0x7a3   :  { %13032 = vmatpush1.bf16.msra.mxu1 %v15381_v18  ;;  %12705 = vmatprep.subr.bf16.mxu0 %v15388_v57  ;;  %v15436_v18 = vcombine.high %v6507_v53, %v6511_v49  ;;  %v15438_v57 = vcombine.high %v6508_v51, %v6512_v17  ;;  %v6556_v53 = vld [vmem:[#allocation10 + $0x1e18] sm:$0xff] }
 0x7a4   :  { %13033 = vmatprep.subr.bf16.mxu1 %v15390_v43  ;;  %v6515_v43 = vld [vmem:[#allocation10 + $0x1cd0] sm:$0xff]  ;;  %v6560_v49 = vld [vmem:[#allocation10 + $0x1e38] sm:$0xff] }
 0x7a6   :  { %12706 = vmatpush1.bf16.msra.mxu0 %v15387_v26  ;;  %v15444_v26 = vcombine.high %v6515_v43, %v6519_v56 }
 0x7a7   :  { %13034 = vmatpush1.bf16.msra.mxu1 %v15389_v60  ;;  %12707 = vmatprep.subr.bf16.mxu0 %v15396_v2  ;;  %v15446_v60 = vcombine.high %v6516_v44, %v6520_v58  ;;  %v6523_v2 = vld [vmem:[#allocation10 + $0x1d10] sm:$0xff]  ;;  %v15485_v44 = vcombine.low %v6556_v53, %v6560_v49 }
 0x7a8   :  { %13035 = vmatprep.subr.bf16.mxu1 %v15398_v59  ;;  %v6527_v59 = vld [vmem:[#allocation10 + $0x1d30] sm:$0xff] }
 0x7a9   :  { %v15452_v28 = vcombine.high %v6523_v2, %v6527_v59  ;;  %v15451_v62 = vcombine.low %v6523_v2, %v6527_v59  ;;  %v6576_v2 = vld [vmem:[#allocation10 + $0x1eb8] sm:$0xff] }
 0x7aa   :  { %12708 = vmatpush1.bf16.msra.mxu0 %v15395_v61  ;;  %v15454_v61 = vcombine.high %v6524_v6, %v6528_v8 }
 0x7ab   :  { %13036 = vmatpush1.bf16.msra.mxu1 %v15397_v10  ;;  %12709 = vmatprep.subr.bf16.mxu0 %v15404_v36  ;;  %v6531_v10 = vld [vmem:[#allocation10 + $0x1d50] sm:$0xff] }
 0x7ac   :  { %13037 = vmatprep.subr.bf16.mxu1 %v15406_v52  ;;  %v6535_v36 = vld [vmem:[#allocation10 + $0x1d70] sm:$0xff]  ;;  %v6532_v52 = vld [vmem:[#allocation10 + $0x1d58] sm:$0xff] }
 0x7ad   :  { %v15460_v3 = vcombine.high %v6531_v10, %v6535_v36  ;;  %v15459_v12 = vcombine.low %v6531_v10, %v6535_v36  ;;  %v15461_v41 = vcombine.low %v6532_v52, %v6536_v14  ;;  %v6584_v10 = vld [vmem:[#allocation10 + $0x1ef8] sm:$0xff] }
 0x7ae   :  { %12710 = vmatpush1.bf16.msra.mxu0 %v15403_v1  ;;  %v15462_v1 = vcombine.high %v6532_v52, %v6536_v14 }
 0x7af   :  { %13038 = vmatpush1.bf16.msra.mxu1 %v15405_v40  ;;  %12711 = vmatprep.subr.bf16.mxu0 %v15412_v4  ;;  %v6539_v40 = vld [vmem:[#allocation10 + $0x1d90] sm:$0xff] }
 0x7b0   :  { %13039 = vmatprep.subr.bf16.mxu1 %v15414_v27  ;;  %v6543_v4 = vld [vmem:[#allocation10 + $0x1db0] sm:$0xff]  ;;  %v6540_v27 = vld [vmem:[#allocation10 + $0x1d98] sm:$0xff] }
 0x7b1   :  { %v15468_v9 = vcombine.high %v6539_v40, %v6543_v4  ;;  %v15467_v5 = vcombine.low %v6539_v40, %v6543_v4  ;;  %v6592_v40 = vld [vmem:[#allocation10 + $0x1f38] sm:$0xff] }
 0x7b2   :  { %12712 = vmatpush1.bf16.msra.mxu0 %v15411_v32  ;;  %v15470_v32 = vcombine.high %v6540_v27, %v6544_v22 }
 0x7b3   :  { %13040 = vmatpush1.bf16.msra.mxu1 %v15413_v38  ;;  %12722 = vmatprep.subr.bf16.mxu0 %v15420_v55  ;;  %v6547_v38 = vld [vmem:[#allocation10 + $0x1dd0] sm:$0xff] }
 0x7b4   :  { %13050 = vmatprep.subr.bf16.mxu1 %v15422_v47  ;;  %v6551_v55 = vld [vmem:[#allocation10 + $0x1df0] sm:$0xff]  ;;  %v6548_v47 = vld [vmem:[#allocation10 + $0x1dd8] sm:$0xff] }
 0x7b5   :  { %12714 = vmatmul.mubr.bf16.vlgmr.msra.gmra.mrb[36].mxu0 %v16616_v0  ;;  %v15476_v21 = vcombine.high %v6547_v38, %v6551_v55  ;;  %v15478_v23 = vcombine.high %v6548_v47, %v6552_v48 }
 0x7b6   :  { %13042 = vmatmul.mubr.bf16.vlgmr.msra.gmra.mrb[36].mxu1 %v16616_v0  ;;  %12723 = vmatpush1.bf16.msra.mxu0 %v15419_v20  ;;  %v15437_v0 = vcombine.low %v6508_v51, %v6512_v17  ;;  %v15469_v20 = vcombine.low %v6540_v27, %v6544_v22  ;;  %v15477_v51 = vcombine.low %v6548_v47, %v6552_v48 }
 0x7b7   :  { %12754 = vmatprep.mubr.bf16.mxu0 %v16618_v63  ;;  %13051 = vmatpush1.bf16.msra.mxu1 %v15421_v24  ;;  %v6555_v24 = vld [vmem:[#allocation10 + $0x1e10] sm:$0xff] }
 0x7b8   :  { %13082 = vmatprep.mubr.bf16.mxu1 %v16618_v63  ;;  %12724 = vmatprep.subr.bf16.mxu0 %v15428_v15  ;;  %v15443_v63 = vcombine.low %v6515_v43, %v6519_v56  ;;  %v6559_v15 = vld [vmem:[#allocation10 + $0x1e30] sm:$0xff]  ;;  %v6568_v43 = vld [vmem:[#allocation10 + $0x1e78] sm:$0xff] }
 0x7b9   :  { %13052 = vmatprep.subr.bf16.mxu1 %v15430_v46  ;;  %v15475_v46 = vcombine.low %v6547_v38, %v6551_v55  ;;  %v15484_v17 = vcombine.high %v6555_v24, %v6559_v15  ;;  %v15483_v56 = vcombine.low %v6555_v24, %v6559_v15  ;;  %v6600_v38 = vld [vmem:[#allocation10 + $0x1f78] sm:$0xff]  ;;  %v16669_v15 = vld [vmem:[#allocation11] sm:$0xff] }
 0x7ba   :  { %12725 = vmatpush1.bf16.msra.mxu0 %v15427_v54  ;;  %v15486_v54 = vcombine.high %v6556_v53, %v6560_v49  ;;  %v6608_v24 = vld [vmem:[#allocation10 + $0x1fb8] sm:$0xff] }
 0x7bb   :  { %13053 = vmatpush1.bf16.msra.mxu1 %v15429_v25  ;;  %12726 = vmatprep.subr.bf16.mxu0 %v15436_v18  ;;  %v6563_v25 = vld [vmem:[#allocation10 + $0x1e50] sm:$0xff] }
 0x7bc   :  { %13054 = vmatprep.subr.bf16.mxu1 %v15438_v57  ;;  %v6567_v18 = vld [vmem:[#allocation10 + $0x1e70] sm:$0xff]  ;;  %v6564_v57 = vld [vmem:[#allocation10 + $0x1e58] sm:$0xff] }
 0x7bd   :  { %v15492_v58 = vcombine.high %v6563_v25, %v6567_v18  ;;  %v15491_v59 = vcombine.low %v6563_v25, %v6567_v18  ;;  %v15493_v6 = vcombine.low %v6564_v57, %v6568_v43  ;;  %v6626_v25 = vrot.slane %v16669_v15, %v16399_v33  ;;  %v6612_v18 = vld [vmem:[#allocation10 + $0x1fd8] sm:$0xff] }
 0x7be   :  { %12727 = vmatpush1.bf16.msra.mxu0 %v15435_v42  ;;  %v15494_v42 = vcombine.high %v6564_v57, %v6568_v43  ;;  %v6616_v57 = vld [vmem:[#allocation10 + $0x1ff8] sm:$0xff]  ;;  %v6634_v43 = vrot.slane %v16669_v15, %v16397_v31  ;;  %v15879_v31 = vld [vmem:[#allocation13 + $0xc0] sm:$0xff]  }
 0x7bf   :  { %13055 = vmatpush1.bf16.msra.mxu1 %v15437_v0  ;;  %12728 = vmatprep.subr.bf16.mxu0 %v15444_v26  ;;  %v6571_v0 = vld [vmem:[#allocation10 + $0x1e90] sm:$0xff]  ;;  %v15541_v33 = vcombine.low %v6612_v18, %v6616_v57 }
 0x7c0   :  { %13056 = vmatprep.subr.bf16.mxu1 %v15446_v60  ;;  %v6575_v26 = vld [vmem:[#allocation10 + $0x1eb0] sm:$0xff]  ;;  %v6572_v60 = vld [vmem:[#allocation10 + $0x1e98] sm:$0xff] }
 0x7c1   :  { %v15500_v8 = vcombine.high %v6571_v0, %v6575_v26  ;;  %v15499_v36 = vcombine.low %v6571_v0, %v6575_v26  ;;  %v15501_v52 = vcombine.low %v6572_v60, %v6576_v2  ;;  %v15713_v0 = vadd.f32 %v16649_v16, %v6626_v25  ;;  %v15913_v25 = vld [vmem:[#allocation13 + $0x180] sm:$0xff]  }
 0x7c2   :  { %12729 = vmatpush1.bf16.msra.mxu0 %v15443_v63  ;;  %v15502_v63 = vcombine.high %v6572_v60, %v6576_v2  ;;  %v15715_v26 = vadd.f32 %v16651_v50, %v6634_v43  ;;  %v15878_v2 = vld [vmem:[#allocation13 + $0x40] sm:$0xff]   ;;  %v15883_v50 = vld [vmem:[#allocation13 + $0xc8] sm:$0xff]  }
 0x7c3   :  { %13057 = vmatpush1.bf16.msra.mxu1 %v15445_v11  ;;  %12730 = vmatprep.subr.bf16.mxu0 %v15452_v28  ;;  %v6579_v11 = vld [vmem:[#allocation10 + $0x1ed0] sm:$0xff] }
 0x7c4   :  { %13058 = vmatprep.subr.bf16.mxu1 %v15454_v61  ;;  %v6583_v28 = vld [vmem:[#allocation10 + $0x1ef0] sm:$0xff]  ;;  %v6580_v61 = vld [vmem:[#allocation10 + $0x1ed8] sm:$0xff] }
 0x7c5   :  { %v15508_v14 = vcombine.high %v6579_v11, %v6583_v28  ;;  %v15507_v4 = vcombine.low %v6579_v11, %v6583_v28  ;;  %v15509_v27 = vcombine.low %v6580_v61, %v6584_v10  ;;  %v15882_v11 = vld [vmem:[#allocation13 + $0x48] sm:$0xff]  }
 0x7c6   :  { %12731 = vmatpush1.bf16.msra.mxu0 %v15451_v62  ;;  %v15510_v62 = vcombine.high %v6580_v61, %v6584_v10  ;;  %v15884_v61 = vld [vmem:[#allocation13 + $0x8] sm:$0xff]  }
 0x7c7   :  { %13059 = vmatpush1.bf16.msra.mxu1 %v15453_v19  ;;  %12732 = vmatprep.subr.bf16.mxu0 %v15460_v3  ;;  %v6587_v19 = vld [vmem:[#allocation10 + $0x1f10] sm:$0xff] }
 0x7c8   :  { %13060 = vmatprep.subr.bf16.mxu1 %v15462_v1  ;;  %v6591_v3 = vld [vmem:[#allocation10 + $0x1f30] sm:$0xff]  ;;  %v6588_v1 = vld [vmem:[#allocation10 + $0x1f18] sm:$0xff] }
 0x7c9   :  { %v15516_v22 = vcombine.high %v6587_v19, %v6591_v3  ;;  %v15515_v55 = vcombine.low %v6587_v19, %v6591_v3  ;;  %v15517_v47 = vcombine.low %v6588_v1, %v6592_v40  ;;  %v15885_v10 = vld [vmem:[#allocation13 + $0x88] sm:$0xff]   ;;  %v15890_v19 = vld [vmem:[#allocation13 + $0x58] sm:$0xff]  }
 0x7ca   :  { %12733 = vmatpush1.bf16.msra.mxu0 %v15459_v12  ;;  %v15518_v12 = vcombine.high %v6588_v1, %v6592_v40  ;;  %v15891_v3 = vld [vmem:[#allocation13 + $0xd8] sm:$0xff]   ;;  %v15894_v40 = vld [vmem:[#allocation13 + $0x60] sm:$0xff]   ;;  %v15916_v43 = vld [vmem:[#allocation13 + $0x108] sm:$0xff]  }
 0x7cb   :  { %13061 = vmatpush1.bf16.msra.mxu1 %v15461_v41  ;;  %12734 = vmatprep.subr.bf16.mxu0 %v15468_v9  ;;  %v6595_v41 = vld [vmem:[#allocation10 + $0x1f50] sm:$0xff]  ;;  %v15893_v1 = vld [vmem:[#allocation13 + $0x98] sm:$0xff]  }
 0x7cc   :  { %13062 = vmatprep.subr.bf16.mxu1 %v15470_v32  ;;  %v6599_v9 = vld [vmem:[#allocation10 + $0x1f70] sm:$0xff]  ;;  %v6596_v32 = vld [vmem:[#allocation10 + $0x1f58] sm:$0xff] }
 0x7cd   :  { %v15524_v48 = vcombine.high %v6595_v41, %v6599_v9  ;;  %v15523_v53 = vcombine.low %v6595_v41, %v6599_v9  ;;  %v15525_v49 = vcombine.low %v6596_v32, %v6600_v38  ;;  %v15899_v41 = vld [vmem:[#allocation13 + $0xe8] sm:$0xff]  }
 0x7ce   :  { %12735 = vmatpush1.bf16.msra.mxu0 %v15467_v5  ;;  %v15526_v5 = vcombine.high %v6596_v32, %v6600_v38  ;;  %v15900_v9 = vld [vmem:[#allocation13 + $0x28] sm:$0xff]   ;;  %v6622_v32 = vrot.slane %v16669_v15, %v16395_v30  ;;  %v15907_v30 = vld [vmem:[#allocation13 + $0xf8] sm:$0xff]  }
 0x7cf   :  { %13063 = vmatpush1.bf16.msra.mxu1 %v15469_v20  ;;  %12736 = vmatprep.subr.bf16.mxu0 %v15476_v21  ;;  %v6603_v20 = vld [vmem:[#allocation10 + $0x1f90] sm:$0xff] }
 0x7d0   :  { %13064 = vmatprep.subr.bf16.mxu1 %v15478_v23  ;;  %v6607_v21 = vld [vmem:[#allocation10 + $0x1fb0] sm:$0xff]  ;;  %v6604_v23 = vld [vmem:[#allocation10 + $0x1f98] sm:$0xff] }
 0x7d1   :  { %v15901_v38 = vld [vmem:[#allocation13 + $0xa8] sm:$0xff]  }
 0x7d2   :  { %12737 = vmatpush1.bf16.msra.mxu0 %v15475_v46  ;;  %v15532_v46 = vcombine.high %v6603_v20, %v6607_v21 }
 0x7d3   :  { %13065 = vmatpush1.bf16.msra.mxu1 %v15477_v51  ;;  %12738 = vmatprep.subr.bf16.mxu0 %v15484_v17  ;;  %v15534_v51 = vcombine.high %v6604_v23, %v6608_v24  ;;  %v6611_v17 = vld [vmem:[#allocation10 + $0x1fd0] sm:$0xff] }
 0x7d4   :  { %13066 = vmatprep.subr.bf16.mxu1 %v15486_v54  ;;  %v6615_v54 = vld [vmem:[#allocation10 + $0x1ff0] sm:$0xff] }
 0x7d5   :  { %v15539_v60 = vcombine.low %v6611_v17, %v6615_v54 }
 0x7d6   :  { %12739 = vmatpush1.bf16.msra.mxu0 %v15483_v56  ;;  %v15531_v56 = vcombine.low %v6603_v20, %v6607_v21  ;;  %v15712_v20 = vadd.f32 %v16645_v7, %v6622_v32  ;;  %v15905_v21 = vld [vmem:[#allocation13 + $0xb0] sm:$0xff]   ;;  %v15912_v7 = vld [vmem:[#allocation13 + $0x100] sm:$0xff]  }
 0x7d7   :  { %13067 = vmatpush1.bf16.msra.mxu1 %v15485_v44  ;;  %12740 = vmatprep.subr.bf16.mxu0 %v15492_v58  ;;  %v15533_v44 = vcombine.low %v6604_v23, %v6608_v24  ;;  %v15540_v58 = vcombine.high %v6611_v17, %v6615_v54  ;;  %v15906_v23 = vld [vmem:[#allocation13 + $0x78] sm:$0xff]   ;;  %v15911_v17 = vld [vmem:[#allocation13 + $0x1c0] sm:$0xff]  }
 0x7d8   :  { %13068 = vmatprep.subr.bf16.mxu1 %v15494_v42  ;;  %v15542_v42 = vcombine.high %v6612_v18, %v6616_v57  ;;  %v15914_v18 = vld [vmem:[#allocation13 + $0x148] sm:$0xff]  }
 0x7d9   :  { %v15915_v57 = vld [vmem:[#allocation13 + $0x1c8] sm:$0xff]  }
 0x7da   :  { %12741 = vmatpush1.bf16.msra.mxu0 %v15491_v59  ;;  %v13092_v59 = vmax.f32 %v15713_v0, 0.0  ;;  %v15921_v0 = vld [vmem:[#allocation13 + $0x190] sm:$0xff]  }
 0x7db   :  { %13069 = vmatpush1.bf16.msra.mxu1 %v15493_v6  ;;  %12742 = vmatprep.subr.bf16.mxu0 %v15500_v8  ;;  %v13094_v6 = vmax.f32 %v15715_v26, 0.0  ;;  %v15880_v8 = vld [vmem:[#allocation13] sm:$0xff]   ;;  %v15922_v26 = vld [vmem:[#allocation13 + $0x158] sm:$0xff]  }
 0x7dc   :  { %13070 = vmatprep.subr.bf16.mxu1 %v15502_v63  ;;  %v15881_v63 = vld [vmem:[#allocation13 + $0x80] sm:$0xff]   ;;  %v13100_v16 = vpack.c.bf16 %v13092_v59, %v13092_v59 }
 0x7dd   :  { %v13102_v28 = vpack.c.bf16 %v13094_v6, %v13094_v6  ;;  %v15927_v59 = vld [vmem:[#allocation13 + $0x1e0] sm:$0xff]  }
 0x7de   :  { %12743 = vmatpush1.bf16.msra.mxu0 %v15499_v36  ;;  %v15886_v36 = vld [vmem:[#allocation13 + $0x50] sm:$0xff]   ;;  %v15928_v6 = vld [vmem:[#allocation13 + $0x120] sm:$0xff]  }
 0x7df   :  { %13071 = vmatpush1.bf16.msra.mxu1 %v15501_v52  ;;  %12744 = vmatprep.subr.bf16.mxu0 %v15508_v14  ;;  %v15887_v52 = vld [vmem:[#allocation13 + $0xd0] sm:$0xff]  }
 0x7e0   :  { %13072 = vmatprep.subr.bf16.mxu1 %v15510_v62  ;;  %v15888_v14 = vld [vmem:[#allocation13 + $0x10] sm:$0xff]  }
 0x7e1   :  { %v15889_v62 = vld [vmem:[#allocation13 + $0x90] sm:$0xff]  }
 0x7e2   :  { %12745 = vmatpush1.bf16.msra.mxu0 %v15507_v4  ;;  %v15895_v4 = vld [vmem:[#allocation13 + $0xe0] sm:$0xff]  }
 0x7e3   :  { %13073 = vmatpush1.bf16.msra.mxu1 %v15509_v27  ;;  %12746 = vmatprep.subr.bf16.mxu0 %v15516_v22  ;;  %v15896_v27 = vld [vmem:[#allocation13 + $0x20] sm:$0xff]  }
 0x7e4   :  { %13074 = vmatprep.subr.bf16.mxu1 %v15518_v12  ;;  %v15897_v22 = vld [vmem:[#allocation13 + $0xa0] sm:$0xff]   ;;  %v15898_v12 = vld [vmem:[#allocation13 + $0x68] sm:$0xff]  }
 0x7e6   :  { %12747 = vmatpush1.bf16.msra.mxu0 %v15515_v55  ;;  %v15902_v55 = vld [vmem:[#allocation13 + $0x70] sm:$0xff]  }
 0x7e7   :  { %13075 = vmatpush1.bf16.msra.mxu1 %v15517_v47  ;;  %12748 = vmatprep.subr.bf16.mxu0 %v15524_v48  ;;  %v6630_v47 = vrot.slane %v16669_v15, %v16393_v29  ;;  %v15903_v48 = vld [vmem:[#allocation13 + $0xf0] sm:$0xff]   ;;  %v15909_v29 = vld [vmem:[#allocation13 + $0xb8] sm:$0xff]  }
 0x7e8   :  { %13076 = vmatprep.subr.bf16.mxu1 %v15526_v5  ;;  %v15904_v5 = vld [vmem:[#allocation13 + $0x30] sm:$0xff]  }
 0x7e9   :  { %v15714_v24 = vadd.f32 %v16647_v13, %v6630_v47 }
 0x7ea   :  { %12749 = vmatpush1.bf16.msra.mxu0 %v15523_v53  ;;  %v15908_v53 = vld [vmem:[#allocation13 + $0x38] sm:$0xff]  }
 0x7eb   :  { %13077 = vmatpush1.bf16.msra.mxu1 %v15525_v49  ;;  %12750 = vmatprep.subr.bf16.mxu0 %v15532_v46  ;;  %v13091_v49 = vmax.f32 %v15712_v20, 0.0  ;;  %v15910_v46 = vld [vmem:[#allocation13 + $0x140] sm:$0xff]  }
 0x7ec   :  { %13078 = vmatprep.subr.bf16.mxu1 %v15534_v51  ;;  %v13093_v51 = vmax.f32 %v15714_v24, 0.0 }
 0x7ed   :  { %v13099_v54 = vpack.c.bf16 %v13091_v49, %v13091_v49 }
 0x7ee   :  { %12751 = vmatpush1.bf16.msra.mxu0 %v15531_v56  ;;  %v13101_v13 = vpack.c.bf16 %v13093_v51, %v13093_v51  ;;  %v15917_v56 = vld [vmem:[#allocation13 + $0x188] sm:$0xff]  }
 0x7ef   :  { %13079 = vmatpush1.bf16.msra.mxu1 %v15533_v44  ;;  %12752 = vmatprep.subr.bf16.mxu0 %v15540_v58  ;;  %v15918_v44 = vld [vmem:[#allocation13 + $0x150] sm:$0xff]  }
 0x7f0   :  { %13080 = vmatprep.subr.bf16.mxu1 %v15542_v42  ;;  %v15919_v58 = vld [vmem:[#allocation13 + $0x1d0] sm:$0xff]  }
 0x7f1   :  { %v15920_v42 = vld [vmem:[#allocation13 + $0x110] sm:$0xff]  }
 0x7f2   :  { %12753 = vmatpush1.bf16.msra.mxu0 %v15539_v60  ;;  %v15923_v60 = vld [vmem:[#allocation13 + $0x1d8] sm:$0xff]  }
 0x7f3   :  { %13081 = vmatpush1.bf16.msra.mxu1 %v15541_v33  ;;  %15608 = vmatprep.subr.bf16.mxu0 %v15878_v2  ;;  %v15924_v33 = vld [vmem:[#allocation13 + $0x118] sm:$0xff]  }
 0x7f4   :  { %15630 = vmatprep.subr.bf16.mxu1 %v15879_v31  ;;  %v15925_v2 = vld [vmem:[#allocation13 + $0x198] sm:$0xff]   ;;  %v15926_v31 = vld [vmem:[#allocation13 + $0x160] sm:$0xff]  }
 0x7f5   :  { %12755 = vmatmul.mubr.bf16.vlgmr.msra.gmra.mrb[36].mxu0 %v16627_v35 }
 0x7f6   :  { %13083 = vmatmul.mubr.bf16.vlgmr.msra.gmra.mrb[36].mxu1 %v16627_v35  ;;  %15609 = vmatpush3.bf16.msra.mxu0 %v15880_v8  ;;  %v15892_v35 = vld [vmem:[#allocation13 + $0x18] sm:$0xff]   ;;  %v15929_v8 = vld [vmem:[#allocation13 + $0x1a0] sm:$0xff]  }
 0x7f7   :  { %13658 = vmatprep.mubr.bf16.mxu0 %v13100_v16  ;;  %15631 = vmatpush3.bf16.msra.mxu1 %v15881_v63  ;;  %v15930_v63 = vld [vmem:[#allocation13 + $0x168] sm:$0xff]  }
 0x7f8   :  { %13698 = vmatprep.mubr.bf16.mxu1 %v13102_v28  ;;  %15610 = vmatprep.subr.bf16.mxu0 %v15882_v11  ;;  %v15931_v11 = vld [vmem:[#allocation13 + $0x1e8] sm:$0xff]   ;;  %v15934_v28 = vld [vmem:[#allocation13 + $0x170] sm:$0xff]  }
 0x7f9   :  { %15632 = vmatprep.subr.bf16.mxu1 %v15883_v50  ;;  %v15932_v16 = vld [vmem:[#allocation13 + $0x128] sm:$0xff]  }
 0x7fa   :  { %15611 = vmatpush3.bf16.msra.mxu0 %v15884_v61  ;;  %v15933_v50 = vld [vmem:[#allocation13 + $0x1a8] sm:$0xff]   ;;  %v15935_v61 = vld [vmem:[#allocation13 + $0x1f0] sm:$0xff]  }
 0x7fb   :  { %15633 = vmatpush3.bf16.msra.mxu1 %v15885_v10  ;;  %15612 = vmatprep.subr.bf16.mxu0 %v15886_v36  ;;  %v15936_v10 = vld [vmem:[#allocation13 + $0x130] sm:$0xff]  }
 0x7fc   :  { %15634 = vmatprep.subr.bf16.mxu1 %v15887_v52  ;;  %v15937_v36 = vld [vmem:[#allocation13 + $0x1b0] sm:$0xff]   ;;  %v15938_v52 = vld [vmem:[#allocation13 + $0x178] sm:$0xff]  }
 0x7fe   :  { %15613 = vmatpush3.bf16.msra.mxu0 %v15888_v14  ;;  %v15939_v14 = vld [vmem:[#allocation13 + $0x1f8] sm:$0xff]  }
 0x7ff   :  { %15635 = vmatpush3.bf16.msra.mxu1 %v15889_v62  ;;  %15614 = vmatprep.subr.bf16.mxu0 %v15890_v19  ;;  %v15940_v62 = vld [vmem:[#allocation13 + $0x138] sm:$0xff]  }
 0x800   :  { %15636 = vmatprep.subr.bf16.mxu1 %v15891_v3  ;;  %v15941_v19 = vld [vmem:[#allocation13 + $0x1b8] sm:$0xff]   ;;  %v6638_v3 = vrot.slane %v16669_v15, %v16401_v34 }
 0x802   :  { %15615 = vmatpush3.bf16.msra.mxu0 %v15892_v35  ;;  %v6646_v35 = vrot.slane %v16669_v15, %v16406_v39 }
 0x803   :  { %15637 = vmatpush3.bf16.msra.mxu1 %v15893_v1  ;;  %15616 = vmatprep.subr.bf16.mxu0 %v15894_v40  ;;  %v6642_v1 = vrot.slane %v16669_v15, %v16403_v37  ;;  %v6650_v40 = vrot.slane %v16669_v15, %v16410_v45 }
 0x804   :  { %15638 = vmatprep.subr.bf16.mxu1 %v15895_v4 }
 0x806   :  { %15617 = vmatpush3.bf16.msra.mxu0 %v15896_v27 }
 0x807   :  { %15639 = vmatpush3.bf16.msra.mxu1 %v15897_v22  ;;  %15618 = vmatprep.subr.bf16.mxu0 %v15898_v12 }
 0x808   :  { %15640 = vmatprep.subr.bf16.mxu1 %v15899_v41 }
 0x80a   :  { %15619 = vmatpush3.bf16.msra.mxu0 %v15900_v9 }
 0x80b   :  { %15641 = vmatpush3.bf16.msra.mxu1 %v15901_v38  ;;  %15620 = vmatprep.subr.bf16.mxu0 %v15902_v55 }
 0x80c   :  { %15642 = vmatprep.subr.bf16.mxu1 %v15903_v48 }
 0x80e   :  { %15621 = vmatpush3.bf16.msra.mxu0 %v15904_v5 }
 0x80f   :  { %15643 = vmatpush3.bf16.msra.mxu1 %v15905_v21  ;;  %15622 = vmatprep.subr.bf16.mxu0 %v15906_v23 }
 0x810   :  { %15644 = vmatprep.subr.bf16.mxu1 %v15907_v30 }
 0x812   :  { %15623 = vmatpush3.bf16.msra.mxu0 %v15908_v53  ;;  %v15543_v53 = vld [vmem:[#allocation14] ss:$0 sm:$0xff] }
 0x813   :  { %15645 = vmatpush3.bf16.msra.mxu1 %v15909_v29  ;;  %15652 = vmatprep.subr.bf16.mxu0 %v15910_v46 }
 0x814   :  { %15674 = vmatprep.subr.bf16.mxu1 %v15911_v17 }
 0x815   :  { %13659 = vmatmul.mubr.bf16.vlgmr.msra.gmra.mrb[40].mxu0 %v13099_v54 }
 0x816   :  { %13699 = vmatmul.mubr.bf16.vlgmr.msra.gmra.mrb[40].mxu1 %v13101_v13  ;;  %15653 = vmatpush3.bf16.msra.mxu0 %v15912_v7 }
 0x817   :  { %15675 = vmatpush3.bf16.msra.mxu1 %v15913_v25  ;;  %15654 = vmatprep.subr.bf16.mxu0 %v15914_v18 }
 0x818   :  { %15676 = vmatprep.subr.bf16.mxu1 %v15915_v57 }
 0x81a   :  { %15655 = vmatpush3.bf16.msra.mxu0 %v15916_v43 }
 0x81b   :  { %15677 = vmatpush3.bf16.msra.mxu1 %v15917_v56  ;;  %15656 = vmatprep.subr.bf16.mxu0 %v15918_v44 }
 0x81c   :  { %15678 = vmatprep.subr.bf16.mxu1 %v15919_v58 }
 0x81e   :  { %15657 = vmatpush3.bf16.msra.mxu0 %v15920_v42 }
 0x81f   :  { %15679 = vmatpush3.bf16.msra.mxu1 %v15921_v0  ;;  %15658 = vmatprep.subr.bf16.mxu0 %v15922_v26 }
 0x820   :  { %15680 = vmatprep.subr.bf16.mxu1 %v15923_v60 }
 0x822   :  { %15659 = vmatpush3.bf16.msra.mxu0 %v15924_v33 }
 0x823   :  { %15681 = vmatpush3.bf16.msra.mxu1 %v15925_v2  ;;  %15660 = vmatprep.subr.bf16.mxu0 %v15926_v31 }
 0x824   :  { %15682 = vmatprep.subr.bf16.mxu1 %v15927_v59 }
 0x826   :  { %15661 = vmatpush3.bf16.msra.mxu0 %v15928_v6 }
 0x827   :  { %15683 = vmatpush3.bf16.msra.mxu1 %v15929_v8  ;;  %15662 = vmatprep.subr.bf16.mxu0 %v15930_v63 }
 0x828   :  { %15684 = vmatprep.subr.bf16.mxu1 %v15931_v11 }
 0x82a   :  { %15663 = vmatpush3.bf16.msra.mxu0 %v15932_v16 }
 0x82b   :  { %15685 = vmatpush3.bf16.msra.mxu1 %v15933_v50  ;;  %15664 = vmatprep.subr.bf16.mxu0 %v15934_v28 }
 0x82c   :  { %15686 = vmatprep.subr.bf16.mxu1 %v15935_v61 }
 0x82e   :  { %15665 = vmatpush3.bf16.msra.mxu0 %v15936_v10 }
 0x82f   :  { %15687 = vmatpush3.bf16.msra.mxu1 %v15937_v36  ;;  %15666 = vmatprep.subr.bf16.mxu0 %v15938_v52 }
 0x830   :  { %15688 = vmatprep.subr.bf16.mxu1 %v15939_v14 }
 0x832   :  { %15667 = vmatpush3.bf16.msra.mxu0 %v15940_v62 }
 0x833   :  { %15689 = vmatpush3.bf16.msra.mxu1 %v15941_v19 }
 0x8c8   :  { %v12756_v4 = vpop.f32.mrb[36].mxu0 }
 0x8c9   :  { %v15716_v27 = vadd.f32 %v12756_v4, %v6638_v3  ;;  %v13084_v22 = vpop.f32.mrb[36].mxu1  ;;  %v12758_v12 = vpop.f32.mrb[37].mxu0 }
 0x8ca   :  { %v15718_v41 = vadd.f32 %v13084_v22, %v6646_v35  ;;  %v15717_v9 = vadd.f32 %v12758_v12, %v6642_v1  ;;  %v13086_v32 = vpop.f32.mrb[37].mxu1  ;;  %v12760_v38 = vpop.f32.mrb[38].mxu0 }
 0x8cb   :  { %v13095_v55 = vmax.f32 %v15716_v27, 0.0  ;;  %v15719_v47 = vadd.f32 %v13086_v32, %v6650_v40  ;;  %v13088_v34 = vpop.f32.mrb[38].mxu1  ;;  %v12761_v48 = vpop.f32.mrb[39].mxu0 }
 0x8cc   :  { %v13097_v5 = vmax.f32 %v15718_v41, 0.0  ;;  %v13096_v39 = vmax.f32 %v15717_v9, 0.0  ;;  %v13089_v20 = vpop.f32.mrb[39].mxu1 }
 0x8cd   :  { %v13098_v21 = vmax.f32 %v15719_v47, 0.0  ;;  %v13103_v23 = vpack.c.bf16 %v13095_v55, %v13095_v55 }
 0x8ce   :  { %v13104_v37 = vpack.c.bf16 %v13096_v39, %v13096_v39  ;;  %v13105_v45 = vpack.c.bf16 %v13097_v5, %v13097_v5 }
 0x8cf   :  { %v13106_v24 = vpack.c.bf16 %v13098_v21, %v13098_v21 }
 0x8d0   :  { %13738 = vmatprep.mubr.bf16.mxu0 %v13104_v37 }
 0x8d1   :  { %13778 = vmatprep.mubr.bf16.mxu1 %v13106_v24  ;;  %13739 = vmatmul.mubr.bf16.vlgmr.msra.gmra.mrb[44].mxu0 %v13103_v23 }
 0x8d2   :  { %13779 = vmatmul.mubr.bf16.vlgmr.msra.gmra.mrb[44].mxu1 %v13105_v45 }
 0x8e8   :  { %v15624_v15 = vpop.f32.mrb[40].mxu0 }
 0x8e9   :  { %v15646_v30 = vpop.f32.mrb[40].mxu1  ;;  %v15625_v49 = vpop.f32.mrb[41].mxu0 }
 0x8ea   :  { %v15626_v29 = vadd.f32 %v15625_v49, %v15624_v15  ;;  %v15647_v46 = vpop.f32.mrb[41].mxu1  ;;  %v15627_v51 = vpop.f32.mrb[42].mxu0 }
 0x8eb   :  { %v15648_v17 = vadd.f32 %v15647_v46, %v15646_v30  ;;  %v15649_v7 = vpop.f32.mrb[42].mxu1  ;;  %v15628_v54 = vpop.f32.mrb[43].mxu0 }
 0x8ec   :  { %v13661_v25 = vadd.f32 %v15626_v29, %v15543_v53  ;;  %v15650_v18 = vpop.f32.mrb[43].mxu1 }
 0x8ee   :  { %v13701_v13 = vadd.f32 %v15648_v17, %v13661_v25 }
 0x9a4   :  { %v15668_v57 = vpop.f32.mrb[44].mxu0 }
 0x9a5   :  { %v15690_v43 = vpop.f32.mrb[44].mxu1  ;;  %v15669_v56 = vpop.f32.mrb[45].mxu0 }
 0x9a6   :  { %v15670_v44 = vadd.f32 %v15669_v56, %v15668_v57  ;;  %v15691_v58 = vpop.f32.mrb[45].mxu1  ;;  %v15671_v42 = vpop.f32.mrb[46].mxu0 }
 0x9a7   :  { %v15692_v0 = vadd.f32 %v15691_v58, %v15690_v43  ;;  %v15693_v26 = vpop.f32.mrb[46].mxu1  ;;  %v15672_v60 = vpop.f32.mrb[47].mxu0 }
 0x9a8   :  { %v13741_v33 = vadd.f32 %v15670_v44, %v13701_v13  ;;  %v15694_v2 = vpop.f32.mrb[47].mxu1 }
 0x9aa   :  { %v13781_v31 = vadd.f32 %v15692_v0, %v13741_v33 }
 0x9ac   :  { %13786 = vst [vmem:[#allocation16] sm:$0x3] %v13781_v31 }
 0x9ad   :  { %16131 = shalt.err (!%p16128_p12)
}
 0x9ae   :  { %s16132_s20 = scalar_lea.hbm %s16714_s9, 32 }
 0x9af   :  { %p16133_p13 = scmp.ne.s32.totalorder %s16714_s9, %s16132_s20  ;;  %p16136_p0 = scmp.lt.u32.totalorder %s16132_s20, %s16714_s9 }
 0x9b1   :  { %p16138_p1 = pnand %p16136_p0, %p16133_p13 }
 0x9b3   :  { %16141 = shalt.err (!%p16138_p1)
}
 0x9b4   :  { %13796 = dma.vmem_to_hbm [thread:$0]  %s13794_s14, 32, %s16714_s9, [#allocation4]  }
 0x9b5   :  { %16152 = dma.done.wait [#allocation4], 32  }
 0x9b6   :  { %16153 = vsyncadd [#allocation4], 4294967264 }
 0x9b7   :  { %13800 = vsyncpa [#allocation3], 1 }
 0x9b8   :  { %13801 = vsyncpa [#allocation6], 1 }
 0x9b9   :  { %13802 = vsyncpa [#allocation9], 1 }
 0x9ba   :  { %13803 = vsyncpa [#allocation12], 1 }
 0x9bb   :  { %13804 = vsyncpa [#allocation15], 1 }
 0x9bc   :  { %13805 = vsyncpa [#allocation4], 1 }

</bundles_post_ra>
